<compile_context>
chip_gen: v6e
topology: v6e:2x2x1
jax: 0.10.0
libtpu: 0.0.40
codegen_flags: <defaults>
</compile_context>

<pallas_src>
import functools

import jax
import jax.numpy as jnp
from jax.experimental import pallas as pl
from jax.experimental.pallas import tpu as pltpu


# ------------------------------ fused kernel ---------------------------------

def _charcnn_fused_kernel(*refs, conv_ks, pools):
    """Full CharCNN forward for one batch element.

    refs layout:
      refs[0]              : x      (1, L_in, C_in)  f32
      refs[1 : 1+2*nc]     : per conv  (w (K*C_in, C_out) bf16, b (1, C_out) f32)
      refs[1+2*nc : -1]    : per linear (w (F_in, F_out) bf16, b (1, F_out) f32)
      refs[-1]             : out    (1, 1, n_classes) f32
    """
    nc = len(conv_ks)
    x_ref = refs[0]
    conv_refs = refs[1:1 + 2 * nc]
    lin_refs = refs[1 + 2 * nc:-1]
    o_ref = refs[-1]

    x = x_ref[0]                                      # (L_in, C_in) f32

    # ---- conv stack: im2col + single MXU matmul, bias, (pool), ReLU -------
    for i in range(nc):
        w_ref = conv_refs[2 * i]
        b_ref = conv_refs[2 * i + 1]
        K = conv_ks[i]
        L_in, C_in = x.shape
        L_out = L_in - K + 1
        # im2col: cols[l, k*C_in + c] = x[l + k, c]  -> (L_out, K*C_in)
        cols = jnp.concatenate([x[k:k + L_out, :] for k in range(K)], axis=1)
        acc = jnp.dot(cols.astype(w_ref.dtype), w_ref[...],
                      preferred_element_type=jnp.float32)
        acc = acc + b_ref[...]                        # bias broadcast (f32)
        if pools[i]:                                  # MaxPool1d(kernel=3, stride=3)
            lp = L_out // 3
            acc = acc[:lp * 3, :].reshape(lp, 3, acc.shape[-1]).max(axis=1)
        x = jnp.maximum(acc, 0.0)                     # ReLU (f32)

    # ---- flatten, matching PyTorch x.view(B, -1) on a (B, C, L) tensor ----
    L_f, C = x.shape
    if L_f == 1:
        flat = x                                      # (1, C): already channel-major
    else:
        flat = jnp.transpose(x, (1, 0)).reshape(1, L_f * C)

    # ---- linear stack (Dropout == identity at inference) ------------------
    y = flat
    n_lin = len(lin_refs) // 2
    for i in range(n_lin):
        w_ref = lin_refs[2 * i]
        b_ref = lin_refs[2 * i + 1]
        y = jnp.dot(y.astype(w_ref.dtype), w_ref[...],
                    preferred_element_type=jnp.float32) + b_ref[...]
        if i != n_lin - 1:
            y = jnp.maximum(y, 0.0)

    o_ref[0] = y.astype(o_ref.dtype)


def charcnn_forward(params, sentences):
    # Embedding lookup (gather) kept in plain-JAX glue.
    x = jnp.take(params["embedding"], sentences, axis=0)    # (B, L, E), f32
    B, L_in, C_in = x.shape

    pools = (True, True, False, False, False, True)          # conv1..conv6
    conv_ks = tuple(int(w.shape[0]) for (w, _) in params["convs"])

    # Pre-reshape conv weights for im2col, cast weights to bf16 (biases f32).
    conv_args = []
    for (w, b) in params["convs"]:
        K, ci, co = w.shape
        conv_args.append(w.reshape(K * ci, co).astype(jnp.bfloat16))
        conv_args.append(b.astype(jnp.float32))
    lin_args = []
    for (w, b) in params["linears"]:
        lin_args.append(w.astype(jnp.bfloat16))
        lin_args.append(b.astype(jnp.float32))

    n_classes = params["linears"][-1][0].shape[1]
    inputs = [x] + conv_args + lin_args

    # Per-sample activation block; all weights as whole-array, constant-index
    # blocks (fetched into VMEM once, reused across the batch grid).
    in_specs = [pl.BlockSpec((1, L_in, C_in), lambda bi: (bi, 0, 0))]
    for a in conv_args + lin_args:
        in_specs.append(pl.BlockSpec(a.shape, lambda bi: (0, 0)))

    out = pl.pallas_call(
        functools.partial(_charcnn_fused_kernel, conv_ks=conv_ks, pools=pools),
        out_shape=jax.ShapeDtypeStruct((B, 1, n_classes), jnp.float32),
        grid=(B,),
        in_specs=in_specs,
        out_specs=pl.BlockSpec((1, 1, n_classes), lambda bi: (bi, 0, 0)),
        compiler_params=pltpu.CompilerParams(
            dimension_semantics=("parallel",),       # v7x: 2 TCs split the batch
            vmem_limit_bytes=48 * 1024 * 1024,       # explicit budget (< v7x 64 MiB)
        ),
    )(*inputs)
    return out.reshape(B, n_classes)


# ------------------------------ params ---------------------------------------

def init_params(key, vocab_size, embed_size, conv_features, linear_features,
                n_classes, initial_linear_size):
    ks = jax.random.split(key, 32)

    def uni(k, shape, fan_in):
        bound = 1.0 / jnp.sqrt(jnp.float32(fan_in))
        return jax.random.uniform(k, shape, jnp.float32, -bound, bound)

    params = {}
    params["embedding"] = (
        jax.random.normal(ks[0], (vocab_size, embed_size), jnp.float32) * 0.1)

    conv_cfg = ([(7, embed_size, conv_features),
                 (7, conv_features, conv_features)]
                + [(3, conv_features, conv_features)] * 4)
    convs = []
    for i, (K, ci, co) in enumerate(conv_cfg):
        w = uni(ks[1 + 2 * i], (K, ci, co), ci * K)     # (K, C_in, C_out)
        b = uni(ks[2 + 2 * i], (1, co), ci * K)
        convs.append((w, b))
    params["convs"] = convs

    lin_cfg = [(initial_linear_size, linear_features),
               (linear_features, linear_features),
               (linear_features, n_classes)]
    lins = []
    for i, (fi, fo) in enumerate(lin_cfg):
        w = uni(ks[14 + 2 * i], (fi, fo), fi)
        b = uni(ks[15 + 2 * i], (1, fo), fi)
        lins.append((w, b))
    params["linears"] = lins
    return params


# -------------------------------- main ----------------------------------------

if __name__ == "__main__":
    # Small config consistent with the module (mode='small').
    B = 2
    max_length = 123                    # (123 - 96) // 27 == 1 final length
    vocab_size = 33
    embed_size = vocab_size - 1         # 32
    conv_features = 256
    linear_features = 1024
    n_classes = 4
    initial_linear_size = (max_length - 96) // 27 * conv_features  # 256

    key = jax.random.PRNGKey(0)
    kp, kd = jax.random.split(key)
    params = init_params(kp, vocab_size, embed_size, conv_features,
                         linear_features, n_classes, initial_linear_size)
    sentences = jax.random.randint(kd, (B, max_length), 0, vocab_size,
                                   dtype=jnp.int32)

    fwd = jax.jit(charcnn_forward)
    out = fwd(params, sentences)
    jax.block_until_ready(out)
    assert out.shape == (B, n_classes), out.shape
    print("KERNEL_OK")
</pallas_src>

<mosaic_0001>
module attributes {stable_mosaic.version = 11 : i64} {
  func.func @_charcnn_fused_kernel(%arg0: i32, %arg1: memref<1x123x32xf32, #tpu.memory_space<vmem>>, %arg2: memref<224x256xbf16, #tpu.memory_space<vmem>>, %arg3: memref<1x256xf32, #tpu.memory_space<vmem>>, %arg4: memref<1792x256xbf16, #tpu.memory_space<vmem>>, %arg5: memref<1x256xf32, #tpu.memory_space<vmem>>, %arg6: memref<768x256xbf16, #tpu.memory_space<vmem>>, %arg7: memref<1x256xf32, #tpu.memory_space<vmem>>, %arg8: memref<768x256xbf16, #tpu.memory_space<vmem>>, %arg9: memref<1x256xf32, #tpu.memory_space<vmem>>, %arg10: memref<768x256xbf16, #tpu.memory_space<vmem>>, %arg11: memref<1x256xf32, #tpu.memory_space<vmem>>, %arg12: memref<768x256xbf16, #tpu.memory_space<vmem>>, %arg13: memref<1x256xf32, #tpu.memory_space<vmem>>, %arg14: memref<256x1024xbf16, #tpu.memory_space<vmem>>, %arg15: memref<1x1024xf32, #tpu.memory_space<vmem>>, %arg16: memref<1024x1024xbf16, #tpu.memory_space<vmem>>, %arg17: memref<1x1024xf32, #tpu.memory_space<vmem>>, %arg18: memref<1024x4xbf16, #tpu.memory_space<vmem>>, %arg19: memref<1x4xf32, #tpu.memory_space<vmem>>, %arg20: memref<1x1x4xf32, #tpu.memory_space<vmem>>) attributes {dimension_semantics = [#tpu.dimension_semantics<parallel>], iteration_bounds = array<i64: 2>, scalar_prefetch = 0 : i64, scratch_operands = 0 : i64, tpu.core_type = #tpu.core_type<tc>, window_params = [{transform_indices = @transform_0, window_bounds = array<i64: 1, 123, 32>}, {pipeline_mode = #tpu.pipeline_mode<synchronous>, transform_indices = @transform_1, window_bounds = array<i64: 224, 256>}, {pipeline_mode = #tpu.pipeline_mode<synchronous>, transform_indices = @transform_2, window_bounds = array<i64: 1, 256>}, {pipeline_mode = #tpu.pipeline_mode<synchronous>, transform_indices = @transform_3, window_bounds = array<i64: 1792, 256>}, {pipeline_mode = #tpu.pipeline_mode<synchronous>, transform_indices = @transform_4, window_bounds = array<i64: 1, 256>}, {pipeline_mode = #tpu.pipeline_mode<synchronous>, transform_indices = @transform_5, window_bounds = array<i64: 768, 256>}, {pipeline_mode = #tpu.pipeline_mode<synchronous>, transform_indices = @transform_6, window_bounds = array<i64: 1, 256>}, {pipeline_mode = #tpu.pipeline_mode<synchronous>, transform_indices = @transform_7, window_bounds = array<i64: 768, 256>}, {pipeline_mode = #tpu.pipeline_mode<synchronous>, transform_indices = @transform_8, window_bounds = array<i64: 1, 256>}, {pipeline_mode = #tpu.pipeline_mode<synchronous>, transform_indices = @transform_9, window_bounds = array<i64: 768, 256>}, {pipeline_mode = #tpu.pipeline_mode<synchronous>, transform_indices = @transform_10, window_bounds = array<i64: 1, 256>}, {pipeline_mode = #tpu.pipeline_mode<synchronous>, transform_indices = @transform_11, window_bounds = array<i64: 768, 256>}, {pipeline_mode = #tpu.pipeline_mode<synchronous>, transform_indices = @transform_12, window_bounds = array<i64: 1, 256>}, {pipeline_mode = #tpu.pipeline_mode<synchronous>, transform_indices = @transform_13, window_bounds = array<i64: 256, 1024>}, {pipeline_mode = #tpu.pipeline_mode<synchronous>, transform_indices = @transform_14, window_bounds = array<i64: 1, 1024>}, {pipeline_mode = #tpu.pipeline_mode<synchronous>, transform_indices = @transform_15, window_bounds = array<i64: 1024, 1024>}, {pipeline_mode = #tpu.pipeline_mode<synchronous>, transform_indices = @transform_16, window_bounds = array<i64: 1, 1024>}, {pipeline_mode = #tpu.pipeline_mode<synchronous>, transform_indices = @transform_17, window_bounds = array<i64: 1024, 4>}, {pipeline_mode = #tpu.pipeline_mode<synchronous>, transform_indices = @transform_18, window_bounds = array<i64: 1, 4>}, {transform_indices = @transform_19, window_bounds = array<i64: 1, 1, 4>}]} {
    %c0 = arith.constant 0 : index
    %c0_0 = arith.constant 0 : index
    %c0_1 = arith.constant 0 : index
    %0 = vector.load %arg1[%c0, %c0_0, %c0_1] : memref<1x123x32xf32, #tpu.memory_space<vmem>>, vector<1x123x32xf32>
    %1 = vector.shape_cast %0 : vector<1x123x32xf32> to vector<123x32xf32>
    %2 = vector.extract_strided_slice %1 {offsets = [0, 0], sizes = [117, 32], strides = [1, 1]} : vector<123x32xf32> to vector<117x32xf32>
    %3 = vector.extract_strided_slice %1 {offsets = [1, 0], sizes = [117, 32], strides = [1, 1]} : vector<123x32xf32> to vector<117x32xf32>
    %4 = vector.extract_strided_slice %1 {offsets = [2, 0], sizes = [117, 32], strides = [1, 1]} : vector<123x32xf32> to vector<117x32xf32>
    %5 = vector.extract_strided_slice %1 {offsets = [3, 0], sizes = [117, 32], strides = [1, 1]} : vector<123x32xf32> to vector<117x32xf32>
    %6 = vector.extract_strided_slice %1 {offsets = [4, 0], sizes = [117, 32], strides = [1, 1]} : vector<123x32xf32> to vector<117x32xf32>
    %7 = vector.extract_strided_slice %1 {offsets = [5, 0], sizes = [117, 32], strides = [1, 1]} : vector<123x32xf32> to vector<117x32xf32>
    %8 = vector.extract_strided_slice %1 {offsets = [6, 0], sizes = [117, 32], strides = [1, 1]} : vector<123x32xf32> to vector<117x32xf32>
    %9 = tpu.concatenate %2, %3, %4, %5, %6, %7, %8 in 1 : vector<117x32xf32>, vector<117x32xf32>, vector<117x32xf32>, vector<117x32xf32>, vector<117x32xf32>, vector<117x32xf32>, vector<117x32xf32> -> vector<117x224xf32>
    %10 = arith.truncf %9 : vector<117x224xf32> to vector<117x224xbf16>
    %c0_2 = arith.constant 0 : index
    %c0_3 = arith.constant 0 : index
    %11 = vector.load %arg2[%c0_2, %c0_3] : memref<224x256xbf16, #tpu.memory_space<vmem>>, vector<224x256xbf16>
    %cst = arith.constant dense<0.000000e+00> : vector<117x256xf32>
    %12 = tpu.matmul %10, %11, %cst {dimension_numbers = #tpu.dot_dimension_numbers<[1], [0], [0], [1], [0, 0, 1, 1], [], []>} : vector<117x224xbf16>, vector<224x256xbf16>, vector<117x256xf32> -> vector<117x256xf32>
    %c0_4 = arith.constant 0 : index
    %c0_5 = arith.constant 0 : index
    %13 = vector.load %arg3[%c0_4, %c0_5] : memref<1x256xf32, #tpu.memory_space<vmem>>, vector<1x256xf32>
    %14 = vector.broadcast %13 : vector<1x256xf32> to vector<117x256xf32>
    %15 = arith.addf %12, %14 : vector<117x256xf32>
    %16 = vector.shape_cast %15 : vector<117x256xf32> to vector<39x3x256xf32>
    %cst_6 = arith.constant dense<0xFF800000> : vector<39x256xf32>
    %17 = vector.multi_reduction <maximumf>, %16, %cst_6 [1] : vector<39x3x256xf32> to vector<39x256xf32>
    %cst_7 = arith.constant 0.000000e+00 : f32
    %18 = vector.broadcast %cst_7 : f32 to vector<39x256xf32>
    %19 = arith.maximumf %17, %18 : vector<39x256xf32>
    %20 = vector.extract_strided_slice %19 {offsets = [0, 0], sizes = [33, 256], strides = [1, 1]} : vector<39x256xf32> to vector<33x256xf32>
    %21 = vector.extract_strided_slice %19 {offsets = [1, 0], sizes = [33, 256], strides = [1, 1]} : vector<39x256xf32> to vector<33x256xf32>
    %22 = vector.extract_strided_slice %19 {offsets = [2, 0], sizes = [33, 256], strides = [1, 1]} : vector<39x256xf32> to vector<33x256xf32>
    %23 = vector.extract_strided_slice %19 {offsets = [3, 0], sizes = [33, 256], strides = [1, 1]} : vector<39x256xf32> to vector<33x256xf32>
    %24 = vector.extract_strided_slice %19 {offsets = [4, 0], sizes = [33, 256], strides = [1, 1]} : vector<39x256xf32> to vector<33x256xf32>
    %25 = vector.extract_strided_slice %19 {offsets = [5, 0], sizes = [33, 256], strides = [1, 1]} : vector<39x256xf32> to vector<33x256xf32>
    %26 = vector.extract_strided_slice %19 {offsets = [6, 0], sizes = [33, 256], strides = [1, 1]} : vector<39x256xf32> to vector<33x256xf32>
    %27 = tpu.concatenate %20, %21, %22, %23, %24, %25, %26 in 1 : vector<33x256xf32>, vector<33x256xf32>, vector<33x256xf32>, vector<33x256xf32>, vector<33x256xf32>, vector<33x256xf32>, vector<33x256xf32> -> vector<33x1792xf32>
    %28 = arith.truncf %27 : vector<33x1792xf32> to vector<33x1792xbf16>
    %c0_8 = arith.constant 0 : index
    %c0_9 = arith.constant 0 : index
    %29 = vector.load %arg4[%c0_8, %c0_9] : memref<1792x256xbf16, #tpu.memory_space<vmem>>, vector<1792x256xbf16>
    %cst_10 = arith.constant dense<0.000000e+00> : vector<33x256xf32>
    %30 = tpu.matmul %28, %29, %cst_10 {dimension_numbers = #tpu.dot_dimension_numbers<[1], [0], [0], [1], [0, 0, 1, 1], [], []>} : vector<33x1792xbf16>, vector<1792x256xbf16>, vector<33x256xf32> -> vector<33x256xf32>
    %c0_11 = arith.constant 0 : index
    %c0_12 = arith.constant 0 : index
    %31 = vector.load %arg5[%c0_11, %c0_12] : memref<1x256xf32, #tpu.memory_space<vmem>>, vector<1x256xf32>
    %32 = vector.broadcast %31 : vector<1x256xf32> to vector<33x256xf32>
    %33 = arith.addf %30, %32 : vector<33x256xf32>
    %34 = vector.shape_cast %33 : vector<33x256xf32> to vector<11x3x256xf32>
    %cst_13 = arith.constant dense<0xFF800000> : vector<11x256xf32>
    %35 = vector.multi_reduction <maximumf>, %34, %cst_13 [1] : vector<11x3x256xf32> to vector<11x256xf32>
    %cst_14 = arith.constant 0.000000e+00 : f32
    %36 = vector.broadcast %cst_14 : f32 to vector<11x256xf32>
    %37 = arith.maximumf %35, %36 : vector<11x256xf32>
    %38 = vector.extract_strided_slice %37 {offsets = [0, 0], sizes = [9, 256], strides = [1, 1]} : vector<11x256xf32> to vector<9x256xf32>
    %39 = vector.extract_strided_slice %37 {offsets = [1, 0], sizes = [9, 256], strides = [1, 1]} : vector<11x256xf32> to vector<9x256xf32>
    %40 = vector.extract_strided_slice %37 {offsets = [2, 0], sizes = [9, 256], strides = [1, 1]} : vector<11x256xf32> to vector<9x256xf32>
    %41 = tpu.concatenate %38, %39, %40 in 1 : vector<9x256xf32>, vector<9x256xf32>, vector<9x256xf32> -> vector<9x768xf32>
    %42 = arith.truncf %41 : vector<9x768xf32> to vector<9x768xbf16>
    %c0_15 = arith.constant 0 : index
    %c0_16 = arith.constant 0 : index
    %43 = vector.load %arg6[%c0_15, %c0_16] : memref<768x256xbf16, #tpu.memory_space<vmem>>, vector<768x256xbf16>
    %cst_17 = arith.constant dense<0.000000e+00> : vector<9x256xf32>
    %44 = tpu.matmul %42, %43, %cst_17 {dimension_numbers = #tpu.dot_dimension_numbers<[1], [0], [0], [1], [0, 0, 1, 1], [], []>} : vector<9x768xbf16>, vector<768x256xbf16>, vector<9x256xf32> -> vector<9x256xf32>
    %c0_18 = arith.constant 0 : index
    %c0_19 = arith.constant 0 : index
    %45 = vector.load %arg7[%c0_18, %c0_19] : memref<1x256xf32, #tpu.memory_space<vmem>>, vector<1x256xf32>
    %46 = vector.broadcast %45 : vector<1x256xf32> to vector<9x256xf32>
    %47 = arith.addf %44, %46 : vector<9x256xf32>
    %cst_20 = arith.constant 0.000000e+00 : f32
    %48 = vector.broadcast %cst_20 : f32 to vector<9x256xf32>
    %49 = arith.maximumf %47, %48 : vector<9x256xf32>
    %50 = vector.extract_strided_slice %49 {offsets = [0, 0], sizes = [7, 256], strides = [1, 1]} : vector<9x256xf32> to vector<7x256xf32>
    %51 = vector.extract_strided_slice %49 {offsets = [1, 0], sizes = [7, 256], strides = [1, 1]} : vector<9x256xf32> to vector<7x256xf32>
    %52 = vector.extract_strided_slice %49 {offsets = [2, 0], sizes = [7, 256], strides = [1, 1]} : vector<9x256xf32> to vector<7x256xf32>
    %53 = tpu.concatenate %50, %51, %52 in 1 : vector<7x256xf32>, vector<7x256xf32>, vector<7x256xf32> -> vector<7x768xf32>
    %54 = arith.truncf %53 : vector<7x768xf32> to vector<7x768xbf16>
    %c0_21 = arith.constant 0 : index
    %c0_22 = arith.constant 0 : index
    %55 = vector.load %arg8[%c0_21, %c0_22] : memref<768x256xbf16, #tpu.memory_space<vmem>>, vector<768x256xbf16>
    %cst_23 = arith.constant dense<0.000000e+00> : vector<7x256xf32>
    %56 = tpu.matmul %54, %55, %cst_23 {dimension_numbers = #tpu.dot_dimension_numbers<[1], [0], [0], [1], [0, 0, 1, 1], [], []>} : vector<7x768xbf16>, vector<768x256xbf16>, vector<7x256xf32> -> vector<7x256xf32>
    %c0_24 = arith.constant 0 : index
    %c0_25 = arith.constant 0 : index
    %57 = vector.load %arg9[%c0_24, %c0_25] : memref<1x256xf32, #tpu.memory_space<vmem>>, vector<1x256xf32>
    %58 = vector.broadcast %57 : vector<1x256xf32> to vector<7x256xf32>
    %59 = arith.addf %56, %58 : vector<7x256xf32>
    %cst_26 = arith.constant 0.000000e+00 : f32
    %60 = vector.broadcast %cst_26 : f32 to vector<7x256xf32>
    %61 = arith.maximumf %59, %60 : vector<7x256xf32>
    %62 = vector.extract_strided_slice %61 {offsets = [0, 0], sizes = [5, 256], strides = [1, 1]} : vector<7x256xf32> to vector<5x256xf32>
    %63 = vector.extract_strided_slice %61 {offsets = [1, 0], sizes = [5, 256], strides = [1, 1]} : vector<7x256xf32> to vector<5x256xf32>
    %64 = vector.extract_strided_slice %61 {offsets = [2, 0], sizes = [5, 256], strides = [1, 1]} : vector<7x256xf32> to vector<5x256xf32>
    %65 = tpu.concatenate %62, %63, %64 in 1 : vector<5x256xf32>, vector<5x256xf32>, vector<5x256xf32> -> vector<5x768xf32>
    %66 = arith.truncf %65 : vector<5x768xf32> to vector<5x768xbf16>
    %c0_27 = arith.constant 0 : index
    %c0_28 = arith.constant 0 : index
    %67 = vector.load %arg10[%c0_27, %c0_28] : memref<768x256xbf16, #tpu.memory_space<vmem>>, vector<768x256xbf16>
    %cst_29 = arith.constant dense<0.000000e+00> : vector<5x256xf32>
    %68 = tpu.matmul %66, %67, %cst_29 {dimension_numbers = #tpu.dot_dimension_numbers<[1], [0], [0], [1], [0, 0, 1, 1], [], []>} : vector<5x768xbf16>, vector<768x256xbf16>, vector<5x256xf32> -> vector<5x256xf32>
    %c0_30 = arith.constant 0 : index
    %c0_31 = arith.constant 0 : index
    %69 = vector.load %arg11[%c0_30, %c0_31] : memref<1x256xf32, #tpu.memory_space<vmem>>, vector<1x256xf32>
    %70 = vector.broadcast %69 : vector<1x256xf32> to vector<5x256xf32>
    %71 = arith.addf %68, %70 : vector<5x256xf32>
    %cst_32 = arith.constant 0.000000e+00 : f32
    %72 = vector.broadcast %cst_32 : f32 to vector<5x256xf32>
    %73 = arith.maximumf %71, %72 : vector<5x256xf32>
    %74 = vector.extract_strided_slice %73 {offsets = [0, 0], sizes = [3, 256], strides = [1, 1]} : vector<5x256xf32> to vector<3x256xf32>
    %75 = vector.extract_strided_slice %73 {offsets = [1, 0], sizes = [3, 256], strides = [1, 1]} : vector<5x256xf32> to vector<3x256xf32>
    %76 = vector.extract_strided_slice %73 {offsets = [2, 0], sizes = [3, 256], strides = [1, 1]} : vector<5x256xf32> to vector<3x256xf32>
    %77 = tpu.concatenate %74, %75, %76 in 1 : vector<3x256xf32>, vector<3x256xf32>, vector<3x256xf32> -> vector<3x768xf32>
    %78 = arith.truncf %77 : vector<3x768xf32> to vector<3x768xbf16>
    %c0_33 = arith.constant 0 : index
    %c0_34 = arith.constant 0 : index
    %79 = vector.load %arg12[%c0_33, %c0_34] : memref<768x256xbf16, #tpu.memory_space<vmem>>, vector<768x256xbf16>
    %cst_35 = arith.constant dense<0.000000e+00> : vector<3x256xf32>
    %80 = tpu.matmul %78, %79, %cst_35 {dimension_numbers = #tpu.dot_dimension_numbers<[1], [0], [0], [1], [0, 0, 1, 1], [], []>} : vector<3x768xbf16>, vector<768x256xbf16>, vector<3x256xf32> -> vector<3x256xf32>
    %c0_36 = arith.constant 0 : index
    %c0_37 = arith.constant 0 : index
    %81 = vector.load %arg13[%c0_36, %c0_37] : memref<1x256xf32, #tpu.memory_space<vmem>>, vector<1x256xf32>
    %82 = vector.broadcast %81 : vector<1x256xf32> to vector<3x256xf32>
    %83 = arith.addf %80, %82 : vector<3x256xf32>
    %84 = vector.shape_cast %83 : vector<3x256xf32> to vector<1x3x256xf32>
    %cst_38 = arith.constant dense<0xFF800000> : vector<1x256xf32>
    %85 = vector.multi_reduction <maximumf>, %84, %cst_38 [1] : vector<1x3x256xf32> to vector<1x256xf32>
    %cst_39 = arith.constant 0.000000e+00 : f32
    %86 = vector.broadcast %cst_39 : f32 to vector<1x256xf32>
    %87 = arith.maximumf %85, %86 : vector<1x256xf32>
    %88 = arith.truncf %87 : vector<1x256xf32> to vector<1x256xbf16>
    %c0_40 = arith.constant 0 : index
    %c0_41 = arith.constant 0 : index
    %89 = vector.load %arg14[%c0_40, %c0_41] : memref<256x1024xbf16, #tpu.memory_space<vmem>>, vector<256x1024xbf16>
    %cst_42 = arith.constant dense<0.000000e+00> : vector<1x1024xf32>
    %90 = tpu.matmul %88, %89, %cst_42 {dimension_numbers = #tpu.dot_dimension_numbers<[1], [0], [0], [1], [0, 0, 1, 1], [], []>} : vector<1x256xbf16>, vector<256x1024xbf16>, vector<1x1024xf32> -> vector<1x1024xf32>
    %c0_43 = arith.constant 0 : index
    %c0_44 = arith.constant 0 : index
    %91 = vector.load %arg15[%c0_43, %c0_44] : memref<1x1024xf32, #tpu.memory_space<vmem>>, vector<1x1024xf32>
    %92 = arith.addf %90, %91 : vector<1x1024xf32>
    %cst_45 = arith.constant 0.000000e+00 : f32
    %93 = vector.broadcast %cst_45 : f32 to vector<1x1024xf32>
    %94 = arith.maximumf %92, %93 : vector<1x1024xf32>
    %95 = arith.truncf %94 : vector<1x1024xf32> to vector<1x1024xbf16>
    %c0_46 = arith.constant 0 : index
    %c0_47 = arith.constant 0 : index
    %96 = vector.load %arg16[%c0_46, %c0_47] : memref<1024x1024xbf16, #tpu.memory_space<vmem>>, vector<1024x1024xbf16>
    %cst_48 = arith.constant dense<0.000000e+00> : vector<1x1024xf32>
    %97 = tpu.matmul %95, %96, %cst_48 {dimension_numbers = #tpu.dot_dimension_numbers<[1], [0], [0], [1], [0, 0, 1, 1], [], []>} : vector<1x1024xbf16>, vector<1024x1024xbf16>, vector<1x1024xf32> -> vector<1x1024xf32>
    %c0_49 = arith.constant 0 : index
    %c0_50 = arith.constant 0 : index
    %98 = vector.load %arg17[%c0_49, %c0_50] : memref<1x1024xf32, #tpu.memory_space<vmem>>, vector<1x1024xf32>
    %99 = arith.addf %97, %98 : vector<1x1024xf32>
    %cst_51 = arith.constant 0.000000e+00 : f32
    %100 = vector.broadcast %cst_51 : f32 to vector<1x1024xf32>
    %101 = arith.maximumf %99, %100 : vector<1x1024xf32>
    %102 = arith.truncf %101 : vector<1x1024xf32> to vector<1x1024xbf16>
    %c0_52 = arith.constant 0 : index
    %c0_53 = arith.constant 0 : index
    %103 = vector.load %arg18[%c0_52, %c0_53] : memref<1024x4xbf16, #tpu.memory_space<vmem>>, vector<1024x4xbf16>
    %cst_54 = arith.constant dense<0.000000e+00> : vector<1x4xf32>
    %104 = tpu.matmul %102, %103, %cst_54 {dimension_numbers = #tpu.dot_dimension_numbers<[1], [0], [0], [1], [0, 0, 1, 1], [], []>} : vector<1x1024xbf16>, vector<1024x4xbf16>, vector<1x4xf32> -> vector<1x4xf32>
    %c0_55 = arith.constant 0 : index
    %c0_56 = arith.constant 0 : index
    %105 = vector.load %arg19[%c0_55, %c0_56] : memref<1x4xf32, #tpu.memory_space<vmem>>, vector<1x4xf32>
    %106 = arith.addf %104, %105 : vector<1x4xf32>
    %c0_57 = arith.constant 0 : index
    %c0_58 = arith.constant 0 : index
    %c0_59 = arith.constant 0 : index
    %107 = vector.load %arg20[%c0_57, %c0_58, %c0_59] : memref<1x1x4xf32, #tpu.memory_space<vmem>>, vector<1x1x4xf32>
    %108 = vector.shape_cast %107 : vector<1x1x4xf32> to vector<1x4xf32>
    %109 = vector.shape_cast %106 : vector<1x4xf32> to vector<1x1x4xf32>
    tpu.vector_store %arg20[%c0_57, %c0_58, %c0_59], %109 {strides = array<i32>} : memref<1x1x4xf32, #tpu.memory_space<vmem>>, vector<1x1x4xf32>,
    return
  }
  func.func @transform_0(%arg0: i32) -> (i32, i32, i32) {
    %c0_i32 = arith.constant 0 : i32
    %c0_i32_0 = arith.constant 0 : i32
    %c0_i32_1 = arith.constant 0 : i32
    return %arg0, %c0_i32, %c0_i32_0 : i32, i32, i32
  }
  func.func @transform_1(%arg0: i32) -> (i32, i32) {
    %c0_i32 = arith.constant 0 : i32
    %c0_i32_0 = arith.constant 0 : i32
    %c0_i32_1 = arith.constant 0 : i32
    return %c0_i32, %c0_i32_0 : i32, i32
  }
  func.func @transform_2(%arg0: i32) -> (i32, i32) {
    %c0_i32 = arith.constant 0 : i32
    %c0_i32_0 = arith.constant 0 : i32
    %c0_i32_1 = arith.constant 0 : i32
    return %c0_i32, %c0_i32_0 : i32, i32
  }
  func.func @transform_3(%arg0: i32) -> (i32, i32) {
    %c0_i32 = arith.constant 0 : i32
    %c0_i32_0 = arith.constant 0 : i32
    %c0_i32_1 = arith.constant 0 : i32
    return %c0_i32, %c0_i32_0 : i32, i32
  }
  func.func @transform_4(%arg0: i32) -> (i32, i32) {
    %c0_i32 = arith.constant 0 : i32
    %c0_i32_0 = arith.constant 0 : i32
    %c0_i32_1 = arith.constant 0 : i32
    return %c0_i32, %c0_i32_0 : i32, i32
  }
  func.func @transform_5(%arg0: i32) -> (i32, i32) {
    %c0_i32 = arith.constant 0 : i32
    %c0_i32_0 = arith.constant 0 : i32
    %c0_i32_1 = arith.constant 0 : i32
    return %c0_i32, %c0_i32_0 : i32, i32
  }
  func.func @transform_6(%arg0: i32) -> (i32, i32) {
    %c0_i32 = arith.constant 0 : i32
    %c0_i32_0 = arith.constant 0 : i32
    %c0_i32_1 = arith.constant 0 : i32
    return %c0_i32, %c0_i32_0 : i32, i32
  }
  func.func @transform_7(%arg0: i32) -> (i32, i32) {
    %c0_i32 = arith.constant 0 : i32
    %c0_i32_0 = arith.constant 0 : i32
    %c0_i32_1 = arith.constant 0 : i32
    return %c0_i32, %c0_i32_0 : i32, i32
  }
  func.func @transform_8(%arg0: i32) -> (i32, i32) {
    %c0_i32 = arith.constant 0 : i32
    %c0_i32_0 = arith.constant 0 : i32
    %c0_i32_1 = arith.constant 0 : i32
    return %c0_i32, %c0_i32_0 : i32, i32
  }
  func.func @transform_9(%arg0: i32) -> (i32, i32) {
    %c0_i32 = arith.constant 0 : i32
    %c0_i32_0 = arith.constant 0 : i32
    %c0_i32_1 = arith.constant 0 : i32
    return %c0_i32, %c0_i32_0 : i32, i32
  }
  func.func @transform_10(%arg0: i32) -> (i32, i32) {
    %c0_i32 = arith.constant 0 : i32
    %c0_i32_0 = arith.constant 0 : i32
    %c0_i32_1 = arith.constant 0 : i32
    return %c0_i32, %c0_i32_0 : i32, i32
  }
  func.func @transform_11(%arg0: i32) -> (i32, i32) {
    %c0_i32 = arith.constant 0 : i32
    %c0_i32_0 = arith.constant 0 : i32
    %c0_i32_1 = arith.constant 0 : i32
    return %c0_i32, %c0_i32_0 : i32, i32
  }
  func.func @transform_12(%arg0: i32) -> (i32, i32) {
    %c0_i32 = arith.constant 0 : i32
    %c0_i32_0 = arith.constant 0 : i32
    %c0_i32_1 = arith.constant 0 : i32
    return %c0_i32, %c0_i32_0 : i32, i32
  }
  func.func @transform_13(%arg0: i32) -> (i32, i32) {
    %c0_i32 = arith.constant 0 : i32
    %c0_i32_0 = arith.constant 0 : i32
    %c0_i32_1 = arith.constant 0 : i32
    return %c0_i32, %c0_i32_0 : i32, i32
  }
  func.func @transform_14(%arg0: i32) -> (i32, i32) {
    %c0_i32 = arith.constant 0 : i32
    %c0_i32_0 = arith.constant 0 : i32
    %c0_i32_1 = arith.constant 0 : i32
    return %c0_i32, %c0_i32_0 : i32, i32
  }
  func.func @transform_15(%arg0: i32) -> (i32, i32) {
    %c0_i32 = arith.constant 0 : i32
    %c0_i32_0 = arith.constant 0 : i32
    %c0_i32_1 = arith.constant 0 : i32
    return %c0_i32, %c0_i32_0 : i32, i32
  }
  func.func @transform_16(%arg0: i32) -> (i32, i32) {
    %c0_i32 = arith.constant 0 : i32
    %c0_i32_0 = arith.constant 0 : i32
    %c0_i32_1 = arith.constant 0 : i32
    return %c0_i32, %c0_i32_0 : i32, i32
  }
  func.func @transform_17(%arg0: i32) -> (i32, i32) {
    %c0_i32 = arith.constant 0 : i32
    %c0_i32_0 = arith.constant 0 : i32
    %c0_i32_1 = arith.constant 0 : i32
    return %c0_i32, %c0_i32_0 : i32, i32
  }
  func.func @transform_18(%arg0: i32) -> (i32, i32) {
    %c0_i32 = arith.constant 0 : i32
    %c0_i32_0 = arith.constant 0 : i32
    %c0_i32_1 = arith.constant 0 : i32
    return %c0_i32, %c0_i32_0 : i32, i32
  }
  func.func @transform_19(%arg0: i32) -> (i32, i32, i32) {
    %c0_i32 = arith.constant 0 : i32
    %c0_i32_0 = arith.constant 0 : i32
    %c0_i32_1 = arith.constant 0 : i32
    return %arg0, %c0_i32, %c0_i32_0 : i32, i32, i32
  }
}

</mosaic_0001>

<bundles_post_ra>
// kernel: charcnn_forward.1
= control target key start
LH: loop header
LB: loop body
LE: loop exit
PB: predicated region body
PF: predicated region fallthrough
CT: control target
= control target key end

     0   :  { %s25509_s0 = inlined_call_operand.vmem [shape: f32[2,123,32], index: 0, kind: input, shape index: {}]   ;;  %s25510_s1 = inlined_call_operand.vmem [shape: bf16[224,256], index: 1, kind: input, shape index: {}]   ;;  %s25511_s2 = inlined_call_operand.vmem [shape: f32[1,256], index: 2, kind: input, shape index: {}]   ;;  %s25512_s3 = inlined_call_operand.vmem [shape: bf16[1792,256], index: 3, kind: input, shape index: {}]   ;;  %s25513_s4 = inlined_call_operand.vmem [shape: f32[1,256], index: 4, kind: input, shape index: {}]   ;;  %s25514_s5 = inlined_call_operand.vmem [shape: bf16[768,256], index: 5, kind: input, shape index: {}]   ;;  %s25515_s6 = inlined_call_operand.vmem [shape: f32[1,256], index: 6, kind: input, shape index: {}]   ;;  %s25516_s7 = inlined_call_operand.vmem [shape: bf16[768,256], index: 7, kind: input, shape index: {}]   ;;  %s25517_s8 = inlined_call_operand.vmem [shape: f32[1,256], index: 8, kind: input, shape index: {}]   ;;  %s25518_s9 = inlined_call_operand.vmem [shape: bf16[768,256], index: 9, kind: input, shape index: {}]   ;;  %s25519_s10 = inlined_call_operand.vmem [shape: f32[1,256], index: 10, kind: input, shape index: {}]   ;;  %s25520_s11 = inlined_call_operand.vmem [shape: bf16[768,256], index: 11, kind: input, shape index: {}]   ;;  %s25521_s12 = inlined_call_operand.vmem [shape: f32[1,256], index: 12, kind: input, shape index: {}]   ;;  %s25522_s13 = inlined_call_operand.vmem [shape: bf16[256,1024], index: 13, kind: input, shape index: {}]   ;;  %s25523_s14 = inlined_call_operand.vmem [shape: f32[1,1024], index: 14, kind: input, shape index: {}]   ;;  %s25524_s15 = inlined_call_operand.vmem [shape: bf16[1024,1024], index: 15, kind: input, shape index: {}]   ;;  %s25525_s16 = inlined_call_operand.vmem [shape: f32[1,1024], index: 16, kind: input, shape index: {}]   ;;  %s25526_s17 = inlined_call_operand.vmem [shape: bf16[1024,4], index: 17, kind: input, shape index: {}]   ;;  %s25527_s18 = inlined_call_operand.vmem [shape: f32[1,4], index: 18, kind: input, shape index: {}]   ;;  %s25528_s19 = inlined_call_operand.hbm [shape: f32[2,1,4], index: 19, kind: output, shape index: {}]  }
   0x1   :  { %25689 = sst [smem:[#allocation77_spill]] %s25509_s0 }
   0x2   :  { %25690 = sst [smem:[#allocation78_spill]] %s25510_s1 }
   0x3   :  { %25691 = sst [smem:[#allocation79_spill]] %s25511_s2 }
   0x4   :  { %25692 = sst [smem:[#allocation80_spill]] %s25512_s3 }
   0x5   :  { %25693 = sst [smem:[#allocation81_spill]] %s25513_s4 }
   0x6   :  { %25694 = sst [smem:[#allocation82_spill]] %s25514_s5 }
   0x7   :  { %25695 = sst [smem:[#allocation83_spill]] %s25528_s19 }
   0x8   :  { %24 = vsyncpa [#allocation3], 0 }
   0x9   :  { %26 = vsyncpa [#allocation3 + $0x1], 0  ;;  %s18704_s0 = smov 0   ;;  %s18706_s30 = smov 0  }
   0xa   :  { %s18708_s20 = smov 0   ;;  %s18710_s21 = smov 0  }
   0xb LB: > { %25696 = sst [smem:[#allocation5_spill]] %s18585_s0  ;;  %s18725_s1 = sadd.s32 4294967295, %s18597_s21   ;;  %s18597_s21 = sphi %s18710_s21, %s25945_s21   ;;  %s18593_s20 = sphi %s18708_s20, %s25947_s20   ;;  %s18589_s30 = sphi %s18706_s30, %s25949_s30   ;;  %s18585_s0 = sphi %s18704_s0, %s25948_s0  }
   0xc   : > { %25697 = sst [smem:[#allocation6_spill]] %s18593_s20  ;;  %s15816_s22 = sadd.s32 4294967294, %s18597_s21  }
   0xd   : > { %25698 = sst [smem:[#allocation7_spill]] %s18597_s21  ;;  %s18729_s2 = sadd.s32 1, %s18597_s21  }
   0xe   : > { %25699 = sst [smem:[#allocation8_spill]] %s18725_s1  ;;  %s443_s23 = sadd.s32 1, %s18593_s20 }
   0xf   : > { %25700 = sst [smem:[#allocation9_spill]] %s18729_s2  ;;  %s440_s24 = ssub.s32 %s18597_s21, %s18729_s2 }
  0x10   : > { %p453_p0 = scmp.ne.s32.totalorder %s18593_s20, %s18589_s30  ;;  %p441_p1 = scmp.eq.s32.totalorder %s440_s24, 0 }
  0x11   : > { %p454_p2 = scmp.eq.s32.totalorder %s18725_s1, 1  ;;  %p459_p3 = scmp.ne.s32.totalorder %s18589_s30, %s18585_s0 }
  0x12   : > { %p460_p4 = scmp.eq.s32.totalorder %s15816_s22, 1  ;;  %p15819_p7 = scmp.ge.s32.totalorder %s18597_s21, 1 }
  0x13   : > { %s18740_s25 = scalar_select %p441_p1, %s18593_s20, %s443_s23  }
  0x14   : > { %p18742_p5 = por %p454_p2, %p453_p0  ;;  %p18746_p6 = por %p460_p4, %p459_p3 }
  0x15   : > { %25701 = sst [smem:[#allocation10_spill]] %s18740_s25  ;;  %p540_p8 = scmp.lt.s32.totalorder %s18597_s21, 3 }
  0x16   : > { %s25702_s3 = scalar_select %p18742_p5, 1, 0 }
  0x17   : > { %s25704_s26 = scalar_select %p18746_p6, 1, 0 }
  0x18   : > { %25703 = sst [smem:[#allocation11_spill]] %s25702_s3  ;;  %p541_p9 = pnand %p15819_p7, %p540_p8 }
  0x19   : > { %25705 = sst [smem:[#allocation12_spill]] %s25704_s26 }
  0x1a   : > { %544 = sbr.rel (%p541_p9) target bundleno = 3237 (0xca5), region = 96 }
  0x1f   : > { %p595_p10 = scmp.lt.s32.totalorder %s18725_s1, 1  ;;  %s25706_s22 = sld [smem:[#allocation78_spill]]  ;;  %vm707_vm0 = vcmask 1045504   ;;  %vm632_vm1 = vcmask 1046528   ;;  %vm982_vm2 = vcmask 1041408   ;;  %vm905_vm3 = vcmask 1042432  }
  0x20   : > { %s25707_s3 = sld [smem:[#allocation77_spill]]  ;;  %vm782_vm4 = vcmask 1044480   ;;  %s18599_s25 = smov 64   ;;  %vm858_vm5 = vcmask 1043456   ;;  %vm1059_vm6 = vcmask 261120   ;;  %vm1075_vm7 = vcmask 523264  }
  0x21   : > { %s596_s27 = scalar_select %p595_p10, %s18725_s1, 1  ;;  %vm1091_vm8 = vcmask 785408   ;;  %vm4215_vm9 = vcmask 1041409   ;;  %vm4217_vm10 = vcmask 1042434   ;;  %vm4219_vm11 = vcmask 1043459  }
  0x22   : > { %s18601_s0 = smov 96   ;;  %s25713_s28 = sld [smem:[#allocation79_spill]]  ;;  %vm4221_vm12 = vcmask 1044484   ;;  %vm4223_vm13 = vcmask 1045509   ;;  %vm4225_vm14 = vcmask 1046534   ;;  %vm4227_vm15 = vcmask 1047559  }
  0x23   : > { %s17186_s2 = sshll.u32 %s596_s27, 7  ;;  %s25933_s4 = sld [smem:[#allocation81_spill]] }
  0x24   : > { %s25936_s5 = sld [smem:[#allocation82_spill]]  ;;  %s593_s19 = sand.u32 1, %s18589_s30  }
  0x25   : > { %v17503_v0 = vld [vmem:[%s25706_s22 + $0x74] ss:$8 sps:$4 sm:$0xff]   ;;  %v17505_v1 = vld [vmem:[%s25706_s22 + $0x70] ss:$8 sps:$4 sm:$0xff]   ;;  %v17506_v2 = vld [vmem:[%s25706_s22 + $0x64] ss:$8 sps:$4 sm:$0xff]  }
  0x26   : > { %1357 = vmatprep.subr.bf16.mxu0 %v17503_v0  ;;  %v17508_v3 = vld [vmem:[%s25706_s22 + $0x60] ss:$8 sps:$4 sm:$0xff]   ;;  %s18769_s1 = scalar_lea.vmem %s25707_s3, %s17186_s2  ;;  %v17509_v4 = vld [vmem:[%s25706_s22 + $0x54] ss:$8 sps:$4 sm:$0xff]   ;;  %v17511_v22 = vld [vmem:[%s25706_s22 + $0x50] ss:$8 sps:$4 sm:$0xff]  }
  0x27   : > { %1358 = vmatpush1.bf16.msra.mxu0 %v17505_v1  ;;  %v601_v5 = vld [vmem:[%s18769_s1] sm:$0xff]  ;;  %v602_v6 = vld [vmem:[%s18769_s1 + $0x8] sm:$0xff]  ;;  %v18777_v7 = vld [vmem:[%s18769_s1 + $0x10] sm:$0xff]  ;;  %s18600_s3 = smov 32   ;;  %s25938_s20 = sld [smem:[#allocation8_spill]] }
  0x28   : > { %1359 = vmatprep.subr.bf16.mxu0 %v17506_v2  ;;  %v708_v8 = vrot.slane %v601_v5, 2  ;;  %v709_v9 = vrot.slane %v602_v6, 2  ;;  %v711_v10 = vrot.slane %v18777_v7, 2  ;;  %v633_v11 = vrot.slane %v601_v5, 1  ;;  %v18785_v20 = vld [vmem:[%s18769_s1 + $0x18] sm:$0xff]  ;;  %v18788_v21 = vld [vmem:[%s18769_s1 + $0x20] sm:$0xff] }
  0x29   : > { %v634_v12 = vrot.slane %v602_v6, 1  ;;  %v636_v13 = vrot.slane %v18777_v7, 1  ;;  %v983_v14 = vrot.slane %v601_v5, 6  ;;  %v984_v15 = vrot.slane %v602_v6, 6  ;;  %v17512_v27 = vld [vmem:[%s25706_s22 + $0x44] ss:$8 sps:$4 sm:$0xff]  }
  0x2a   : > { %v710_v16 = vsel %vm707_vm0, %v708_v8, %v709_v9  ;;  %v712_v17 = vsel %vm707_vm0, %v709_v9, %v711_v10  ;;  %v986_v18 = vrot.slane %v18777_v7, 6  ;;  %v906_v19 = vrot.slane %v601_v5, 5  ;;  %v17514_v40 = vld [vmem:[%s25706_s22 + $0x40] ss:$8 sps:$4 sm:$0xff]   ;;  %v17515_v45 = vld [vmem:[%s25706_s22 + $0x34] ss:$8 sps:$4 sm:$0xff]  }
  0x2b   : > { %1360 = vmatpush1.bf16.msra.mxu0 %v17508_v3  ;;  %v17328_v23 = vpack.i.bf16 %v712_v17, %v710_v16  ;;  %v635_v24 = vsel %vm632_vm1, %v633_v11, %v634_v12  ;;  %v637_v25 = vsel %vm632_vm1, %v634_v12, %v636_v13  ;;  %v985_v26 = vsel %vm982_vm2, %v983_v14, %v984_v15  ;;  %v18829_v54 = vld [vmem:[%s18769_s1 + $0x28] sm:$0xff]  ;;  %v18832_v55 = vld [vmem:[%s18769_s1 + $0x30] sm:$0xff]  ;;  %s594_s26 = scalar_lea.vmem [#allocation2], %s593_s19 }
  0x2c   : > { %1361 = vmatprep.subr.bf16.mxu0 %v17509_v4  ;;  %v17318_v28 = vpack.i.bf16 %v637_v25, %v635_v24  ;;  %v987_v29 = vsel %vm982_vm2, %v984_v15, %v986_v18  ;;  %v907_v30 = vrot.slane %v602_v6, 5  ;;  %v909_v31 = vrot.slane %v18777_v7, 5  ;;  %v17517_v56 = vld [vmem:[%s25706_s22 + $0x30] ss:$8 sps:$4 sm:$0xff]   ;;  %v17518_v0 = vld [vmem:[%s25706_s22 + $0x24] ss:$8 sps:$4 sm:$0xff]  }
  0x2d   : > { %17329 = vrot.lane.b32.xlu1 %v17328_v23, %s18599_s25  ;;  %v17333_v32 = vpack.i.bf16 %v987_v29, %v985_v26  ;;  %v638_v33 = vrot.slane %v18785_v20, 1  ;;  %v640_v34 = vrot.slane %v18788_v21, 1  ;;  %v783_v35 = vrot.slane %v601_v5, 3  ;;  %v17520_v12 = vld [vmem:[%s25706_s22 + $0x20] ss:$8 sps:$4 sm:$0xff]   ;;  %v18883_v24 = vld [vmem:[%s18769_s1 + $0x38] sm:$0xff] }
  0x2e   : > { %17319 = vrot.lane.b32.xlu0 %v17318_v28, %s18600_s3  ;;  %v908_v36 = vsel %vm905_vm3, %v906_v19, %v907_v30  ;;  %v910_v37 = vsel %vm905_vm3, %v907_v30, %v909_v31  ;;  %v784_v38 = vrot.slane %v602_v6, 3  ;;  %v786_v39 = vrot.slane %v18777_v7, 3  ;;  %v17523_v25 = vld [vmem:[%s25706_s22 + $0x10] ss:$8 sps:$4 sm:$0xff]   ;;  %v18889_v26 = vld [vmem:[%s18769_s1 + $0x40] sm:$0xff]  ;;  %s17183_s2 = sshll.u32 %s25938_s20, 4 }
  0x2f   : > { %1362 = vmatpush1.bf16.msra.mxu0 %v17511_v22  ;;  %v17323_v41 = vpack.i.bf16 %v910_v37, %v908_v36  ;;  %v639_v42 = vsel %vm632_vm1, %v636_v13, %v638_v33  ;;  %v641_v43 = vsel %vm632_vm1, %v638_v33, %v640_v34  ;;  %v713_v44 = vrot.slane %v18785_v20, 2  ;;  %v17521_v13 = vld [vmem:[%s25706_s22 + $0x14] ss:$8 sps:$4 sm:$0xff]   ;;  %s15761_s27 = sshll.u32 %s594_s26, 4  ;;  %s18603_s20 = smov [#allocation2]   ;;  %s15762_s27 = int_to_ptr.vmem [resolvable:$true] %s15761_s27 }
  0x30   : > { %1363 = vmatprep.subr.bf16.mxu0 %v17512_v27  ;;  %v17343_v46 = vpack.i.bf16 %v641_v43, %v639_v42  ;;  %v785_v47 = vsel %vm782_vm4, %v783_v35, %v784_v38  ;;  %v787_v48 = vsel %vm782_vm4, %v784_v38, %v786_v39  ;;  %v715_v49 = vrot.slane %v18788_v21, 2  ;;  %v17524_v27 = vld [vmem:[%s25706_s22 + $0x4] ss:$8 sps:$4 sm:$0xff]  }
  0x31   : > { %17334 = vrot.lane.b32.xlu1 %v17333_v32, %s18599_s25  ;;  %v17338_v50 = vpack.i.bf16 %v787_v48, %v785_v47  ;;  %v714_v51 = vsel %vm707_vm0, %v711_v10, %v713_v44  ;;  %v911_v52 = vrot.slane %v18785_v20, 5  ;;  %v913_v53 = vrot.slane %v18788_v21, 5 }
  0x32   : > { %17324 = vrot.lane.b32.xlu0 %v17323_v41, %s18600_s3  ;;  %v716_v57 = vsel %vm707_vm0, %v713_v44, %v715_v49  ;;  %v788_v58 = vrot.slane %v18785_v20, 3  ;;  %v790_v59 = vrot.slane %v18788_v21, 3  ;;  %v988_v60 = vrot.slane %v18785_v20, 6 }
  0x33   : > { %1364 = vmatpush1.bf16.msra.mxu0 %v17514_v40  ;;  %v912_v61 = vsel %vm905_vm3, %v909_v31, %v911_v52  ;;  %v914_v62 = vsel %vm905_vm3, %v911_v52, %v913_v53  ;;  %v990_v63 = vrot.slane %v18788_v21, 6  ;;  %v17353_v1 = vpack.i.bf16 %v716_v57, %v714_v51 }
  0x34   : > { %1365 = vmatprep.subr.bf16.mxu0 %v17515_v45  ;;  %v17348_v2 = vpack.i.bf16 %v914_v62, %v912_v61  ;;  %v789_v3 = vsel %vm782_vm4, %v786_v39, %v788_v58  ;;  %v791_v4 = vsel %vm782_vm4, %v788_v58, %v790_v59  ;;  %v915_v5 = vrot.slane %v18829_v54, 5  ;;  %v17527_v39 = vld [vmem:[%s25706_s22 + $0xd4] ss:$8 sps:$4 sm:$0xff]  }
  0x35   : > { %17344 = vrot.lane.b32.xlu1 %v17343_v46, %s18600_s3  ;;  %v917_v6 = vrot.slane %v18832_v55, 5  ;;  %v989_v8 = vsel %vm982_vm2, %v986_v18, %v988_v60  ;;  %v991_v9 = vsel %vm982_vm2, %v988_v60, %v990_v63  ;;  %v642_v10 = vrot.slane %v18829_v54, 1  ;;  %v17529_v46 = vld [vmem:[%s25706_s22 + $0xd0] ss:$8 sps:$4 sm:$0xff]   ;;  %v17532_v60 = vld [vmem:[%s25706_s22 + $0xc0] ss:$8 sps:$4 sm:$0xff]  }
  0x36   : > { %17339 = vrot.lane.b32.xlu0 %v17338_v50, %s18601_s0  ;;  %v644_v11 = vrot.slane %v18832_v55, 1  ;;  %v17363_v7 = vpack.i.bf16 %v791_v4, %v789_v3  ;;  %v992_v14 = vrot.slane %v18829_v54, 6  ;;  %v17358_v15 = vpack.i.bf16 %v991_v9, %v989_v8  ;;  %v18930_v50 = vld [vmem:[%s18769_s1 + $0x48] sm:$0xff]  ;;  %v17535_v9 = vld [vmem:[%s25706_s22 + $0xb0] ss:$8 sps:$4 sm:$0xff]  }
  0x37   : > { %1366 = vmatpush1.bf16.msra.mxu0 %v17517_v56  ;;  %v916_v16 = vsel %vm905_vm3, %v913_v53, %v915_v5  ;;  %v918_v17 = vsel %vm905_vm3, %v915_v5, %v917_v6  ;;  %v994_v18 = vrot.slane %v18832_v55, 6  ;;  %v643_v19 = vsel %vm632_vm1, %v640_v34, %v642_v10  ;;  %v17526_v34 = vld [vmem:[%s25706_s22] ss:$8 sps:$4 sm:$0xff]   ;;  %v18934_v53 = vld [vmem:[%s18769_s1 + $0x50] sm:$0xff] }
  0x38   : > { %1367 = vmatprep.subr.bf16.mxu0 %v17518_v0  ;;  %v645_v20 = vsel %vm632_vm1, %v642_v10, %v644_v11  ;;  %v717_v22 = vrot.slane %v18829_v54, 2  ;;  %v719_v23 = vrot.slane %v18832_v55, 2  ;;  %v17373_v28 = vpack.i.bf16 %v918_v17, %v916_v16 }
  0x39   : > { %17354 = vrot.lane.b32.xlu1 %v17353_v1, %s18599_s25  ;;  %v993_v29 = vsel %vm982_vm2, %v990_v63, %v992_v14  ;;  %v17368_v30 = vpack.i.bf16 %v645_v20, %v643_v19  ;;  %v995_v31 = vsel %vm982_vm2, %v992_v14, %v994_v18  ;;  %v792_v32 = vrot.slane %v18829_v54, 3  ;;  %v17530_v54 = vld [vmem:[%s25706_s22 + $0xc4] ss:$8 sps:$4 sm:$0xff]   ;;  %v17533_v1 = vld [vmem:[%s25706_s22 + $0xb4] ss:$8 sps:$4 sm:$0xff]  }
  0x3a   : > { %17349 = vrot.lane.b32.xlu0 %v17348_v2, %s18600_s3  ;;  %v794_v33 = vrot.slane %v18832_v55, 3  ;;  %v718_v35 = vsel %vm707_vm0, %v715_v49, %v717_v22  ;;  %v720_v36 = vsel %vm707_vm0, %v717_v22, %v719_v23  ;;  %v646_v37 = vrot.slane %v18883_v24, 1  ;;  %v18980_v19 = vld [vmem:[%s18769_s1 + $0x58] sm:$0xff]  ;;  %v18983_v20 = vld [vmem:[%s18769_s1 + $0x60] sm:$0xff] }
  0x3b   : > { %1368 = vmatpush1.bf16.msra.mxu0 %v17520_v12  ;;  %v648_v38 = vrot.slane %v18889_v26, 1  ;;  %v17383_v40 = vpack.i.bf16 %v995_v31, %v993_v29  ;;  %v919_v41 = vrot.slane %v18883_v24, 5  ;;  %v17378_v42 = vpack.i.bf16 %v720_v36, %v718_v35  ;;  %v17538_v22 = vld [vmem:[%s25706_s22 + $0xa0] ss:$8 sps:$4 sm:$0xff]   ;;  %v17539_v29 = vld [vmem:[%s25706_s22 + $0x94] ss:$8 sps:$4 sm:$0xff]  }
  0x3c   : > { %1369 = vmatprep.subr.bf16.mxu0 %v17521_v13  ;;  %v793_v43 = vsel %vm782_vm4, %v790_v59, %v792_v32  ;;  %v795_v44 = vsel %vm782_vm4, %v792_v32, %v794_v33  ;;  %v921_v45 = vrot.slane %v18889_v26, 5  ;;  %v647_v47 = vsel %vm632_vm1, %v644_v11, %v646_v37  ;;  %v17536_v13 = vld [vmem:[%s25706_s22 + $0xa4] ss:$8 sps:$4 sm:$0xff]   ;;  %v19009_v36 = vld [vmem:[%s18769_s1 + $0x70] sm:$0xff] }
  0x3d   : > { %17364 = vrot.lane.b32.xlu1 %v17363_v7, %s18601_s0  ;;  %v649_v48 = vsel %vm632_vm1, %v646_v37, %v648_v38  ;;  %v721_v49 = vrot.slane %v18883_v24, 2  ;;  %v723_v21 = vrot.slane %v18889_v26, 2  ;;  %v17388_v51 = vpack.i.bf16 %v795_v44, %v793_v43  ;;  %v17541_v37 = vld [vmem:[%s25706_s22 + $0x90] ss:$8 sps:$4 sm:$0xff]  }
  0x3e   : > { %17359 = vrot.lane.b32.xlu0 %v17358_v15, %s18599_s25  ;;  %v920_v52 = vsel %vm905_vm3, %v917_v6, %v919_v41  ;;  %v17393_v56 = vpack.i.bf16 %v649_v48, %v647_v47  ;;  %v922_v57 = vsel %vm905_vm3, %v919_v41, %v921_v45  ;;  %v996_v58 = vrot.slane %v18883_v24, 6 }
  0x3f   : > { %1370 = vmatpush1.bf16.msra.mxu0 %v17523_v25  ;;  %v998_v59 = vrot.slane %v18889_v26, 6  ;;  %v722_v61 = vsel %vm707_vm0, %v719_v23, %v721_v49  ;;  %v724_v62 = vsel %vm707_vm0, %v721_v49, %v723_v21  ;;  %v796_v63 = vrot.slane %v18883_v24, 3 }
  0x40   : > { %1371 = vmatprep.subr.bf16.mxu0 %v17524_v27  ;;  %v798_v0 = vrot.slane %v18889_v26, 3  ;;  %v17398_v2 = vpack.i.bf16 %v922_v57, %v920_v52  ;;  %v650_v3 = vrot.slane %v18930_v50, 1  ;;  %v17403_v4 = vpack.i.bf16 %v724_v62, %v722_v61 }
  0x41   : > { %17374 = vrot.lane.b32.xlu1 %v17373_v28, %s18600_s3  ;;  %v997_v5 = vsel %vm982_vm2, %v994_v18, %v996_v58  ;;  %v999_v6 = vsel %vm982_vm2, %v996_v58, %v998_v59  ;;  %v652_v8 = vrot.slane %v18934_v53, 1  ;;  %v797_v10 = vsel %vm782_vm4, %v794_v33, %v796_v63  ;;  %v18996_v28 = vld [vmem:[%s18769_s1 + $0x78] sm:$0x7] }
  0x42   : > { %17369 = vrot.lane.b32.xlu0 %v17368_v30, %s18600_s3  ;;  %v799_v11 = vsel %vm782_vm4, %v796_v63, %v798_v0  ;;  %v923_v55 = vrot.slane %v18930_v50, 5  ;;  %v925_v12 = vrot.slane %v18934_v53, 5  ;;  %v17408_v7 = vpack.i.bf16 %v999_v6, %v997_v5 }
  0x43   : > { %1372 = vmatpush1.bf16.msra.mxu0 %v17526_v34  ;;  %v651_v14 = vsel %vm632_vm1, %v648_v38, %v650_v3  ;;  %v17413_v15 = vpack.i.bf16 %v799_v11, %v797_v10  ;;  %v653_v16 = vsel %vm632_vm1, %v650_v3, %v652_v8  ;;  %v725_v17 = vrot.slane %v18930_v50, 2 }
  0x44   : > { %1377 = vmatprep.subr.bf16.mxu0 %v17527_v39  ;;  %v727_v18 = vrot.slane %v18934_v53, 2  ;;  %v924_v23 = vsel %vm905_vm3, %v921_v45, %v923_v55  ;;  %v926_v24 = vsel %vm905_vm3, %v923_v55, %v925_v12  ;;  %v1000_v25 = vrot.slane %v18930_v50, 6 }
  0x45   : > { %17384 = vrot.lane.b32.xlu1 %v17383_v40, %s18599_s25  ;;  %v1002_v27 = vrot.slane %v18934_v53, 6  ;;  %v800_v30 = vrot.slane %v18930_v50, 3  ;;  %v802_v31 = vrot.slane %v18934_v53, 3  ;;  %v17418_v32 = vpack.i.bf16 %v653_v16, %v651_v14  ;;  %v17544_v50 = vld [vmem:[%s25706_s22 + $0x80] ss:$8 sps:$4 sm:$0xff]  }
  0x46   : > { %17379 = vrot.lane.b32.xlu0 %v17378_v42, %s18599_s25  ;;  %v17423_v33 = vpack.i.bf16 %v926_v24, %v924_v23  ;;  %v726_v34 = vsel %vm707_vm0, %v723_v21, %v725_v17  ;;  %v728_v35 = vsel %vm707_vm0, %v725_v17, %v727_v18  ;;  %v1001_v38 = vsel %vm982_vm2, %v998_v59, %v1000_v25  ;;  %v17542_v42 = vld [vmem:[%s25706_s22 + $0x84] ss:$8 sps:$4 sm:$0xff]  }
  0x47   : > { %1378 = vmatpush2.bf16.msra.mxu0 %v17529_v46  ;;  %v1003_v39 = vsel %vm982_vm2, %v1000_v25, %v1002_v27  ;;  %v654_v40 = vrot.slane %v18980_v19, 1  ;;  %v656_v26 = vrot.slane %v18983_v20, 1  ;;  %v1012_v41 = vrot.slane %v18996_v28, 6  ;;  %v614_v59 = vld [vmem:[%s18769_s1 + $0x68] sm:$0xff] }
  0x48   : > { %1379 = vmatprep.subr.bf16.mxu0 %v17530_v54  ;;  %v17428_v43 = vpack.i.bf16 %v728_v35, %v726_v34  ;;  %v801_v44 = vsel %vm782_vm4, %v798_v0, %v800_v30  ;;  %v803_v45 = vsel %vm782_vm4, %v800_v30, %v802_v31  ;;  %v1010_v46 = vrot.slane %v19009_v36, 6 }
  0x49   : > { %17394 = vrot.lane.b32.xlu1 %v17393_v56, %s18600_s3  ;;  %v17433_v47 = vpack.i.bf16 %v1003_v39, %v1001_v38  ;;  %v927_v48 = vrot.slane %v18980_v19, 5  ;;  %v929_v49 = vrot.slane %v18983_v20, 5  ;;  %v729_v21 = vrot.slane %v18980_v19, 2 }
  0x4a   : > { %17389 = vrot.lane.b32.xlu0 %v17388_v51, %s18601_s0  ;;  %v655_v51 = vsel %vm632_vm1, %v652_v8, %v654_v40  ;;  %v657_v52 = vsel %vm632_vm1, %v654_v40, %v656_v26  ;;  %v731_v54 = vrot.slane %v18983_v20, 2  ;;  %v19038_v56 = vsel %vm982_vm2, %v1010_v46, %v1012_v41 }
  0x4b   : > { %1380 = vmatpush2.bf16.msra.mxu0 %v17532_v60  ;;  %v17438_v57 = vpack.i.bf16 %v803_v45, %v801_v44  ;;  %v1004_v58 = vrot.slane %v18980_v19, 6  ;;  %v17443_v60 = vpack.i.bf16 %v657_v52, %v655_v51  ;;  %v928_v61 = vsel %vm905_vm3, %v925_v12, %v927_v48  ;;  %v18521_v45 = vld [vmem:[%s18769_s1] sm:$0xff] }
  0x4c   : > { %1381 = vmatprep.subr.bf16.mxu0 %v17533_v1  ;;  %v930_v62 = vsel %vm905_vm3, %v927_v48, %v929_v49  ;;  %v1006_v63 = vrot.slane %v18983_v20, 6  ;;  %v730_v0 = vsel %vm707_vm0, %v727_v18, %v729_v21  ;;  %v732_v1 = vsel %vm707_vm0, %v729_v21, %v731_v54 }
  0x4d   : > { %17404 = vrot.lane.b32.xlu1 %v17403_v4, %s18599_s25  ;;  %v806_v3 = vrot.slane %v18983_v20, 3  ;;  %v17448_v4 = vpack.i.bf16 %v930_v62, %v928_v61  ;;  %v1005_v53 = vsel %vm982_vm2, %v1002_v27, %v1004_v58  ;;  %v17453_v5 = vpack.i.bf16 %v732_v1, %v730_v0 }
  0x4e   : > { %17399 = vrot.lane.b32.xlu0 %v17398_v2, %s18600_s3  ;;  %v804_v2 = vrot.slane %v18980_v19, 3  ;;  %v1007_v6 = vsel %vm982_vm2, %v1004_v58, %v1006_v63  ;;  %v658_v8 = vrot.slane %v614_v59, 1  ;;  %v931_v55 = vrot.slane %v614_v59, 5 }
  0x4f   : > { %1382 = vmatpush2.bf16.msra.mxu0 %v17535_v9  ;;  %v660_v9 = vrot.slane %v19009_v36, 1  ;;  %v933_v12 = vrot.slane %v19009_v36, 5  ;;  %v1008_v19 = vrot.slane %v614_v59, 6  ;;  %v735_v20 = vrot.slane %v19009_v36, 2 }
  0x50   : > { %1383 = vmatprep.subr.bf16.mxu0 %v17536_v13  ;;  %v805_v10 = vsel %vm782_vm4, %v802_v31, %v804_v2  ;;  %v807_v11 = vsel %vm782_vm4, %v804_v2, %v806_v3  ;;  %v17458_v13 = vpack.i.bf16 %v1007_v6, %v1005_v53  ;;  %v659_v14 = vsel %vm632_vm1, %v656_v26, %v658_v8 }
  0x51   : > { %17414 = vrot.lane.b32.xlu1 %v17413_v15, %s18601_s0  ;;  %v733_v15 = vrot.slane %v614_v59, 2  ;;  %v661_v16 = vsel %vm632_vm1, %v658_v8, %v660_v9  ;;  %v932_v17 = vsel %vm905_vm3, %v929_v49, %v931_v55  ;;  %v934_v18 = vsel %vm905_vm3, %v931_v55, %v933_v12  ;;  %v18523_v49 = vld [vmem:[%s18769_s1 + $0x10] sm:$0xff] }
  0x52   : > { %17409 = vrot.lane.b32.xlu0 %v17408_v7, %s18599_s25  ;;  %v17463_v7 = vpack.i.bf16 %v807_v11, %v805_v10  ;;  %v17473_v23 = vpack.i.bf16 %v934_v18, %v932_v17  ;;  %v886_v24 = vrot.slane %v19009_v36, 4  ;;  %v888_v25 = vrot.slane %v18996_v28, 4 }
  0x53   : > { %1384 = vmatpush2.bf16.msra.mxu0 %v17538_v22  ;;  %v17468_v22 = vpack.i.bf16 %v661_v16, %v659_v14  ;;  %v734_v27 = vsel %vm707_vm0, %v731_v54, %v733_v15  ;;  %v1011_v30 = vsel %vm982_vm2, %v1008_v19, %v1010_v46  ;;  %v935_v31 = vrot.slane %v18996_v28, 5  ;;  %v18524_v14 = vld [vmem:[%s18769_s1 + $0x18] sm:$0xff]  ;;  %v19111_v16 = vld [vmem:[%s18769_s1 + $0x20] sm:$0xff] }
  0x54   : > { %1385 = vmatprep.subr.bf16.mxu0 %v17539_v29  ;;  %v1009_v29 = vsel %vm982_vm2, %v1006_v63, %v1008_v19  ;;  %v810_v34 = vrot.slane %v19009_v36, 3  ;;  %v19081_v35 = vsel %vm858_vm5, %v886_v24, %v888_v25  ;;  %v859_v46 = vrot.slane %v18521_v45, 4 }
  0x55   : > { %17424 = vrot.lane.b32.xlu1 %v17423_v33, %s18600_s3  ;;  %v808_v33 = vrot.slane %v614_v59, 3  ;;  %v936_v39 = vsel %vm905_vm3, %v933_v12, %v935_v31  ;;  %v862_v21 = vrot.slane %v18523_v49, 4  ;;  %v866_v17 = vrot.slane %v19111_v16, 4 }
  0x56   : > { %17419 = vrot.lane.b32.xlu0 %v17418_v32, %s18600_s3  ;;  %v736_v32 = vsel %vm707_vm0, %v733_v15, %v735_v20  ;;  %v17493_v26 = vpack.i.bf16 %v936_v39, %v660_v9  ;;  %v864_v15 = vrot.slane %v18524_v14, 4 }
  0x57   : > { %1386 = vmatpush2.bf16.msra.mxu0 %v17541_v37  ;;  %v17483_v37 = vpack.i.bf16 %v1011_v30, %v1009_v29  ;;  %v17478_v38 = vpack.i.bf16 %v736_v32, %v734_v27  ;;  %v809_v28 = vsel %vm782_vm4, %v806_v3, %v808_v33  ;;  %v811_v40 = vsel %vm782_vm4, %v808_v33, %v810_v34 }
  0x58   : > { %1387 = vmatprep.subr.bf16.mxu0 %v17542_v42  ;;  %v17488_v41 = vpack.i.bf16 %v811_v40, %v809_v28  ;;  %v17498_v42 = vpack.i.bf16 %v19038_v56, %v735_v20  ;;  %v865_v32 = vsel %vm858_vm5, %v862_v21, %v864_v15  ;;  %v867_v33 = vsel %vm858_vm5, %v864_v15, %v866_v17 }
  0x59   : > { %17434 = vrot.lane.b32.xlu1 %v17433_v47, %s18599_s25  ;;  %v18522_v47 = vld [vmem:[%s18769_s1 + $0x8] sm:$0xff] }
  0x5a   : > { %17429 = vrot.lane.b32.xlu0 %v17428_v43, %s18599_s25  ;;  %v860_v48 = vrot.slane %v18522_v47, 4 }
  0x5b   : > { %1388 = vmatpush2.bf16.msra.mxu0 %v17544_v50 }
  0x5c   : > { %v861_v56 = vsel %vm858_vm5, %v859_v46, %v860_v48  ;;  %v863_v59 = vsel %vm858_vm5, %v860_v48, %v862_v21 }
  0x5d   : > { %17444 = vrot.lane.b32.xlu1 %v17443_v60, %s18600_s3 }
  0x5e   : > { %17439 = vrot.lane.b32.xlu0 %v17438_v57, %s18601_s0 }
  0x61   : > { %17454 = vrot.lane.b32.xlu1 %v17453_v5, %s18599_s25 }
  0x62   : > { %17449 = vrot.lane.b32.xlu0 %v17448_v4, %s18600_s3 }
  0x65   : > { %17464 = vrot.lane.b32.xlu1 %v17463_v7, %s18601_s0 }
  0x66   : > { %17459 = vrot.lane.b32.xlu0 %v17458_v13, %s18599_s25 }
  0x69   : > { %17474 = vrot.lane.b32.xlu1 %v17473_v23, %s18600_s3 }
  0x6a   : > { %17469 = vrot.lane.b32.xlu0 %v17468_v22, %s18600_s3 }
  0x6d   : > { %17484 = vrot.lane.b32.xlu1 %v17483_v37, %s18599_s25  ;;  %v18526_v37 = vld [vmem:[%s18769_s1 + $0x28] sm:$0xff] }
  0x6e   : > { %17479 = vrot.lane.b32.xlu0 %v17478_v38, %s18599_s25  ;;  %v868_v38 = vrot.slane %v18526_v37, 4 }
  0x71   : > { %17494 = vrot.lane.b32.xlu1 %v17493_v26, %s18600_s3  ;;  %v18527_v26 = vld [vmem:[%s18769_s1 + $0x30] sm:$0xff] }
  0x72   : > { %17489 = vrot.lane.b32.xlu0 %v17488_v41, %s18601_s0  ;;  %v870_v41 = vrot.slane %v18527_v26, 4 }
  0x75   : > { %840 = vrot.lane.b32.xlu1 %v810_v34, %s18601_s0  ;;  %s25708_s0 = sld [smem:[#allocation80_spill]] }
  0x76   : > { %17499 = vrot.lane.b32.xlu0 %v17498_v42, %s18599_s25 }
  0x7b   : > { %s25709_s29 = smov %s25708_s0 }
  0x9f   : > { %v17330_v43 = vpop.permute.xlu1 %17329 }
  0xa0   : > { %v17320_v44 = vpop.permute.xlu0 %17319  ;;  %v17332_v62 = vunpack.i.h.bf16 %v17330_v43  ;;  %v17331_v63 = vunpack.i.l.bf16 %v17330_v43 }
  0xa1   : > { %v17322_v50 = vunpack.i.h.bf16 %v17320_v44  ;;  %v17321_v51 = vunpack.i.l.bf16 %v17320_v44 }
  0xa3   : > { %v17335_v52 = vpop.permute.xlu1 %17334  ;;  %v1061_v0 = vsel %vm1059_vm6, %v18522_v47, %v17322_v50  ;;  %v1060_v1 = vsel %vm1059_vm6, %v18521_v45, %v17321_v51  ;;  %v869_v51 = vsel %vm858_vm5, %v866_v17, %v868_v38 }
  0xa4   : > { %v17337_v54 = vunpack.i.h.bf16 %v17335_v52  ;;  %v17336_v57 = vunpack.i.l.bf16 %v17335_v52  ;;  %v17325_v58 = vpop.permute.xlu0 %17324  ;;  %v1076_v12 = vsel %vm1075_vm7, %v1060_v1, %v17331_v63  ;;  %v1077_v13 = vsel %vm1075_vm7, %v1061_v0, %v17332_v62 }
  0xa5   : > { %v17327_v60 = vunpack.i.h.bf16 %v17325_v58  ;;  %v17326_v61 = vunpack.i.l.bf16 %v17325_v58  ;;  %v871_v58 = vsel %vm858_vm5, %v868_v38, %v870_v41 }
  0xa7   : > { %v17345_v2 = vpop.permute.xlu1 %17344  ;;  %v1107_v3 = vsel %vm1059_vm6, %v861_v56, %v17326_v61  ;;  %v1108_v4 = vsel %vm1059_vm6, %v863_v59, %v17327_v60 }
  0xa8   : > { %v17340_v53 = vpop.permute.xlu0 %17339  ;;  %v1122_v5 = vsel %vm1075_vm7, %v1107_v3, %v17336_v57  ;;  %v1123_v6 = vsel %vm1075_vm7, %v1108_v4, %v17337_v54  ;;  %v17347_v11 = vunpack.i.h.bf16 %v17345_v2  ;;  %v17346_v55 = vunpack.i.l.bf16 %v17345_v2 }
  0xa9   : > { %v17342_v8 = vunpack.i.h.bf16 %v17340_v53  ;;  %v17341_v9 = vunpack.i.l.bf16 %v17340_v53  ;;  %v1138_v10 = vpack.c.bf16 %v1123_v6, %v1122_v5 }
  0xaa   : > { %v1063_v27 = vsel %vm1059_vm6, %v18524_v14, %v17347_v11  ;;  %v1062_v29 = vsel %vm1059_vm6, %v18523_v49, %v17346_v55  ;;  %v18529_v14 = vld [vmem:[%s18769_s1 + $0x40] sm:$0xff] }
  0xab   : > { %15850 = vmatprep.mubr.msk.bf16.mxu0 %vm1091_vm8, %v1138_v10  ;;  %v17355_v7 = vpop.permute.xlu1 %17354  ;;  %v1092_v18 = vsel %vm1091_vm8, %v1076_v12, %v17341_v9  ;;  %v1093_v19 = vsel %vm1091_vm8, %v1077_v13, %v17342_v8  ;;  %v18528_v13 = vld [vmem:[%s18769_s1 + $0x38] sm:$0xff]  ;;  %v874_v15 = vrot.slane %v18529_v14, 4 }
  0xac   : > { %v17350_v20 = vpop.permute.xlu0 %17349  ;;  %v1137_v22 = vpack.c.bf16 %v1093_v19, %v1092_v18  ;;  %v17357_v23 = vunpack.i.h.bf16 %v17355_v7  ;;  %v17356_v25 = vunpack.i.l.bf16 %v17355_v7  ;;  %v872_v7 = vrot.slane %v18528_v13, 4 }
  0xad   : > { %v17352_v30 = vunpack.i.h.bf16 %v17350_v20  ;;  %v17351_v31 = vunpack.i.l.bf16 %v17350_v20 }
  0xae   : > { %1390 = vmatmul.mubr.bf16.vlgmr.msra.gmra.mxu0 %v1137_v22  ;;  %v1078_v42 = vsel %vm1075_vm7, %v1062_v29, %v17356_v25  ;;  %v1079_v43 = vsel %vm1075_vm7, %v1063_v27, %v17357_v23  ;;  %v875_v38 = vsel %vm858_vm5, %v872_v7, %v874_v15 }
  0xaf   : > { %v17365_v34 = vpop.permute.xlu1 %17364  ;;  %v1110_v46 = vsel %vm1059_vm6, %v867_v33, %v17352_v30  ;;  %v1109_v47 = vsel %vm1059_vm6, %v865_v32, %v17351_v31 }
  0xb0   : > { %v17367_v39 = vunpack.i.h.bf16 %v17365_v34  ;;  %v17366_v28 = vunpack.i.l.bf16 %v17365_v34  ;;  %v17360_v40 = vpop.permute.xlu0 %17359 }
  0xb1   : > { %v17362_v44 = vunpack.i.h.bf16 %v17360_v40  ;;  %v17361_v45 = vunpack.i.l.bf16 %v17360_v40 }
  0xb2   : > { %v1094_v48 = vsel %vm1091_vm8, %v1078_v42, %v17366_v28  ;;  %v1095_v49 = vsel %vm1091_vm8, %v1079_v43, %v17367_v39 }
  0xb3   : > { %v1124_v21 = vsel %vm1075_vm7, %v1109_v47, %v17361_v45  ;;  %v1125_v50 = vsel %vm1075_vm7, %v1110_v46, %v17362_v44  ;;  %v17375_v52 = vpop.permute.xlu1 %17374  ;;  %v1139_v54 = vpack.c.bf16 %v1095_v49, %v1094_v48  ;;  %v18530_v44 = vld [vmem:[%s18769_s1 + $0x48] sm:$0xff]  ;;  %v18531_v46 = vld [vmem:[%s18769_s1 + $0x50] sm:$0xff] }
  0xb4   : > { %v1140_v57 = vpack.c.bf16 %v1125_v50, %v1124_v21  ;;  %v17377_v56 = vunpack.i.h.bf16 %v17375_v52  ;;  %v17376_v59 = vunpack.i.l.bf16 %v17375_v52  ;;  %v17370_v60 = vpop.permute.xlu0 %17369  ;;  %v876_v45 = vrot.slane %v18530_v44, 4 }
  0xb5   : > { %v17372_v3 = vunpack.i.h.bf16 %v17370_v60  ;;  %v17371_v4 = vunpack.i.l.bf16 %v17370_v60 }
  0xb6   : > { %15851 = vmatprep.mubr.msk.bf16.mxu0 %vm1091_vm8, %v1140_v57  ;;  %v1112_v61 = vsel %vm1059_vm6, %v871_v58, %v17377_v56  ;;  %v1111_v62 = vsel %vm1059_vm6, %v869_v51, %v17376_v59  ;;  %v877_v56 = vsel %vm858_vm5, %v874_v15, %v876_v45 }
  0xb7   : > { %1400 = vmatmul.mubr.bf16.gmra.mxu0 %v1139_v54  ;;  %v17385_v63 = vpop.permute.xlu1 %17384  ;;  %v1065_v17 = vsel %vm1059_vm6, %v18526_v37, %v17372_v3  ;;  %v1064_v18 = vsel %vm1059_vm6, %v19111_v16, %v17371_v4  ;;  %v873_v37 = vsel %vm858_vm5, %v870_v41, %v872_v7 }
  0xb8   : > { %v17387_v0 = vunpack.i.h.bf16 %v17385_v63  ;;  %v17386_v1 = vunpack.i.l.bf16 %v17385_v63  ;;  %v17380_v2 = vpop.permute.xlu0 %17379 }
  0xb9   : > { %v17382_v6 = vunpack.i.h.bf16 %v17380_v2  ;;  %v17381_v8 = vunpack.i.l.bf16 %v17380_v2 }
  0xba   : > { %v1126_v53 = vsel %vm1075_vm7, %v1111_v62, %v17386_v1  ;;  %v1127_v5 = vsel %vm1075_vm7, %v1112_v61, %v17387_v0 }
  0xbb   : > { %v1142_v9 = vpack.c.bf16 %v1127_v5, %v1126_v53  ;;  %v17395_v10 = vpop.permute.xlu1 %17394  ;;  %v1080_v22 = vsel %vm1075_vm7, %v1064_v18, %v17381_v8  ;;  %v1081_v23 = vsel %vm1075_vm7, %v1065_v17, %v17382_v6 }
  0xbc   : > { %v17390_v11 = vpop.permute.xlu0 %17389  ;;  %v17397_v55 = vunpack.i.h.bf16 %v17395_v10  ;;  %v17396_v12 = vunpack.i.l.bf16 %v17395_v10 }
  0xbd   : > { %v17392_v19 = vunpack.i.h.bf16 %v17390_v11  ;;  %v17391_v20 = vunpack.i.l.bf16 %v17390_v11  ;;  %15852 = vmatprep.mubr.msk.bf16.mxu0 %vm1091_vm8, %v1142_v9 }
  0xbe   : > { %v1067_v25 = vsel %vm1059_vm6, %v18528_v13, %v17397_v55  ;;  %v1066_v31 = vsel %vm1059_vm6, %v18527_v26, %v17396_v12  ;;  %v878_v26 = vrot.slane %v18531_v46, 4 }
  0xbf   : > { %v17405_v27 = vpop.permute.xlu1 %17404  ;;  %v1096_v29 = vsel %vm1091_vm8, %v1080_v22, %v17391_v20  ;;  %v1097_v30 = vsel %vm1091_vm8, %v1081_v23, %v17392_v19 }
  0xc0   : > { %v17400_v16 = vpop.permute.xlu0 %17399  ;;  %v17407_v32 = vunpack.i.h.bf16 %v17405_v27  ;;  %v17406_v33 = vunpack.i.l.bf16 %v17405_v27  ;;  %v1141_v34 = vpack.c.bf16 %v1097_v30, %v1096_v29  ;;  %v879_v63 = vsel %vm858_vm5, %v876_v45, %v878_v26  ;;  %v18532_v29 = vld [vmem:[%s18769_s1 + $0x58] sm:$0xff]  ;;  %v18533_v30 = vld [vmem:[%s18769_s1 + $0x60] sm:$0xff] }
  0xc1   : > { %v17402_v39 = vunpack.i.h.bf16 %v17400_v16  ;;  %v17401_v28 = vunpack.i.l.bf16 %v17400_v16 }
  0xc2   : > { %1410 = vmatmul.mubr.bf16.gmra.mxu0 %v1141_v34  ;;  %v1082_v40 = vsel %vm1075_vm7, %v1066_v31, %v17406_v33  ;;  %v1083_v42 = vsel %vm1075_vm7, %v1067_v25, %v17407_v32  ;;  %v882_v31 = vrot.slane %v18533_v30, 4 }
  0xc3   : > { %v17415_v43 = vpop.permute.xlu1 %17414  ;;  %v1114_v47 = vsel %vm1059_vm6, %v875_v38, %v17402_v39  ;;  %v1113_v48 = vsel %vm1059_vm6, %v873_v37, %v17401_v28 }
  0xc4   : > { %v17410_v49 = vpop.permute.xlu0 %17409  ;;  %v17417_v41 = vunpack.i.h.bf16 %v17415_v43  ;;  %v17416_v21 = vunpack.i.l.bf16 %v17415_v43 }
  0xc5   : > { %v17412_v50 = vunpack.i.h.bf16 %v17410_v49  ;;  %v17411_v51 = vunpack.i.l.bf16 %v17410_v49 }
  0xc6   : > { %v1098_v52 = vsel %vm1091_vm8, %v1082_v40, %v17416_v21  ;;  %v1099_v54 = vsel %vm1091_vm8, %v1083_v42, %v17417_v41  ;;  %v18534_v41 = vld [vmem:[%s18769_s1 + $0x68] sm:$0xff] }
  0xc7   : > { %v1128_v57 = vsel %vm1075_vm7, %v1113_v48, %v17411_v51  ;;  %v1129_v58 = vsel %vm1075_vm7, %v1114_v47, %v17412_v50  ;;  %v17425_v59 = vpop.permute.xlu1 %17424  ;;  %v1143_v60 = vpack.c.bf16 %v1099_v54, %v1098_v52  ;;  %v884_v21 = vrot.slane %v18534_v41, 4 }
  0xc8   : > { %v1144_v61 = vpack.c.bf16 %v1129_v58, %v1128_v57  ;;  %v17420_v62 = vpop.permute.xlu0 %17419  ;;  %v17427_v0 = vunpack.i.h.bf16 %v17425_v59  ;;  %v17426_v1 = vunpack.i.l.bf16 %v17425_v59 }
  0xc9   : > { %v17422_v2 = vunpack.i.h.bf16 %v17420_v62  ;;  %v17421_v3 = vunpack.i.l.bf16 %v17420_v62 }
  0xca   : > { %15853 = vmatprep.mubr.msk.bf16.mxu0 %vm1091_vm8, %v1144_v61  ;;  %v1116_v4 = vsel %vm1059_vm6, %v879_v63, %v17427_v0  ;;  %v1115_v53 = vsel %vm1059_vm6, %v877_v56, %v17426_v1  ;;  %v885_v61 = vsel %vm858_vm5, %v882_v31, %v884_v21 }
  0xcb   : > { %1420 = vmatmul.mubr.bf16.gmra.mxu0 %v1143_v60  ;;  %v17435_v5 = vpop.permute.xlu1 %17434  ;;  %v1069_v10 = vsel %vm1059_vm6, %v18530_v44, %v17422_v2  ;;  %v1068_v11 = vsel %vm1059_vm6, %v18529_v14, %v17421_v3  ;;  %v880_v14 = vrot.slane %v18532_v29, 4  ;;  %v887_v2 = vsel %vm858_vm5, %v884_v21, %v886_v24  ;;  %v17554_v21 = vld [vmem:[%s25709_s29 + $0x54] ss:$8 sps:$4 sm:$0xff]  }
  0xcc   : > { %v17430_v6 = vpop.permute.xlu0 %17429  ;;  %v17437_v8 = vunpack.i.h.bf16 %v17435_v5  ;;  %v17436_v9 = vunpack.i.l.bf16 %v17435_v5 }
  0xcd   : > { %v17432_v55 = vunpack.i.h.bf16 %v17430_v6  ;;  %v17431_v12 = vunpack.i.l.bf16 %v17430_v6  ;;  %v881_v42 = vsel %vm858_vm5, %v878_v26, %v880_v14  ;;  %v883_v43 = vsel %vm858_vm5, %v880_v14, %v882_v31 }
  0xce   : > { %v1130_v13 = vsel %vm1075_vm7, %v1115_v53, %v17436_v9  ;;  %v1131_v7 = vsel %vm1075_vm7, %v1116_v4, %v17437_v8 }
  0xcf   : > { %v1146_v15 = vpack.c.bf16 %v1131_v7, %v1130_v13  ;;  %v17445_v17 = vpop.permute.xlu1 %17444  ;;  %v1084_v18 = vsel %vm1075_vm7, %v1068_v11, %v17431_v12  ;;  %v1085_v19 = vsel %vm1075_vm7, %v1069_v10, %v17432_v55 }
  0xd0   : > { %v17440_v20 = vpop.permute.xlu0 %17439  ;;  %v17447_v22 = vunpack.i.h.bf16 %v17445_v17  ;;  %v17446_v23 = vunpack.i.l.bf16 %v17445_v17 }
  0xd1   : > { %v17442_v25 = vunpack.i.h.bf16 %v17440_v20  ;;  %v17441_v27 = vunpack.i.l.bf16 %v17440_v20  ;;  %15854 = vmatprep.mubr.msk.bf16.mxu0 %vm1091_vm8, %v1146_v15 }
  0xd2   : > { %v1071_v16 = vsel %vm1059_vm6, %v18532_v29, %v17447_v22  ;;  %v1070_v37 = vsel %vm1059_vm6, %v18531_v46, %v17446_v23 }
  0xd3   : > { %v17455_v32 = vpop.permute.xlu1 %17454  ;;  %v1100_v33 = vsel %vm1091_vm8, %v1084_v18, %v17441_v27  ;;  %v1101_v34 = vsel %vm1091_vm8, %v1085_v19, %v17442_v25 }
  0xd4   : > { %v17450_v38 = vpop.permute.xlu0 %17449  ;;  %v17457_v39 = vunpack.i.h.bf16 %v17455_v32  ;;  %v17456_v28 = vunpack.i.l.bf16 %v17455_v32  ;;  %v1145_v40 = vpack.c.bf16 %v1101_v34, %v1100_v33  ;;  %v18535_v33 = vld [vmem:[%s18769_s1 + $0x70] sm:$0xff]  ;;  %s15749_s1 = scalar_lea.sflag [#allocation3], %s593_s19 }
  0xd5   : > { %v17452_v44 = vunpack.i.h.bf16 %v17450_v38  ;;  %v17451_v45 = vunpack.i.l.bf16 %v17450_v38 }
  0xd6   : > { %1430 = vmatmul.mubr.bf16.gmra.mxu0 %v1145_v40  ;;  %v1086_v47 = vsel %vm1075_vm7, %v1070_v37, %v17456_v28  ;;  %v1087_v48 = vsel %vm1075_vm7, %v1071_v16, %v17457_v39 }
  0xd7   : > { %v17465_v49 = vpop.permute.xlu1 %17464  ;;  %v1118_v46 = vsel %vm1059_vm6, %v883_v43, %v17452_v44  ;;  %v1117_v50 = vsel %vm1059_vm6, %v881_v42, %v17451_v45  ;;  %v17547_v44 = vld [vmem:[%s25709_s29 + $0x70] ss:$8 sps:$4 sm:$0xff]  }
  0xd8   : > { %v17460_v51 = vpop.permute.xlu0 %17459  ;;  %v17467_v52 = vunpack.i.h.bf16 %v17465_v49  ;;  %v17466_v54 = vunpack.i.l.bf16 %v17465_v49  ;;  %v17550_v49 = vld [vmem:[%s25709_s29 + $0x170] ss:$8 sps:$4 sm:$0xff]  }
  0xd9   : > { %v17462_v26 = vunpack.i.h.bf16 %v17460_v51  ;;  %v17461_v57 = vunpack.i.l.bf16 %v17460_v51  ;;  %v17559_v51 = vld [vmem:[%s25709_s29 + $0x50] ss:$8 sps:$4 sm:$0xff]  }
  0xda   : > { %v1102_v58 = vsel %vm1091_vm8, %v1086_v47, %v17466_v54  ;;  %v1103_v56 = vsel %vm1091_vm8, %v1087_v48, %v17467_v52  ;;  %v17548_v47 = vld [vmem:[%s25709_s29 + $0x64] ss:$8 sps:$4 sm:$0xff]   ;;  %v17552_v48 = vld [vmem:[%s25709_s29 + $0x174] ss:$8 sps:$4 sm:$0xff]  }
  0xdb   : > { %v1132_v59 = vsel %vm1075_vm7, %v1117_v50, %v17461_v57  ;;  %v1133_v60 = vsel %vm1075_vm7, %v1118_v46, %v17462_v26  ;;  %v17475_v62 = vpop.permute.xlu1 %17474  ;;  %v1147_v63 = vpack.c.bf16 %v1103_v56, %v1102_v58  ;;  %6155 = vmatprep.subr.bf16.mxu0 %v17552_v48  ;;  %v17558_v46 = vld [vmem:[%s25709_s29 + $0x164] ss:$8 sps:$4 sm:$0xff]   ;;  %v17556_v50 = vld [vmem:[%s25709_s29 + $0x160] ss:$8 sps:$4 sm:$0xff]   ;;  %v17564_v54 = vld [vmem:[%s25709_s29 + $0x154] ss:$8 sps:$4 sm:$0xff]  }
  0xdc   : > { %v1148_v0 = vpack.c.bf16 %v1133_v60, %v1132_v59  ;;  %v17470_v1 = vpop.permute.xlu0 %17469  ;;  %v17477_v3 = vunpack.i.h.bf16 %v17475_v62  ;;  %v17476_v4 = vunpack.i.l.bf16 %v17475_v62  ;;  %6156 = vmatpush1.bf16.msra.mxu0 %v17550_v49  ;;  %v17560_v52 = vld [vmem:[%s25709_s29 + $0x44] ss:$8 sps:$4 sm:$0xff]   ;;  %v17562_v26 = vld [vmem:[%s25709_s29 + $0x150] ss:$8 sps:$4 sm:$0xff]   ;;  %v17565_v57 = vld [vmem:[%s25709_s29 + $0x40] ss:$8 sps:$4 sm:$0xff]  }
  0xdd   : > { %v17472_v53 = vunpack.i.h.bf16 %v17470_v1  ;;  %v17471_v5 = vunpack.i.l.bf16 %v17470_v1  ;;  %6157 = vmatprep.subr.bf16.mxu0 %v17558_v46  ;;  %v17566_v58 = vld [vmem:[%s25709_s29 + $0x34] ss:$8 sps:$4 sm:$0xff]   ;;  %v17570_v56 = vld [vmem:[%s25709_s29 + $0x144] ss:$8 sps:$4 sm:$0xff]   ;;  %v17568_v59 = vld [vmem:[%s25709_s29 + $0x140] ss:$8 sps:$4 sm:$0xff]  }
  0xde   : > { %15855 = vmatprep.mubr.msk.bf16.mxu0 %vm1091_vm8, %v1148_v0  ;;  %v1120_v6 = vsel %vm1059_vm6, %v887_v2, %v17477_v3  ;;  %v1119_v8 = vsel %vm1059_vm6, %v885_v61, %v17476_v4  ;;  %v17571_v60 = vld [vmem:[%s25709_s29 + $0x30] ss:$8 sps:$4 sm:$0xff]   ;;  %v17572_v61 = vld [vmem:[%s25709_s29 + $0x24] ss:$8 sps:$4 sm:$0xff]   ;;  %v17576_v62 = vld [vmem:[%s25709_s29 + $0x134] ss:$8 sps:$4 sm:$0xff]  }
  0xdf   : > { %1440 = vmatmul.mubr.bf16.gmra.mxu0 %v1147_v63  ;;  %v17485_v9 = vpop.permute.xlu1 %17484  ;;  %v1073_v12 = vsel %vm1059_vm6, %v18534_v41, %v17472_v53  ;;  %v1072_v36 = vsel %vm1059_vm6, %v18533_v30, %v17471_v5  ;;  %v17553_v41 = vld [vmem:[%s25709_s29 + $0x60] ss:$8 sps:$4 sm:$0xff]   ;;  %v17574_v63 = vld [vmem:[%s25709_s29 + $0x130] ss:$8 sps:$4 sm:$0xff]   ;;  %v17578_v1 = vld [vmem:[%s25709_s29 + $0x14] ss:$8 sps:$4 sm:$0xff]  }
  0xe0   : > { %v17480_v10 = vpop.permute.xlu0 %17479  ;;  %v17487_v11 = vunpack.i.h.bf16 %v17485_v9  ;;  %v17486_v55 = vunpack.i.l.bf16 %v17485_v9  ;;  %6158 = vmatpush1.bf16.msra.mxu0 %v17556_v50  ;;  %v17577_v0 = vld [vmem:[%s25709_s29 + $0x20] ss:$8 sps:$4 sm:$0xff]   ;;  %v17582_v2 = vld [vmem:[%s25709_s29 + $0x124] ss:$8 sps:$4 sm:$0xff]   ;;  %v17583_v4 = vld [vmem:[%s25709_s29 + $0x10] ss:$8 sps:$4 sm:$0xff]  }
  0xe1   : > { %v17482_v24 = vunpack.i.h.bf16 %v17480_v10  ;;  %v17481_v13 = vunpack.i.l.bf16 %v17480_v10  ;;  %6159 = vmatprep.subr.bf16.mxu0 %v17564_v54  ;;  %v17580_v3 = vld [vmem:[%s25709_s29 + $0x120] ss:$8 sps:$4 sm:$0xff]   ;;  %v17584_v53 = vld [vmem:[%s25709_s29 + $0x4] ss:$8 sps:$4 sm:$0xff]   ;;  %v17588_v5 = vld [vmem:[%s25709_s29 + $0x114] ss:$8 sps:$4 sm:$0xff]  }
  0xe2   : > { %v1134_v7 = vsel %vm1075_vm7, %v1119_v8, %v17486_v55  ;;  %v1135_v15 = vsel %vm1075_vm7, %v1120_v6, %v17487_v11  ;;  %v17586_v6 = vld [vmem:[%s25709_s29 + $0x110] ss:$8 sps:$4 sm:$0xff]   ;;  %v17589_v8 = vld [vmem:[%s25709_s29] ss:$8 sps:$4 sm:$0xff]   ;;  %v17590_v9 = vld [vmem:[%s25709_s29 + $0xf4] ss:$8 sps:$4 sm:$0xff]  }
  0xe3   : > { %v1150_v17 = vpack.c.bf16 %v1135_v15, %v1134_v7  ;;  %v17495_v18 = vpop.permute.xlu1 %17494  ;;  %v1088_v19 = vsel %vm1075_vm7, %v1072_v36, %v17481_v13  ;;  %v1089_v20 = vsel %vm1075_vm7, %v1073_v12, %v17482_v24  ;;  %v17594_v10 = vld [vmem:[%s25709_s29 + $0x104] ss:$8 sps:$4 sm:$0xff]   ;;  %v17592_v11 = vld [vmem:[%s25709_s29 + $0x100] ss:$8 sps:$4 sm:$0xff]   ;;  %v17595_v55 = vld [vmem:[%s25709_s29 + $0xf0] ss:$8 sps:$4 sm:$0xff]   ;;  %v1183_v12 = vlaneseq }
  0xe4   : > { %v17490_v22 = vpop.permute.xlu0 %17489  ;;  %v17497_v23 = vunpack.i.h.bf16 %v17495_v18  ;;  %v17496_v25 = vunpack.i.l.bf16 %v17495_v18  ;;  %6160 = vmatpush1.bf16.msra.mxu0 %v17562_v26  ;;  %v18602_v7 = vmov 1966171168   ;;  %v17596_v18 = vld [vmem:[%s25709_s29 + $0xe4] ss:$8 sps:$4 sm:$0xff]  }
  0xe5   : > { %v17492_v27 = vunpack.i.h.bf16 %v17490_v22  ;;  %v17491_v29 = vunpack.i.l.bf16 %v17490_v22  ;;  %15856 = vmatprep.mubr.msk.bf16.mxu0 %vm1091_vm8, %v1150_v17  ;;  %6161 = vmatprep.subr.bf16.mxu0 %v17570_v56  ;;  %v19316_v36 = vshrl.u32 %v1183_v12, 7  ;;  %v1501_v15 = vunpack.c.l.s4 %v18602_v7  ;;  %v1181_v17 = vld [vmem:[%s25713_s28] sm:$0x3]  ;;  %v17610_v7 = vld [vmem:[%s25709_s29 + $0x1d0] ss:$8 sps:$4 sm:$0xff]   ;;  %s18537_s28 = scalar_lea.vmem %s15762_s27, 16 }
  0xe6   : > { %v1121_v31 = vsel %vm1059_vm6, %v19081_v35, %v17497_v23  ;;  %v1074_v34 = vsel %vm1059_vm6, %v18535_v33, %v17496_v25  ;;  %v17545_v35 = vld [vmem:[%s25708_s0 + $0x74] ss:$8 sps:$4 sm:$0xff]   ;;  %v17601_v22 = vld [vmem:[%s25709_s29 + $0xe0] ss:$8 sps:$4 sm:$0xff]   ;;  %s25940_s0 = sld [smem:[#allocation83_spill]]  ;;  %p18538_p11 = scmp.ne.s32.totalorder %s15762_s27, %s18537_s28 }
  0xe7   : > { %v1104_v14 = vsel %vm1091_vm8, %v1088_v19, %v17491_v29  ;;  %v1105_v30 = vsel %vm1091_vm8, %v1089_v20, %v17492_v27  ;;  %v841_v39 = vpop.permute.xlu1 %840  ;;  %6094 = vmatprep.subr.bf16.mxu1 %v17545_v35  ;;  %25710 = vst [vmem:[#allocation13_spill] sm:$0xff] %v19316_v36  ;;  %v19319_v24 = vsub.s32 0, %v19316_v36  ;;  %v19322_v13 = vsub.s32 1, %v19316_v36  ;;  %v17600_v19 = vld [vmem:[%s25709_s29 + $0x1f4] ss:$8 sps:$4 sm:$0xff]  }
  0xe8   : > { %v1149_v16 = vpack.c.bf16 %v1105_v30, %v1104_v14  ;;  %v17500_v32 = vpop.permute.xlu0 %17499  ;;  %6095 = vmatpush1.bf16.msra.mxu1 %v17547_v44  ;;  %6162 = vmatpush1.bf16.msra.mxu0 %v17568_v59  ;;  %v17598_v20 = vld [vmem:[%s25709_s29 + $0x1f0] ss:$8 sps:$4 sm:$0xff]   ;;  %v1502_v27 = vunpack.c.0.s8 %v1501_v15  ;;  %v17602_v14 = vld [vmem:[%s25709_s29 + $0xd4] ss:$8 sps:$4 sm:$0xff]   ;;  %v17606_v30 = vld [vmem:[%s25709_s29 + $0x1e4] ss:$8 sps:$4 sm:$0xff]   ;;  %p18539_p12 = pnand %p18538_p11, %p18742_p5 }
  0xe9   : > { %v17502_v37 = vunpack.i.h.bf16 %v17500_v32  ;;  %v17501_v38 = vunpack.i.l.bf16 %v17500_v32  ;;  %6096 = vmatprep.subr.bf16.mxu1 %v17548_v47  ;;  %6163 = vmatprep.subr.bf16.mxu0 %v17576_v62  ;;  %25711 = vst [vmem:[#allocation14_spill] sm:$0xff] %v19319_v24  ;;  %25712 = vst [vmem:[#allocation15_spill] sm:$0xff] %v19322_v13  ;;  %v19340_v23 = vrot.slane %v1181_v17, %v19319_v24  ;;  %v17613_v15 = vld [vmem:[%s25709_s29 + $0xc0] ss:$8 sps:$4 sm:$0xff]  }
  0xea   : > { %1450 = vmatmul.mubr.bf16.gmra.mxu0 %v1149_v16  ;;  %v19343_v25 = vrot.slane %v1181_v17, %v19322_v13  ;;  %v17607_v16 = vld [vmem:[%s25709_s29 + $0xd0] ss:$8 sps:$4 sm:$0xff]   ;;  %p18540_p13 = pneg %p18539_p12 }
  0xeb   : > { %v1136_v28 = vsel %vm1075_vm7, %v1121_v31, %v17502_v37  ;;  %v1090_v40 = vsel %vm1075_vm7, %v1074_v34, %v17501_v38  ;;  %25714 = vst [vmem:[#allocation16_spill] sm:$0xff] %v19340_v23  ;;  %v17604_v31 = vld [vmem:[%s25709_s29 + $0x1e0] ss:$8 sps:$4 sm:$0xff]   ;;  %v19360_v37 = vsub.s32 %v1502_v27, %v19316_v36 }
  0xec   : > { %v1152_v42 = vpack.c.bf16 %v1136_v28, %v1136_v28  ;;  %v1106_v43 = vsel %vm1091_vm8, %v1090_v40, %v841_v39  ;;  %6097 = vmatpush1.bf16.msra.mxu1 %v17553_v41  ;;  %6164 = vmatpush1.bf16.msra.mxu0 %v17574_v63  ;;  %25715 = vst [vmem:[#allocation17_spill] sm:$0xff] %v19343_v25  ;;  %s25941_s23 = smov %s25940_s0  ;;  %s25474_s24 = scalar_lea.hbm %s25940_s0, %s17183_s2 }
  0xed   : > { %v1151_v45 = vpack.c.bf16 %v1106_v43, %v1106_v43  ;;  %6098 = vmatprep.subr.bf16.mxu1 %v17554_v21  ;;  %6165 = vmatprep.subr.bf16.mxu0 %v17582_v2 }
  0xee   : > { %15857 = vmatprep.mubr.msk.bf16.mxu0 %vm1091_vm8, %v1152_v42 }
  0xf0   : > { %6099 = vmatpush1.bf16.msra.mxu1 %v17559_v51  ;;  %6166 = vmatpush1.bf16.msra.mxu0 %v17580_v3 }
  0xf1   : > { %6100 = vmatprep.subr.bf16.mxu1 %v17560_v52  ;;  %6167 = vmatprep.subr.bf16.mxu0 %v17588_v5 }
  0xf2   : > { %1460 = vmatmul.mubr.bf16.gmra.mxu0 %v1151_v45 }
  0xf4   : > { %6101 = vmatpush1.bf16.msra.mxu1 %v17565_v57  ;;  %6168 = vmatpush1.bf16.msra.mxu0 %v17586_v6 }
  0xf5   : > { %6102 = vmatprep.subr.bf16.mxu1 %v17566_v58  ;;  %6169 = vmatprep.subr.bf16.mxu0 %v17594_v10 }
  0xf8   : > { %6103 = vmatpush1.bf16.msra.mxu1 %v17571_v60  ;;  %6170 = vmatpush1.bf16.msra.mxu0 %v17592_v11 }
  0xf9   : > { %6104 = vmatprep.subr.bf16.mxu1 %v17572_v61  ;;  %6171 = vmatprep.subr.bf16.mxu0 %v17600_v19 }
  0xfc   : > { %6105 = vmatpush1.bf16.msra.mxu1 %v17577_v0  ;;  %6172 = vmatpush2.bf16.msra.mxu0 %v17598_v20 }
  0xfd   : > { %6106 = vmatprep.subr.bf16.mxu1 %v17578_v1  ;;  %6173 = vmatprep.subr.bf16.mxu0 %v17606_v30 }
 0x100   : > { %6107 = vmatpush1.bf16.msra.mxu1 %v17583_v4  ;;  %6174 = vmatpush2.bf16.msra.mxu0 %v17604_v31 }
 0x101   : > { %6108 = vmatprep.subr.bf16.mxu1 %v17584_v53 }
 0x104   : > { %6109 = vmatpush1.bf16.msra.mxu1 %v17589_v8  ;;  %v17608_v8 = vld [vmem:[%s25709_s29 + $0xc4] ss:$8 sps:$4 sm:$0xff]  }
 0x105   : > { %6110 = vmatprep.subr.bf16.mxu1 %v17590_v9  ;;  %v17612_v9 = vld [vmem:[%s25709_s29 + $0x1d4] ss:$8 sps:$4 sm:$0xff]  }
 0x106   : > { %6175 = vmatprep.subr.bf16.mxu0 %v17612_v9 }
 0x107   : > { %6176 = vmatpush2.bf16.msra.mxu0 %v17610_v7 }
 0x108   : > { %6111 = vmatpush2.bf16.msra.mxu1 %v17595_v55 }
 0x109   : > { %6112 = vmatprep.subr.bf16.mxu1 %v17596_v18 }
 0x10c   : > { %6113 = vmatpush2.bf16.msra.mxu1 %v17601_v22 }
 0x10d   : > { %6114 = vmatprep.subr.bf16.mxu1 %v17602_v14 }
 0x110   : > { %6115 = vmatpush2.bf16.msra.mxu1 %v17607_v16 }
 0x111   : > { %6116 = vmatprep.subr.bf16.mxu1 %v17608_v8 }
 0x114   : > { %6117 = vmatpush2.bf16.msra.mxu1 %v17613_v15 }
 0x16e   : > { %v1391_v29 = vpop.f32.mrf.mxu0 }
 0x16f   : > { %v1392_v33 = vadd.f32 %v1391_v29, %v19340_v23 }
 0x170   : > { %v1393_v32 = vpop.f32.mrf.mxu0 }
 0x171   : > { %v1394_v34 = vadd.f32 %v1393_v32, %v19343_v25 }
 0x172   : > { %v1395_v38 = vpop.f32.mrf.mxu0 }
 0x173   : > { %v1498_v39 = vcombine.low %v1392_v33, %v1394_v34  ;;  %v1499_v28 = vcombine.high %v1392_v33, %v1394_v34  ;;  %v1396_v44 = vadd.f32 %v1395_v38, %v19340_v23 }
 0x174   : > { %v1397_v40 = vpop.f32.mrf.mxu0 }
 0x175   : > { %v1506_v42 = vrot.slane %v1498_v39, %v19360_v37  ;;  %v1513_v43 = vrot.slane %v1499_v28, %v19360_v37  ;;  %v1398_v35 = vadd.f32 %v1397_v40, %v19343_v25 }
 0x177   : > { %v1514_v45 = vcombine.high %v1506_v42, %v1506_v42  ;;  %v1515_v47 = vcombine.high %v1513_v43, %v1513_v43  ;;  %v1401_v48 = vpop.f32.mrf.mxu0  ;;  %v1548_v49 = vcombine.low %v1396_v44, %v1398_v35  ;;  %v1522_v50 = vrot.slane %v1506_v42, %v19360_v37 }
 0x178   : > { %v1529_v51 = vrot.slane %v1513_v43, %v19360_v37  ;;  %v19375_v57 = vadd.f32 %v1401_v48, %v19340_v23  ;;  %v1549_v61 = vcombine.high %v1396_v44, %v1398_v35 }
 0x179   : > { %v1536_v41 = vrot.slane %v1514_v45, %v19360_v37  ;;  %v1543_v21 = vrot.slane %v1515_v47, %v19360_v37  ;;  %v1403_v46 = vpop.f32.mrf.mxu0  ;;  %v1556_v52 = vrot.slane %v1548_v49, %v19360_v37  ;;  %v1544_v63 = vcombine.high %v1522_v50, %v1522_v50 }
 0x17a   : > { %v19372_v54 = vadd.f32 %v1403_v46, %v19343_v25  ;;  %v1563_v6 = vrot.slane %v1549_v61, %v19360_v37 }
 0x17b   : > { %v1546_v26 = vcombine.high %v1536_v41, %v1536_v41  ;;  %v2238_v58 = vcombine.low %v1522_v50, %v1536_v41  ;;  %v15858_v56 = vcombine.high %v1529_v51, %v1543_v21  ;;  %v1572_v59 = vrot.slane %v1556_v52, %v19360_v37  ;;  %v1405_v47 = vpop.f32.mrf.mxu0 }
 0x17c   : > { %v1598_v62 = vcombine.low %v19375_v57, %v19372_v54  ;;  %v2283_v2 = vrot.slane %v1543_v21, %v19360_v37  ;;  %v2252_v10 = vrot.slane %v1544_v63, %v19360_v37  ;;  %v1564_v11 = vcombine.high %v1556_v52, %v1556_v52 }
 0x17d   : > { %v2269_v60 = vcombine.low %v1546_v26, %v1529_v51  ;;  %v2307_v0 = vrot.slane %v15858_v56, %v19360_v37  ;;  %v2245_v3 = vrot.slane %v2238_v58, %v19360_v37  ;;  %v2314_v4 = vrot.slane %v1572_v59, %v19360_v37 }
 0x17e   : > { %v1565_v18 = vcombine.high %v1563_v6, %v1563_v6  ;;  %v1586_v19 = vrot.slane %v1564_v11, %v19360_v37  ;;  %v1594_v20 = vcombine.high %v1572_v59, %v1572_v59  ;;  %v1579_v32 = vrot.slane %v1563_v6, %v19360_v37 }
 0x17f   : > { %v2276_v1 = vrot.slane %v2269_v60, %v19360_v37  ;;  %v2315_v55 = vcombine.low %v2307_v0, %v2314_v4  ;;  %v2316_v12 = vcombine.high %v2307_v0, %v2314_v4  ;;  %v2253_v17 = vcombine.low %v2245_v3, %v2252_v10 }
 0x180   : > { %v2254_v22 = vcombine.high %v2245_v3, %v2252_v10  ;;  %v1593_v29 = vrot.slane %v1565_v18, %v19360_v37  ;;  %v1596_v14 = vcombine.high %v1586_v19, %v1586_v19  ;;  %v2331_v30 = vcombine.low %v1586_v19, %v1594_v20 }
 0x181   : > { %v2284_v53 = vcombine.low %v2276_v1, %v2283_v2  ;;  %v2285_v5 = vcombine.high %v2276_v1, %v2283_v2  ;;  %v2261_v27 = vrot.slane %v2253_v17, %v19360_v37  ;;  %v1595_v35 = vcombine.high %v1579_v32, %v1579_v32 }
 0x182   : > { %v2268_v31 = vrot.slane %v2254_v22, %v19360_v37  ;;  %v2362_v38 = vcombine.low %v1579_v32, %v1593_v29  ;;  %v2338_v39 = vrot.slane %v2331_v30, %v19360_v37  ;;  %v2345_v28 = vrot.slane %v1596_v14, %v19360_v37 }
 0x183   : > { %v2292_v16 = vrot.slane %v2284_v53, %v19360_v37  ;;  %v3525_v33 = vsel %vm905_vm3, %v2261_v27, -inf  ;;  %v2299_v34 = vrot.slane %v2285_v5, %v19360_v37  ;;  %v1599_v21 = vcombine.high %v19375_v57, %v19372_v54  ;;  %v1407_v54 = vpop.f32.mrf.mxu0  ;;  %v17614_v57 = vld [vmem:[%s25709_s29 + $0xb4] ss:$8 sps:$4 sm:$0xff]   ;;  %v17616_v53 = vld [vmem:[%s25709_s29 + $0x1c0] ss:$8 sps:$4 sm:$0xff]  }
 0x184   : > { %v3526_v40 = vrot.slane %v3525_v33, 4  ;;  %v3532_v42 = vsel %vm905_vm3, %v2268_v31, -inf  ;;  %v19413_v45 = vrot.slane %v2362_v38, %v19360_v37  ;;  %v2346_v41 = vcombine.low %v2338_v39, %v2345_v28  ;;  %v17619_v5 = vld [vmem:[%s25709_s29 + $0xb0] ss:$8 sps:$4 sm:$0xff]   ;;  %6118 = vmatprep.subr.bf16.mxu1 %v17614_v57 }
 0x185   : > { %v3539_v43 = vsel %vm905_vm3, %v2292_v16, -inf  ;;  %v3546_v44 = vsel %vm905_vm3, %v2299_v34, -inf  ;;  %v3533_v48 = vrot.slane %v3532_v42, 4  ;;  %v2376_v50 = vrot.slane %v1595_v35, %v19360_v37  ;;  %6119 = vmatpush2.bf16.msra.mxu1 %v17619_v5 }
 0x186   : > { %v3540_v49 = vrot.slane %v3539_v43, 4  ;;  %v3527_v46 = vmax.f32 %v3525_v33, %v3526_v40  ;;  %v1597_v51 = vcombine.high %v1593_v29, %v1593_v29  ;;  %v1606_v52 = vrot.slane %v1598_v62, %v19360_v37  ;;  %v17618_v62 = vld [vmem:[%s25709_s29 + $0x1c4] ss:$8 sps:$4 sm:$0xff]  }
 0x187   : > { %v3547_v26 = vrot.slane %v3546_v44, 4  ;;  %v2323_v58 = vrot.slane %v2315_v55, %v19360_v37  ;;  %v2330_v56 = vrot.slane %v2316_v12, %v19360_v37  ;;  %v1613_v59 = vrot.slane %v1599_v21, %v19360_v37  ;;  %6177 = vmatprep.subr.bf16.mxu0 %v17618_v62 }
 0x188   : > { %v2347_v60 = vcombine.high %v2338_v39, %v2345_v28  ;;  %v2377_v61 = vcombine.low %v19413_v45, %v2376_v50  ;;  %v1614_v63 = vcombine.high %v1606_v52, %v1606_v52  ;;  %v1622_v0 = vrot.slane %v1606_v52, %v19360_v37  ;;  %6178 = vmatpush2.bf16.msra.mxu0 %v17616_v53 }
 0x189   : > { %v3534_v1 = vmax.f32 %v3532_v42, %v3533_v48  ;;  %v3541_v2 = vmax.f32 %v3539_v43, %v3540_v49  ;;  %v1615_v3 = vcombine.high %v1613_v59, %v1613_v59  ;;  %v1629_v4 = vrot.slane %v1613_v59, %v19360_v37 }
 0x18a   : > { %v3528_v6 = vrot.slane %v3527_v46, 2  ;;  %v2354_v8 = vrot.slane %v2346_v41, %v19360_v37  ;;  %v1636_v9 = vrot.slane %v1614_v63, %v19360_v37  ;;  %v2393_v10 = vcombine.low %v1597_v51, %v1622_v0 }
 0x18b   : > { %v3548_v11 = vmax.f32 %v3546_v44, %v3547_v26  ;;  %v3553_v55 = vsel %vm905_vm3, %v2323_v58, -inf  ;;  %v3560_v12 = vsel %vm905_vm3, %v2330_v56, -inf  ;;  %v19442_v7 = vadd.f32 %v1407_v54, %v19343_v25 }
 0x18c   : > { %v2385_v15 = vrot.slane %v2377_v61, %v19360_v37  ;;  %v2400_v17 = vrot.slane %v2393_v10, %v19360_v37  ;;  %v2407_v18 = vrot.slane %v1636_v9, %v19360_v37  ;;  %v15859_v19 = vcombine.high %v1622_v0, %v1636_v9  ;;  %v17624_v9 = vld [vmem:[%s25709_s29 + $0x1b4] ss:$8 sps:$4 sm:$0xff]  }
 0x18d   : > { %v3542_v20 = vrot.slane %v3541_v2, 2  ;;  %v1643_v22 = vrot.slane %v1615_v3, %v19360_v37  ;;  %v1645_v27 = vcombine.high %v1629_v4, %v1629_v4  ;;  %v19449_v29 = vadd.f32 %v1405_v47, %v19340_v23  ;;  %6179 = vmatprep.subr.bf16.mxu0 %v17624_v9 }
 0x18e   : > { %v2408_v14 = vcombine.low %v2400_v17, %v2407_v18  ;;  %v2409_v30 = vcombine.high %v2400_v17, %v2407_v18  ;;  %v2431_v31 = vrot.slane %v15859_v19, %v19360_v37  ;;  %v2438_v16 = vrot.slane %v1629_v4, %v19360_v37  ;;  %v17625_v17 = vld [vmem:[%s25709_s29 + $0xa0] ss:$8 sps:$4 sm:$0xff]  }
 0x18f   : > { %v3529_v32 = vmax.f32 %v3527_v46, %v3528_v6  ;;  %v2361_v33 = vrot.slane %v2347_v60, %v19360_v37  ;;  %v2378_v34 = vcombine.high %v19413_v45, %v2376_v50  ;;  %v1648_v38 = vcombine.low %v19449_v29, %v19442_v7 }
 0x190   : > { %v3554_v39 = vrot.slane %v3553_v55, 4  ;;  %v3581_v28 = vsel %vm905_vm3, %v2385_v15, -inf  ;;  %v2439_v40 = vcombine.low %v2431_v31, %v2438_v16  ;;  %v2440_v42 = vcombine.high %v2431_v31, %v2438_v16  ;;  %v17622_v15 = vld [vmem:[%s25709_s29 + $0x1b0] ss:$8 sps:$4 sm:$0xff]   ;;  %v1411_v16 = vpop.f32.mrf.mxu0 }
 0x191   : > { %v3535_v43 = vrot.slane %v3534_v1, 2  ;;  %v3561_v35 = vrot.slane %v3560_v12, 4  ;;  %v1647_v44 = vcombine.high %v1643_v22, %v1643_v22  ;;  %v2455_v47 = vcombine.low %v1643_v22, %v1645_v27  ;;  %6180 = vmatpush2.bf16.msra.mxu0 %v17622_v15 }
 0x192   : > { %v3543_v48 = vmax.f32 %v3541_v2, %v3542_v20  ;;  %v3549_v49 = vrot.slane %v3548_v11, 2  ;;  %v2416_v41 = vrot.slane %v2408_v14, %v19360_v37  ;;  %v2392_v21 = vrot.slane %v2378_v34, %v19360_v37 }
 0x193   : > { %v3567_v45 = vsel %vm905_vm3, %v2354_v8, -inf  ;;  %v3582_v46 = vrot.slane %v3581_v28, 4  ;;  %v1656_v50 = vrot.slane %v1648_v38, %v19360_v37  ;;  %v3530_v51 = vrot.slane %v3529_v32, 1  ;;  %v17620_v8 = vld [vmem:[%s25709_s29 + $0xa4] ss:$8 sps:$4 sm:$0xff]  }
 0x194   : > { %v3555_v52 = vmax.f32 %v3553_v55, %v3554_v39  ;;  %v3574_v26 = vsel %vm905_vm3, %v2361_v33, -inf  ;;  %v2423_v58 = vrot.slane %v2409_v30, %v19360_v37  ;;  %v19464_v56 = vmax.f32 %v3534_v1, %v3535_v43  ;;  %6120 = vmatprep.subr.bf16.mxu1 %v17620_v8 }
 0x195   : > { %v3562_v59 = vmax.f32 %v3560_v12, %v3561_v35  ;;  %v2462_v60 = vrot.slane %v2455_v47, %v19360_v37  ;;  %v2469_v61 = vrot.slane %v1647_v44, %v19360_v37  ;;  %v3544_v63 = vrot.slane %v3543_v48, 1  ;;  %6121 = vmatpush2.bf16.msra.mxu1 %v17625_v17 }
 0x196   : > { %v19468_v0 = vmax.f32 %v3548_v11, %v3549_v49  ;;  %v3568_v54 = vrot.slane %v3567_v45, 4  ;;  %v3595_v57 = vsel %vm905_vm3, %v2416_v41, -inf  ;;  %v3575_v62 = vrot.slane %v3574_v26, 4  ;;  %v1413_v41 = vpop.f32.mrf.mxu0 }
 0x197   : > { %v3583_v2 = vmax.f32 %v3581_v28, %v3582_v46  ;;  %v3588_v3 = vsel %vm905_vm3, %v2392_v21, -inf  ;;  %v1664_v4 = vcombine.high %v1656_v50, %v1656_v50  ;;  %v19472_v53 = vmax.f32 %v3529_v32, %v3530_v51 }
 0x198   : > { %v3556_v1 = vrot.slane %v3555_v52, 2  ;;  %v2447_v5 = vrot.slane %v2439_v40, %v19360_v37  ;;  %v3602_v6 = vsel %vm905_vm3, %v2423_v58, -inf  ;;  %v3563_v10 = vrot.slane %v3562_v59, 2 }
 0x199   : > { %25716 = vst [vmem:[#allocation18_spill] sm:$0xff] %v19472_v53  ;;  %v2454_v11 = vrot.slane %v2440_v42, %v19360_v37  ;;  %v2470_v55 = vcombine.low %v2462_v60, %v2469_v61  ;;  %v3596_v12 = vrot.slane %v3595_v57, 4  ;;  %v3569_v18 = vmax.f32 %v3567_v45, %v3568_v54 }
 0x19a   : > { %v3589_v19 = vrot.slane %v3588_v3, 4  ;;  %v2471_v20 = vcombine.high %v2462_v60, %v2469_v61  ;;  %v1649_v22 = vcombine.high %v19449_v29, %v19442_v7  ;;  %v19491_v27 = vmax.f32 %v3543_v48, %v3544_v63 }
 0x19b   : > { %v3584_v14 = vrot.slane %v3583_v2, 2  ;;  %v3603_v30 = vrot.slane %v3602_v6, 4  ;;  %v1686_v31 = vrot.slane %v1664_v4, %v19360_v37  ;;  %v3557_v33 = vmax.f32 %v3555_v52, %v3556_v1 }
 0x19c   : > { %25717 = vst [vmem:[#allocation19_spill] sm:$0xff] %v19491_v27  ;;  %v19495_v34 = vmax.f32 %v3574_v26, %v3575_v62  ;;  %v3609_v38 = vsel %vm905_vm3, %v2447_v5, -inf  ;;  %v2478_v7 = vrot.slane %v2470_v55, %v19360_v37  ;;  %v3597_v29 = vmax.f32 %v3595_v57, %v3596_v12 }
 0x19d   : > { %v3616_v39 = vsel %vm905_vm3, %v2454_v11, -inf  ;;  %v1672_v28 = vrot.slane %v1656_v50, %v19360_v37  ;;  %v19501_v40 = vmax.f32 %v3562_v59, %v3563_v10  ;;  %v3590_v42 = vmax.f32 %v3588_v3, %v3589_v19  ;;  %v1415_v3 = vpop.f32.mrf.mxu0 }
 0x19e   : > { %v2485_v43 = vrot.slane %v2471_v20, %v19360_v37  ;;  %v1663_v35 = vrot.slane %v1649_v22, %v19360_v37  ;;  %v3585_v44 = vmax.f32 %v3583_v2, %v3584_v14  ;;  %v3604_v47 = vmax.f32 %v3602_v6, %v3603_v30 }
 0x19f   : > { %v3610_v48 = vrot.slane %v3609_v38, 4  ;;  %v2486_v49 = vcombine.low %v1672_v28, %v1686_v31  ;;  %v3570_v45 = vrot.slane %v3569_v18, 2  ;;  %v3617_v46 = vrot.slane %v3616_v39, 4  ;;  %v1417_v14 = vpop.f32.mrf.mxu0 }
 0x1a0   : > { %v1696_v51 = vcombine.high %v1686_v31, %v1686_v31  ;;  %v3558_v52 = vrot.slane %v3557_v33, 1  ;;  %v3598_v26 = vrot.slane %v3597_v29, 2  ;;  %v3623_v50 = vsel %vm905_vm3, %v2478_v7, -inf }
 0x1a1   : > { %v1694_v58 = vcombine.high %v1672_v28, %v1672_v28  ;;  %v3591_v59 = vrot.slane %v3590_v42, 2  ;;  %v3630_v60 = vsel %vm905_vm3, %v2485_v43, -inf  ;;  %v1665_v61 = vcombine.high %v1663_v35, %v1663_v35 }
 0x1a2   : > { %v1679_v63 = vrot.slane %v1663_v35, %v19360_v37  ;;  %v3586_v54 = vrot.slane %v3585_v44, 1  ;;  %v3605_v57 = vrot.slane %v3604_v47, 2  ;;  %v3611_v62 = vmax.f32 %v3609_v38, %v3610_v48 }
 0x1a3   : > { %v2493_v2 = vrot.slane %v2486_v49, %v19360_v37  ;;  %v19510_v4 = vmax.f32 %v3569_v18, %v3570_v45  ;;  %v3618_v1 = vmax.f32 %v3616_v39, %v3617_v46  ;;  %v3624_v5 = vrot.slane %v3623_v50, 4 }
 0x1a4   : > { %v2517_v6 = vcombine.low %v1696_v51, %v1679_v63  ;;  %v3599_v8 = vmax.f32 %v3597_v29, %v3598_v26  ;;  %v3631_v9 = vrot.slane %v3630_v60, 4  ;;  %v2500_v10 = vrot.slane %v1694_v58, %v19360_v37  ;;  %v17630_v26 = vld [vmem:[%s25709_s29 + $0x1a4] ss:$8 sps:$4 sm:$0xff]  }
 0x1a5   : > { %25718 = vst [vmem:[#allocation20_spill] sm:$0xff] %v19510_v4  ;;  %v1414_v11 = vadd.f32 %v1413_v41, %v19343_v25  ;;  %v19514_v55 = vmax.f32 %v3557_v33, %v3558_v52  ;;  %v19516_v12 = vmax.f32 %v3590_v42, %v3591_v59  ;;  %v1693_v15 = vrot.slane %v1665_v61, %v19360_v37  ;;  %v17626_v52 = vld [vmem:[%s25709_s29 + $0x94] ss:$8 sps:$4 sm:$0xff]   ;;  %v17628_v61 = vld [vmem:[%s25709_s29 + $0x1a0] ss:$8 sps:$4 sm:$0xff]  }
 0x1a6   : > { %v1412_v17 = vadd.f32 %v1411_v16, %v19340_v23  ;;  %v3587_v19 = vmax.f32 %v3585_v44, %v3586_v54  ;;  %v3606_v18 = vmax.f32 %v3604_v47, %v3605_v57  ;;  %v3612_v20 = vrot.slane %v3611_v62, 2  ;;  %6122 = vmatprep.subr.bf16.mxu1 %v17626_v52  ;;  %6181 = vmatprep.subr.bf16.mxu0 %v17630_v26 }
 0x1a7   : > { %25719 = vst [vmem:[#allocation21_spill] sm:$0xff] %v19514_v55  ;;  %v2501_v22 = vcombine.low %v2493_v2, %v2500_v10  ;;  %v3619_v30 = vrot.slane %v3618_v1, 2  ;;  %v2524_v31 = vrot.slane %v2517_v6, %v19360_v37  ;;  %v3600_v29 = vrot.slane %v3599_v8, 1  ;;  %6182 = vmatpush2.bf16.msra.mxu0 %v17628_v61 }
 0x1a8   : > { %v1698_v38 = vcombine.low %v1412_v17, %v1414_v11  ;;  %v1699_v7 = vcombine.high %v1412_v17, %v1414_v11  ;;  %v3625_v39 = vmax.f32 %v3623_v50, %v3624_v5  ;;  %v3632_v33 = vmax.f32 %v3630_v60, %v3631_v9 }
 0x1a9   : > { %v2502_v28 = vcombine.high %v2493_v2, %v2500_v10  ;;  %v2531_v42 = vrot.slane %v1693_v15, %v19360_v37  ;;  %v19525_v35 = vadd.f32 %v1417_v14, %v19343_v25  ;;  %v3607_v44 = vrot.slane %v3606_v18, 1 }
 0x1aa   : > { %v1706_v43 = vrot.slane %v1698_v38, %v19360_v37  ;;  %v1713_v16 = vrot.slane %v1699_v7, %v19360_v37  ;;  %v3613_v47 = vmax.f32 %v3611_v62, %v3612_v20  ;;  %v2509_v48 = vrot.slane %v2501_v22, %v19360_v37  ;;  %v17632_v7 = vld [vmem:[%s25709_s29 + $0x84] ss:$8 sps:$4 sm:$0xff]  }
 0x1ab   : > { %v15860_v49 = vcombine.high %v1679_v63, %v1693_v15  ;;  %v2532_v41 = vcombine.low %v2524_v31, %v2531_v42  ;;  %v19530_v51 = vadd.f32 %v1415_v3, %v19340_v23  ;;  %v3620_v50 = vmax.f32 %v3618_v1, %v3619_v30  ;;  %v17631_v63 = vld [vmem:[%s25709_s29 + $0x90] ss:$8 sps:$4 sm:$0xff]  }
 0x1ac   : > { %v1714_v45 = vcombine.high %v1706_v43, %v1706_v43  ;;  %v1722_v46 = vrot.slane %v1706_v43, %v19360_v37  ;;  %v3626_v58 = vrot.slane %v3625_v39, 2  ;;  %v2516_v59 = vrot.slane %v2502_v28, %v19360_v37  ;;  %6123 = vmatpush2.bf16.msra.mxu1 %v17631_v63 }
 0x1ad   : > { %v2533_v60 = vcombine.high %v2524_v31, %v2531_v42  ;;  %v1715_v54 = vcombine.high %v1713_v16, %v1713_v16  ;;  %v1748_v2 = vcombine.low %v19530_v51, %v19525_v35  ;;  %v3601_v3 = vmax.f32 %v3599_v8, %v3600_v29  ;;  %v17636_v29 = vld [vmem:[%s25709_s29 + $0x194] ss:$8 sps:$4 sm:$0xff]   ;;  %6124 = vmatprep.subr.bf16.mxu1 %v17632_v7 }
 0x1ae   : > { %v1736_v57 = vrot.slane %v1714_v45, %v19360_v37  ;;  %v1744_v62 = vcombine.high %v1722_v46, %v1722_v46  ;;  %v3633_v1 = vrot.slane %v3632_v33, 2  ;;  %v2555_v5 = vrot.slane %v15860_v49, %v19360_v37  ;;  %v17634_v49 = vld [vmem:[%s25709_s29 + $0x190] ss:$8 sps:$4 sm:$0xff]   ;;  %6183 = vmatprep.subr.bf16.mxu0 %v17636_v29 }
 0x1af   : > { %v3637_v6 = vsel %vm905_vm3, %v2509_v48, -inf  ;;  %v2540_v9 = vrot.slane %v2532_v41, %v19360_v37  ;;  %v2562_v11 = vrot.slane %v1722_v46, %v19360_v37  ;;  %v3614_v17 = vrot.slane %v3613_v47, 1  ;;  %v17637_v41 = vld [vmem:[%s25709_s29 + $0x80] ss:$8 sps:$4 sm:$0xff]   ;;  %6184 = vmatpush2.bf16.msra.mxu0 %v17634_v49 }
 0x1b0   : > { %v1746_v10 = vcombine.high %v1736_v57, %v1736_v57  ;;  %v2579_v15 = vcombine.low %v1736_v57, %v1744_v62  ;;  %v3621_v20 = vrot.slane %v3620_v50, 1  ;;  %v2547_v22 = vrot.slane %v2533_v60, %v19360_v37  ;;  %6125 = vmatpush2.bf16.msra.mxu1 %v17637_v41  ;;  %v1421_v41 = vpop.f32.mrf.mxu0 }
 0x1b1   : > { %v3644_v8 = vsel %vm905_vm3, %v2516_v59, -inf  ;;  %v1743_v14 = vrot.slane %v1715_v54, %v19360_v37  ;;  %v2563_v30 = vcombine.low %v2555_v5, %v2562_v11  ;;  %v2564_v31 = vcombine.high %v2555_v5, %v2562_v11 }
 0x1b2   : > { %v1756_v38 = vrot.slane %v1748_v2, %v19360_v37  ;;  %v19562_v28 = vmax.f32 %v3587_v19, 0.0  ;;  %v3608_v42 = vmax.f32 %v3606_v18, %v3607_v44  ;;  %v3627_v43 = vmax.f32 %v3625_v39, %v3626_v58 }
 0x1b3   : > { %v3638_v48 = vrot.slane %v3637_v6, 4  ;;  %v3651_v45 = vsel %vm905_vm3, %v2540_v9, -inf  ;;  %v1729_v46 = vrot.slane %v1713_v16, %v19360_v37  ;;  %v2586_v52 = vrot.slane %v2579_v15, %v19360_v37 }
 0x1b4   : > { %25720 = vst [vmem:[#allocation22_spill] sm:$0xff] %v19562_v28  ;;  %v2593_v19 = vrot.slane %v1746_v10, %v19360_v37  ;;  %v3615_v18 = vmax.f32 %v3613_v47, %v3614_v17  ;;  %v19574_v39 = vmax.f32 %v3620_v50, %v3621_v20  ;;  %v3634_v44 = vmax.f32 %v3632_v33, %v3633_v1 }
 0x1b5   : > { %v3645_v26 = vrot.slane %v3644_v8, 4  ;;  %v19576_v58 = vmax.f32 %v3601_v3, 0.0  ;;  %v3658_v59 = vsel %vm905_vm3, %v2547_v22, -inf  ;;  %v2610_v60 = vcombine.low %v1729_v46, %v1743_v14 }
 0x1b6   : > { %v1764_v61 = vcombine.high %v1756_v38, %v1756_v38  ;;  %v3628_v16 = vrot.slane %v3627_v43, 1  ;;  %v19579_v63 = vmax.f32 %v3608_v42, 0.0  ;;  %v3639_v54 = vmax.f32 %v3637_v6, %v3638_v48 }
 0x1b7   : > { %25721 = vst [vmem:[#allocation23_spill] sm:$0xff] %v19576_v58  ;;  %v3652_v57 = vrot.slane %v3651_v45, 4  ;;  %v1745_v62 = vcombine.high %v1729_v46, %v1729_v46  ;;  %v2571_v47 = vrot.slane %v2563_v30, %v19360_v37  ;;  %v2594_v50 = vcombine.low %v2586_v52, %v2593_v19 }
 0x1b8   : > { %v2595_v33 = vcombine.high %v2586_v52, %v2593_v19  ;;  %v3646_v2 = vmax.f32 %v3644_v8, %v3645_v26  ;;  %v3659_v1 = vrot.slane %v3658_v59, 4  ;;  %v2578_v3 = vrot.slane %v2564_v31, %v19360_v37 }
 0x1b9   : > { %v1749_v5 = vcombine.high %v19530_v51, %v19525_v35  ;;  %v1747_v9 = vcombine.high %v1743_v14, %v1743_v14  ;;  %v2617_v10 = vrot.slane %v2610_v60, %v19360_v37  ;;  %v19587_v11 = vrot.slane %v1756_v38, %v19360_v37 }
 0x1ba   : > { %v19590_v6 = vrot.slane %v1764_v61, %v19360_v37  ;;  %v3635_v15 = vrot.slane %v3634_v44, 1  ;;  %v19592_v17 = vmax.f32 %v3615_v18, 0.0  ;;  %v3640_v20 = vrot.slane %v3639_v54, 2 }
 0x1bb   : > { %v3653_v22 = vmax.f32 %v3651_v45, %v3652_v57  ;;  %v2602_v8 = vrot.slane %v2594_v50, %v19360_v37  ;;  %v2609_v30 = vrot.slane %v2595_v33, %v19360_v37  ;;  %v2624_v35 = vrot.slane %v1745_v62, %v19360_v37  ;;  %v1423_v33 = vpop.f32.mrf.mxu0 }
 0x1bc   : > { %25722 = vst [vmem:[#allocation24_spill] sm:$0xff] %v19592_v17  ;;  %v3665_v51 = vsel %vm905_vm3, %v2571_v47, -inf  ;;  %v3629_v14 = vmax.f32 %v3627_v43, %v3628_v16  ;;  %v3647_v31 = vrot.slane %v3646_v2, 2  ;;  %v3672_v38 = vsel %vm905_vm3, %v2578_v3, -inf }
 0x1bd   : > { %v1763_v7 = vrot.slane %v1749_v5, %v19360_v37  ;;  %v3660_v29 = vmax.f32 %v3658_v59, %v3659_v1  ;;  %v2625_v42 = vcombine.low %v2617_v10, %v2624_v35  ;;  %v2641_v48 = vcombine.low %v1747_v9, %v19587_v11 }
 0x1be   : > { %v19603_v49 = vrot.slane %v19590_v6, %v19360_v37  ;;  %v3641_v45 = vmax.f32 %v3639_v54, %v3640_v20  ;;  %v3654_v46 = vrot.slane %v3653_v22, 2  ;;  %v2626_v52 = vcombine.high %v2617_v10, %v2624_v35 }
 0x1bf   : > { %v3666_v19 = vrot.slane %v3665_v51, 4  ;;  %v3673_v18 = vrot.slane %v3672_v38, 4  ;;  %v3679_v43 = vsel %vm905_vm3, %v2602_v8, -inf  ;;  %v3686_v26 = vsel %vm905_vm3, %v2609_v30, -inf }
 0x1c0   : > { %v2648_v60 = vrot.slane %v2641_v48, %v19360_v37  ;;  %v3636_v59 = vmax.f32 %v3634_v44, %v3635_v15  ;;  %v3648_v61 = vmax.f32 %v3646_v2, %v3647_v31  ;;  %v1765_v16 = vcombine.high %v1763_v7, %v1763_v7  ;;  %v19625_v48 = vpop.f32.mrf.mxu0 }
 0x1c1   : > { %v1779_v57 = vrot.slane %v1763_v7, %v19360_v37  ;;  %v3661_v62 = vrot.slane %v3660_v29, 2  ;;  %v2633_v47 = vrot.slane %v2625_v42, %v19360_v37  ;;  %v2640_v1 = vrot.slane %v2626_v52, %v19360_v37 }
 0x1c2   : > { %v2656_v54 = vcombine.low %v2648_v60, %v19603_v49  ;;  %v2657_v50 = vcombine.high %v2648_v60, %v19603_v49  ;;  %v3667_v3 = vmax.f32 %v3665_v51, %v3666_v19  ;;  %v3680_v5 = vrot.slane %v3679_v43, 4 }
 0x1c3   : > { %v3687_v9 = vrot.slane %v3686_v26, 4  ;;  %v19614_v10 = vmax.f32 %v19574_v39, 0.0  ;;  %v3642_v44 = vrot.slane %v3641_v45, 1  ;;  %v3655_v2 = vmax.f32 %v3653_v22, %v3654_v46 }
 0x1c4   : > { %v3674_v15 = vmax.f32 %v3672_v38, %v3673_v18  ;;  %v19616_v20 = vmax.f32 %v3629_v14, 0.0  ;;  %v3649_v8 = vrot.slane %v3648_v61, 1  ;;  %v1793_v30 = vrot.slane %v1765_v16, %v19360_v37 }
 0x1c5   : > { %25723 = vst [vmem:[#allocation25_spill] sm:$0xff] %v19614_v10  ;;  %v1795_v35 = vcombine.high %v1779_v57, %v1779_v57  ;;  %v19619_v31 = vmax.f32 %v3636_v59, 0.0  ;;  %v3662_v7 = vmax.f32 %v3660_v29, %v3661_v62  ;;  %v3693_v42 = vsel %vm905_vm3, %v2633_v47, -inf }
 0x1c6   : > { %25724 = vst [vmem:[#allocation26_spill] sm:$0xff] %v19616_v20  ;;  %v19623_v51 = vadd.f32 %v1421_v41, %v19340_v23  ;;  %v3668_v39 = vrot.slane %v3667_v3, 2  ;;  %v3681_v49 = vmax.f32 %v3679_v43, %v3680_v5  ;;  %v3688_v22 = vmax.f32 %v3686_v26, %v3687_v9  ;;  %v19632_v43 = vpop.f32.mrf.mxu0 }
 0x1c7   : > { %25725 = vst [vmem:[#allocation27_spill] sm:$0xff] %v19619_v31  ;;  %v3700_v14 = vsel %vm905_vm3, %v2640_v1, -inf  ;;  %v3643_v38 = vmax.f32 %v3641_v45, %v3642_v44  ;;  %v3656_v46 = vrot.slane %v3655_v2, 1  ;;  %v3675_v52 = vrot.slane %v3674_v15, 2 }
 0x1c8   : > { %v15861_v19 = vcombine.high %v19587_v11, %v19590_v6  ;;  %v3650_v18 = vmax.f32 %v3648_v61, %v3649_v8  ;;  %v1797_v29 = vcombine.high %v1793_v30, %v1793_v30  ;;  %v2703_v60 = vcombine.low %v1793_v30, %v1795_v35  ;;  %v19638_v61 = vpop.f32.mrf.mxu0 }
 0x1c9   : > { %v1424_v59 = vadd.f32 %v1423_v33, %v19343_v25  ;;  %v3663_v41 = vrot.slane %v3662_v7, 1  ;;  %v3694_v16 = vrot.slane %v3693_v42, 4  ;;  %v3701_v62 = vrot.slane %v3700_v14, 4 }
 0x1ca   : > { %v2664_v47 = vrot.slane %v2656_v54, %v19360_v37  ;;  %v3669_v26 = vmax.f32 %v3667_v3, %v3668_v39  ;;  %v3682_v1 = vrot.slane %v3681_v49, 2  ;;  %v3689_v45 = vrot.slane %v3688_v22, 2 }
 0x1cb   : > { %v1798_v5 = vcombine.low %v19623_v51, %v1424_v59  ;;  %v3657_v9 = vmax.f32 %v3655_v2, %v3656_v46  ;;  %v19635_v44 = vmax.f32 %v3643_v38, 0.0  ;;  %v3676_v11 = vmax.f32 %v3674_v15, %v3675_v52 }
 0x1cc   : > { %v2679_v6 = vrot.slane %v15861_v19, %v19360_v37  ;;  %v2671_v33 = vrot.slane %v2657_v50, %v19360_v37  ;;  %v2710_v8 = vrot.slane %v2703_v60, %v19360_v37  ;;  %v2717_v54 = vrot.slane %v1797_v29, %v19360_v37  ;;  %v19648_v60 = vpop.f32.mrf.mxu0 }
 0x1cd   : > { %25726 = vst [vmem:[#allocation28_spill] sm:$0xff] %v19635_v44  ;;  %v1806_v3 = vrot.slane %v1798_v5, %v19360_v37  ;;  %v3695_v30 = vmax.f32 %v3693_v42, %v3694_v16  ;;  %v3702_v35 = vmax.f32 %v3700_v14, %v3701_v62  ;;  %v2686_v39 = vrot.slane %v1779_v57, %v19360_v37 }
 0x1ce   : > { %v3707_v2 = vsel %vm905_vm3, %v2664_v47, -inf  ;;  %v3664_v38 = vmax.f32 %v3662_v7, %v3663_v41  ;;  %v3670_v15 = vrot.slane %v3669_v26, 1  ;;  %v3683_v46 = vmax.f32 %v3681_v49, %v3682_v1 }
 0x1cf   : > { %v3690_v52 = vmax.f32 %v3688_v22, %v3689_v45  ;;  %v19646_v19 = vmax.f32 %v3650_v18, 0.0  ;;  %v3677_v21 = vrot.slane %v3676_v11, 1  ;;  %v2687_v50 = vcombine.low %v2679_v6, %v2686_v39 }
 0x1d0   : > { %v1814_v32 = vcombine.high %v1806_v3, %v1806_v3  ;;  %v2688_v29 = vcombine.high %v2679_v6, %v2686_v39  ;;  %v2718_v36 = vcombine.low %v2710_v8, %v2717_v54  ;;  %v3708_v5 = vrot.slane %v3707_v2, 4  ;;  %v19658_v6 = vpop.f32.mrf.mxu0 }
 0x1d1   : > { %25727 = vst [vmem:[#allocation29_spill] sm:$0xff] %v19646_v19  ;;  %v3714_v42 = vsel %vm905_vm3, %v2671_v33, -inf  ;;  %v19651_v14 = vmax.f32 %v3657_v9, 0.0  ;;  %v3696_v57 = vrot.slane %v3695_v30, 2  ;;  %v3703_v16 = vrot.slane %v3702_v35, 2 }
 0x1d2   : > { %v1799_v7 = vcombine.high %v19623_v51, %v1424_v59  ;;  %v19654_v49 = vmax.f32 %v3664_v38, 0.0  ;;  %v3671_v22 = vmax.f32 %v3669_v26, %v3670_v15  ;;  %v3684_v18 = vrot.slane %v3683_v46, 1 }
 0x1d3   : > { %25728 = vst [vmem:[#allocation30_spill] sm:$0xff] %v19651_v14  ;;  %v3691_v41 = vrot.slane %v3690_v52, 1  ;;  %v3678_v62 = vmax.f32 %v3676_v11, %v3677_v21  ;;  %v2695_v47 = vrot.slane %v2687_v50, %v19360_v37  ;;  %v3715_v1 = vrot.slane %v3714_v42, 4 }
 0x1d4   : > { %25729 = vst [vmem:[#allocation31_spill] sm:$0xff] %v19654_v49  ;;  %v1836_v45 = vrot.slane %v1814_v32, %v19360_v37  ;;  %v2702_v9 = vrot.slane %v2688_v29, %v19360_v37  ;;  %v2719_v33 = vcombine.high %v2710_v8, %v2717_v54  ;;  %v2726_v39 = vrot.slane %v2718_v36, %v19360_v37  ;;  %v19672_v54 = vpop.f32.mrf.mxu0 }
 0x1d5   : > { %v3709_v13 = vmax.f32 %v3707_v2, %v3708_v5  ;;  %v3697_v51 = vmax.f32 %v3695_v30, %v3696_v57  ;;  %v3704_v59 = vmax.f32 %v3702_v35, %v3703_v16  ;;  %v1813_v26 = vrot.slane %v1799_v7, %v19360_v37 }
 0x1d6   : > { %v1822_v38 = vrot.slane %v1806_v3, %v19360_v37  ;;  %v3685_v21 = vmax.f32 %v3683_v46, %v3684_v18  ;;  %v3692_v11 = vmax.f32 %v3690_v52, %v3691_v41  ;;  %v19664_v15 = vmax.f32 %v3671_v22, 0.0 }
 0x1d7   : > { %v1426_v32 = vadd.f32 %v19625_v48, %v19340_v23  ;;  %v3716_v50 = vmax.f32 %v3714_v42, %v3715_v1  ;;  %v3721_v29 = vsel %vm905_vm3, %v2695_v47, -inf  ;;  %v19670_v8 = vrot.slane %v1813_v26, %v19360_v37  ;;  %v19682_v1 = vpop.f32.mrf.mxu0 }
 0x1d8   : > { %25730 = vst [vmem:[#allocation32_spill] sm:$0xff] %v19664_v15  ;;  %v1846_v36 = vcombine.high %v1836_v45, %v1836_v45  ;;  %v2733_v30 = vrot.slane %v2719_v33, %v19360_v37  ;;  %v3710_v35 = vrot.slane %v3709_v13, 2  ;;  %v3728_v3 = vsel %vm905_vm3, %v2702_v9, -inf }
 0x1d9   : > { %v3735_v2 = vsel %vm905_vm3, %v2726_v39, -inf  ;;  %v1815_v46 = vcombine.high %v1813_v26, %v1813_v26  ;;  %v1844_v52 = vcombine.high %v1822_v38, %v1822_v38  ;;  %v2734_v5 = vcombine.low %v1822_v38, %v1836_v45 }
 0x1da   : > { %v1428_v48 = vadd.f32 %v19632_v43, %v19343_v25  ;;  %v3698_v42 = vrot.slane %v3697_v51, 1  ;;  %v3705_v57 = vrot.slane %v3704_v59, 1  ;;  %v19679_v16 = vmax.f32 %v3678_v62, 0.0 }
 0x1db   : > { %v3722_v7 = vrot.slane %v3721_v29, 4  ;;  %v3717_v22 = vrot.slane %v3716_v50, 2  ;;  %v3729_v18 = vrot.slane %v3728_v3, 4  ;;  %v2765_v41 = vcombine.low %v1846_v36, %v19670_v8 }
 0x1dc   : > { %25731 = vst [vmem:[#allocation33_spill] sm:$0xff] %v19679_v16  ;;  %v1848_v47 = vcombine.low %v1426_v32, %v1428_v48  ;;  %v3711_v9 = vmax.f32 %v3709_v13, %v3710_v35  ;;  %v3736_v33 = vrot.slane %v3735_v2, 4  ;;  %v3742_v39 = vsel %vm905_vm3, %v2733_v30, -inf  ;;  %v19694_v30 = vpop.f32.mrf.mxu0 }
 0x1dd   : > { %v1849_v45 = vcombine.high %v1426_v32, %v1428_v48  ;;  %v1843_v26 = vrot.slane %v1815_v46, %v19360_v37  ;;  %v2741_v43 = vrot.slane %v2734_v5, %v19360_v37  ;;  %v2748_v62 = vrot.slane %v1844_v52, %v19360_v37 }
 0x1de   : > { %v1856_v38 = vrot.slane %v1848_v47, %v19360_v37  ;;  %v3699_v24 = vmax.f32 %v3697_v51, %v3698_v42  ;;  %v3706_v20 = vmax.f32 %v3704_v59, %v3705_v57  ;;  %v19689_v17 = vmax.f32 %v3685_v21, 0.0 }
 0x1df   : > { %v3723_v36 = vmax.f32 %v3721_v29, %v3722_v7  ;;  %v3718_v58 = vmax.f32 %v3716_v50, %v3717_v22  ;;  %v2772_v13 = vrot.slane %v2765_v41, %v19360_v37  ;;  %v2779_v35 = vrot.slane %v1843_v26, %v19360_v37 }
 0x1e0   : > { %25732 = vst [vmem:[#allocation34_spill] sm:$0xff] %v19689_v17  ;;  %v1863_v32 = vrot.slane %v1849_v45, %v19360_v37  ;;  %v3730_v46 = vmax.f32 %v3728_v3, %v3729_v18  ;;  %v3737_v5 = vmax.f32 %v3735_v2, %v3736_v33  ;;  %v3743_v48 = vrot.slane %v3742_v39, 4  ;;  %v19702_v3 = vpop.f32.mrf.mxu0  ;;  %v17640_v2 = vld [vmem:[%s25709_s29 + $0x184] ss:$8 sps:$4 sm:$0xff]  }
 0x1e1   : > { %v1864_v52 = vcombine.high %v1856_v38, %v1856_v38  ;;  %v19696_v28 = vmax.f32 %v3692_v11, 0.0  ;;  %v3712_v51 = vrot.slane %v3711_v9, 1  ;;  %v2749_v59 = vcombine.low %v2741_v43, %v2748_v62  ;;  %v17638_v11 = vld [vmem:[%s25709_s29 + $0x180] ss:$8 sps:$4 sm:$0xff]   ;;  %6185 = vmatprep.subr.bf16.mxu0 %v17640_v2 }
 0x1e2   : > { %v1872_v21 = vrot.slane %v1856_v38, %v19360_v37  ;;  %v19699_v29 = vmax.f32 %v3699_v24, 0.0  ;;  %v3724_v50 = vrot.slane %v3723_v36, 2  ;;  %v2750_v42 = vcombine.high %v2741_v43, %v2748_v62  ;;  %v17643_v43 = vld [vmem:[%s25709_s29 + $0x274] ss:$8 sps:$4 sm:$0xff]   ;;  %6186 = vmatpush2.bf16.msra.mxu0 %v17638_v11 }
 0x1e3   : > { %25733 = vst [vmem:[#allocation35_spill] sm:$0xff] %v19696_v28  ;;  %v1886_v57 = vrot.slane %v1864_v52, %v19360_v37  ;;  %v3719_v7 = vrot.slane %v3718_v58, 1  ;;  %v2780_v22 = vcombine.low %v2772_v13, %v2779_v35  ;;  %v1865_v41 = vcombine.high %v1863_v32, %v1863_v32  ;;  %6216 = vmatprep.subr.bf16.mxu1 %v17643_v43 }
 0x1e4   : > { %25734 = vst [vmem:[#allocation36_spill] sm:$0xff] %v19699_v29  ;;  %v1894_v47 = vcombine.high %v1872_v21, %v1872_v21  ;;  %v19710_v24 = vmax.f32 %v3706_v20, 0.0  ;;  %v3731_v18 = vrot.slane %v3730_v46, 2  ;;  %v3738_v33 = vrot.slane %v3737_v5, 2 }
 0x1e5   : > { %v3744_v45 = vmax.f32 %v3742_v39, %v3743_v48  ;;  %v3713_v62 = vmax.f32 %v3711_v9, %v3712_v51  ;;  %v2757_v38 = vrot.slane %v2749_v59, %v19360_v37  ;;  %v2781_v52 = vcombine.high %v2772_v13, %v2779_v35  ;;  %v19723_v9 = vpop.f32.mrf.mxu0 }
 0x1e6   : > { %25735 = vst [vmem:[#allocation37_spill] sm:$0xff] %v19710_v24  ;;  %v15862_v29 = vcombine.high %v19670_v8, %v1843_v26  ;;  %v3725_v17 = vmax.f32 %v3723_v36, %v3724_v50  ;;  %v2764_v15 = vrot.slane %v2750_v42, %v19360_v37  ;;  %v1896_v14 = vcombine.high %v1886_v57, %v1886_v57 }
 0x1e7   : > { %v2827_v20 = vcombine.low %v1886_v57, %v1894_v47  ;;  %v3720_v44 = vmax.f32 %v3718_v58, %v3719_v7  ;;  %v2788_v39 = vrot.slane %v2780_v22, %v19360_v37  ;;  %v1879_v48 = vrot.slane %v1863_v32, %v19360_v37  ;;  %v19733_v59 = vpop.f32.mrf.mxu0 }
 0x1e8   : > { %v19721_v27 = vrot.slane %v1865_v41, %v19360_v37  ;;  %v3732_v13 = vmax.f32 %v3730_v46, %v3731_v18  ;;  %v3739_v8 = vmax.f32 %v3737_v5, %v3738_v33  ;;  %v3745_v26 = vrot.slane %v3744_v45, 2 }
 0x1e9   : > { %v19727_v36 = vadd.f32 %v19638_v61, %v19340_v23  ;;  %v2795_v35 = vrot.slane %v2781_v52, %v19360_v37  ;;  %v2803_v58 = vrot.slane %v15862_v29, %v19360_v37  ;;  %v3749_v51 = vsel %vm905_vm3, %v2757_v38, -inf }
 0x1ea   : > { %v2810_v32 = vrot.slane %v1872_v21, %v19360_v37  ;;  %v3756_v50 = vsel %vm905_vm3, %v2764_v15, -inf  ;;  %v2834_v46 = vrot.slane %v2827_v20, %v19360_v37  ;;  %v2841_v5 = vrot.slane %v1896_v14, %v19360_v37  ;;  %v19745_v14 = vpop.f32.mrf.mxu0 }
 0x1eb   : > { %v1434_v61 = vadd.f32 %v19648_v60, %v19343_v25  ;;  %v3726_v42 = vrot.slane %v3725_v17, 1  ;;  %v3763_v57 = vsel %vm905_vm3, %v2788_v39, -inf  ;;  %v1895_v7 = vcombine.high %v1879_v48, %v1879_v48 }
 0x1ec   : > { %v2858_v29 = vcombine.low %v1879_v48, %v19721_v27  ;;  %v3733_v22 = vrot.slane %v3732_v13, 1  ;;  %v3746_v41 = vmax.f32 %v3744_v45, %v3745_v26  ;;  %v19742_v21 = vmax.f32 %v3713_v62, 0.0  ;;  %v19754_v31 = vpop.f32.mrf.mxu0 }
 0x1ed   : > { %v3750_v47 = vrot.slane %v3749_v51, 4  ;;  %v3757_v11 = vrot.slane %v3756_v50, 4  ;;  %v3770_v15 = vsel %vm905_vm3, %v2795_v35, -inf  ;;  %v2811_v2 = vcombine.low %v2803_v58, %v2810_v32  ;;  %25738 = vst [vmem:[#allocation40_spill] sm:$0xff] %v19754_v31 }
 0x1ee   : > { %25736 = vst [vmem:[#allocation38_spill] sm:$0xff] %v19742_v21  ;;  %v2812_v18 = vcombine.high %v2803_v58, %v2810_v32  ;;  %v3740_v33 = vrot.slane %v3739_v8, 1  ;;  %v3764_v60 = vrot.slane %v3763_v57, 4  ;;  %v2842_v43 = vcombine.low %v2834_v46, %v2841_v5 }
 0x1ef   : > { %v1898_v38 = vcombine.low %v19727_v36, %v1434_v61  ;;  %v19748_v52 = vmax.f32 %v3720_v44, 0.0  ;;  %v2843_v20 = vcombine.high %v2834_v46, %v2841_v5  ;;  %v2865_v45 = vrot.slane %v2858_v29, %v19360_v37 }
 0x1f0   : > { %v2872_v62 = vrot.slane %v1895_v7, %v19360_v37  ;;  %v3727_v39 = vmax.f32 %v3725_v17, %v3726_v42  ;;  %v3747_v48 = vrot.slane %v3746_v41, 1  ;;  %v3751_v26 = vmax.f32 %v3749_v51, %v3750_v47 }
 0x1f1   : > { %25737 = vst [vmem:[#allocation39_spill] sm:$0xff] %v19748_v52  ;;  %v3771_v35 = vrot.slane %v3770_v15, 4  ;;  %v3734_v21 = vmax.f32 %v3732_v13, %v3733_v22  ;;  %v3758_v58 = vmax.f32 %v3756_v50, %v3757_v11  ;;  %v2819_v32 = vrot.slane %v2811_v2, %v19360_v37  ;;  %v19764_v2 = vpop.f32.mrf.mxu0 }
 0x1f2   : > { %v2826_v53 = vrot.slane %v2812_v18, %v19360_v37  ;;  %v3741_v55 = vmax.f32 %v3739_v8, %v3740_v33  ;;  %v3765_v44 = vmax.f32 %v3763_v57, %v3764_v60  ;;  %v2850_v46 = vrot.slane %v2842_v43, %v19360_v37  ;;  %25740 = vst [vmem:[#allocation42_spill] sm:$0xff] %v19764_v2 }
 0x1f3   : > { %v1906_v5 = vrot.slane %v1898_v38, %v19360_v37  ;;  %v2857_v7 = vrot.slane %v2843_v20, %v19360_v37  ;;  %v2873_v17 = vcombine.low %v2865_v45, %v2872_v62  ;;  %v2874_v42 = vcombine.high %v2865_v45, %v2872_v62 }
 0x1f4   : > { %v1899_v51 = vcombine.high %v19727_v36, %v1434_v61  ;;  %v3748_v13 = vmax.f32 %v3746_v41, %v3747_v48  ;;  %v19760_v50 = vmax.f32 %v3727_v39, 0.0  ;;  %v3752_v29 = vrot.slane %v3751_v26, 2  ;;  %v19779_v48 = vpop.f32.mrf.mxu0 }
 0x1f5   : > { %v3772_v22 = vmax.f32 %v3770_v15, %v3771_v35  ;;  %v3759_v47 = vrot.slane %v3758_v58, 2  ;;  %v3777_v11 = vsel %vm905_vm3, %v2819_v32, -inf  ;;  %v3784_v8 = vsel %vm905_vm3, %v2826_v53, -inf  ;;  %25743 = vst [vmem:[#allocation45_spill] sm:$0xff] %v19779_v48  ;;  %v17649_v35 = vld [vmem:[%s25709_s29 + $0x374] ss:$8 sps:$4 sm:$0xff]  }
 0x1f6   : > { %25739 = vst [vmem:[#allocation41_spill] sm:$0xff] %v19760_v50  ;;  %v1914_v57 = vcombine.high %v1906_v5, %v1906_v5  ;;  %v19766_v18 = vmax.f32 %v3734_v21, 0.0  ;;  %v19768_v33 = vmax.f32 %v3741_v55, 0.0  ;;  %v3766_v60 = vrot.slane %v3765_v44, 2  ;;  %6277 = vmatprep.subr.bf16.mxu0 %v17649_v35  ;;  %v19793_v48 = vpop.f32.mrf.mxu0 }
 0x1f7   : > { %v3791_v36 = vsel %vm905_vm3, %v2850_v46, -inf  ;;  %v2881_v61 = vrot.slane %v2873_v17, %v19360_v37  ;;  %v2888_v41 = vrot.slane %v2874_v42, %v19360_v37  ;;  %v3798_v15 = vsel %vm905_vm3, %v2857_v7, -inf  ;;  %25745 = vst [vmem:[#allocation47_spill] sm:$0xff] %v19793_v48 }
 0x1f8   : > { %25741 = vst [vmem:[#allocation43_spill] sm:$0xff] %v19766_v18  ;;  %25742 = vst [vmem:[#allocation44_spill] sm:$0xff] %v19768_v33  ;;  %v1913_v43 = vrot.slane %v1899_v51, %v19360_v37  ;;  %v3778_v38 = vrot.slane %v3777_v11, 4  ;;  %v3785_v53 = vrot.slane %v3784_v8, 4  ;;  %v1897_v20 = vcombine.high %v19721_v27, %v19721_v27 }
 0x1f9   : > { %v1922_v21 = vrot.slane %v1906_v5, %v19360_v37  ;;  %v3753_v55 = vmax.f32 %v3751_v26, %v3752_v29  ;;  %v3760_v45 = vmax.f32 %v3758_v58, %v3759_v47  ;;  %v3773_v62 = vrot.slane %v3772_v22, 2 }
 0x1fa   : > { %v1936_v39 = vrot.slane %v1914_v57, %v19360_v37  ;;  %v19784_v32 = vmax.f32 %v3748_v13, 0.0  ;;  %v3767_v46 = vmax.f32 %v3765_v44, %v3766_v60  ;;  %v3792_v7 = vrot.slane %v3791_v36, 4 }
 0x1fb   : > { %v19788_v27 = vadd.f32 %v19658_v6, %v19340_v23  ;;  %v3799_v5 = vrot.slane %v3798_v15, 4  ;;  %v3805_v26 = vsel %vm905_vm3, %v2881_v61, -inf  ;;  %v1915_v58 = vcombine.high %v1913_v43, %v1913_v43 }
 0x1fc   : > { %25744 = vst [vmem:[#allocation46_spill] sm:$0xff] %v19784_v32  ;;  %v1929_v17 = vrot.slane %v1913_v43, %v19360_v37  ;;  %v3779_v42 = vmax.f32 %v3777_v11, %v3778_v38  ;;  %v3786_v51 = vmax.f32 %v3784_v8, %v3785_v53  ;;  %v3812_v29 = vsel %vm905_vm3, %v2888_v41, -inf  ;;  %v1465_v41 = vpop.f32.mrf.mxu0 }
 0x1fd   : > { %v2889_v47 = vcombine.low %v1897_v20, %v1922_v21  ;;  %v3754_v13 = vrot.slane %v3753_v55, 1  ;;  %v3761_v57 = vrot.slane %v3760_v45, 1  ;;  %v3774_v44 = vmax.f32 %v3772_v22, %v3773_v62 }
 0x1fe   : > { %v15863_v60 = vcombine.high %v1922_v21, %v1936_v39  ;;  %v3768_v6 = vrot.slane %v3767_v46, 1  ;;  %v3793_v2 = vmax.f32 %v3791_v36, %v3792_v7  ;;  %v3806_v33 = vrot.slane %v3805_v26, 4 }
 0x1ff   : > { %v19797_v61 = vadd.f32 %v19672_v54, %v19343_v25  ;;  %v3800_v43 = vmax.f32 %v3798_v15, %v3799_v5  ;;  %v3813_v35 = vrot.slane %v3812_v29, 4  ;;  %v1943_v11 = vrot.slane %v1915_v58, %v19360_v37  ;;  %v1466_v15 = vpop.f32.mrf.mxu0 }
 0x200   : > { %v1945_v8 = vcombine.high %v1929_v17, %v1929_v17  ;;  %v3780_v38 = vrot.slane %v3779_v42, 2  ;;  %v3787_v53 = vrot.slane %v3786_v51, 2  ;;  %v2896_v22 = vrot.slane %v2889_v47, %v19360_v37 }
 0x201   : > { %v2903_v20 = vrot.slane %v1936_v39, %v19360_v37  ;;  %v3775_v21 = vrot.slane %v3774_v44, 1  ;;  %v2927_v36 = vrot.slane %v15863_v60, %v19360_v37  ;;  %v2934_v62 = vrot.slane %v1929_v17, %v19360_v37 }
 0x202   : > { %v1948_v54 = vcombine.low %v19788_v27, %v19797_v61  ;;  %v3755_v7 = vmax.f32 %v3753_v55, %v3754_v13  ;;  %v3762_v5 = vmax.f32 %v3760_v45, %v3761_v57  ;;  %v3794_v58 = vrot.slane %v3793_v2, 2 }
 0x203   : > { %v3807_v48 = vmax.f32 %v3805_v26, %v3806_v33  ;;  %v3801_v41 = vrot.slane %v3800_v43, 2  ;;  %v3814_v50 = vmax.f32 %v3812_v29, %v3813_v35  ;;  %v1947_v31 = vcombine.high %v1943_v11, %v1943_v11 }
 0x204   : > { %v2951_v32 = vcombine.low %v1943_v11, %v1945_v8  ;;  %v3769_v47 = vmax.f32 %v3767_v46, %v3768_v6  ;;  %v3781_v18 = vmax.f32 %v3779_v42, %v3780_v38  ;;  %v3788_v39 = vmax.f32 %v3786_v51, %v3787_v53 }
 0x205   : > { %v2904_v4 = vcombine.low %v2896_v22, %v2903_v20  ;;  %v3776_v52 = vmax.f32 %v3774_v44, %v3775_v21  ;;  %v2905_v60 = vcombine.high %v2896_v22, %v2903_v20  ;;  %v2935_v10 = vcombine.low %v2927_v36, %v2934_v62 }
 0x206   : > { %v1956_v17 = vrot.slane %v1948_v54, %v19360_v37  ;;  %v19807_v24 = vmax.f32 %v3755_v7, 0.0  ;;  %v3795_v15 = vmax.f32 %v3793_v2, %v3794_v58  ;;  %v3808_v55 = vrot.slane %v3807_v48, 2 }
 0x207   : > { %v2936_v45 = vcombine.high %v2927_v36, %v2934_v62  ;;  %v3802_v13 = vmax.f32 %v3800_v43, %v3801_v41  ;;  %v3815_v33 = vrot.slane %v3814_v50, 2  ;;  %v2958_v26 = vrot.slane %v2951_v32, %v19360_v37 }
 0x208   : > { %25746 = vst [vmem:[#allocation48_spill] sm:$0xff] %v19807_v24  ;;  %v2965_v29 = vrot.slane %v1947_v31, %v19360_v37  ;;  %v19811_v46 = vmax.f32 %v3762_v5, 0.0  ;;  %v3782_v42 = vrot.slane %v3781_v18, 1  ;;  %v3789_v51 = vrot.slane %v3788_v39, 1 }
 0x209   : > { %v2912_v57 = vrot.slane %v2904_v4, %v19360_v37  ;;  %v19814_v44 = vmax.f32 %v3769_v47, 0.0  ;;  %v2919_v6 = vrot.slane %v2905_v60, %v19360_v37  ;;  %v2943_v2 = vrot.slane %v2935_v10, %v19360_v37 }
 0x20a   : > { %25747 = vst [vmem:[#allocation49_spill] sm:$0xff] %v19811_v46  ;;  %v1964_v35 = vcombine.high %v1956_v17, %v1956_v17  ;;  %v19818_v11 = vmax.f32 %v3776_v52, 0.0  ;;  %v3796_v43 = vrot.slane %v3795_v15, 1  ;;  %v3809_v8 = vmax.f32 %v3807_v48, %v3808_v55 }
 0x20b   : > { %25748 = vst [vmem:[#allocation50_spill] sm:$0xff] %v19814_v44  ;;  %v2950_v32 = vrot.slane %v2936_v45, %v19360_v37  ;;  %v3803_v31 = vrot.slane %v3802_v13, 1  ;;  %v3816_v38 = vmax.f32 %v3814_v50, %v3815_v33  ;;  %v2966_v53 = vcombine.low %v2958_v26, %v2965_v29  ;;  %v25796_v44 = vld [vmem:[#allocation23_spill] sm:$0xff] }
 0x20c   : > { %25749 = vst [vmem:[#allocation51_spill] sm:$0xff] %v19818_v11  ;;  %v2967_v22 = vcombine.high %v2958_v26, %v2965_v29  ;;  %v3783_v20 = vmax.f32 %v3781_v18, %v3782_v42  ;;  %v3790_v21 = vmax.f32 %v3788_v39, %v3789_v51  ;;  %v3819_v4 = vsel %vm905_vm3, %v2912_v57, -inf }
 0x20d   : > { %v1949_v36 = vcombine.high %v19788_v27, %v19797_v61  ;;  %v3826_v10 = vsel %vm905_vm3, %v2919_v6, -inf  ;;  %v3833_v52 = vsel %vm905_vm3, %v2943_v2, -inf  ;;  %v1972_v62 = vrot.slane %v1956_v17, %v19360_v37 }
 0x20e   : > { %v1986_v48 = vrot.slane %v1964_v35, %v19360_v37  ;;  %v3797_v54 = vmax.f32 %v3795_v15, %v3796_v43  ;;  %v3810_v7 = vrot.slane %v3809_v8, 1  ;;  %v3840_v50 = vsel %vm905_vm3, %v2950_v32, -inf }
 0x20f   : > { %v1442_v18 = vadd.f32 %v19682_v1, %v19340_v23  ;;  %v2974_v5 = vrot.slane %v2966_v53, %v19360_v37  ;;  %v2981_v58 = vrot.slane %v2967_v22, %v19360_v37  ;;  %v3820_v27 = vrot.slane %v3819_v4, 4 }
 0x210   : > { %v1444_v61 = vadd.f32 %v19694_v30, %v19343_v25  ;;  %v3817_v41 = vrot.slane %v3816_v38, 1  ;;  %v3827_v47 = vrot.slane %v3826_v10, 4  ;;  %v3834_v39 = vrot.slane %v3833_v52, 4 }
 0x211   : > { %v1963_v60 = vrot.slane %v1949_v36, %v19360_v37  ;;  %v3804_v17 = vmax.f32 %v3802_v13, %v3803_v31  ;;  %v3841_v15 = vrot.slane %v3840_v50, 4  ;;  %v1994_v55 = vcombine.high %v1972_v62, %v1972_v62 }
 0x212   : > { %v2982_v45 = vcombine.low %v1972_v62, %v1986_v48  ;;  %v19836_v33 = vmax.f32 %v3783_v20, 0.0  ;;  %v19838_v1 = vmax.f32 %v3790_v21, 0.0  ;;  %v1996_v29 = vcombine.high %v1986_v48, %v1986_v48 }
 0x213   : > { %v1979_v26 = vrot.slane %v1963_v60, %v19360_v37  ;;  %v3821_v42 = vmax.f32 %v3819_v4, %v3820_v27  ;;  %v3847_v51 = vsel %vm905_vm3, %v2974_v5, -inf  ;;  %v3854_v30 = vsel %vm905_vm3, %v2981_v58, -inf }
 0x214   : > { %25750 = vst [vmem:[#allocation52_spill] sm:$0xff] %v19836_v33  ;;  %25751 = vst [vmem:[#allocation53_spill] sm:$0xff] %v19838_v1  ;;  %v1998_v57 = vcombine.low %v1442_v18, %v1444_v61  ;;  %v3811_v6 = vmax.f32 %v3809_v8, %v3810_v7  ;;  %v3818_v2 = vmax.f32 %v3816_v38, %v3817_v41  ;;  %v3848_v22 = vrot.slane %v3847_v51, 4 }
 0x215   : > { %v3828_v35 = vmax.f32 %v3826_v10, %v3827_v47  ;;  %v3835_v13 = vmax.f32 %v3833_v52, %v3834_v39  ;;  %v3842_v43 = vmax.f32 %v3840_v50, %v3841_v15  ;;  %v1965_v32 = vcombine.high %v1963_v60, %v1963_v60 }
 0x216   : > { %v2989_v31 = vrot.slane %v2982_v45, %v19360_v37  ;;  %v2996_v53 = vrot.slane %v1994_v55, %v19360_v37  ;;  %v3855_v20 = vrot.slane %v3854_v30, 4  ;;  %v3013_v21 = vcombine.low %v1996_v29, %v1979_v26 }
 0x217   : > { %v2006_v4 = vrot.slane %v1998_v57, %v19360_v37  ;;  %v19846_v36 = vmax.f32 %v3797_v54, 0.0  ;;  %v19848_v62 = vmax.f32 %v3804_v17, 0.0  ;;  %v3822_v48 = vrot.slane %v3821_v42, 2 }
 0x218   : > { %v1999_v8 = vcombine.high %v1442_v18, %v1444_v61  ;;  %v3829_v38 = vrot.slane %v3828_v35, 2  ;;  %v3836_v10 = vrot.slane %v3835_v13, 2  ;;  %v19851_v50 = vmax.f32 %v3811_v6, 0.0 }
 0x219   : > { %25752 = vst [vmem:[#allocation54_spill] sm:$0xff] %v19846_v36  ;;  %v2014_v52 = vcombine.high %v2006_v4, %v2006_v4  ;;  %v2022_v7 = vrot.slane %v2006_v4, %v19360_v37  ;;  %v3843_v5 = vrot.slane %v3842_v43, 2  ;;  %v1993_v58 = vrot.slane %v1965_v32, %v19360_v37 }
 0x21a   : > { %25753 = vst [vmem:[#allocation55_spill] sm:$0xff] %v19851_v50  ;;  %v2997_v27 = vcombine.low %v2989_v31, %v2996_v53  ;;  %v3849_v41 = vmax.f32 %v3847_v51, %v3848_v22  ;;  %v3856_v47 = vmax.f32 %v3854_v30, %v3855_v20  ;;  %v2998_v39 = vcombine.high %v2989_v31, %v2996_v53 }
 0x21b   : > { %v3020_v54 = vrot.slane %v3013_v21, %v19360_v37  ;;  %v3027_v60 = vrot.slane %v1993_v58, %v19360_v37  ;;  %v2013_v18 = vrot.slane %v1999_v8, %v19360_v37  ;;  %v2036_v61 = vrot.slane %v2014_v52, %v19360_v37 }
 0x21c   : > { %v2044_v17 = vcombine.high %v2022_v7, %v2022_v7  ;;  %v19858_v15 = vmax.f32 %v3818_v2, 0.0  ;;  %v3823_v55 = vmax.f32 %v3821_v42, %v3822_v48  ;;  %v3830_v45 = vmax.f32 %v3828_v35, %v3829_v38 }
 0x21d   : > { %v3837_v29 = vmax.f32 %v3835_v13, %v3836_v10  ;;  %v3844_v57 = vmax.f32 %v3842_v43, %v3843_v5  ;;  %v3005_v6 = vrot.slane %v2997_v27, %v19360_v37  ;;  %v15864_v51 = vcombine.high %v1979_v26, %v1993_v58 }
 0x21e   : > { %25754 = vst [vmem:[#allocation56_spill] sm:$0xff] %v19858_v15  ;;  %v19863_v30 = vadd.f32 %v19702_v3, %v19340_v23  ;;  %v3850_v32 = vrot.slane %v3849_v41, 2  ;;  %v3857_v31 = vrot.slane %v3856_v47, 2  ;;  %v2046_v53 = vcombine.high %v2036_v61, %v2036_v61 }
 0x21f   : > { %v3075_v22 = vcombine.low %v2036_v61, %v2044_v17  ;;  %v3012_v20 = vrot.slane %v2998_v39, %v19360_v37  ;;  %v3028_v21 = vcombine.low %v3020_v54, %v3027_v60  ;;  %v2015_v2 = vcombine.high %v2013_v18, %v2013_v18 }
 0x220   : > { %v1448_v42 = vadd.f32 %v19723_v9, %v19343_v25  ;;  %v3824_v35 = vrot.slane %v3823_v55, 1  ;;  %v3831_v13 = vrot.slane %v3830_v45, 1  ;;  %v3838_v43 = vrot.slane %v3837_v29, 1 }
 0x221   : > { %v3029_v4 = vcombine.high %v3020_v54, %v3027_v60  ;;  %v3845_v26 = vrot.slane %v3844_v57, 1  ;;  %v3051_v48 = vrot.slane %v15864_v51, %v19360_v37  ;;  %v3861_v3 = vsel %vm905_vm3, %v3005_v6, -inf }
 0x222   : > { %v3058_v8 = vrot.slane %v2022_v7, %v19360_v37  ;;  %v3851_v38 = vmax.f32 %v3849_v41, %v3850_v32  ;;  %v3858_v10 = vmax.f32 %v3856_v47, %v3857_v31  ;;  %v3082_v52 = vrot.slane %v3075_v22, %v19360_v37 }
 0x223   : > { %v3089_v5 = vrot.slane %v2046_v53, %v19360_v37  ;;  %v3036_v58 = vrot.slane %v3028_v21, %v19360_v37  ;;  %v3868_v9 = vsel %vm905_vm3, %v3012_v20, -inf  ;;  %v2029_v27 = vrot.slane %v2013_v18, %v19360_v37 }
 0x224   : > { %v2043_v39 = vrot.slane %v2015_v2, %v19360_v37  ;;  %v3825_v54 = vmax.f32 %v3823_v55, %v3824_v35  ;;  %v3832_v60 = vmax.f32 %v3830_v45, %v3831_v13  ;;  %v3043_v61 = vrot.slane %v3029_v4, %v19360_v37 }
 0x225   : > { %v3862_v17 = vrot.slane %v3861_v3, 4  ;;  %v3839_v7 = vmax.f32 %v3837_v29, %v3838_v43  ;;  %v3059_v41 = vcombine.low %v3051_v48, %v3058_v8  ;;  %v3060_v47 = vcombine.high %v3051_v48, %v3058_v8 }
 0x226   : > { %v2048_v6 = vcombine.low %v19863_v30, %v1448_v42  ;;  %v3846_v51 = vmax.f32 %v3844_v57, %v3845_v26  ;;  %v3852_v32 = vrot.slane %v3851_v38, 1  ;;  %v3869_v31 = vrot.slane %v3868_v9, 4 }
 0x227   : > { %v3090_v53 = vcombine.low %v3082_v52, %v3089_v5  ;;  %v3859_v22 = vrot.slane %v3858_v10, 1  ;;  %v3875_v20 = vsel %vm905_vm3, %v3036_v58, -inf  ;;  %v2045_v18 = vcombine.high %v2029_v27, %v2029_v27 }
 0x228   : > { %v3106_v21 = vcombine.low %v2029_v27, %v2043_v39  ;;  %v19880_v2 = vmax.f32 %v3825_v54, 0.0  ;;  %v3863_v55 = vmax.f32 %v3861_v3, %v3862_v17  ;;  %v3882_v45 = vsel %vm905_vm3, %v3043_v61, -inf }
 0x229   : > { %v3091_v35 = vcombine.high %v3082_v52, %v3089_v5  ;;  %v19883_v29 = vmax.f32 %v3832_v60, 0.0  ;;  %v3067_v13 = vrot.slane %v3059_v41, %v19360_v37  ;;  %v3074_v57 = vrot.slane %v3060_v47, %v19360_v37 }
 0x22a   : > { %25755 = vst [vmem:[#allocation57_spill] sm:$0xff] %v19880_v2  ;;  %v2056_v43 = vrot.slane %v2048_v6, %v19360_v37  ;;  %v3870_v4 = vmax.f32 %v3868_v9, %v3869_v31  ;;  %v3876_v26 = vrot.slane %v3875_v20, 4  ;;  %v3098_v48 = vrot.slane %v3090_v53, %v19360_v37 }
 0x22b   : > { %25756 = vst [vmem:[#allocation58_spill] sm:$0xff] %v19883_v29  ;;  %v2049_v8 = vcombine.high %v19863_v30, %v1448_v42  ;;  %v19890_v58 = vmax.f32 %v3839_v7, 0.0  ;;  %v3883_v3 = vrot.slane %v3882_v45, 4  ;;  %v3113_v27 = vrot.slane %v3106_v21, %v19360_v37 }
 0x22c   : > { %v3120_v52 = vrot.slane %v2045_v18, %v19360_v37  ;;  %v19894_v5 = vmax.f32 %v3846_v51, 0.0  ;;  %v3864_v54 = vrot.slane %v3863_v55, 2  ;;  %v2047_v60 = vcombine.high %v2043_v39, %v2043_v39 }
 0x22d   : > { %25757 = vst [vmem:[#allocation59_spill] sm:$0xff] %v19890_v58  ;;  %v3105_v61 = vrot.slane %v3091_v35, %v19360_v37  ;;  %v3889_v9 = vsel %vm905_vm3, %v3067_v13, -inf  ;;  %v3896_v17 = vsel %vm905_vm3, %v3074_v57, -inf  ;;  %v2064_v41 = vcombine.high %v2056_v43, %v2056_v43 }
 0x22e   : > { %25758 = vst [vmem:[#allocation60_spill] sm:$0xff] %v19894_v5  ;;  %v2072_v30 = vrot.slane %v2056_v43, %v19360_v37  ;;  %v3871_v42 = vrot.slane %v3870_v4, 2  ;;  %v3877_v7 = vmax.f32 %v3875_v20, %v3876_v26  ;;  %v3903_v47 = vsel %vm905_vm3, %v3098_v48, -inf  ;;  %v25786_v5 = vld [vmem:[#allocation32_spill] sm:$0xff] }
 0x22f   : > { %v2063_v6 = vrot.slane %v2049_v8, %v19360_v37  ;;  %v3853_v31 = vmax.f32 %v3851_v38, %v3852_v32  ;;  %v3860_v51 = vmax.f32 %v3858_v10, %v3859_v22  ;;  %v3884_v53 = vmax.f32 %v3882_v45, %v3883_v3 }
 0x230   : > { %v3121_v18 = vcombine.low %v3113_v27, %v3120_v52  ;;  %v3865_v39 = vmax.f32 %v3863_v55, %v3864_v54  ;;  %v3122_v21 = vcombine.high %v3113_v27, %v3120_v52  ;;  %v3890_v35 = vrot.slane %v3889_v9, 4 }
 0x231   : > { %v3897_v58 = vrot.slane %v3896_v17, 4  ;;  %v3904_v13 = vrot.slane %v3903_v47, 4  ;;  %v3910_v57 = vsel %vm905_vm3, %v3105_v61, -inf  ;;  %v2086_v2 = vrot.slane %v2064_v41, %v19360_v37 }
 0x232   : > { %v3137_v43 = vcombine.low %v2047_v60, %v2072_v30  ;;  %v3872_v50 = vmax.f32 %v3870_v4, %v3871_v42  ;;  %v3878_v20 = vrot.slane %v3877_v7, 2  ;;  %v2065_v26 = vcombine.high %v2063_v6, %v2063_v6 }
 0x233   : > { %v2079_v48 = vrot.slane %v2063_v6, %v19360_v37  ;;  %v19905_v8 = vmax.f32 %v3853_v31, 0.0  ;;  %v19907_v38 = vmax.f32 %v3860_v51, 0.0  ;;  %v3885_v10 = vrot.slane %v3884_v53, 2 }
 0x234   : > { %v3129_v32 = vrot.slane %v3121_v18, %v19360_v37  ;;  %v3866_v22 = vrot.slane %v3865_v39, 1  ;;  %v3891_v55 = vmax.f32 %v3889_v9, %v3890_v35  ;;  %v3898_v45 = vmax.f32 %v3896_v17, %v3897_v58 }
 0x235   : > { %25759 = vst [vmem:[#allocation61_spill] sm:$0xff] %v19905_v8  ;;  %25760 = vst [vmem:[#allocation62_spill] sm:$0xff] %v19907_v38  ;;  %v3911_v3 = vrot.slane %v3910_v57, 4  ;;  %v3136_v27 = vrot.slane %v3122_v21, %v19360_v37  ;;  %v3905_v52 = vmax.f32 %v3903_v47, %v3904_v13  ;;  %v3144_v4 = vrot.slane %v3137_v43, %v19360_v37 }
 0x236   : > { %v3151_v54 = vrot.slane %v2086_v2, %v19360_v37  ;;  %v3873_v60 = vrot.slane %v3872_v50, 1  ;;  %v3879_v61 = vmax.f32 %v3877_v7, %v3878_v20  ;;  %v2093_v41 = vrot.slane %v2065_v26, %v19360_v37 }
 0x237   : > { %v2095_v42 = vcombine.high %v2079_v48, %v2079_v48  ;;  %v3886_v6 = vmax.f32 %v3884_v53, %v3885_v10  ;;  %v3917_v31 = vsel %vm905_vm3, %v3129_v32, -inf  ;;  %v15865_v51 = vcombine.high %v2072_v30, %v2086_v2 }
 0x238   : > { %v19917_v58 = vadd.f32 %v19733_v59, %v19340_v23  ;;  %v3867_v9 = vmax.f32 %v3865_v39, %v3866_v22  ;;  %v3892_v17 = vrot.slane %v3891_v55, 2  ;;  %v3912_v47 = vmax.f32 %v3910_v57, %v3911_v3 }
 0x239   : > { %v1454_v18 = vadd.f32 %v19745_v14, %v19343_v25  ;;  %v3899_v21 = vrot.slane %v3898_v45, 2  ;;  %v3906_v35 = vrot.slane %v3905_v52, 2  ;;  %v3924_v7 = vsel %vm905_vm3, %v3136_v27, -inf }
 0x23a   : > { %v3152_v13 = vcombine.low %v3144_v4, %v3151_v54  ;;  %v3918_v43 = vrot.slane %v3917_v31, 4  ;;  %v2097_v53 = vcombine.high %v2093_v41, %v2093_v41  ;;  %v3153_v20 = vcombine.high %v3144_v4, %v3151_v54 }
 0x23b   : > { %v3199_v26 = vcombine.low %v2093_v41, %v2095_v42  ;;  %v3874_v2 = vmax.f32 %v3872_v50, %v3873_v60  ;;  %v3175_v30 = vrot.slane %v15865_v51, %v19360_v37  ;;  %v3182_v59 = vrot.slane %v2079_v48, %v19360_v37 }
 0x23c   : > { %v2098_v39 = vcombine.low %v19917_v58, %v1454_v18  ;;  %v3880_v57 = vrot.slane %v3879_v61, 1  ;;  %v3887_v10 = vrot.slane %v3886_v6, 1  ;;  %v3913_v32 = vrot.slane %v3912_v47, 2 }
 0x23d   : > { %v3925_v14 = vrot.slane %v3924_v7, 4  ;;  %v3893_v22 = vmax.f32 %v3891_v55, %v3892_v17  ;;  %v3900_v3 = vmax.f32 %v3898_v45, %v3899_v21  ;;  %v3907_v8 = vmax.f32 %v3905_v52, %v3906_v35 }
 0x23e   : > { %v3160_v27 = vrot.slane %v3152_v13, %v19360_v37  ;;  %v3919_v38 = vmax.f32 %v3917_v31, %v3918_v43  ;;  %v3167_v4 = vrot.slane %v3153_v20, %v19360_v37  ;;  %v3206_v50 = vrot.slane %v3199_v26, %v19360_v37 }
 0x23f   : > { %v3213_v54 = vrot.slane %v2097_v53, %v19360_v37  ;;  %v19929_v60 = vmax.f32 %v3867_v9, 0.0  ;;  %v3183_v48 = vcombine.low %v3175_v30, %v3182_v59  ;;  %v3184_v41 = vcombine.high %v3175_v30, %v3182_v59 }
 0x240   : > { %v2106_v42 = vrot.slane %v2098_v39, %v19360_v37  ;;  %v3881_v51 = vmax.f32 %v3879_v61, %v3880_v57  ;;  %v19932_v36 = vmax.f32 %v3874_v2, 0.0  ;;  %v3914_v55 = vmax.f32 %v3912_v47, %v3913_v32 }
 0x241   : > { %25761 = vst [vmem:[#allocation63_spill] sm:$0xff] %v19929_v60  ;;  %v3926_v45 = vmax.f32 %v3924_v7, %v3925_v14  ;;  %v3888_v52 = vmax.f32 %v3886_v6, %v3887_v10  ;;  %v3894_v17 = vrot.slane %v3893_v22, 1  ;;  %v3901_v31 = vrot.slane %v3900_v3, 1  ;;  %v25787_v60 = vld [vmem:[#allocation34_spill] sm:$0xff] }
 0x242   : > { %25762 = vst [vmem:[#allocation64_spill] sm:$0xff] %v19932_v36  ;;  %v3931_v21 = vsel %vm905_vm3, %v3160_v27, -inf  ;;  %v3908_v35 = vrot.slane %v3907_v8, 1  ;;  %v3920_v13 = vrot.slane %v3919_v38, 2  ;;  %v3214_v43 = vcombine.low %v3206_v50, %v3213_v54  ;;  %v25801_v36 = vld [vmem:[#allocation24_spill] sm:$0xff] }
 0x243   : > { %v3938_v9 = vsel %vm905_vm3, %v3167_v4, -inf  ;;  %v3191_v53 = vrot.slane %v3183_v48, %v19360_v37  ;;  %v3198_v20 = vrot.slane %v3184_v41, %v19360_v37  ;;  %v2099_v61 = vcombine.high %v19917_v58, %v1454_v18 }
 0x244   : > { %v2114_v26 = vcombine.high %v2106_v42, %v2106_v42  ;;  %v3915_v2 = vrot.slane %v3914_v55, 1  ;;  %v3927_v47 = vrot.slane %v3926_v45, 2  ;;  %v3215_v7 = vcombine.high %v3206_v50, %v3213_v54 }
 0x245   : > { %v3932_v6 = vrot.slane %v3931_v21, 4  ;;  %v19939_v30 = vmax.f32 %v3881_v51, 0.0  ;;  %v3895_v59 = vmax.f32 %v3893_v22, %v3894_v17  ;;  %v3902_v39 = vmax.f32 %v3900_v3, %v3901_v31 }
 0x246   : > { %v3939_v57 = vrot.slane %v3938_v9, 4  ;;  %v19941_v10 = vmax.f32 %v3888_v52, 0.0  ;;  %v3909_v32 = vmax.f32 %v3907_v8, %v3908_v35  ;;  %v3921_v14 = vmax.f32 %v3919_v38, %v3920_v13 }
 0x247   : > { %25763 = vst [vmem:[#allocation65_spill] sm:$0xff] %v19939_v30  ;;  %v3222_v27 = vrot.slane %v3214_v43, %v19360_v37  ;;  %v3945_v4 = vsel %vm905_vm3, %v3191_v53, -inf  ;;  %v3952_v58 = vsel %vm905_vm3, %v3198_v20, -inf  ;;  %v2113_v18 = vrot.slane %v2099_v61, %v19360_v37 }
 0x248   : > { %25764 = vst [vmem:[#allocation66_spill] sm:$0xff] %v19941_v10  ;;  %v2136_v50 = vrot.slane %v2114_v26, %v19360_v37  ;;  %v3916_v54 = vmax.f32 %v3914_v55, %v3915_v2  ;;  %v3928_v48 = vmax.f32 %v3926_v45, %v3927_v47  ;;  %v3229_v22 = vrot.slane %v3215_v7, %v19360_v37  ;;  %v25798_v10 = vld [vmem:[#allocation42_spill] sm:$0xff] }
 0x249   : > { %v3933_v3 = vmax.f32 %v3931_v21, %v3932_v6  ;;  %v19949_v41 = vmax.f32 %v3895_v59, 0.0  ;;  %v19951_v51 = vmax.f32 %v3902_v39, 0.0  ;;  %v3940_v8 = vmax.f32 %v3938_v9, %v3939_v57 }
 0x24a   : > { %v2122_v38 = vrot.slane %v2106_v42, %v19360_v37  ;;  %v3922_v52 = vrot.slane %v3921_v14, 1  ;;  %v19954_v17 = vmax.f32 %v3909_v32, 0.0  ;;  %v3946_v31 = vrot.slane %v3945_v4, 4 }
 0x24b   : > { %25765 = vst [vmem:[#allocation67_spill] sm:$0xff] %v19949_v41  ;;  %25766 = vst [vmem:[#allocation68_spill] sm:$0xff] %v19951_v51  ;;  %v3953_v35 = vrot.slane %v3952_v58, 4  ;;  %v3959_v13 = vsel %vm905_vm3, %v3222_v27, -inf  ;;  %v2115_v43 = vcombine.high %v2113_v18, %v2113_v18  ;;  %v19958_v55 = vrot.slane %v2113_v18, %v19360_v37  ;;  %v25785_v41 = vld [vmem:[#allocation46_spill] sm:$0xff] }
 0x24c   : > { %25767 = vst [vmem:[#allocation69_spill] sm:$0xff] %v19954_v17  ;;  %v2146_v45 = vcombine.high %v2136_v50, %v2136_v50  ;;  %v3929_v21 = vrot.slane %v3928_v48, 1  ;;  %v19960_v53 = vmax.f32 %v3916_v54, 0.0  ;;  %v3934_v20 = vrot.slane %v3933_v3, 2  ;;  %v25784_v17 = vld [vmem:[#allocation30_spill] sm:$0xff] }
 0x24d   : > { %v3966_v9 = vsel %vm905_vm3, %v3229_v22, -inf  ;;  %v3941_v61 = vrot.slane %v3940_v8, 2  ;;  %v2144_v42 = vcombine.high %v2122_v38, %v2122_v38  ;;  %v3230_v26 = vcombine.low %v2122_v38, %v2136_v50 }
 0x24e   : > { %25768 = vst [vmem:[#allocation70_spill] sm:$0xff] %v19960_v53  ;;  %v3551_v2 = vrot.slane %v19468_v0, 1  ;;  %v19964_v47 = vmax.f32 %v3921_v14, %v3922_v52  ;;  %v3947_v7 = vmax.f32 %v3945_v4, %v3946_v31  ;;  %v3954_v6 = vmax.f32 %v3952_v58, %v3953_v35 }
 0x24f   : > { %v3960_v59 = vrot.slane %v3959_v13, 4  ;;  %v19967_v39 = vrot.slane %v2115_v43, %v19360_v37  ;;  %v3261_v57 = vcombine.low %v2146_v45, %v19958_v55  ;;  %v3537_v32 = vrot.slane %v19464_v56, 1 }
 0x250   : > { %v3577_v27 = vrot.slane %v19495_v34, 2  ;;  %v19972_v18 = vmax.f32 %v3933_v3, %v3934_v20  ;;  %v3967_v54 = vrot.slane %v3966_v9, 4  ;;  %v3565_v50 = vrot.slane %v19501_v40, 1 }
 0x251   : > { %v3593_v14 = vrot.slane %v19516_v12, 1  ;;  %v19976_v22 = vmax.f32 %v3940_v8, %v3941_v61  ;;  %v3237_v4 = vrot.slane %v3230_v26, %v19360_v37  ;;  %v3244_v58 = vrot.slane %v2144_v42, %v19360_v37 }
 0x252   : > { %v19981_v38 = vmax.f32 %v19468_v0, %v3551_v2  ;;  %v19983_v52 = vmax.f32 %v3928_v48, %v3929_v21  ;;  %v3948_v31 = vrot.slane %v3947_v7, 2  ;;  %v3955_v35 = vrot.slane %v3954_v6, 2 }
 0x253   : > { %v3578_v3 = vmax.f32 %v19495_v34, %v3577_v27  ;;  %v19986_v43 = vmax.f32 %v3959_v13, %v3960_v59  ;;  %v3268_v45 = vrot.slane %v3261_v57, %v19360_v37  ;;  %v3275_v8 = vrot.slane %v19967_v39, %v19360_v37  ;;  %v25781_v34 = vld [vmem:[#allocation19_spill] sm:$0xff] }
 0x254   : > { %v3538_v20 = vmax.f32 %v19464_v56, %v3537_v32  ;;  %v19992_v61 = vmax.f32 %v3966_v9, %v3967_v54  ;;  %v3566_v0 = vmax.f32 %v19501_v40, %v3565_v50  ;;  %v3594_v48 = vmax.f32 %v19516_v12, %v3593_v14 }
 0x255   : > { %v3579_v42 = vrot.slane %v3578_v3, 1  ;;  %v3245_v13 = vcombine.low %v3237_v4, %v3244_v58  ;;  %v4074_v26 = vmax.f32 %v19981_v38, 0.0  ;;  %v19999_v2 = vmax.f32 %v3947_v7, %v3948_v31 }
 0x256   : > { %v20001_v59 = vmax.f32 %v3954_v6, %v3955_v35  ;;  %v3246_v56 = vcombine.high %v3237_v4, %v3244_v58  ;;  %v3276_v9 = vcombine.low %v3268_v45, %v3275_v8  ;;  %v4072_v32 = vmax.f32 %v3538_v20, 0.0 }
 0x257   : > { %v3580_v57 = vmax.f32 %v3578_v3, %v3579_v42  ;;  %v20003_v40 = vmax.f32 %v3566_v0, 0.0  ;;  %v20007_v27 = vmax.f32 %v3594_v48, 0.0  ;;  %v3253_v54 = vrot.slane %v3245_v13, %v19360_v37  ;;  %v25772_v42 = vld [vmem:[#allocation37_spill] sm:$0xff] }
 0x258   : > { %v3277_v50 = vcombine.high %v3268_v45, %v3275_v8  ;;  %v4229_v7 = vsel %vm4215_vm9, %v4074_v26, %v4072_v32  ;;  %v4243_v4 = vsel %vm4215_vm9, %v19654_v49, %v19646_v19  ;;  %v3260_v58 = vrot.slane %v3246_v56, %v19360_v37  ;;  %v25773_v13 = vld [vmem:[#allocation25_spill] sm:$0xff]  ;;  %v25774_v56 = vld [vmem:[#allocation39_spill] sm:$0xff]  ;;  %v25775_v32 = vld [vmem:[#allocation20_spill] sm:$0xff] }
 0x259   : > { %25769 = vst [vmem:[#allocation71_spill] sm:$0xff] %v20003_v40  ;;  %v20005_v12 = vmax.f32 %v3580_v57, 0.0  ;;  %25771 = vst [vmem:[#allocation73_spill] sm:$0xff] %v20007_v27  ;;  %v4230_v14 = vsel %vm4217_vm10, %v20003_v40, %v4229_v7  ;;  %v4244_v31 = vsel %vm4217_vm10, %v19679_v16, %v4243_v4  ;;  %v3284_v35 = vrot.slane %v3276_v9, %v19360_v37 }
 0x25a   : > { %v4245_v45 = vsel %vm4219_vm11, %v19696_v28, %v4244_v31  ;;  %v3291_v8 = vrot.slane %v3277_v50, %v19360_v37  ;;  %v3973_v20 = vsel %vm905_vm3, %v3253_v54, -inf  ;;  %v3572_v7 = vrot.slane %v25775_v32, 1  ;;  %v25778_v54 = vld [vmem:[#allocation43_spill] sm:$0xff] }
 0x25b   : > { %25770 = vst [vmem:[#allocation72_spill] sm:$0xff] %v20005_v12  ;;  %v4231_v38 = vsel %vm4219_vm11, %v20005_v12, %v4230_v14  ;;  %v4246_v48 = vsel %vm4221_vm12, %v25772_v42, %v4245_v45  ;;  %v25776_v14 = vld [vmem:[#allocation21_spill] sm:$0xff]  ;;  %v25782_v45 = vmax.f32 %v25781_v34, 0.0  ;;  %v3987_v51 = vsel %vm905_vm3, %v3284_v35, -inf  ;;  %v25792_v34 = vld [vmem:[#allocation38_spill] sm:$0xff] }
 0x25c   : > { %v4232_v3 = vsel %vm4221_vm12, %v20007_v27, %v4231_v38  ;;  %v4247_v9 = vsel %vm4223_vm13, %v25774_v56, %v4246_v48  ;;  %v4075_v4 = vmax.f32 %v25776_v14, 0.0  ;;  %v25777_v38 = vld [vmem:[#allocation27_spill] sm:$0xff]  ;;  %v3573_v14 = vmax.f32 %v25775_v32, %v3572_v7  ;;  %v25789_v32 = vld [vmem:[#allocation36_spill] sm:$0xff] }
 0x25d   : > { %v4233_v0 = vsel %vm4223_vm13, %v19579_v63, %v4232_v3  ;;  %v4248_v31 = vsel %vm4225_vm14, %v25778_v54, %v4247_v9  ;;  %v25779_v3 = vld [vmem:[#allocation18_spill] sm:$0xff]  ;;  %v4297_v7 = vsel %vm4215_vm9, %v20003_v40, %v4074_v26 }
 0x25e   : > { %v4234_v57 = vsel %vm4225_vm14, %v25773_v13, %v4233_v0  ;;  %v25780_v6 = vmax.f32 %v25779_v3, 0.0  ;;  %v25783_v0 = vld [vmem:[#allocation28_spill] sm:$0xff]  ;;  %v4249_v53 = vsel %vm4227_vm15, %v25785_v41, %v4248_v31  ;;  %v3980_v3 = vsel %vm905_vm3, %v3260_v58, -inf  ;;  %v25795_v40 = vld [vmem:[#allocation22_spill] sm:$0xff] }
 0x25f   : > { %v4235_v50 = vsel %vm4227_vm15, %v25777_v38, %v4234_v57  ;;  %v4236_v48 = vsel %vm4215_vm9, %v25784_v17, %v25783_v0  ;;  %v4290_v33 = vsel %vm4215_vm9, %v4075_v4, %v25782_v45  ;;  %v20064_v31 = vmax.f32 %v3573_v14, 0.0 }
 0x260   : > { %v4216_v21 = vsel %vm4215_vm9, %v25782_v45, %v25780_v6  ;;  %v4237_v9 = vsel %vm4217_vm10, %v25786_v5, %v4236_v48  ;;  %v4697_v30 = vpack.c.bf16 %v4249_v53, %v4235_v50  ;;  %v3969_v58 = vrot.slane %v19992_v61, 2  ;;  %v25790_v53 = vld [vmem:[#allocation40_spill] sm:$0xff] }
 0x261   : > { %v4218_v57 = vsel %vm4217_vm10, %v4075_v4, %v4216_v21  ;;  %v4238_v6 = vsel %vm4219_vm11, %v25787_v60, %v4237_v9  ;;  %25788 = vst [vmem:[#allocation20_spill] sm:$0xff] %v20064_v31  ;;  %v20073_v50 = vadd.f32 %v25790_v53, %v19340_v23  ;;  %v4298_v35 = vsel %vm4217_vm10, %v20005_v12, %v4297_v7  ;;  %v25797_v12 = vld [vmem:[#allocation44_spill] sm:$0xff] }
 0x262   : > { %v4239_v21 = vsel %vm4221_vm12, %v25789_v32, %v4238_v6  ;;  %6126 = vmatprep.mubr.bf16.mxu1 %v4697_v30  ;;  %v3974_v14 = vrot.slane %v3973_v20, 4  ;;  %v4220_v9 = vsel %vm4219_vm11, %v20064_v31, %v4218_v57  ;;  %v25793_v6 = vld [vmem:[#allocation41_spill] sm:$0xff]  ;;  %v20085_v45 = vsel %vm4215_vm9, %v20064_v31, %v4075_v4 }
 0x263   : > { %25791 = vst [vmem:[#allocation21_spill] sm:$0xff] %v20073_v50  ;;  %v4240_v48 = vsel %vm4223_vm13, %v25792_v34, %v4239_v21  ;;  %25794 = vst [vmem:[#allocation18_spill] sm:$0xff] %v20085_v45  ;;  %v3981_v53 = vrot.slane %v3980_v3, 4  ;;  %v3988_v23 = vrot.slane %v3987_v51, 4  ;;  %v3994_v30 = vsel %vm905_vm3, %v3291_v8, -inf }
 0x264   : > { %v4241_v26 = vsel %vm4225_vm14, %v25793_v6, %v4240_v48  ;;  %v4222_v21 = vsel %vm4221_vm12, %v25795_v40, %v4220_v9  ;;  %v20096_v48 = vadd.f32 %v25798_v10, %v19343_v25  ;;  %v4291_v4 = vsel %vm4217_vm10, %v20064_v31, %v4290_v33  ;;  %v17641_v33 = vld [vmem:[%s25709_s29 + $0x270] ss:$8 sps:$4 sm:$0xff]  }
 0x265   : > { %v4224_v7 = vsel %vm4223_vm13, %v25796_v44, %v4222_v21  ;;  %v4242_v57 = vsel %vm4227_vm15, %v25797_v12, %v4241_v26  ;;  %v25800_v45 = vrot.slane %v19972_v18, 1  ;;  %v4299_v21 = vsel %vm4219_vm11, %v20007_v27, %v4298_v35  ;;  %v25802_v25 = vld [vmem:[#allocation26_spill] sm:$0xff] }
 0x266   : > { %25799 = vst [vmem:[#allocation19_spill] sm:$0xff] %v20096_v48  ;;  %v4226_v9 = vsel %vm4225_vm14, %v25801_v36, %v4224_v7  ;;  %v4311_v26 = vsel %vm4215_vm9, %v19679_v16, %v19654_v49  ;;  %v3975_v29 = vmax.f32 %v3973_v20, %v3974_v14  ;;  %v3995_v10 = vrot.slane %v3994_v30, 4  ;;  %v17646_v20 = vld [vmem:[%s25709_s29 + $0x264] ss:$8 sps:$4 sm:$0xff]  }
 0x267   : > { %v3937_v8 = vmax.f32 %v19972_v18, %v25800_v45  ;;  %v4228_v31 = vsel %vm4227_vm15, %v25802_v25, %v4226_v9  ;;  %v4312_v18 = vsel %vm4217_vm10, %v19696_v28, %v4311_v26  ;;  %v3950_v45 = vrot.slane %v19999_v2, 1 }
 0x268   : > { %v3957_v35 = vrot.slane %v20001_v59, 1  ;;  %v3982_v7 = vmax.f32 %v3980_v3, %v3981_v53  ;;  %v4696_v27 = vpack.c.bf16 %v4242_v57, %v4228_v31  ;;  %v3989_v14 = vmax.f32 %v3987_v51, %v3988_v23 }
 0x269   : > { %v2148_v49 = vcombine.low %v20073_v50, %v20096_v48  ;;  %v4300_v9 = vsel %vm4221_vm12, %v19579_v63, %v4299_v21  ;;  %v4313_v26 = vsel %vm4219_vm11, %v25772_v42, %v4312_v18  ;;  %v20129_v28 = vmax.f32 %v19964_v47, 0.0  ;;  %v25823_v48 = vld [vmem:[#allocation69_spill] sm:$0xff] }
 0x26a   : > { %v20132_v3 = vmax.f32 %v19983_v52, 0.0  ;;  %v25805_v31 = vrot.slane %v19976_v22, 1  ;;  %v25806_v23 = vrot.slane %v19986_v43, 2  ;;  %6127 = vmatmul.mubr.bf16.vlgmr.msra.gmra.mxu1 %v4696_v27  ;;  %v3970_v57 = vmax.f32 %v19992_v61, %v3969_v58  ;;  %v17644_v52 = vld [vmem:[%s25709_s29 + $0x260] ss:$8 sps:$4 sm:$0xff]  }
 0x26b   : > { %25803 = vst [vmem:[#allocation40_spill] sm:$0xff] %v20129_v28  ;;  %v3976_v21 = vrot.slane %v3975_v29, 2  ;;  %v3996_v16 = vmax.f32 %v3994_v30, %v3995_v10  ;;  %6217 = vmatpush1.bf16.msra.mxu1 %v17641_v33  ;;  %v4314_v47 = vsel %vm4221_vm12, %v25774_v56, %v4313_v26  ;;  %v3951_v18 = vmax.f32 %v19999_v2, %v3950_v45  ;;  %v17652_v61 = vld [vmem:[%s25709_s29 + $0x254] ss:$8 sps:$4 sm:$0xff]  }
 0x26c   : > { %25804 = vst [vmem:[#allocation42_spill] sm:$0xff] %v20132_v3  ;;  %v3944_v53 = vmax.f32 %v19976_v22, %v25805_v31  ;;  %v3963_v51 = vmax.f32 %v19986_v43, %v25806_v23  ;;  %v3983_v22 = vrot.slane %v3982_v7, 2  ;;  %v4301_v31 = vsel %vm4223_vm13, %v25773_v13, %v4300_v9  ;;  %6218 = vmatprep.subr.bf16.mxu1 %v17646_v20 }
 0x26d   : > { %v4315_v43 = vsel %vm4223_vm13, %v25778_v54, %v4314_v47  ;;  %v20155_v27 = vmax.f32 %v20001_v59, %v3957_v35  ;;  %v20157_v58 = vmax.f32 %v3937_v8, 0.0  ;;  %v3990_v30 = vrot.slane %v3989_v14, 2 }
 0x26e   : > { %v2156_v2 = vrot.slane %v2148_v49, %v19360_v37  ;;  %v3964_v10 = vrot.slane %v3963_v51, 1  ;;  %v15866_v33 = vcombine.high %v19958_v55, %v19967_v39  ;;  %v4316_v45 = vsel %vm4225_vm14, %v25785_v41, %v4315_v43  ;;  %v17650_v39 = vld [vmem:[%s25709_s29 + $0x250] ss:$8 sps:$4 sm:$0xff]  }
 0x26f   : > { %25807 = vst [vmem:[#allocation74_spill] sm:$0xff] %v20157_v58  ;;  %v4292_v20 = vsel %vm4219_vm11, %v25795_v40, %v4291_v4  ;;  %v3977_v9 = vmax.f32 %v3975_v29, %v3976_v21  ;;  %v3997_v26 = vrot.slane %v3996_v16, 2  ;;  %v4302_v59 = vsel %vm4225_vm14, %v25777_v38, %v4301_v31  ;;  %6219 = vmatpush1.bf16.msra.mxu1 %v17644_v52  ;;  %v25829_v40 = vld [vmem:[#allocation61_spill] sm:$0xff] }
 0x270   : > { %v4317_v8 = vsel %vm4227_vm15, %v19811_v46, %v4316_v45  ;;  %v3971_v49 = vrot.slane %v3970_v57, 1  ;;  %v20170_v35 = vmax.f32 %v3944_v53, 0.0  ;;  %v3984_v23 = vmax.f32 %v3982_v7, %v3983_v22  ;;  %6220 = vmatprep.subr.bf16.mxu1 %v17652_v61  ;;  %v17658_v53 = vld [vmem:[%s25709_s29 + $0x244] ss:$8 sps:$4 sm:$0xff]  }
 0x271   : > { %v4303_v55 = vsel %vm4227_vm15, %v19646_v19, %v4302_v59  ;;  %v3991_v29 = vmax.f32 %v3989_v14, %v3990_v30  ;;  %v2164_v4 = vcombine.high %v2156_v2, %v2156_v2  ;;  %v4293_v47 = vsel %vm4221_vm12, %v25796_v44, %v4292_v20  ;;  %v25817_v44 = vld [vmem:[#allocation65_spill] sm:$0xff] }
 0x272   : > { %25808 = vst [vmem:[#allocation75_spill] sm:$0xff] %v20170_v35  ;;  %v4699_v21 = vpack.c.bf16 %v4317_v8, %v4303_v55  ;;  %v20182_v52 = vmax.f32 %v3963_v51, %v3964_v10  ;;  %v20184_v7 = vmax.f32 %v3951_v18, 0.0  ;;  %v2172_v22 = vrot.slane %v2156_v2, %v19360_v37  ;;  %v17656_v2 = vld [vmem:[%s25709_s29 + $0x240] ss:$8 sps:$4 sm:$0xff]  }
 0x273   : > { %v4304_v31 = vsel %vm4215_vm9, %v25786_v5, %v25784_v17  ;;  %v20191_v14 = vrot.slane %v15866_v33, %v19360_v37  ;;  %v3978_v43 = vrot.slane %v3977_v9, 1  ;;  %v3998_v61 = vmax.f32 %v3996_v16, %v3997_v26  ;;  %6221 = vmatpush1.bf16.msra.mxu1 %v17650_v39  ;;  %v17664_v26 = vld [vmem:[%s25709_s29 + $0x234] ss:$8 sps:$4 sm:$0xff]  }
 0x274   : > { %25809 = vst [vmem:[#allocation76_spill] sm:$0xff] %v20184_v7  ;;  %6187 = vmatprep.mubr.bf16.mxu0 %v4699_v21  ;;  %v4305_v30 = vsel %vm4217_vm10, %v25787_v60, %v4304_v31  ;;  %v3985_v45 = vrot.slane %v3984_v23, 1  ;;  %v4294_v51 = vsel %vm4223_vm13, %v25801_v36, %v4293_v47  ;;  %v4257_v16 = vsel %vm4215_vm9, %v19818_v11, %v19811_v46 }
 0x275   : > { %v4306_v18 = vsel %vm4219_vm11, %v25789_v32, %v4305_v30  ;;  %v3992_v10 = vrot.slane %v3991_v29, 1  ;;  %v20206_v33 = vrot.slane %v2164_v4, %v19360_v37  ;;  %6222 = vmatprep.subr.bf16.mxu1 %v17658_v53  ;;  %v4258_v59 = vsel %vm4217_vm10, %v19838_v1, %v4257_v16 }
 0x276   : > { %v4307_v20 = vsel %vm4221_vm12, %v25792_v34, %v4306_v18  ;;  %v2194_v8 = vcombine.high %v2172_v22, %v2172_v22  ;;  %v3306_v55 = vrot.slane %v2172_v22, %v19360_v37  ;;  %v4259_v4 = vsel %vm4219_vm11, %v19848_v62, %v4258_v59  ;;  %v17647_v22 = vld [vmem:[%s25709_s29 + $0x370] ss:$8 sps:$4 sm:$0xff]  }
 0x277   : > { %v4308_v39 = vsel %vm4223_vm13, %v25793_v6, %v4307_v20  ;;  %v3972_v21 = vmax.f32 %v3970_v57, %v3971_v49  ;;  %v3999_v47 = vrot.slane %v3998_v61, 1  ;;  %v4295_v53 = vsel %vm4225_vm14, %v25802_v25, %v4294_v51  ;;  %6223 = vmatpush1.bf16.msra.mxu1 %v17656_v2  ;;  %v17662_v57 = vld [vmem:[%s25709_s29 + $0x230] ss:$8 sps:$4 sm:$0xff]   ;;  %v17670_v51 = vld [vmem:[%s25709_s29 + $0x224] ss:$8 sps:$4 sm:$0xff]  }
 0x278   : > { %v4309_v31 = vsel %vm4225_vm14, %v25797_v12, %v4308_v39  ;;  %v20224_v30 = vmax.f32 %v3977_v9, %v3978_v43  ;;  %v4296_v18 = vsel %vm4227_vm15, %v25783_v0, %v4295_v53  ;;  %v4260_v49 = vsel %vm4221_vm12, %v19858_v15, %v4259_v4  ;;  %v17655_v43 = vld [vmem:[%s25709_s29 + $0x364] ss:$8 sps:$4 sm:$0xff]   ;;  %6224 = vmatprep.subr.bf16.mxu1 %v17664_v26  ;;  %v25811_v59 = vld [vmem:[#allocation64_spill] sm:$0xff]  ;;  %v25816_v6 = vld [vmem:[#allocation63_spill] sm:$0xff] }
 0x279   : > { %v4310_v16 = vsel %vm4227_vm15, %v19807_v24, %v4309_v31  ;;  %v25810_v20 = vld [vmem:[#allocation58_spill] sm:$0xff]  ;;  %v3307_v26 = vcombine.low %v20191_v14, %v3306_v55  ;;  %v3323_v17 = vcombine.low %v20206_v33, %v2194_v8  ;;  %v3308_v0 = vcombine.high %v20191_v14, %v3306_v55  ;;  %v25815_v12 = vld [vmem:[#allocation52_spill] sm:$0xff] }
 0x27a   : > { %v4698_v9 = vpack.c.bf16 %v4310_v16, %v4296_v18  ;;  %v4261_v2 = vsel %vm4223_vm13, %v25810_v20, %v4260_v49  ;;  %v25812_v39 = vld [vmem:[#allocation66_spill] sm:$0xff]  ;;  %v20252_v18 = vmax.f32 %v3984_v23, %v3985_v45  ;;  %v20254_v16 = vmax.f32 %v3991_v29, %v3992_v10  ;;  %v25814_v49 = vld [vmem:[#allocation68_spill] sm:$0xff]  ;;  %v25821_v10 = vld [vmem:[#allocation67_spill] sm:$0xff] }
 0x27b   : > { %v4271_v53 = vsel %vm4215_vm9, %v25812_v39, %v25811_v59  ;;  %v25813_v31 = vld [vmem:[#allocation50_spill] sm:$0xff]  ;;  %v4264_v23 = vsel %vm4215_vm9, %v25817_v44, %v25816_v6  ;;  %v20267_v29 = vmax.f32 %v20155_v27, 0.0  ;;  %v20269_v45 = vmax.f32 %v3998_v61, %v3999_v47  ;;  %6225 = vmatpush1.bf16.msra.mxu1 %v17662_v57  ;;  %v25818_v55 = vld [vmem:[#allocation60_spill] sm:$0xff] }
 0x27c   : > { %v4250_v4 = vsel %vm4215_vm9, %v25813_v31, %v19807_v24  ;;  %6188 = vmatmul.mubr.bf16.vlgmr.msra.gmra.mxu0 %v4698_v9  ;;  %v4272_v25 = vsel %vm4217_vm10, %v25814_v49, %v4271_v53  ;;  %v17653_v14 = vld [vmem:[%s25709_s29 + $0x360] ss:$8 sps:$4 sm:$0xff]   ;;  %v4262_v9 = vsel %vm4225_vm14, %v25818_v55, %v4261_v2  ;;  %v20281_v27 = vmax.f32 %v3972_v21, 0.0  ;;  %v17661_v61 = vld [vmem:[%s25709_s29 + $0x354] ss:$8 sps:$4 sm:$0xff]   ;;  %6226 = vmatprep.subr.bf16.mxu1 %v17670_v51 }
 0x27d   : > { %v4251_v36 = vsel %vm4217_vm10, %v25815_v12, %v4250_v4  ;;  %6278 = vmatpush1.bf16.msra.mxu0 %v17647_v22  ;;  %v17668_v8 = vld [vmem:[%s25709_s29 + $0x220] ss:$8 sps:$4 sm:$0xff]   ;;  %v17676_v47 = vld [vmem:[%s25709_s29 + $0x214] ss:$8 sps:$4 sm:$0xff]   ;;  %v4265_v21 = vsel %vm4217_vm10, %v25821_v10, %v4264_v23  ;;  %v20298_v2 = vrot.slane %v3307_v26, %v19360_v37  ;;  %v20301_v51 = vrot.slane %v3323_v17, %v19360_v37  ;;  %v17659_v17 = vld [vmem:[%s25709_s29 + $0x350] ss:$8 sps:$4 sm:$0xff]  }
 0x27e   : > { %6279 = vmatprep.subr.bf16.mxu0 %v17655_v43  ;;  %v25819_v22 = vld [vmem:[#allocation70_spill] sm:$0xff]  ;;  %v4266_v23 = vsel %vm4219_vm11, %v25823_v48, %v4265_v21  ;;  %v4325_v26 = vsel %vm4215_vm9, %v19838_v1, %v19818_v11  ;;  %v20316_v43 = vmax.f32 %v20182_v52, 0.0 }
 0x27f   : > { %v4273_v57 = vsel %vm4219_vm11, %v25819_v22, %v4272_v25  ;;  %v25820_v53 = vld [vmem:[#allocation54_spill] sm:$0xff]  ;;  %25822 = vst [vmem:[#allocation64_spill] sm:$0xff] %v20301_v51  ;;  %v20306_v25 = vrot.slane %v3308_v0, %v19360_v37  ;;  %6227 = vmatpush1.bf16.msra.mxu1 %v17668_v8  ;;  %v25826_v51 = vld [vmem:[#allocation55_spill] sm:$0xff]  ;;  %v4326_v32 = vsel %vm4217_vm10, %v19848_v62, %v4325_v26 }
 0x280   : > { %v4252_v4 = vsel %vm4219_vm11, %v25820_v53, %v4251_v36  ;;  %v4274_v24 = vsel %vm4221_vm12, %v20132_v3, %v4273_v57  ;;  %25824 = vst [vmem:[#allocation50_spill] sm:$0xff] %v20316_v43  ;;  %v25825_v0 = vld [vmem:[#allocation62_spill] sm:$0xff]  ;;  %6228 = vmatprep.subr.bf16.mxu1 %v17676_v47 }
 0x281   : > { %v4275_v36 = vsel %vm4223_vm13, %v20170_v35, %v4274_v24  ;;  %6280 = vmatpush1.bf16.msra.mxu0 %v17653_v14  ;;  %v17674_v24 = vld [vmem:[%s25709_s29 + $0x210] ss:$8 sps:$4 sm:$0xff]   ;;  %v4263_v57 = vsel %vm4227_vm15, %v25825_v0, %v4262_v9  ;;  %v4253_v52 = vsel %vm4221_vm12, %v25826_v51, %v4252_v4  ;;  %v17667_v14 = vld [vmem:[%s25709_s29 + $0x344] ss:$8 sps:$4 sm:$0xff]  }
 0x282   : > { %v4276_v21 = vsel %vm4225_vm14, %v20267_v29, %v4275_v36  ;;  %6281 = vmatprep.subr.bf16.mxu0 %v17661_v61  ;;  %v17682_v8 = vld [vmem:[%s25709_s29 + $0x204] ss:$8 sps:$4 sm:$0xff]   ;;  %v4267_v36 = vsel %vm4221_vm12, %v20129_v28, %v4266_v23  ;;  %v25828_v61 = vld [vmem:[#allocation59_spill] sm:$0xff] }
 0x283   : > { %v4277_v50 = vsel %vm4227_vm15, %v20281_v27, %v4276_v21  ;;  %v25827_v9 = vld [vmem:[#allocation57_spill] sm:$0xff]  ;;  %v4268_v47 = vsel %vm4223_vm13, %v20157_v58, %v4267_v36  ;;  %6229 = vmatpush1.bf16.msra.mxu1 %v17674_v24  ;;  %v17673_v24 = vld [vmem:[%s25709_s29 + $0x334] ss:$8 sps:$4 sm:$0xff]  }
 0x284   : > { %v4254_v34 = vsel %vm4223_vm13, %v25827_v9, %v4253_v52  ;;  %v4711_v4 = vpack.c.bf16 %v4277_v50, %v4263_v57  ;;  %v4269_v21 = vsel %vm4225_vm14, %v20184_v7, %v4268_v47  ;;  %v4327_v52 = vsel %vm4219_vm11, %v19858_v15, %v4326_v32  ;;  %6230 = vmatprep.subr.bf16.mxu1 %v17682_v8  ;;  %v17688_v36 = vld [vmem:[%s25709_s29 + $0x2f4] ss:$8 sps:$4 sm:$0xff]  }
 0x285   : > { %v4255_v1 = vsel %vm4225_vm14, %v25828_v61, %v4254_v34  ;;  %v4339_v50 = vsel %vm4215_vm9, %v25814_v49, %v25812_v39  ;;  %6282 = vmatpush1.bf16.msra.mxu0 %v17659_v17  ;;  %v17665_v34 = vld [vmem:[%s25709_s29 + $0x340] ss:$8 sps:$4 sm:$0xff]   ;;  %v4270_v23 = vsel %vm4227_vm15, %v20316_v43, %v4269_v21  ;;  %v4328_v32 = vsel %vm4221_vm12, %v25810_v20, %v4327_v52 }
 0x286   : > { %v4256_v60 = vsel %vm4227_vm15, %v25829_v40, %v4255_v1  ;;  %v17680_v1 = vld [vmem:[%s25709_s29 + $0x200] ss:$8 sps:$4 sm:$0xff]   ;;  %v4340_v26 = vsel %vm4217_vm10, %v25819_v22, %v4339_v50  ;;  %v20370_v17 = vmax.f32 %v20252_v18, 0.0  ;;  %6283 = vmatprep.subr.bf16.mxu0 %v17667_v14  ;;  %v4329_v47 = vsel %vm4223_vm13, %v25818_v55, %v4328_v32  ;;  %6136 = vmatprep.mubr.bf16.mxu1 %v4711_v4 }
 0x287   : > { %v4710_v57 = vpack.c.bf16 %v4270_v23, %v4256_v60  ;;  %v4341_v21 = vsel %vm4219_vm11, %v20132_v3, %v4340_v26  ;;  %v4330_v18 = vsel %vm4225_vm14, %v25825_v0, %v4329_v47  ;;  %v4318_v60 = vsel %vm4215_vm9, %v25815_v12, %v25813_v31  ;;  %v17671_v26 = vld [vmem:[%s25709_s29 + $0x330] ss:$8 sps:$4 sm:$0xff]   ;;  %6231 = vmatpush1.bf16.msra.mxu1 %v17680_v1 }
 0x288   : > { %v4342_v14 = vsel %vm4221_vm12, %v20170_v35, %v4341_v21  ;;  %v4332_v8 = vsel %vm4215_vm9, %v25821_v10, %v25817_v44  ;;  %v4331_v52 = vsel %vm4227_vm15, %v25811_v59, %v4330_v18  ;;  %v4319_v50 = vsel %vm4217_vm10, %v25820_v53, %v4318_v60  ;;  %6232 = vmatprep.subr.bf16.mxu1 %v17688_v36  ;;  %v17694_v36 = vld [vmem:[%s25709_s29 + $0x2e4] ss:$8 sps:$4 sm:$0xff]  }
 0x289   : > { %6137 = vmatmul.mubr.bf16.gmra.mxu1 %v4710_v57  ;;  %v4343_v4 = vsel %vm4223_vm13, %v20267_v29, %v4342_v14  ;;  %v4333_v23 = vsel %vm4217_vm10, %v25823_v48, %v4332_v8  ;;  %v20401_v32 = vmax.f32 %v20224_v30, 0.0  ;;  %6284 = vmatpush1.bf16.msra.mxu0 %v17665_v34  ;;  %v17686_v57 = vld [vmem:[%s25709_s29 + $0x2f0] ss:$8 sps:$4 sm:$0xff]   ;;  %v4320_v21 = vsel %vm4219_vm11, %v25826_v51, %v4319_v50  ;;  %v17679_v34 = vld [vmem:[%s25709_s29 + $0x324] ss:$8 sps:$4 sm:$0xff]  }
 0x28a   : > { %v4344_v47 = vsel %vm4225_vm14, %v20281_v27, %v4343_v4  ;;  %v4334_v30 = vsel %vm4219_vm11, %v20129_v28, %v4333_v23  ;;  %6285 = vmatprep.subr.bf16.mxu0 %v17673_v24  ;;  %v4321_v18 = vsel %vm4221_vm12, %v25827_v9, %v4320_v21  ;;  %v4725_v4 = vpack.c.bf16 %v20370_v17, %v20370_v17  ;;  %v25832_v21 = vld [vmem:[#allocation72_spill] sm:$0xff] }
 0x28b   : > { %25830 = vst [vmem:[#allocation52_spill] sm:$0xff] %v20401_v32  ;;  %v4345_v1 = vsel %vm4227_vm15, %v20370_v17, %v4344_v47  ;;  %v4335_v14 = vsel %vm4221_vm12, %v20157_v58, %v4334_v30  ;;  %v4322_v8 = vsel %vm4223_vm13, %v25828_v61, %v4321_v18  ;;  %v25831_v47 = vld [vmem:[#allocation71_spill] sm:$0xff]  ;;  %6233 = vmatpush2.bf16.msra.mxu1 %v17686_v57 }
 0x28c   : > { %v4713_v60 = vpack.c.bf16 %v4345_v1, %v4331_v52  ;;  %v4336_v24 = vsel %vm4223_vm13, %v20184_v7, %v4335_v14  ;;  %v4323_v50 = vsel %vm4225_vm14, %v25829_v40, %v4322_v8  ;;  %v4724_v52 = vpack.c.bf16 %v20401_v32, %v20401_v32  ;;  %v17677_v1 = vld [vmem:[%s25709_s29 + $0x320] ss:$8 sps:$4 sm:$0xff]   ;;  %v17685_v57 = vld [vmem:[%s25709_s29 + $0x314] ss:$8 sps:$4 sm:$0xff]   ;;  %6234 = vmatprep.subr.bf16.mxu1 %v17694_v36 }
 0x28d   : > { %v4337_v23 = vsel %vm4225_vm14, %v20316_v43, %v4336_v24  ;;  %v4365_v30 = vsel %vm4215_vm9, %v25832_v21, %v25831_v47  ;;  %6286 = vmatpush1.bf16.msra.mxu0 %v17671_v26  ;;  %v4324_v18 = vsel %vm4227_vm15, %v25816_v6, %v4323_v50  ;;  %v17692_v8 = vld [vmem:[%s25709_s29 + $0x2e0] ss:$8 sps:$4 sm:$0xff]   ;;  %v20455_v26 = vmax.f32 %v20269_v45, 0.0  ;;  %6146 = vmatprep.mubr.bf16.mxu1 %v4725_v4 }
 0x28e   : > { %v4338_v14 = vsel %vm4227_vm15, %v20401_v32, %v4337_v23  ;;  %v25833_v24 = vld [vmem:[#allocation73_spill] sm:$0xff]  ;;  %v4001_v47 = vsel %vm905_vm3, %v20298_v2, -inf  ;;  %6287 = vmatprep.subr.bf16.mxu0 %v17679_v34  ;;  %6197 = vmatprep.mubr.bf16.mxu0 %v4713_v60  ;;  %v25836_v32 = vld [vmem:[#allocation35_spill] sm:$0xff]  ;;  %v4008_v45 = vsel %vm905_vm3, %v20306_v25, -inf }
 0x28f   : > { %v4366_v44 = vsel %vm4217_vm10, %v25833_v24, %v4365_v30  ;;  %25834 = vst [vmem:[#allocation54_spill] sm:$0xff] %v20455_v26  ;;  %v4712_v50 = vpack.c.bf16 %v4338_v14, %v4324_v18  ;;  %v25835_v6 = vld [vmem:[#allocation33_spill] sm:$0xff]  ;;  %v4727_v60 = vpack.c.bf16 %v20455_v26, %v20455_v26  ;;  %v25837_v18 = vcombine.high %v20206_v33, %v20206_v33  ;;  %v17683_v14 = vld [vmem:[%s25709_s29 + $0x310] ss:$8 sps:$4 sm:$0xff]  }
 0x290   : > { %v4367_v23 = vsel %vm4219_vm11, %v19579_v63, %v4366_v44  ;;  %v4379_v30 = vsel %vm4215_vm9, %v25836_v32, %v25835_v6  ;;  %v17700_v44 = vld [vmem:[%s25709_s29 + $0x2d4] ss:$8 sps:$4 sm:$0xff]   ;;  %6235 = vmatpush2.bf16.msra.mxu1 %v17692_v8  ;;  %v17691_v8 = vld [vmem:[%s25709_s29 + $0x304] ss:$8 sps:$4 sm:$0xff]  }
 0x291   : > { %v4368_v2 = vsel %vm4221_vm12, %v25773_v13, %v4367_v23  ;;  %v4380_v34 = vsel %vm4217_vm10, %v25772_v42, %v4379_v30  ;;  %v20482_v25 = vrot.slane %v25837_v18, %v19360_v37  ;;  %6198 = vmatmul.mubr.bf16.gmra.mxu0 %v4712_v50  ;;  %6147 = vmatmul.mubr.bf16.gmra.mxu1 %v4724_v52  ;;  %v17698_v52 = vld [vmem:[%s25709_s29 + $0x2d0] ss:$8 sps:$4 sm:$0xff]   ;;  %v4009_v30 = vrot.slane %v4008_v45, 4 }
 0x292   : > { %v4369_v36 = vsel %vm4223_vm13, %v25777_v38, %v4368_v2  ;;  %v4381_v4 = vsel %vm4219_vm11, %v25774_v56, %v4380_v34  ;;  %6288 = vmatpush1.bf16.msra.mxu0 %v17677_v1  ;;  %v4433_v50 = vsel %vm4215_vm9, %v25833_v24, %v25832_v21  ;;  %v4002_v1 = vrot.slane %v4001_v47, 4  ;;  %6207 = vmatprep.mubr.bf16.mxu0 %v4727_v60  ;;  %v17706_v34 = vld [vmem:[%s25709_s29 + $0x2c4] ss:$8 sps:$4 sm:$0xff]  }
 0x293   : > { %v4370_v23 = vsel %vm4225_vm14, %v19646_v19, %v4369_v36  ;;  %v4382_v33 = vsel %vm4221_vm12, %v25778_v54, %v4381_v4  ;;  %6289 = vmatprep.subr.bf16.mxu0 %v17685_v57  ;;  %v4434_v18 = vsel %vm4217_vm10, %v19579_v63, %v4433_v50  ;;  %6236 = vmatprep.subr.bf16.mxu1 %v17700_v44  ;;  %v20514_v57 = vmax.f32 %v20254_v16, 0.0  ;;  %v25839_v4 = vld [vmem:[#allocation31_spill] sm:$0xff]  ;;  %v17689_v44 = vld [vmem:[%s25709_s29 + $0x300] ss:$8 sps:$4 sm:$0xff]  }
 0x294   : > { %v4383_v2 = vsel %vm4223_vm13, %v25785_v41, %v4382_v33  ;;  %v4435_v36 = vsel %vm4219_vm11, %v25773_v13, %v4434_v18  ;;  %v4447_v60 = vsel %vm4215_vm9, %v25772_v42, %v25836_v32  ;;  %v4371_v33 = vsel %vm4227_vm15, %v25839_v4, %v4370_v23  ;;  %6237 = vmatpush2.bf16.msra.mxu1 %v17698_v52  ;;  %v17704_v23 = vld [vmem:[%s25709_s29 + $0x2c0] ss:$8 sps:$4 sm:$0xff]  }
 0x295   : > { %v4384_v21 = vsel %vm4225_vm14, %v19811_v46, %v4383_v2  ;;  %25838 = vst [vmem:[#allocation67_spill] sm:$0xff] %v20514_v57  ;;  %v4436_v2 = vsel %vm4221_vm12, %v25777_v38, %v4435_v36  ;;  %v4448_v16 = vsel %vm4217_vm10, %v25774_v56, %v4447_v60  ;;  %v4726_v60 = vpack.c.bf16 %v20514_v57, %v20514_v57  ;;  %v25840_v32 = vld [vmem:[#allocation34_spill] sm:$0xff] }
 0x296   : > { %v4385_v50 = vsel %vm4227_vm15, %v19818_v11, %v4384_v21  ;;  %6290 = vmatpush1.bf16.msra.mxu0 %v17683_v14  ;;  %v4437_v21 = vsel %vm4223_vm13, %v19646_v19, %v4436_v2  ;;  %v4449_v36 = vsel %vm4219_vm11, %v25778_v54, %v4448_v16  ;;  %v17697_v14 = vld [vmem:[%s25709_s29 + $0x3f4] ss:$8 sps:$4 sm:$0xff]   ;;  %6238 = vmatprep.subr.bf16.mxu1 %v17706_v34 }
 0x297   : > { %v4701_v18 = vpack.c.bf16 %v4385_v50, %v4371_v33  ;;  %6291 = vmatprep.subr.bf16.mxu0 %v17691_v8  ;;  %v4438_v52 = vsel %vm4225_vm14, %v25839_v4, %v4437_v21  ;;  %v4450_v33 = vsel %vm4221_vm12, %v25785_v41, %v4449_v36  ;;  %v17712_v50 = vld [vmem:[%s25709_s29 + $0x2b4] ss:$8 sps:$4 sm:$0xff]   ;;  %v4003_v2 = vmax.f32 %v4001_v47, %v4002_v1  ;;  %v25841_v4 = vld [vmem:[#allocation18_spill] sm:$0xff] }
 0x298   : > { %v4010_v8 = vmax.f32 %v4008_v45, %v4009_v30  ;;  %v4451_v16 = vsel %vm4223_vm13, %v19811_v46, %v4450_v33  ;;  %v4372_v34 = vsel %vm4215_vm9, %v25840_v32, %v25786_v5  ;;  %v4439_v21 = vsel %vm4227_vm15, %v25835_v6, %v4438_v52  ;;  %v25842_v41 = vld [vmem:[#allocation22_spill] sm:$0xff]  ;;  %v25843_v45 = vld [vmem:[#allocation36_spill] sm:$0xff]  ;;  %6239 = vmatpush2.bf16.msra.mxu1 %v17704_v23 }
 0x299   : > { %6248 = vmatprep.mubr.bf16.mxu1 %v4701_v18  ;;  %6208 = vmatmul.mubr.bf16.gmra.mxu0 %v4726_v60  ;;  %v4452_v36 = vsel %vm4225_vm14, %v19818_v11, %v4451_v16  ;;  %v4359_v47 = vsel %vm4217_vm10, %v25842_v41, %v25841_v4  ;;  %v4373_v1 = vsel %vm4217_vm10, %v25843_v45, %v4372_v34  ;;  %v17695_v30 = vld [vmem:[%s25709_s29 + $0x3f0] ss:$8 sps:$4 sm:$0xff]   ;;  %v25844_v18 = vld [vmem:[#allocation53_spill] sm:$0xff] }
 0x29a   : > { %6292 = vmatpush1.bf16.msra.mxu0 %v17689_v44  ;;  %v4453_v60 = vsel %vm4227_vm15, %v25844_v18, %v4452_v36  ;;  %v17710_v52 = vld [vmem:[%s25709_s29 + $0x2b0] ss:$8 sps:$4 sm:$0xff]   ;;  %v4393_v4 = vsel %vm4215_vm9, %v19848_v62, %v25844_v18  ;;  %v25846_v44 = vld [vmem:[#allocation21_spill] sm:$0xff]  ;;  %6240 = vmatprep.subr.bf16.mxu1 %v17712_v50  ;;  %v4011_v54 = vrot.slane %v4010_v8, 2 }
 0x29b   : > { %v25845_v33 = vld [vmem:[#allocation38_spill] sm:$0xff]  ;;  %v25847_v34 = vld [vmem:[#allocation19_spill] sm:$0xff]  ;;  %6293 = vmatprep.subr.bf16.mxu0 %v17697_v14  ;;  %v4703_v36 = vpack.c.bf16 %v4453_v60, %v4439_v21  ;;  %v25850_v5 = vld [vmem:[#allocation64_spill] sm:$0xff]  ;;  %v4407_v14 = vsel %vm4215_vm9, %v25819_v22, %v25814_v49  ;;  %v4394_v60 = vsel %vm4217_vm10, %v19858_v15, %v4393_v4  ;;  %v4440_v4 = vsel %vm4215_vm9, %v25843_v45, %v25840_v32 }
 0x29c   : > { %v4374_v16 = vsel %vm4219_vm11, %v25845_v33, %v4373_v1  ;;  %v25848_v6 = vcombine.high %v25846_v44, %v25847_v34  ;;  %v17703_v23 = vld [vmem:[%s25709_s29 + $0x3e4] ss:$8 sps:$4 sm:$0xff]   ;;  %v3338_v18 = vcombine.low %v25850_v5, %v20482_v25  ;;  %v3339_v46 = vcombine.high %v25850_v5, %v20482_v25  ;;  %v25851_v44 = vld [vmem:[#allocation23_spill] sm:$0xff]  ;;  %v17701_v5 = vld [vmem:[%s25709_s29 + $0x3e0] ss:$8 sps:$4 sm:$0xff]   ;;  %6241 = vmatpush2.bf16.msra.mxu1 %v17710_v52 }
 0x29d   : > { %v17718_v1 = vld [vmem:[%s25709_s29 + $0x2a4] ss:$8 sps:$4 sm:$0xff]   ;;  %v4004_v34 = vrot.slane %v4003_v2, 2  ;;  %6309 = vmatprep.mubr.bf16.mxu0 %v4703_v36  ;;  %v4408_v19 = vsel %vm4217_vm10, %v20132_v3, %v4407_v14  ;;  %v17716_v25 = vld [vmem:[%s25709_s29 + $0x2a0] ss:$8 sps:$4 sm:$0xff]   ;;  %v4012_v56 = vmax.f32 %v4010_v8, %v4011_v54  ;;  %v4475_v32 = vsel %vm4215_vm9, %v20132_v3, %v25819_v22 }
 0x29e   : > { %v20582_v11 = vrot.slane %v25848_v6, %v19360_v37  ;;  %v4360_v6 = vsel %vm4219_vm11, %v25851_v44, %v4359_v47  ;;  %v25852_v50 = vld [vmem:[#allocation41_spill] sm:$0xff]  ;;  %6294 = vmatpush2.bf16.msra.mxu0 %v17695_v30  ;;  %v4395_v47 = vsel %vm4219_vm11, %v25810_v20, %v4394_v60  ;;  %v17709_v30 = vld [vmem:[%s25709_s29 + $0x3d4] ss:$8 sps:$4 sm:$0xff]   ;;  %6242 = vmatprep.subr.bf16.mxu1 %v17718_v1 }
 0x29f   : > { %v4375_v21 = vsel %vm4221_vm12, %v25852_v50, %v4374_v16  ;;  %v4409_v16 = vsel %vm4219_vm11, %v20170_v35, %v4408_v19  ;;  %6295 = vmatprep.subr.bf16.mxu0 %v17703_v23  ;;  %v17724_v52 = vld [vmem:[%s25709_s29 + $0x294] ss:$8 sps:$4 sm:$0xff]   ;;  %v20626_v60 = vrot.slane %v3338_v18, %v19360_v37  ;;  %v3353_v19 = vrot.slane %v3339_v46, %v19360_v37  ;;  %v17707_v46 = vld [vmem:[%s25709_s29 + $0x3d0] ss:$8 sps:$4 sm:$0xff]   ;;  %v17715_v54 = vld [vmem:[%s25709_s29 + $0x3c4] ss:$8 sps:$4 sm:$0xff]  }
 0x2a0   : > { %25849 = vst [vmem:[#allocation62_spill] sm:$0xff] %v20582_v11  ;;  %v25853_v36 = vld [vmem:[#allocation24_spill] sm:$0xff]  ;;  %v20634_v1 = vmax.f32 %v4003_v2, %v4004_v34  ;;  %v4410_v18 = vsel %vm4221_vm12, %v20267_v29, %v4409_v16  ;;  %6243 = vmatpush2.bf16.msra.mxu1 %v17716_v25  ;;  %v25856_v34 = vld [vmem:[#allocation26_spill] sm:$0xff]  ;;  %v4013_v3 = vrot.slane %v4012_v56, 1 }
 0x2a1   : > { %v4361_v14 = vsel %vm4221_vm12, %v25853_v36, %v4360_v6  ;;  %v25854_v49 = vld [vmem:[#allocation44_spill] sm:$0xff]  ;;  %v4396_v6 = vsel %vm4221_vm12, %v25818_v55, %v4395_v47  ;;  %6244 = vmatprep.subr.bf16.mxu1 %v17724_v52  ;;  %v17730_v8 = vld [vmem:[%s25709_s29 + $0x284] ss:$8 sps:$4 sm:$0xff]   ;;  %v4411_v52 = vsel %vm4223_vm13, %v20281_v27, %v4410_v18 }
 0x2a2   : > { %v4376_v23 = vsel %vm4223_vm13, %v25854_v49, %v4375_v21  ;;  %v25855_v11 = vld [vmem:[#allocation48_spill] sm:$0xff]  ;;  %6296 = vmatpush2.bf16.msra.mxu0 %v17701_v5  ;;  %v4362_v21 = vsel %vm4223_vm13, %v25856_v34, %v4361_v14  ;;  %v4441_v14 = vsel %vm4217_vm10, %v25845_v33, %v4440_v4  ;;  %v4386_v4 = vsel %vm4215_vm9, %v25820_v53, %v25815_v12 }
 0x2a3   : > { %v4377_v38 = vsel %vm4225_vm14, %v25855_v11, %v4376_v23  ;;  %v17722_v2 = vld [vmem:[%s25709_s29 + $0x290] ss:$8 sps:$4 sm:$0xff]   ;;  %6297 = vmatprep.subr.bf16.mxu0 %v17709_v30  ;;  %v17728_v18 = vld [vmem:[%s25709_s29 + $0x280] ss:$8 sps:$4 sm:$0xff]   ;;  %v4442_v22 = vsel %vm4219_vm11, %v25852_v50, %v4441_v14  ;;  %v4476_v14 = vsel %vm4217_vm10, %v20170_v35, %v4475_v32  ;;  %v4022_v50 = vsel %vm905_vm3, %v3353_v19, -inf }
 0x2a4   : > { %v25857_v23 = vld [vmem:[#allocation20_spill] sm:$0xff]  ;;  %v4378_v30 = vsel %vm4227_vm15, %v25813_v31, %v4377_v38  ;;  %v4461_v38 = vsel %vm4215_vm9, %v19858_v15, %v19848_v62  ;;  %6245 = vmatpush2.bf16.msra.mxu1 %v17722_v2 }
 0x2a5   : > { %v4426_v47 = vsel %vm4215_vm9, %v25842_v41, %v25857_v23  ;;  %v25858_v5 = vld [vmem:[#allocation28_spill] sm:$0xff]  ;;  %v4397_v23 = vsel %vm4223_vm13, %v25825_v0, %v4396_v6  ;;  %6246 = vmatprep.subr.bf16.mxu1 %v17730_v8  ;;  %v4387_v8 = vsel %vm4217_vm10, %v25826_v51, %v4386_v4 }
 0x2a6   : > { %v4363_v25 = vsel %vm4225_vm14, %v25858_v5, %v4362_v21  ;;  %v4427_v16 = vsel %vm4217_vm10, %v25851_v44, %v4426_v47  ;;  %v4398_v21 = vsel %vm4225_vm14, %v25811_v59, %v4397_v23  ;;  %v4412_v47 = vsel %vm4225_vm14, %v20370_v17, %v4411_v52  ;;  %6298 = vmatpush2.bf16.msra.mxu0 %v17707_v46  ;;  %v17713_v6 = vld [vmem:[%s25709_s29 + $0x3c0] ss:$8 sps:$4 sm:$0xff]   ;;  %v17721_v46 = vld [vmem:[%s25709_s29 + $0x3b4] ss:$8 sps:$4 sm:$0xff]  }
 0x2a7   : > { %v25859_v23 = vld [vmem:[#allocation30_spill] sm:$0xff]  ;;  %v4462_v44 = vsel %vm4217_vm10, %v25810_v20, %v4461_v38  ;;  %6299 = vmatprep.subr.bf16.mxu0 %v17715_v54  ;;  %v17739_v41 = vld [vmem:[%s25709_s29 + $0x474] ss:$8 sps:$4 sm:$0xff]   ;;  %v4399_v54 = vsel %vm4227_vm15, %v25812_v39, %v4398_v21  ;;  %v4413_v38 = vsel %vm4227_vm15, %v20455_v26, %v4412_v47  ;;  %v4388_v19 = vsel %vm4219_vm11, %v25827_v9, %v4387_v8 }
 0x2a8   : > { %v4364_v52 = vsel %vm4227_vm15, %v25859_v23, %v4363_v25  ;;  %v4428_v25 = vsel %vm4219_vm11, %v25853_v36, %v4427_v16  ;;  %v4443_v16 = vsel %vm4221_vm12, %v25854_v49, %v4442_v22  ;;  %v4463_v32 = vsel %vm4219_vm11, %v25818_v55, %v4462_v44  ;;  %v17719_v47 = vld [vmem:[%s25709_s29 + $0x3b0] ss:$8 sps:$4 sm:$0xff]   ;;  %6247 = vmatpush2.bf16.msra.mxu1 %v17728_v18 }
 0x2a9   : > { %v4700_v2 = vpack.c.bf16 %v4378_v30, %v4364_v52  ;;  %v4400_v30 = vsel %vm4215_vm9, %v25823_v48, %v25821_v10  ;;  %v4429_v4 = vsel %vm4221_vm12, %v25856_v34, %v4428_v25  ;;  %v4444_v22 = vsel %vm4223_vm13, %v25855_v11, %v4443_v16  ;;  %v17737_v8 = vld [vmem:[%s25709_s29 + $0x470] ss:$8 sps:$4 sm:$0xff]   ;;  %6338 = vmatprep.subr.bf16.mxu1 %v17739_v41  ;;  %v17742_v34 = vld [vmem:[%s25709_s29 + $0x464] ss:$8 sps:$4 sm:$0xff]  }
 0x2aa   : > { %v4401_v21 = vsel %vm4217_vm10, %v20129_v28, %v4400_v30  ;;  %6300 = vmatpush2.bf16.msra.mxu0 %v17713_v6  ;;  %v4477_v44 = vsel %vm4219_vm11, %v20267_v29, %v4476_v14  ;;  %v4023_v52 = vrot.slane %v4022_v50, 4  ;;  %v17727_v6 = vld [vmem:[%s25709_s29 + $0x3a4] ss:$8 sps:$4 sm:$0xff]   ;;  %v4014_v18 = vmax.f32 %v4012_v56, %v4013_v3 }
 0x2ab   : > { %6301 = vmatprep.subr.bf16.mxu0 %v17721_v46  ;;  %v4389_v25 = vsel %vm4221_vm12, %v25828_v61, %v4388_v19  ;;  %v4402_v30 = vsel %vm4219_vm11, %v20157_v58, %v4401_v21  ;;  %v4015_v14 = vsel %vm905_vm3, %v20626_v60, -inf  ;;  %v4715_v46 = vpack.c.bf16 %v4413_v38, %v4399_v54  ;;  %6249 = vmatmul.mubr.bf16.vlgmr.msra.gmra.mxu1 %v4700_v2  ;;  %v25860_v19 = vld [vmem:[#allocation52_spill] sm:$0xff] }
 0x2ac   : > { %v4430_v16 = vsel %vm4223_vm13, %v25858_v5, %v4429_v4  ;;  %v4464_v41 = vsel %vm4221_vm12, %v25825_v0, %v4463_v32  ;;  %v4403_v56 = vsel %vm4221_vm12, %v20184_v7, %v4402_v30  ;;  %v4445_v3 = vsel %vm4225_vm14, %v25813_v31, %v4444_v22  ;;  %v17725_v32 = vld [vmem:[%s25709_s29 + $0x3a0] ss:$8 sps:$4 sm:$0xff]   ;;  %6339 = vmatpush1.bf16.msra.mxu1 %v17737_v8 }
 0x2ad   : > { %v4465_v60 = vsel %vm4223_vm13, %v25811_v59, %v4464_v41  ;;  %v4478_v54 = vsel %vm4221_vm12, %v20281_v27, %v4477_v44  ;;  %v4404_v38 = vsel %vm4223_vm13, %v20316_v43, %v4403_v56  ;;  %6258 = vmatprep.mubr.bf16.mxu1 %v4715_v46  ;;  %v4390_v2 = vsel %vm4223_vm13, %v25829_v40, %v4389_v25  ;;  %v17740_v22 = vld [vmem:[%s25709_s29 + $0x460] ss:$8 sps:$4 sm:$0xff]   ;;  %v25861_v25 = vld [vmem:[#allocation63_spill] sm:$0xff] }
 0x2ae   : > { %6302 = vmatpush2.bf16.msra.mxu0 %v17719_v47  ;;  %v4405_v21 = vsel %vm4225_vm14, %v25860_v19, %v4404_v38  ;;  %v4468_v4 = vsel %vm4215_vm9, %v20129_v28, %v25823_v48  ;;  %v17733_v47 = vld [vmem:[%s25709_s29 + $0x394] ss:$8 sps:$4 sm:$0xff]   ;;  %v4479_v44 = vsel %vm4223_vm13, %v20370_v17, %v4478_v54  ;;  %v4391_v30 = vsel %vm4225_vm14, %v25861_v25, %v4390_v2  ;;  %v25866_v28 = vld [vmem:[#allocation29_spill] sm:$0xff] }
 0x2af   : > { %6303 = vmatprep.subr.bf16.mxu0 %v17727_v6  ;;  %v4006_v46 = vrot.slane %v20634_v1, 1  ;;  %v4016_v41 = vrot.slane %v4015_v14, 4  ;;  %v4431_v6 = vsel %vm4225_vm14, %v25859_v23, %v4430_v16  ;;  %6340 = vmatprep.subr.bf16.mxu1 %v17742_v34  ;;  %v20785_v56 = vmax.f32 %v4014_v18, 0.0  ;;  %v17748_v38 = vld [vmem:[%s25709_s29 + $0x454] ss:$8 sps:$4 sm:$0xff]  }
 0x2b0   : > { %v4406_v8 = vsel %vm4227_vm15, %v20514_v57, %v4405_v21  ;;  %v4024_v54 = vmax.f32 %v4022_v50, %v4023_v52  ;;  %v20794_v2 = vsel %vm4227_vm15, %v25815_v12, %v4445_v3  ;;  %v4466_v48 = vsel %vm4225_vm14, %v25812_v39, %v4465_v60  ;;  %v17731_v16 = vld [vmem:[%s25709_s29 + $0x390] ss:$8 sps:$4 sm:$0xff]   ;;  %v25862_v52 = vld [vmem:[#allocation65_spill] sm:$0xff]  ;;  %6341 = vmatpush1.bf16.msra.mxu1 %v17740_v22 }
 0x2b1   : > { %v4469_v34 = vsel %vm4217_vm10, %v20157_v58, %v4468_v4  ;;  %v4501_v18 = vsel %vm4215_vm9, %v19579_v63, %v25833_v24  ;;  %v4480_v50 = vsel %vm4225_vm14, %v20455_v26, %v4479_v44  ;;  %v4392_v3 = vsel %vm4227_vm15, %v25862_v52, %v4391_v30  ;;  %v17736_v24 = vld [vmem:[%s25709_s29 + $0x384] ss:$8 sps:$4 sm:$0xff]   ;;  %v17746_v4 = vld [vmem:[%s25709_s29 + $0x450] ss:$8 sps:$4 sm:$0xff]   ;;  %6342 = vmatprep.subr.bf16.mxu1 %v17748_v38 }
 0x2b2   : > { %6304 = vmatpush2.bf16.msra.mxu0 %v17725_v32  ;;  %v4025_v21 = vrot.slane %v4024_v54, 2  ;;  %v4502_v60 = vsel %vm4217_vm10, %v25773_v13, %v4501_v18  ;;  %v4714_v32 = vpack.c.bf16 %v4406_v8, %v4392_v3  ;;  %v4007_v44 = vmax.f32 %v20634_v1, %v4006_v46  ;;  %v17754_v8 = vld [vmem:[%s25709_s29 + $0x444] ss:$8 sps:$4 sm:$0xff]   ;;  %v25863_v1 = vld [vmem:[#allocation39_spill] sm:$0xff] }
 0x2b3   : > { %6305 = vmatprep.subr.bf16.mxu0 %v17733_v47  ;;  %v4454_v30 = vsel %vm4215_vm9, %v25826_v51, %v25820_v53  ;;  %v4729_v47 = vpack.c.bf16 %v20785_v56, %v20785_v56  ;;  %v4470_v22 = vsel %vm4219_vm11, %v20184_v7, %v4469_v34  ;;  %v4515_v46 = vsel %vm4215_vm9, %v25863_v1, %v25772_v42  ;;  %v25864_v3 = vld [vmem:[#allocation27_spill] sm:$0xff]  ;;  %v17734_v34 = vld [vmem:[%s25709_s29 + $0x380] ss:$8 sps:$4 sm:$0xff]  }
 0x2b4   : > { %v4455_v18 = vsel %vm4217_vm10, %v25827_v9, %v4454_v30  ;;  %v4481_v38 = vsel %vm4227_vm15, %v20785_v56, %v4480_v50  ;;  %6259 = vmatmul.mubr.bf16.gmra.mxu1 %v4714_v32  ;;  %v4503_v51 = vsel %vm4219_vm11, %v25864_v3, %v4502_v60  ;;  %v25865_v58 = vld [vmem:[#allocation43_spill] sm:$0xff]  ;;  %v4017_v9 = vmax.f32 %v4015_v14, %v4016_v41  ;;  %v25867_v39 = vld [vmem:[#allocation46_spill] sm:$0xff] }
 0x2b5   : > { %v4516_v30 = vsel %vm4217_vm10, %v25865_v58, %v4515_v46  ;;  %6268 = vmatprep.mubr.bf16.mxu1 %v4729_v47  ;;  %v4026_v7 = vmax.f32 %v4024_v54, %v4025_v21  ;;  %v4504_v26 = vsel %vm4221_vm12, %v25866_v28, %v4503_v51  ;;  %v17745_v60 = vld [vmem:[%s25709_s29 + $0x574] ss:$8 sps:$4 sm:$0xff]   ;;  %6343 = vmatpush1.bf16.msra.mxu1 %v17746_v4  ;;  %v20850_v14 = vmax.f32 %v4007_v44, 0.0  ;;  %v17752_v51 = vld [vmem:[%s25709_s29 + $0x440] ss:$8 sps:$4 sm:$0xff]  }
 0x2b6   : > { %6306 = vmatpush2.bf16.msra.mxu0 %v17731_v16  ;;  %v4517_v50 = vsel %vm4219_vm11, %v25867_v39, %v4516_v30  ;;  %v4456_v41 = vsel %vm4219_vm11, %v25828_v61, %v4455_v18  ;;  %v4471_v54 = vsel %vm4221_vm12, %v20316_v43, %v4470_v22  ;;  %v25868_v16 = vld [vmem:[#allocation49_spill] sm:$0xff]  ;;  %v25870_v47 = vld [vmem:[#allocation68_spill] sm:$0xff]  ;;  %6344 = vmatprep.subr.bf16.mxu1 %v17754_v8  ;;  %v25871_v22 = vld [vmem:[#allocation51_spill] sm:$0xff]  ;;  %v4018_v61 = vrot.slane %v4017_v9, 2 }
 0x2b7   : > { %6307 = vmatprep.subr.bf16.mxu0 %v17736_v24  ;;  %v4518_v21 = vsel %vm4221_vm12, %v25868_v16, %v4517_v50  ;;  %v25869_v24 = vld [vmem:[#allocation32_spill] sm:$0xff]  ;;  %v4467_v4 = vsel %vm4227_vm15, %v25870_v47, %v4466_v48  ;;  %v4472_v44 = vsel %vm4223_vm13, %v25860_v19, %v4471_v54  ;;  %v25872_v30 = vld [vmem:[#allocation31_spill] sm:$0xff]  ;;  %v25873_v43 = vld [vmem:[#allocation53_spill] sm:$0xff]  ;;  %v4583_v48 = vsel %vm4215_vm9, %v25865_v58, %v25863_v1 }
 0x2b8   : > { %v4432_v32 = vsel %vm4227_vm15, %v25869_v24, %v4431_v6  ;;  %v17760_v18 = vld [vmem:[%s25709_s29 + $0x434] ss:$8 sps:$4 sm:$0xff]   ;;  %v4519_v46 = vsel %vm4223_vm13, %v25871_v22, %v4518_v21  ;;  %v4505_v50 = vsel %vm4223_vm13, %v25872_v30, %v4504_v26  ;;  %v17743_v54 = vld [vmem:[%s25709_s29 + $0x570] ss:$8 sps:$4 sm:$0xff]   ;;  %v4717_v19 = vpack.c.bf16 %v4481_v38, %v4467_v4  ;;  %v17749_v58 = vld [vmem:[%s25709_s29 + $0x560] ss:$8 sps:$4 sm:$0xff]  }
 0x2b9   : > { %v4520_v6 = vsel %vm4225_vm14, %v25873_v43, %v4519_v46  ;;  %v4702_v8 = vpack.c.bf16 %v20794_v2, %v4432_v32  ;;  %v4457_v21 = vsel %vm4221_vm12, %v25829_v40, %v4456_v41  ;;  %v4027_v26 = vrot.slane %v4026_v7, 1  ;;  %v17751_v46 = vld [vmem:[%s25709_s29 + $0x564] ss:$8 sps:$4 sm:$0xff]   ;;  %6345 = vmatpush1.bf16.msra.mxu1 %v17752_v51  ;;  %v17758_v38 = vld [vmem:[%s25709_s29 + $0x430] ss:$8 sps:$4 sm:$0xff]  }
 0x2ba   : > { %6308 = vmatpush2.bf16.msra.mxu0 %v17734_v34  ;;  %v4458_v1 = vsel %vm4223_vm13, %v25861_v25, %v4457_v21  ;;  %v4728_v2 = vpack.c.bf16 %v20850_v14, %v20850_v14  ;;  %v4521_v34 = vsel %vm4227_vm15, %v19848_v62, %v4520_v6  ;;  %6346 = vmatprep.subr.bf16.mxu1 %v17760_v18  ;;  %v25874_v41 = vld [vmem:[#allocation33_spill] sm:$0xff]  ;;  %v25875_v6 = vld [vmem:[#allocation35_spill] sm:$0xff] }
 0x2bb   : > { %6399 = vmatprep.subr.bf16.mxu0 %v17745_v60  ;;  %v4473_v60 = vsel %vm4225_vm14, %v20514_v57, %v4472_v44  ;;  %v4506_v32 = vsel %vm4225_vm14, %v25874_v41, %v4505_v50  ;;  %v17766_v51 = vld [vmem:[%s25709_s29 + $0x424] ss:$8 sps:$4 sm:$0xff]   ;;  %v4569_v4 = vsel %vm4215_vm9, %v25773_v13, %v19579_v63  ;;  %v4584_v21 = vsel %vm4217_vm10, %v25867_v39, %v4583_v48 }
 0x2bc   : > { %6269 = vmatmul.mubr.bf16.gmra.mxu1 %v4728_v2  ;;  %v4507_v44 = vsel %vm4227_vm15, %v25875_v6, %v4506_v32  ;;  %v4019_v18 = vmax.f32 %v4017_v9, %v4018_v61  ;;  %v4585_v50 = vsel %vm4219_vm11, %v25868_v16, %v4584_v21  ;;  %v4028_v57 = vmax.f32 %v4026_v7, %v4027_v26  ;;  %v25876_v13 = vld [vmem:[#allocation62_spill] sm:$0xff]  ;;  %v17757_v9 = vld [vmem:[%s25709_s29 + $0x554] ss:$8 sps:$4 sm:$0xff]  }
 0x2bd   : > { %6310 = vmatmul.mubr.bf16.vlgmr.msra.gmra.mxu0 %v4702_v8  ;;  %v4705_v63 = vpack.c.bf16 %v4521_v34, %v4507_v44  ;;  %v2179_v48 = vrot.slane %v25876_v13, %v19360_v37  ;;  %v4459_v8 = vsel %vm4225_vm14, %v25862_v52, %v4458_v1  ;;  %6347 = vmatpush1.bf16.msra.mxu1 %v17758_v38  ;;  %v17764_v61 = vld [vmem:[%s25709_s29 + $0x420] ss:$8 sps:$4 sm:$0xff]  }
 0x2be   : > { %6319 = vmatprep.mubr.bf16.mxu0 %v4717_v19  ;;  %6400 = vmatpush1.bf16.msra.mxu0 %v17743_v54  ;;  %v4474_v7 = vsel %vm4227_vm15, %v20850_v14, %v4473_v60  ;;  %v4570_v19 = vsel %vm4217_vm10, %v25864_v3, %v4569_v4  ;;  %v4586_v1 = vsel %vm4221_vm12, %v25871_v22, %v4585_v50  ;;  %v17772_v54 = vld [vmem:[%s25709_s29 + $0x414] ss:$8 sps:$4 sm:$0xff]   ;;  %v4020_v2 = vrot.slane %v4019_v18, 1  ;;  %v17755_v60 = vld [vmem:[%s25709_s29 + $0x550] ss:$8 sps:$4 sm:$0xff]  }
 0x2bf   : > { %6401 = vmatprep.subr.bf16.mxu0 %v17751_v46  ;;  %6370 = vmatprep.mubr.bf16.mxu1 %v4705_v63  ;;  %v25877_v26 = vcombine.high %v25876_v13, %v25876_v13  ;;  %v4571_v38 = vsel %vm4219_vm11, %v25866_v28, %v4570_v19  ;;  %v4460_v34 = vsel %vm4227_vm15, %v25821_v10, %v4459_v8  ;;  %v20948_v32 = vmax.f32 %v4028_v57, 0.0  ;;  %v17763_v13 = vld [vmem:[%s25709_s29 + $0x544] ss:$8 sps:$4 sm:$0xff]   ;;  %v25878_v8 = vld [vmem:[#allocation16_spill] sm:$0xff]  ;;  %v25882_v19 = vld [vmem:[#allocation47_spill] sm:$0xff] }
 0x2c0   : > { %6348 = vmatprep.subr.bf16.mxu1 %v17766_v51  ;;  %v4716_v51 = vpack.c.bf16 %v4474_v7, %v4460_v34  ;;  %v4587_v4 = vsel %vm4223_vm13, %v25873_v43, %v4586_v1  ;;  %v2195_v21 = vcombine.high %v2179_v48, %v2179_v48  ;;  %v4572_v57 = vsel %vm4221_vm12, %v25872_v30, %v4571_v38  ;;  %v17778_v50 = vld [vmem:[%s25709_s29 + $0x404] ss:$8 sps:$4 sm:$0xff]  }
 0x2c1   : > { %v20939_v46 = vrot.slane %v25877_v26, %v19360_v37  ;;  %6349 = vmatpush1.bf16.msra.mxu1 %v17764_v61  ;;  %v4731_v44 = vpack.c.bf16 %v20948_v32, %v20948_v32  ;;  %v25881_v7 = vld [vmem:[#allocation17_spill] sm:$0xff]  ;;  %v4021_v26 = vmax.f32 %v4019_v18, %v4020_v2  ;;  %v4588_v38 = vsel %vm4225_vm14, %v19848_v62, %v4587_v4 }
 0x2c2   : > { %6402 = vmatpush1.bf16.msra.mxu0 %v17749_v58  ;;  %v17770_v58 = vld [vmem:[%s25709_s29 + $0x410] ss:$8 sps:$4 sm:$0xff]   ;;  %6350 = vmatprep.subr.bf16.mxu1 %v17772_v54  ;;  %v20972_v1 = vadd.f32 %v25882_v19, %v25881_v7  ;;  %v17761_v54 = vld [vmem:[%s25709_s29 + $0x540] ss:$8 sps:$4 sm:$0xff]   ;;  %v4573_v34 = vsel %vm4223_vm13, %v25874_v41, %v4572_v57  ;;  %v20988_v2 = vrot.slane %v2195_v21, %v19360_v37  ;;  %v17790_v7 = vld [vmem:[%s25709_s29 + $0x4e4] ss:$8 sps:$4 sm:$0xff]  }
 0x2c3   : > { %6403 = vmatprep.subr.bf16.mxu0 %v17757_v9  ;;  %v3354_v63 = vcombine.low %v2179_v48, %v20939_v46  ;;  %v25879_v9 = vld [vmem:[#allocation45_spill] sm:$0xff]  ;;  %v17769_v48 = vld [vmem:[%s25709_s29 + $0x534] ss:$8 sps:$4 sm:$0xff]   ;;  %v4589_v21 = vsel %vm4227_vm15, %v19858_v15, %v4588_v38 }
 0x2c4   : > { %v20968_v61 = vadd.f32 %v25879_v9, %v25878_v8  ;;  %25883 = vst [vmem:[#allocation71_spill] sm:$0xff] %v20972_v1  ;;  %v17776_v18 = vld [vmem:[%s25709_s29 + $0x400] ss:$8 sps:$4 sm:$0xff]   ;;  %v17782_v8 = vld [vmem:[%s25709_s29 + $0x4f0] ss:$8 sps:$4 sm:$0xff]  }
 0x2c5   : > { %6320 = vmatmul.mubr.bf16.gmra.mxu0 %v4716_v51  ;;  %6351 = vmatpush1.bf16.msra.mxu1 %v17770_v58  ;;  %v17784_v51 = vld [vmem:[%s25709_s29 + $0x4f4] ss:$8 sps:$4 sm:$0xff]   ;;  %v21000_v58 = vmax.f32 %v4021_v26, 0.0  ;;  %v17773_v38 = vld [vmem:[%s25709_s29 + $0x520] ss:$8 sps:$4 sm:$0xff]  }
 0x2c6   : > { %25880 = vst [vmem:[#allocation61_spill] sm:$0xff] %v20968_v61  ;;  %6329 = vmatprep.mubr.bf16.mxu0 %v4731_v44  ;;  %6404 = vmatpush1.bf16.msra.mxu0 %v17755_v60  ;;  %v4574_v60 = vsel %vm4225_vm14, %v25875_v6, %v4573_v34  ;;  %v2198_v4 = vcombine.low %v20968_v61, %v20972_v1  ;;  %v17767_v44 = vld [vmem:[%s25709_s29 + $0x530] ss:$8 sps:$4 sm:$0xff]   ;;  %v17788_v34 = vld [vmem:[%s25709_s29 + $0x4e0] ss:$8 sps:$4 sm:$0xff]  }
 0x2c7   : > { %6405 = vmatprep.subr.bf16.mxu0 %v17763_v13  ;;  %6352 = vmatprep.subr.bf16.mxu1 %v17778_v50  ;;  %v20996_v13 = vrot.slane %v3354_v63, %v19360_v37  ;;  %v4730_v57 = vpack.c.bf16 %v21000_v58, %v21000_v58  ;;  %v4575_v50 = vsel %vm4227_vm15, %v25772_v42, %v4574_v60  ;;  %v17775_v63 = vld [vmem:[%s25709_s29 + $0x524] ss:$8 sps:$4 sm:$0xff]   ;;  %v17793_v61 = vld [vmem:[%s25709_s29 + $0x5f4] ss:$8 sps:$4 sm:$0xff]  }
 0x2c8   : > { %v4707_v9 = vpack.c.bf16 %v4589_v21, %v4575_v50  ;;  %v2206_v26 = vrot.slane %v2198_v4, %v19360_v37  ;;  %v25884_v60 = vld [vmem:[#allocation41_spill] sm:$0xff]  ;;  %v2197_v21 = vcombine.high %v20939_v46, %v20939_v46  ;;  %v17779_v50 = vld [vmem:[%s25709_s29 + $0x510] ss:$8 sps:$4 sm:$0xff]  }
 0x2c9   : > { %6353 = vmatpush1.bf16.msra.mxu1 %v17776_v18  ;;  %v3370_v19 = vcombine.high %v20996_v13, %v20988_v2  ;;  %v17796_v18 = vld [vmem:[%s25709_s29 + $0x4d4] ss:$8 sps:$4 sm:$0xff]   ;;  %v17794_v46 = vld [vmem:[%s25709_s29 + $0x4d0] ss:$8 sps:$4 sm:$0xff]  }
 0x2ca   : > { %6406 = vmatpush1.bf16.msra.mxu0 %v17761_v54  ;;  %6354 = vmatprep.subr.bf16.mxu1 %v17784_v51  ;;  %v4508_v54 = vsel %vm4215_vm9, %v25845_v33, %v25843_v45  ;;  %v25892_v45 = vld [vmem:[#allocation54_spill] sm:$0xff]  ;;  %v25896_v42 = vld [vmem:[#allocation55_spill] sm:$0xff] }
 0x2cb   : > { %6407 = vmatprep.subr.bf16.mxu0 %v17769_v48  ;;  %v17781_v48 = vld [vmem:[%s25709_s29 + $0x514] ss:$8 sps:$4 sm:$0xff]   ;;  %v4509_v51 = vsel %vm4217_vm10, %v25884_v60, %v4508_v54  ;;  %v3384_v4 = vrot.slane %v3370_v19, %v19360_v37  ;;  %v17802_v54 = vld [vmem:[%s25709_s29 + $0x4c4] ss:$8 sps:$4 sm:$0xff]  }
 0x2cc   : > { %v4510_v19 = vsel %vm4219_vm11, %v25854_v49, %v4509_v51 }
 0x2cd   : > { %6330 = vmatmul.mubr.bf16.gmra.mxu0 %v4730_v57  ;;  %6355 = vmatpush2.bf16.msra.mxu1 %v17782_v8  ;;  %v21044_v57 = vrot.slane %v2206_v26, %v19360_v37  ;;  %v25887_v8 = vld [vmem:[#allocation23_spill] sm:$0xff] }
 0x2ce   : > { %6408 = vmatpush1.bf16.msra.mxu0 %v17767_v44  ;;  %6431 = vmatprep.mubr.bf16.mxu0 %v4707_v9  ;;  %v2214_v44 = vcombine.high %v2206_v26, %v2206_v26  ;;  %v3369_v26 = vcombine.low %v20996_v13, %v20988_v2 }
 0x2cf   : > { %6409 = vmatprep.subr.bf16.mxu0 %v17775_v63  ;;  %6356 = vmatprep.subr.bf16.mxu1 %v17790_v7  ;;  %25885 = vst [vmem:[#allocation72_spill] sm:$0xff] %v21044_v57  ;;  %v25886_v63 = vld [vmem:[#allocation22_spill] sm:$0xff]  ;;  %v3385_v2 = vcombine.low %v2197_v21, %v21044_v57 }
 0x2d0   : > { %v4494_v9 = vsel %vm4215_vm9, %v25887_v8, %v25886_v63  ;;  %v17787_v7 = vld [vmem:[%s25709_s29 + $0x504] ss:$8 sps:$4 sm:$0xff]   ;;  %v21074_v51 = vrot.slane %v2214_v44, %v19360_v37  ;;  %v17800_v21 = vld [vmem:[%s25709_s29 + $0x4c0] ss:$8 sps:$4 sm:$0xff]   ;;  %v3377_v1 = vrot.slane %v3369_v26, %v19360_v37 }
 0x2d1   : > { %6357 = vmatpush2.bf16.msra.mxu1 %v17788_v34  ;;  %v25888_v34 = vld [vmem:[#allocation42_spill] sm:$0xff]  ;;  %v4495_v13 = vsel %vm4217_vm10, %v25853_v36, %v4494_v9  ;;  %v17808_v9 = vld [vmem:[%s25709_s29 + $0x4b4] ss:$8 sps:$4 sm:$0xff]  }
 0x2d2   : > { %6410 = vmatpush1.bf16.msra.mxu0 %v17773_v38  ;;  %6358 = vmatprep.subr.bf16.mxu1 %v17796_v18  ;;  %v4511_v38 = vsel %vm4221_vm12, %v25855_v11, %v4510_v19  ;;  %v4543_v63 = vsel %vm4215_vm9, %v20170_v35, %v25888_v34  ;;  %25889 = vst [vmem:[#allocation73_spill] sm:$0xff] %v21074_v51  ;;  %v4036_v18 = vsel %vm905_vm3, %v3384_v4, -inf  ;;  %v17785_v19 = vld [vmem:[%s25709_s29 + $0x500] ss:$8 sps:$4 sm:$0xff]  }
 0x2d3   : > { %6411 = vmatprep.subr.bf16.mxu0 %v17781_v48  ;;  %v4529_v48 = vsel %vm4215_vm9, %v25810_v20, %v19858_v15  ;;  %v4512_v44 = vsel %vm4223_vm13, %v25813_v31, %v4511_v38  ;;  %v4037_v57 = vrot.slane %v4036_v18, 4  ;;  %v21102_v34 = vrot.slane %v3385_v2, %v19360_v37 }
 0x2d4   : > { %v4530_v4 = vsel %vm4217_vm10, %v25818_v55, %v4529_v48  ;;  %v21106_v38 = vrot.slane %v21074_v51, %v19360_v37  ;;  %v17791_v48 = vld [vmem:[%s25709_s29 + $0x5f0] ss:$8 sps:$4 sm:$0xff]  }
 0x2d5   : > { %6359 = vmatpush2.bf16.msra.mxu1 %v17794_v46  ;;  %v4531_v26 = vsel %vm4219_vm11, %v25825_v0, %v4530_v4  ;;  %v4562_v4 = vsel %vm4215_vm9, %v25853_v36, %v25887_v8  ;;  %v17797_v8 = vld [vmem:[%s25709_s29 + $0x5e0] ss:$8 sps:$4 sm:$0xff]  }
 0x2d6   : > { %6412 = vmatpush1.bf16.msra.mxu0 %v17779_v50  ;;  %v4544_v50 = vsel %vm4217_vm10, %v20267_v29, %v4543_v63  ;;  %6360 = vmatprep.subr.bf16.mxu1 %v17802_v54  ;;  %v4513_v63 = vsel %vm4225_vm14, %v25815_v12, %v4512_v44 }
 0x2d7   : > { %6413 = vmatprep.subr.bf16.mxu0 %v17787_v7  ;;  %v25890_v7 = vld [vmem:[#allocation26_spill] sm:$0xff]  ;;  %v4545_v2 = vsel %vm4219_vm11, %v20281_v27, %v4544_v50  ;;  %v4038_v50 = vmax.f32 %v4036_v18, %v4037_v57 }
 0x2d8   : > { %v4496_v46 = vsel %vm4219_vm11, %v25890_v7, %v4495_v13  ;;  %v17799_v13 = vld [vmem:[%s25709_s29 + $0x5e4] ss:$8 sps:$4 sm:$0xff]   ;;  %v4546_v44 = vsel %vm4221_vm12, %v20370_v17, %v4545_v2  ;;  %v4029_v2 = vsel %vm905_vm3, %v3377_v1, -inf  ;;  %v4563_v18 = vsel %vm4217_vm10, %v25890_v7, %v4562_v4 }
 0x2d9   : > { %v4497_v54 = vsel %vm4221_vm12, %v25858_v5, %v4496_v46  ;;  %6361 = vmatpush2.bf16.msra.mxu1 %v17800_v21  ;;  %v4532_v46 = vsel %vm4221_vm12, %v25811_v59, %v4531_v26  ;;  %v21141_v26 = vsel %vm4227_vm15, %v25820_v53, %v4513_v63  ;;  %v4547_v57 = vsel %vm4223_vm13, %v25892_v45, %v4546_v44  ;;  %v17812_v63 = vld [vmem:[%s25709_s29 + $0x4a0] ss:$8 sps:$4 sm:$0xff]  }
 0x2da   : > { %6414 = vmatpush1.bf16.msra.mxu0 %v17785_v19  ;;  %v17806_v19 = vld [vmem:[%s25709_s29 + $0x4b0] ss:$8 sps:$4 sm:$0xff]   ;;  %6362 = vmatprep.subr.bf16.mxu1 %v17808_v9  ;;  %v4498_v21 = vsel %vm4223_vm13, %v25859_v23, %v4497_v54  ;;  %v4576_v54 = vsel %vm4215_vm9, %v25884_v60, %v25845_v33  ;;  %v3401_v1 = vcombine.high %v21102_v34, %v21106_v38  ;;  %v4030_v15 = vrot.slane %v4029_v2, 4 }
 0x2db   : > { %6415 = vmatprep.subr.bf16.mxu0 %v17793_v61  ;;  %v17814_v61 = vld [vmem:[%s25709_s29 + $0x4a4] ss:$8 sps:$4 sm:$0xff]   ;;  %v4564_v44 = vsel %vm4219_vm11, %v25858_v5, %v4563_v18  ;;  %v25894_v33 = vld [vmem:[#allocation40_spill] sm:$0xff]  ;;  %v4548_v18 = vsel %vm4225_vm14, %v20785_v56, %v4547_v57  ;;  %v4577_v5 = vsel %vm4217_vm10, %v25854_v49, %v4576_v54 }
 0x2dc   : > { %v25891_v9 = vld [vmem:[#allocation66_spill] sm:$0xff]  ;;  %v25897_v57 = vld [vmem:[#allocation57_spill] sm:$0xff]  ;;  %v21220_v49 = vsel %vm4227_vm15, %v20948_v32, %v4548_v18 }
 0x2dd   : > { %v4533_v36 = vsel %vm4223_vm13, %v25891_v9, %v4532_v46  ;;  %6363 = vmatpush2.bf16.msra.mxu1 %v17806_v19  ;;  %v4499_v46 = vsel %vm4225_vm14, %v25869_v24, %v4498_v21  ;;  %v25893_v4 = vld [vmem:[#allocation34_spill] sm:$0xff]  ;;  %v4039_v19 = vrot.slane %v4038_v50, 2  ;;  %v4578_v21 = vsel %vm4219_vm11, %v25855_v11, %v4577_v5 }
 0x2de   : > { %6416 = vmatpush2.bf16.msra.mxu0 %v17791_v48  ;;  %v17805_v48 = vld [vmem:[%s25709_s29 + $0x5d4] ss:$8 sps:$4 sm:$0xff]   ;;  %6364 = vmatprep.subr.bf16.mxu1 %v17814_v61  ;;  %v21173_v51 = vsel %vm4227_vm15, %v25893_v4, %v4499_v46  ;;  %v25895_v7 = vld [vmem:[#allocation74_spill] sm:$0xff]  ;;  %v4534_v61 = vsel %vm4225_vm14, %v25870_v47, %v4533_v36  ;;  %v4597_v36 = vsel %vm4215_vm9, %v25818_v55, %v25810_v20 }
 0x2df   : > { %6417 = vmatprep.subr.bf16.mxu0 %v17799_v13  ;;  %v17820_v13 = vld [vmem:[%s25709_s29 + $0x494] ss:$8 sps:$4 sm:$0xff]   ;;  %v4536_v60 = vsel %vm4215_vm9, %v25895_v7, %v25894_v33  ;;  %v17803_v46 = vld [vmem:[%s25709_s29 + $0x5d0] ss:$8 sps:$4 sm:$0xff]   ;;  %v4565_v33 = vsel %vm4221_vm12, %v25859_v23, %v4564_v44  ;;  %v4522_v4 = vsel %vm4215_vm9, %v25897_v57, %v25896_v42  ;;  %v4611_v5 = vsel %vm4215_vm9, %v20267_v29, %v20170_v35 }
 0x2e0   : > { %v17818_v54 = vld [vmem:[%s25709_s29 + $0x490] ss:$8 sps:$4 sm:$0xff]   ;;  %v3415_v55 = vrot.slane %v3401_v1, %v19360_v37  ;;  %v4040_v20 = vmax.f32 %v4038_v50, %v4039_v19  ;;  %v4031_v35 = vmax.f32 %v4029_v2, %v4030_v15  ;;  %v4579_v1 = vsel %vm4221_vm12, %v25813_v31, %v4578_v21  ;;  %v17809_v50 = vld [vmem:[%s25709_s29 + $0x5c0] ss:$8 sps:$4 sm:$0xff]  }
 0x2e1   : > { %6365 = vmatpush2.bf16.msra.mxu1 %v17812_v63  ;;  %v25898_v44 = vld [vmem:[#allocation76_spill] sm:$0xff]  ;;  %v25899_v11 = vld [vmem:[#allocation70_spill] sm:$0xff]  ;;  %v4598_v15 = vsel %vm4217_vm10, %v25825_v0, %v4597_v36 }
 0x2e2   : > { %6418 = vmatpush2.bf16.msra.mxu0 %v17797_v8  ;;  %v17811_v8 = vld [vmem:[%s25709_s29 + $0x5c4] ss:$8 sps:$4 sm:$0xff]   ;;  %v4537_v23 = vsel %vm4217_vm10, %v25898_v44, %v4536_v60  ;;  %6366 = vmatprep.subr.bf16.mxu1 %v17820_v13  ;;  %v21216_v63 = vsel %vm4227_vm15, %v25899_v11, %v4534_v61  ;;  %v21224_v60 = vsel %vm4223_vm13, %v25869_v24, %v4565_v33  ;;  %v25900_v13 = vld [vmem:[#allocation59_spill] sm:$0xff]  ;;  %v17824_v21 = vld [vmem:[%s25709_s29 + $0x480] ss:$8 sps:$4 sm:$0xff]   ;;  %v4050_v36 = vsel %vm905_vm3, %v3415_v55, -inf }
 0x2e3   : > { %6419 = vmatprep.subr.bf16.mxu0 %v17805_v48  ;;  %v17826_v48 = vld [vmem:[%s25709_s29 + $0x484] ss:$8 sps:$4 sm:$0xff]   ;;  %v4523_v42 = vsel %vm4217_vm10, %v25900_v13, %v4522_v4  ;;  %v4679_v61 = vsel %vm4215_vm9, %v20281_v27, %v20267_v29  ;;  %v4612_v33 = vsel %vm4217_vm10, %v20281_v27, %v4611_v5  ;;  %v17817_v29 = vld [vmem:[%s25709_s29 + $0x5b4] ss:$8 sps:$4 sm:$0xff]   ;;  %v4599_v18 = vsel %vm4219_vm11, %v25811_v59, %v4598_v15 }
 0x2e4   : > { %v25901_v2 = vld [vmem:[#allocation50_spill] sm:$0xff]  ;;  %v4680_v4 = vsel %vm4217_vm10, %v20370_v17, %v4679_v61  ;;  %v4613_v27 = vsel %vm4219_vm11, %v20370_v17, %v4612_v33  ;;  %v4524_v5 = vsel %vm4219_vm11, %v25829_v40, %v4523_v42  ;;  %v4032_v61 = vrot.slane %v4031_v35, 2 }
 0x2e5   : > { %v4538_v19 = vsel %vm4219_vm11, %v25901_v2, %v4537_v23  ;;  %6367 = vmatpush2.bf16.msra.mxu1 %v17818_v54  ;;  %v25902_v23 = vld [vmem:[#allocation52_spill] sm:$0xff]  ;;  %v4041_v54 = vrot.slane %v4040_v20, 1  ;;  %v4681_v15 = vsel %vm4219_vm11, %v25892_v45, %v4680_v4  ;;  %v4719_v17 = vpack.c.bf16 %v21220_v49, %v21216_v63 }
 0x2e6   : > { %6420 = vmatpush2.bf16.msra.mxu0 %v17803_v46  ;;  %v4539_v46 = vsel %vm4221_vm12, %v25902_v23, %v4538_v19  ;;  %6368 = vmatprep.subr.bf16.mxu1 %v17826_v48  ;;  %v4580_v33 = vsel %vm4223_vm13, %v25815_v12, %v4579_v1  ;;  %v4525_v55 = vsel %vm4221_vm12, %v25861_v25, %v4524_v5  ;;  %v17815_v42 = vld [vmem:[%s25709_s29 + $0x5b0] ss:$8 sps:$4 sm:$0xff]   ;;  %v4051_v24 = vrot.slane %v4050_v36, 4 }
 0x2e7   : > { %6421 = vmatprep.subr.bf16.mxu0 %v17811_v8  ;;  %v17835_v8 = vld [vmem:[%s25709_s29 + $0x674] ss:$8 sps:$4 sm:$0xff]   ;;  %v4682_v48 = vsel %vm4221_vm12, %v20785_v56, %v4681_v15  ;;  %v25904_v49 = vcombine.low %v21102_v34, %v21106_v38  ;;  %v4600_v5 = vsel %vm4221_vm12, %v25891_v9, %v4599_v18  ;;  %v4672_v34 = vsel %vm4215_vm9, %v25901_v2, %v25898_v44  ;;  %v17833_v38 = vld [vmem:[%s25709_s29 + $0x670] ss:$8 sps:$4 sm:$0xff]  }
 0x2e8   : > { %v25903_v19 = vld [vmem:[#allocation67_spill] sm:$0xff]  ;;  %v21283_v1 = vsel %vm4223_vm13, %v20948_v32, %v4682_v48  ;;  %v4033_v15 = vmax.f32 %v4031_v35, %v4032_v61  ;;  %v4673_v18 = vsel %vm4217_vm10, %v25902_v23, %v4672_v34  ;;  %v25907_v61 = vld [vmem:[#allocation25_spill] sm:$0xff]  ;;  %v4590_v34 = vsel %vm4215_vm9, %v25900_v13, %v25897_v57 }
 0x2e9   : > { %v4540_v4 = vsel %vm4223_vm13, %v25903_v19, %v4539_v46  ;;  %v3408_v63 = vrot.slane %v25904_v49, %v19360_v37  ;;  %6369 = vmatpush2.bf16.msra.mxu1 %v17824_v21  ;;  %v4614_v46 = vsel %vm4221_vm12, %v25892_v45, %v4613_v27  ;;  %v25905_v48 = vld [vmem:[#allocation43_spill] sm:$0xff]  ;;  %v17838_v45 = vld [vmem:[%s25709_s29 + $0x664] ss:$8 sps:$4 sm:$0xff]   ;;  %v4526_v27 = vsel %vm4223_vm13, %v25862_v52, %v4525_v55 }
 0x2ea   : > { %6422 = vmatpush2.bf16.msra.mxu0 %v17809_v50  ;;  %v17823_v50 = vld [vmem:[%s25709_s29 + $0x5a4] ss:$8 sps:$4 sm:$0xff]   ;;  %6460 = vmatprep.subr.bf16.mxu1 %v17835_v8  ;;  %v4651_v21 = vsel %vm4215_vm9, %v25867_v39, %v25905_v48  ;;  %v4541_v49 = vsel %vm4225_vm14, %v20850_v14, %v4540_v4  ;;  %v17821_v39 = vld [vmem:[%s25709_s29 + $0x5a0] ss:$8 sps:$4 sm:$0xff]   ;;  %v25906_v8 = vpack.c.bf16 %v21141_v26, %v21173_v51 }
 0x2eb   : > { %6423 = vmatprep.subr.bf16.mxu0 %v17817_v29  ;;  %v4042_v29 = vmax.f32 %v4040_v20, %v4041_v54  ;;  %v4652_v35 = vsel %vm4217_vm10, %v25868_v16, %v4651_v21  ;;  %v4674_v20 = vsel %vm4219_vm11, %v25903_v19, %v4673_v18  ;;  %v4052_v54 = vmax.f32 %v4050_v36, %v4051_v24  ;;  %v17836_v26 = vld [vmem:[%s25709_s29 + $0x660] ss:$8 sps:$4 sm:$0xff]   ;;  %v17832_v18 = vld [vmem:[%s25709_s29 + $0x584] ss:$8 sps:$4 sm:$0xff]  }
 0x2ec   : > { %6371 = vmatmul.mubr.bf16.vlgmr.msra.gmra.mxu1 %v25906_v8  ;;  %v4637_v55 = vsel %vm4215_vm9, %v25864_v3, %v25907_v61  ;;  %v4043_v4 = vsel %vm905_vm3, %v3408_v63, -inf  ;;  %v4675_v16 = vsel %vm4221_vm12, %v20850_v14, %v4674_v20  ;;  %v4615_v51 = vsel %vm4223_vm13, %v20785_v56, %v4614_v46  ;;  %v17841_v46 = vld [vmem:[%s25709_s29 + $0x654] ss:$8 sps:$4 sm:$0xff]   ;;  %v17844_v8 = vld [vmem:[%s25709_s29 + $0x644] ss:$8 sps:$4 sm:$0xff]  }
 0x2ed   : > { %6380 = vmatprep.mubr.bf16.mxu1 %v4719_v17  ;;  %v4638_v24 = vsel %vm4217_vm10, %v25866_v28, %v4637_v55  ;;  %v21335_v3 = vsel %vm4223_vm13, %v21000_v58, %v4675_v16  ;;  %6461 = vmatpush1.bf16.msra.mxu1 %v17833_v38  ;;  %v4527_v36 = vsel %vm4225_vm14, %v25821_v10, %v4526_v27  ;;  %v4034_v63 = vrot.slane %v4033_v15, 1  ;;  %v25908_v27 = vld [vmem:[#allocation69_spill] sm:$0xff] }
 0x2ee   : > { %6424 = vmatpush2.bf16.msra.mxu0 %v17815_v42  ;;  %v17829_v42 = vld [vmem:[%s25709_s29 + $0x594] ss:$8 sps:$4 sm:$0xff]   ;;  %v4604_v56 = vsel %vm4215_vm9, %v25898_v44, %v25895_v7  ;;  %v4653_v28 = vsel %vm4219_vm11, %v25871_v22, %v4652_v35  ;;  %6462 = vmatprep.subr.bf16.mxu1 %v17838_v45  ;;  %v21347_v17 = vmax.f32 %v4042_v29, 0.0  ;;  %v4044_v38 = vrot.slane %v4043_v4, 4  ;;  %v17827_v22 = vld [vmem:[%s25709_s29 + $0x590] ss:$8 sps:$4 sm:$0xff]  }
 0x2ef   : > { %6425 = vmatprep.subr.bf16.mxu0 %v17823_v50  ;;  %v4542_v50 = vsel %vm4227_vm15, %v21000_v58, %v4541_v49  ;;  %v4581_v44 = vsel %vm4225_vm14, %v25820_v53, %v4580_v33  ;;  %v4601_v29 = vsel %vm4223_vm13, %v25870_v47, %v4600_v5  ;;  %v4053_v48 = vrot.slane %v4052_v54, 2 }
 0x2f0   : > { %v4639_v21 = vsel %vm4219_vm11, %v25872_v30, %v4638_v24  ;;  %v4616_v45 = vsel %vm4225_vm14, %v20948_v32, %v4615_v51  ;;  %v4528_v49 = vsel %vm4227_vm15, %v25908_v27, %v4527_v36  ;;  %v4605_v33 = vsel %vm4217_vm10, %v25901_v2, %v4604_v56  ;;  %v17839_v30 = vld [vmem:[%s25709_s29 + $0x650] ss:$8 sps:$4 sm:$0xff]  }
 0x2f1   : > { %v4654_v5 = vsel %vm4221_vm12, %v25873_v43, %v4653_v28  ;;  %6463 = vmatpush1.bf16.msra.mxu1 %v17836_v26  ;;  %v4718_v35 = vpack.c.bf16 %v4542_v50, %v4528_v49  ;;  %v4035_v20 = vmax.f32 %v4033_v15, %v4034_v63  ;;  %v4606_v32 = vsel %vm4219_vm11, %v25902_v23, %v4605_v33  ;;  %v17830_v23 = vld [vmem:[%s25709_s29 + $0x580] ss:$8 sps:$4 sm:$0xff]  }
 0x2f2   : > { %6426 = vmatpush2.bf16.msra.mxu0 %v17821_v39  ;;  %v4591_v39 = vsel %vm4217_vm10, %v25829_v40, %v4590_v34  ;;  %6464 = vmatprep.subr.bf16.mxu1 %v17841_v46  ;;  %v4733_v2 = vpack.c.bf16 %v21347_v17, %v21347_v17  ;;  %v4640_v15 = vsel %vm4221_vm12, %v25874_v41, %v4639_v21  ;;  %v25909_v51 = vld [vmem:[#allocation34_spill] sm:$0xff]  ;;  %v25911_v63 = vld [vmem:[#allocation37_spill] sm:$0xff]  ;;  %v25912_v28 = vld [vmem:[#allocation56_spill] sm:$0xff] }
 0x2f3   : > { %6427 = vmatprep.subr.bf16.mxu0 %v17829_v42  ;;  %v4592_v43 = vsel %vm4219_vm11, %v25861_v25, %v4591_v39  ;;  %v4045_v61 = vmax.f32 %v4043_v4, %v4044_v38  ;;  %v4054_v55 = vmax.f32 %v4052_v54, %v4053_v48  ;;  %v4641_v16 = vsel %vm4223_vm13, %v25875_v6, %v4640_v15  ;;  %v25910_v4 = vld [vmem:[#allocation55_spill] sm:$0xff]  ;;  %v25913_v34 = vld [vmem:[#allocation36_spill] sm:$0xff]  ;;  %v25918_v15 = vld [vmem:[#allocation61_spill] sm:$0xff] }
 0x2f4   : > { %6381 = vmatmul.mubr.bf16.gmra.mxu1 %v4718_v35  ;;  %v4655_v42 = vsel %vm4223_vm13, %v19848_v62, %v4654_v5  ;;  %v4567_v24 = vsel %vm4225_vm14, %v25909_v51, %v21224_v60  ;;  %v4607_v41 = vsel %vm4221_vm12, %v25903_v19, %v4606_v32  ;;  %v4582_v26 = vsel %vm4227_vm15, %v25910_v4, %v4581_v44  ;;  %v17842_v60 = vld [vmem:[%s25709_s29 + $0x640] ss:$8 sps:$4 sm:$0xff]   ;;  %v17847_v19 = vld [vmem:[%s25709_s29 + $0x634] ss:$8 sps:$4 sm:$0xff]  }
 0x2f5   : > { %6390 = vmatprep.mubr.bf16.mxu1 %v4733_v2  ;;  %v4602_v54 = vsel %vm4225_vm14, %v25899_v11, %v4601_v29  ;;  %v4617_v6 = vsel %vm4227_vm15, %v21347_v17, %v4616_v45  ;;  %6465 = vmatpush1.bf16.msra.mxu1 %v17839_v30  ;;  %v21411_v62 = vmax.f32 %v4035_v20, 0.0  ;;  %v4593_v36 = vsel %vm4221_vm12, %v25862_v52, %v4592_v43  ;;  %v25914_v29 = vld [vmem:[#allocation58_spill] sm:$0xff]  ;;  %v25916_v35 = vld [vmem:[#allocation39_spill] sm:$0xff] }
 0x2f6   : > { %6428 = vmatpush2.bf16.msra.mxu0 %v17827_v22  ;;  %6466 = vmatprep.subr.bf16.mxu1 %v17844_v8  ;;  %v4642_v56 = vsel %vm4225_vm14, %v25911_v63, %v4641_v16  ;;  %v4656_v50 = vsel %vm4225_vm14, %v25912_v28, %v4655_v42  ;;  %v4046_v46 = vrot.slane %v4045_v61, 2  ;;  %v4568_v38 = vsel %vm4227_vm15, %v25913_v34, %v4567_v24  ;;  %v17850_v2 = vld [vmem:[%s25709_s29 + $0x624] ss:$8 sps:$4 sm:$0xff]   ;;  %v25917_v8 = vld [vmem:[#allocation71_spill] sm:$0xff]  ;;  %v25919_v24 = vld [vmem:[#allocation40_spill] sm:$0xff] }
 0x2f7   : > { %6429 = vmatprep.subr.bf16.mxu0 %v17832_v18  ;;  %v4608_v22 = vsel %vm4223_vm13, %v20850_v14, %v4607_v41  ;;  %v4055_v44 = vrot.slane %v4054_v55, 1  ;;  %v4657_v48 = vsel %vm4227_vm15, %v25914_v29, %v4656_v50  ;;  %v4706_v21 = vpack.c.bf16 %v4582_v26, %v4568_v38  ;;  %v25915_v18 = vld [vmem:[#allocation42_spill] sm:$0xff]  ;;  %v25920_v28 = vld [vmem:[#allocation73_spill] sm:$0xff]  ;;  %v25921_v50 = vld [vmem:[#allocation72_spill] sm:$0xff] }
 0x2f8   : > { %v4603_v45 = vsel %vm4227_vm15, %v25915_v18, %v4602_v54  ;;  %v4594_v33 = vsel %vm4223_vm13, %v25821_v10, %v4593_v36  ;;  %v4732_v5 = vpack.c.bf16 %v21411_v62, %v21411_v62  ;;  %v17845_v14 = vld [vmem:[%s25709_s29 + $0x630] ss:$8 sps:$4 sm:$0xff]   ;;  %v4643_v30 = vsel %vm4227_vm15, %v25916_v35, %v4642_v56  ;;  %v17856_v63 = vld [vmem:[%s25709_s29 + $0x604] ss:$8 sps:$4 sm:$0xff]   ;;  %v17854_v38 = vld [vmem:[%s25709_s29 + $0x600] ss:$8 sps:$4 sm:$0xff]  }
 0x2f9   : > { %v4721_v49 = vpack.c.bf16 %v4617_v6, %v4603_v45  ;;  %6467 = vmatpush1.bf16.msra.mxu1 %v17842_v60  ;;  %v4609_v20 = vsel %vm4225_vm14, %v21000_v58, %v4608_v22  ;;  %v4709_v39 = vpack.c.bf16 %v4657_v48, %v4643_v30  ;;  %v4047_v32 = vmax.f32 %v4045_v61, %v4046_v46  ;;  %v17848_v61 = vld [vmem:[%s25709_s29 + $0x620] ss:$8 sps:$4 sm:$0xff]   ;;  %v17851_v36 = vld [vmem:[%s25709_s29 + $0x610] ss:$8 sps:$4 sm:$0xff]  }
 0x2fa   : > { %6430 = vmatpush2.bf16.msra.mxu0 %v17830_v23  ;;  %6468 = vmatprep.subr.bf16.mxu1 %v17847_v19  ;;  %v4056_v43 = vmax.f32 %v4054_v55, %v4055_v44  ;;  %v2199_v23 = vcombine.high %v25918_v15, %v25917_v8  ;;  %v4595_v16 = vsel %vm4225_vm14, %v25908_v27, %v4594_v33  ;;  %v17853_v55 = vld [vmem:[%s25709_s29 + $0x614] ss:$8 sps:$4 sm:$0xff]   ;;  %v17857_v45 = vld [vmem:[%s25709_s29 + $0x6f0] ss:$8 sps:$4 sm:$0xff]  }
 0x2fb   : > { %v4610_v58 = vsel %vm4227_vm15, %v21411_v62, %v4609_v20  ;;  %v4048_v42 = vrot.slane %v4047_v32, 1  ;;  %v4596_v41 = vsel %vm4227_vm15, %v25919_v24, %v4595_v16  ;;  %v15867_v46 = vcombine.high %v25921_v50, %v25920_v28  ;;  %v17859_v44 = vld [vmem:[%s25709_s29 + $0x6f4] ss:$8 sps:$4 sm:$0xff]   ;;  %v17863_v30 = vld [vmem:[%s25709_s29 + $0x6d0] ss:$8 sps:$4 sm:$0xff]   ;;  %v25922_v16 = vld [vmem:[#allocation41_spill] sm:$0xff] }
 0x2fc   : > { %6391 = vmatmul.mubr.bf16.gmra.mxu1 %v4732_v5  ;;  %v21461_v26 = vmax.f32 %v4056_v43, 0.0  ;;  %v2213_v54 = vrot.slane %v2199_v23, %v19360_v37  ;;  %v4720_v6 = vpack.c.bf16 %v4610_v58, %v4596_v41  ;;  %v17860_v5 = vld [vmem:[%s25709_s29 + $0x6e0] ss:$8 sps:$4 sm:$0xff]   ;;  %v17868_v20 = vld [vmem:[%s25709_s29 + $0x6c4] ss:$8 sps:$4 sm:$0xff]  }
 0x2fd   : > { %6432 = vmatmul.mubr.bf16.vlgmr.msra.gmra.mxu0 %v4706_v21  ;;  %6492 = vmatprep.mubr.bf16.mxu1 %v4709_v39  ;;  %v4049_v19 = vmax.f32 %v4047_v32, %v4048_v42  ;;  %v3423_v29 = vrot.slane %v15867_v46, %v19360_v37  ;;  %v17871_v43 = vld [vmem:[%s25709_s29 + $0x6b4] ss:$8 sps:$4 sm:$0xff]   ;;  %v17869_v23 = vld [vmem:[%s25709_s29 + $0x6b0] ss:$8 sps:$4 sm:$0xff]   ;;  %v17874_v42 = vld [vmem:[%s25709_s29 + $0x6a4] ss:$8 sps:$4 sm:$0xff]  }
 0x2fe   : > { %6441 = vmatprep.mubr.bf16.mxu0 %v4721_v49  ;;  %6469 = vmatpush1.bf16.msra.mxu1 %v17845_v14  ;;  %v4735_v60 = vpack.c.bf16 %v21461_v26, %v21461_v26  ;;  %v2228_v56 = vrot.slane %v2213_v54, %v19360_v37  ;;  %v17862_v49 = vld [vmem:[%s25709_s29 + $0x6e4] ss:$8 sps:$4 sm:$0xff]   ;;  %v17865_v14 = vld [vmem:[%s25709_s29 + $0x6d4] ss:$8 sps:$4 sm:$0xff]  }
 0x2ff   : > { %6470 = vmatprep.subr.bf16.mxu1 %v17850_v2  ;;  %v21478_v22 = vmax.f32 %v4049_v19, 0.0  ;;  %v17866_v2 = vld [vmem:[%s25709_s29 + $0x6c0] ss:$8 sps:$4 sm:$0xff]  }
 0x300   : > { %v3430_v48 = vrot.slane %v2228_v56, %v19360_v37  ;;  %v25923_v58 = vld [vmem:[#allocation44_spill] sm:$0xff] }
 0x301   : > { %v4734_v21 = vpack.c.bf16 %v21478_v22, %v21478_v22  ;;  %v25925_v54 = vld [vmem:[#allocation60_spill] sm:$0xff] }
 0x302   : > { %6471 = vmatpush1.bf16.msra.mxu1 %v17848_v61  ;;  %v3432_v33 = vcombine.high %v3423_v29, %v3430_v48  ;;  %v3431_v39 = vcombine.low %v3423_v29, %v3430_v48  ;;  %v4644_v61 = vsel %vm4215_vm9, %v25923_v58, %v25922_v16  ;;  %v25928_v50 = vld [vmem:[#allocation28_spill] sm:$0xff]  ;;  %v25929_v48 = vld [vmem:[#allocation30_spill] sm:$0xff] }
 0x303   : > { %6472 = vmatprep.subr.bf16.mxu1 %v17853_v55  ;;  %v25924_v55 = vld [vmem:[#allocation48_spill] sm:$0xff] }
 0x304   : > { %v3446_v35 = vrot.slane %v3432_v33, %v19360_v37  ;;  %v3439_v15 = vrot.slane %v3431_v39, %v19360_v37  ;;  %v4645_v41 = vsel %vm4217_vm10, %v25924_v55, %v4644_v61 }
 0x305   : > { %6442 = vmatmul.mubr.bf16.gmra.mxu0 %v4720_v6  ;;  %v4665_v6 = vsel %vm4215_vm9, %v25825_v0, %v25925_v54  ;;  %v4646_v0 = vsel %vm4219_vm11, %v25813_v31, %v4645_v41  ;;  %v17875_v31 = vld [vmem:[%s25709_s29 + $0x690] ss:$8 sps:$4 sm:$0xff]  }
 0x306   : > { %6451 = vmatprep.mubr.bf16.mxu0 %v4735_v60  ;;  %6473 = vmatpush1.bf16.msra.mxu1 %v17851_v36  ;;  %v4064_v32 = vsel %vm905_vm3, %v3446_v35, -inf  ;;  %v25926_v60 = vld [vmem:[#allocation24_spill] sm:$0xff]  ;;  %v25927_v36 = vld [vmem:[#allocation26_spill] sm:$0xff]  ;;  %v4057_v28 = vsel %vm905_vm3, %v3439_v15, -inf }
 0x307   : > { %6474 = vmatprep.subr.bf16.mxu1 %v17856_v63  ;;  %v4065_v8 = vrot.slane %v4064_v32, 4  ;;  %v4630_v19 = vsel %vm4215_vm9, %v25927_v36, %v25926_v60  ;;  %v4666_v63 = vsel %vm4217_vm10, %v25811_v59, %v4665_v6  ;;  %v4058_v29 = vrot.slane %v4057_v28, 4 }
 0x308   : > { %v4631_v46 = vsel %vm4217_vm10, %v25928_v50, %v4630_v19  ;;  %v4667_v59 = vsel %vm4219_vm11, %v25891_v9, %v4666_v63  ;;  %v4658_v9 = vsel %vm4215_vm9, %v25829_v40, %v25900_v13  ;;  %v17878_v13 = vld [vmem:[%s25709_s29 + $0x680] ss:$8 sps:$4 sm:$0xff]   ;;  %v25935_v63 = vld [vmem:[#allocation15_spill] sm:$0xff] }
 0x309   : > { %v4066_v56 = vmax.f32 %v4064_v32, %v4065_v8  ;;  %v4668_v33 = vsel %vm4221_vm12, %v25870_v47, %v4667_v59  ;;  %v4659_v35 = vsel %vm4217_vm10, %v25861_v25, %v4658_v9  ;;  %v4684_v25 = vsel %vm4225_vm14, %v21347_v17, %v21283_v1  ;;  %v25931_v17 = vld [vmem:[#allocation38_spill] sm:$0xff] }
 0x30a   : > { %6475 = vmatpush1.bf16.msra.mxu1 %v17854_v38  ;;  %v17872_v38 = vld [vmem:[%s25709_s29 + $0x6a0] ss:$8 sps:$4 sm:$0xff]   ;;  %v4669_v40 = vsel %vm4223_vm13, %v25899_v11, %v4668_v33  ;;  %v4660_v32 = vsel %vm4219_vm11, %v25862_v52, %v4659_v35  ;;  %v4685_v1 = vsel %vm4227_vm15, %v21461_v26, %v4684_v25  ;;  %v4677_v26 = vsel %vm4225_vm14, %v21411_v62, %v21335_v3 }
 0x30b   : > { %6476 = vmatprep.subr.bf16.mxu1 %v17859_v44  ;;  %v17877_v44 = vld [vmem:[%s25709_s29 + $0x694] ss:$8 sps:$4 sm:$0xff]   ;;  %v4661_v52 = vsel %vm4221_vm12, %v25821_v10, %v4660_v32  ;;  %v25934_v62 = vld [vmem:[#allocation14_spill] sm:$0xff] }
 0x30d   : > { %6452 = vmatmul.mubr.bf16.gmra.mxu0 %v4734_v21  ;;  %v4632_v21 = vsel %vm4219_vm11, %v25929_v48, %v4631_v46 }
 0x30e   : > { %6477 = vmatpush2.bf16.msra.mxu1 %v17857_v45  ;;  %v4067_v45 = vrot.slane %v4066_v56, 2 }
 0x30f   : > { %6478 = vmatprep.subr.bf16.mxu1 %v17862_v49  ;;  %v4647_v49 = vsel %vm4221_vm12, %v25815_v12, %v4646_v0 }
 0x310   : > { %v4648_v47 = vsel %vm4223_vm13, %v25820_v53, %v4647_v49  ;;  %v4068_v39 = vmax.f32 %v4066_v56, %v4067_v45 }
 0x312   : > { %6479 = vmatpush2.bf16.msra.mxu1 %v17860_v5  ;;  %v17880_v5 = vld [vmem:[%s25709_s29 + $0x684] ss:$8 sps:$4 sm:$0xff]   ;;  %v4069_v8 = vrot.slane %v4068_v39, 1 }
 0x313   : > { %6480 = vmatprep.subr.bf16.mxu1 %v17865_v14  ;;  %v25930_v14 = vld [vmem:[#allocation32_spill] sm:$0xff] }
 0x314   : > { %v4633_v12 = vsel %vm4221_vm12, %v25930_v14, %v4632_v21  ;;  %v4070_v58 = vmax.f32 %v4068_v39, %v4069_v8  ;;  %v17881_v39 = vld [vmem:[%s25936_s5 + $0x70] ss:$8 sps:$4 sm:$0xff]  }
 0x316   : > { %6481 = vmatpush2.bf16.msra.mxu1 %v17863_v30  ;;  %v4059_v30 = vmax.f32 %v4057_v28, %v4058_v29  ;;  %v4148_v55 = vmax.f32 %v4070_v58, 0.0  ;;  %v17893_v58 = vld [vmem:[%s25936_s5 + $0x50] ss:$8 sps:$4 sm:$0xff]  }
 0x317   : > { %6482 = vmatprep.subr.bf16.mxu1 %v17868_v20  ;;  %v4634_v20 = vsel %vm4223_vm13, %v25909_v51, %v4633_v12  ;;  %v4649_v51 = vsel %vm4225_vm14, %v25910_v4, %v4648_v47  ;;  %v25932_v4 = vld [vmem:[#allocation75_spill] sm:$0xff] }
 0x318   : > { %v4635_v53 = vsel %vm4225_vm14, %v25913_v34, %v4634_v20  ;;  %v4060_v11 = vrot.slane %v4059_v30, 2  ;;  %v4737_v3 = vpack.c.bf16 %v4148_v55, %v4148_v55 }
 0x319   : > { %v4636_v34 = vsel %vm4227_vm15, %v25931_v17, %v4635_v53  ;;  %v17886_v53 = vld [vmem:[%s25936_s5 + $0x174] ss:$8 sps:$4 sm:$0xff]  }
 0x31a   : > { %6483 = vmatpush2.bf16.msra.mxu1 %v17866_v2  ;;  %v4650_v2 = vsel %vm4227_vm15, %v25897_v57, %v4649_v51  ;;  %v4061_v16 = vmax.f32 %v4059_v30, %v4060_v11  ;;  %v17889_v51 = vld [vmem:[%s25936_s5 + $0x64] ss:$8 sps:$4 sm:$0xff]  }
 0x31b   : > { %6484 = vmatprep.subr.bf16.mxu1 %v17871_v43  ;;  %v4670_v43 = vsel %vm4225_vm14, %v25915_v18, %v4669_v40  ;;  %v4708_v15 = vpack.c.bf16 %v4650_v2, %v4636_v34  ;;  %v4662_v18 = vsel %vm4223_vm13, %v25908_v27, %v4661_v52  ;;  %v4962_v27 = vld [vmem:[%s25933_s4] sm:$0x3]  ;;  %v17883_v40 = vld [vmem:[%s25936_s5 + $0x74] ss:$8 sps:$4 sm:$0xff]   ;;  %s18541_s4 = sshll.u32 %s18603_s20, 4  ;;  %s18542_s4 = int_to_ptr.vmem [resolvable:$false] %s18541_s4 }
 0x31c   : > { %v4663_v10 = vsel %vm4225_vm14, %v25919_v24, %v4662_v18  ;;  %v4062_v61 = vrot.slane %v4061_v16, 1  ;;  %v4967_v36 = vrot.slane %v4962_v27, %v25934_v62  ;;  %7955 = vmatprep.subr.bf16.mxu0 %v17883_v40  ;;  %v17890_v34 = vld [vmem:[%s25936_s5 + $0x160] ss:$8 sps:$4 sm:$0xff]   ;;  %p18544_p0 = scmp.lt.s32.totalorder %s15762_s27, %s18542_s4 }
 0x31d   : > { %v4664_v41 = vsel %vm4227_vm15, %v25895_v7, %v4663_v10  ;;  %7956 = vmatpush1.bf16.msra.mxu0 %v17881_v39  ;;  %v17896_v10 = vld [vmem:[%s25936_s5 + $0x150] ss:$8 sps:$4 sm:$0xff]  }
 0x31e   : > { %6485 = vmatpush2.bf16.msra.mxu1 %v17869_v23  ;;  %v4671_v23 = vsel %vm4227_vm15, %v25932_v4, %v4670_v43  ;;  %v4063_v60 = vmax.f32 %v4061_v16, %v4062_v61  ;;  %v17892_v43 = vld [vmem:[%s25936_s5 + $0x164] ss:$8 sps:$4 sm:$0xff]   ;;  %7957 = vmatprep.subr.bf16.mxu0 %v17889_v51 }
 0x31f   : > { %6486 = vmatprep.subr.bf16.mxu1 %v17874_v42  ;;  %v4723_v57 = vpack.c.bf16 %v4685_v1, %v4671_v23  ;;  %v4678_v42 = vsel %vm4227_vm15, %v21478_v22, %v4677_v26  ;;  %v21611_v22 = vrot.slane %v4962_v27, %v25935_v63  ;;  %v17887_v1 = vld [vmem:[%s25936_s5 + $0x60] ss:$8 sps:$4 sm:$0xff]   ;;  %v17898_v23 = vld [vmem:[%s25936_s5 + $0x154] ss:$8 sps:$4 sm:$0xff]   ;;  %v17901_v61 = vld [vmem:[%s25936_s5 + $0x44] ss:$8 sps:$4 sm:$0xff]  }
 0x320   : > { %v4722_v6 = vpack.c.bf16 %v4678_v42, %v4664_v41  ;;  %v4147_v19 = vmax.f32 %v4063_v60, 0.0  ;;  %v17899_v41 = vld [vmem:[%s25936_s5 + $0x40] ss:$8 sps:$4 sm:$0xff]  }
 0x321   : > { %7958 = vmatpush1.bf16.msra.mxu0 %v17887_v1 }
 0x322   : > { %6487 = vmatpush2.bf16.msra.mxu1 %v17872_v38  ;;  %v4736_v50 = vpack.c.bf16 %v4147_v19, %v4147_v19  ;;  %v17904_v19 = vld [vmem:[%s25936_s5 + $0x144] ss:$8 sps:$4 sm:$0xff]  }
 0x323   : > { %6488 = vmatprep.subr.bf16.mxu1 %v17877_v44 }
 0x326   : > { %6489 = vmatpush2.bf16.msra.mxu1 %v17875_v31 }
 0x327   : > { %6490 = vmatprep.subr.bf16.mxu1 %v17880_v5 }
 0x32a   : > { %6491 = vmatpush2.bf16.msra.mxu1 %v17878_v13  ;;  %v6128_v54 = vpop.f32.mrf.mxu1  ;;  %v17884_v13 = vld [vmem:[%s25936_s5 + $0x170] ss:$8 sps:$4 sm:$0xff]  }
 0x32b   : > { %v6129_v56 = vadd.f32 %v6128_v54, %v4967_v36  ;;  %7998 = vmatprep.subr.bf16.mxu1 %v17886_v53 }
 0x32c   : > { %v6130_v24 = vpop.f32.mrf.mxu1 }
 0x32d   : > { %6493 = vmatmul.mubr.bf16.vlgmr.msra.gmra.mxu1 %v4708_v15  ;;  %v6131_v46 = vadd.f32 %v6130_v24, %v21611_v22  ;;  %v17895_v15 = vld [vmem:[%s25936_s5 + $0x54] ss:$8 sps:$4 sm:$0xff]   ;;  %v17902_v24 = vld [vmem:[%s25936_s5 + $0x140] ss:$8 sps:$4 sm:$0xff]  }
 0x32e   : > { %6502 = vmatprep.mubr.bf16.mxu1 %v4723_v57  ;;  %v6132_v28 = vpop.f32.mrf.mxu1  ;;  %7999 = vmatpush1.bf16.msra.mxu1 %v17884_v13 }
 0x32f   : > { %v6133_v44 = vadd.f32 %v6132_v28, %v4967_v36  ;;  %8000 = vmatprep.subr.bf16.mxu1 %v17892_v43  ;;  %7959 = vmatprep.subr.bf16.mxu0 %v17895_v15 }
 0x330   : > { %v6134_v21 = vpop.f32.mrf.mxu1  ;;  %7960 = vmatpush1.bf16.msra.mxu0 %v17893_v58  ;;  %v17910_v58 = vld [vmem:[%s25936_s5 + $0x134] ss:$8 sps:$4 sm:$0xff]  }
 0x331   : > { %7961 = vmatprep.subr.bf16.mxu0 %v17901_v61  ;;  %v17914_v61 = vld [vmem:[%s25936_s5 + $0x120] ss:$8 sps:$4 sm:$0xff]  }
 0x332   : > { %8001 = vmatpush1.bf16.msra.mxu1 %v17890_v34 }
 0x333   : > { %8002 = vmatprep.subr.bf16.mxu1 %v17898_v23 }
 0x334   : > { %7962 = vmatpush1.bf16.msra.mxu0 %v17899_v41 }
 0x335   : > { %6503 = vmatmul.mubr.bf16.gmra.mxu1 %v4722_v6 }
 0x336   : > { %6512 = vmatprep.mubr.bf16.mxu1 %v4737_v3  ;;  %8003 = vmatpush1.bf16.msra.mxu1 %v17896_v10  ;;  %v6135_v3 = vadd.f32 %v6134_v21, %v21611_v22  ;;  %v17913_v10 = vld [vmem:[%s25936_s5 + $0x24] ss:$8 sps:$4 sm:$0xff]  }
 0x337   : > { %8004 = vmatprep.subr.bf16.mxu1 %v17904_v19 }
 0x33a   : > { %8005 = vmatpush1.bf16.msra.mxu1 %v17902_v24 }
 0x33b   : > { %8006 = vmatprep.subr.bf16.mxu1 %v17910_v58  ;;  %v17950_v58 = vld [vmem:[%s25936_s5 + $0x1c0] ss:$8 sps:$4 sm:$0xff]  }
 0x33c   : > { %v6189_v7 = vpop.f32.mrf.mxu0 }
 0x33d   : > { %v21614_v38 = vadd.f32 %v6189_v7, %v6129_v56  ;;  %6513 = vmatmul.mubr.bf16.gmra.mxu1 %v4736_v50 }
 0x33e   : > { %v6191_v0 = vpop.f32.mrf.mxu0 }
 0x33f   : > { %v21616_v59 = vadd.f32 %v6191_v0, %v6131_v46 }
 0x340   : > { %v6193_v29 = vpop.f32.mrf.mxu0 }
 0x341   : > { %v21618_v48 = vadd.f32 %v6193_v29, %v6133_v44 }
 0x342   : > { %v6195_v33 = vpop.f32.mrf.mxu0 }
 0x343   : > { %v6196_v28 = vadd.f32 %v6195_v33, %v6135_v3 }
 0x349   : > { %v6138_v45 = vpop.f32.mrf.mxu1 }
 0x34a   : > { %v6139_v5 = vadd.f32 %v6138_v45, %v4967_v36 }
 0x34b   : > { %v6140_v49 = vpop.f32.mrf.mxu1 }
 0x34c   : > { %v6141_v35 = vadd.f32 %v6140_v49, %v21611_v22 }
 0x34d   : > { %v6142_v31 = vpop.f32.mrf.mxu1 }
 0x34e   : > { %v6143_v25 = vadd.f32 %v6142_v31, %v4967_v36 }
 0x34f   : > { %v21620_v9 = vpop.f32.mrf.mxu1 }
 0x351   : > { %v6199_v14 = vpop.f32.mrf.mxu0  ;;  %v6148_v12 = vpop.f32.mrf.mxu1 }
 0x352   : > { %v6200_v30 = vadd.f32 %v6199_v14, %v6139_v5  ;;  %v6149_v4 = vadd.f32 %v6148_v12, %v4967_v36 }
 0x353   : > { %v6201_v20 = vpop.f32.mrf.mxu0  ;;  %v6150_v47 = vpop.f32.mrf.mxu1 }
 0x354   : > { %v6202_v32 = vadd.f32 %v6201_v20, %v6141_v35  ;;  %v6151_v57 = vadd.f32 %v6150_v47, %v21611_v22 }
 0x355   : > { %v6203_v11 = vpop.f32.mrf.mxu0  ;;  %v6152_v2 = vpop.f32.mrf.mxu1 }
 0x356   : > { %v6204_v8 = vadd.f32 %v6203_v11, %v6143_v25 }
 0x357   : > { %v6205_v52 = vpop.f32.mrf.mxu0  ;;  %v6153_v17 = vpop.f32.mrf.mxu1 }
 0x359   : > { %v6209_v16 = vpop.f32.mrf.mxu0 }
 0x35a   : > { %v6210_v18 = vadd.f32 %v6209_v16, %v6149_v4  ;;  %v17905_v16 = vld [vmem:[%s25936_s5 + $0x30] ss:$8 sps:$4 sm:$0xff]  }
 0x35b   : > { %v6211_v26 = vpop.f32.mrf.mxu0 }
 0x35c   : > { %v6212_v42 = vadd.f32 %v6211_v26, %v6151_v57  ;;  %v17907_v57 = vld [vmem:[%s25936_s5 + $0x34] ss:$8 sps:$4 sm:$0xff]   ;;  %v17911_v26 = vld [vmem:[%s25936_s5 + $0x20] ss:$8 sps:$4 sm:$0xff]  }
 0x35d   : > { %v6213_v55 = vpop.f32.mrf.mxu0  ;;  %7963 = vmatprep.subr.bf16.mxu0 %v17907_v57  ;;  %v17947_v57 = vld [vmem:[%s25936_s5 + $0xc0] ss:$8 sps:$4 sm:$0xff]  }
 0x35e   : > { %7964 = vmatpush1.bf16.msra.mxu0 %v17905_v16 }
 0x35f   : > { %v6214_v27 = vpop.f32.mrf.mxu0  ;;  %7965 = vmatprep.subr.bf16.mxu0 %v17913_v10 }
 0x362   : > { %7966 = vmatpush1.bf16.msra.mxu0 %v17911_v26  ;;  %v17955_v26 = vld [vmem:[%s25936_s5 + $0xb4] ss:$8 sps:$4 sm:$0xff]  }
 0x36b   : > { %v6250_v54 = vpop.f32.mrf.mxu1 }
 0x36c   : > { %v6251_v6 = vadd.f32 %v6250_v54, %v21614_v38  ;;  %v17917_v54 = vld [vmem:[%s25936_s5 + $0x10] ss:$8 sps:$4 sm:$0xff]  }
 0x36d   : > { %v6252_v60 = vpop.f32.mrf.mxu1 }
 0x36e   : > { %v6253_v36 = vadd.f32 %v6252_v60, %v21616_v59  ;;  %v6145_v59 = vadd.f32 %v21620_v9, %v21611_v22  ;;  %v17920_v60 = vld [vmem:[%s25936_s5 + $0x110] ss:$8 sps:$4 sm:$0xff]  }
 0x36f   : > { %v6254_v56 = vpop.f32.mrf.mxu1 }
 0x370   : > { %v6255_v7 = vadd.f32 %v6254_v56, %v21618_v48  ;;  %v6206_v45 = vadd.f32 %v6205_v52, %v6145_v59 }
 0x371   : > { %v6256_v50 = vpop.f32.mrf.mxu1 }
 0x372   : > { %v6257_v46 = vadd.f32 %v6256_v50, %v6196_v28  ;;  %v17923_v50 = vld [vmem:[%s25936_s5] ss:$8 sps:$4 sm:$0xff]  }
 0x374   : > { %v6260_v38 = vpop.f32.mrf.mxu1 }
 0x375   : > { %v6261_v0 = vadd.f32 %v6260_v38, %v6200_v30  ;;  %v17926_v38 = vld [vmem:[%s25936_s5 + $0x100] ss:$8 sps:$4 sm:$0xff]  }
 0x376   : > { %v6262_v44 = vpop.f32.mrf.mxu1 }
 0x377   : > { %v6263_v29 = vadd.f32 %v6262_v44, %v6202_v32  ;;  %v17928_v44 = vld [vmem:[%s25936_s5 + $0x104] ss:$8 sps:$4 sm:$0xff]  }
 0x378   : > { %v6264_v21 = vpop.f32.mrf.mxu1 }
 0x379   : > { %v6265_v49 = vadd.f32 %v6264_v21, %v6204_v8 }
 0x37a   : > { %v6266_v31 = vpop.f32.mrf.mxu1 }
 0x37b   : > { %v6267_v5 = vadd.f32 %v6266_v31, %v6206_v45  ;;  %v17931_v31 = vld [vmem:[%s25936_s5 + $0xf4] ss:$8 sps:$4 sm:$0xff]  }
 0x37c   : > { %v6270_v33 = vpop.f32.mrf.mxu1 }
 0x37d   : > { %v6311_v14 = vpop.f32.mrf.mxu0  ;;  %v6271_v48 = vadd.f32 %v6270_v33, %v6210_v18  ;;  %v17908_v18 = vld [vmem:[%s25936_s5 + $0x130] ss:$8 sps:$4 sm:$0xff]   ;;  %v17934_v33 = vld [vmem:[%s25936_s5 + $0x1f4] ss:$8 sps:$4 sm:$0xff]  }
 0x37e   : > { %v6312_v12 = vadd.f32 %v6311_v14, %v6251_v6  ;;  %v6272_v20 = vpop.f32.mrf.mxu1  ;;  %8007 = vmatpush1.bf16.msra.mxu1 %v17908_v18  ;;  %v17919_v6 = vld [vmem:[%s25936_s5 + $0x14] ss:$8 sps:$4 sm:$0xff]  }
 0x37f   : > { %v6313_v35 = vpop.f32.mrf.mxu0  ;;  %v6273_v39 = vadd.f32 %v6272_v20, %v6212_v42  ;;  %v17916_v42 = vld [vmem:[%s25936_s5 + $0x124] ss:$8 sps:$4 sm:$0xff]   ;;  %7967 = vmatprep.subr.bf16.mxu0 %v17919_v6 }
 0x380   : > { %v6314_v47 = vadd.f32 %v6313_v35, %v6253_v36  ;;  %v6274_v30 = vpop.f32.mrf.mxu1  ;;  %8008 = vmatprep.subr.bf16.mxu1 %v17916_v42  ;;  %v17922_v36 = vld [vmem:[%s25936_s5 + $0x114] ss:$8 sps:$4 sm:$0xff]   ;;  %7968 = vmatpush1.bf16.msra.mxu0 %v17917_v54  ;;  %v17940_v20 = vld [vmem:[%s25936_s5 + $0x1e4] ss:$8 sps:$4 sm:$0xff]   ;;  %v17956_v54 = vld [vmem:[%s25936_s5 + $0x1b0] ss:$8 sps:$4 sm:$0xff]  }
 0x381   : > { %v6315_v40 = vpop.f32.mrf.mxu0  ;;  %v17961_v6 = vld [vmem:[%s25936_s5 + $0xa4] ss:$8 sps:$4 sm:$0xff]  }
 0x382   : > { %v6316_v13 = vadd.f32 %v6315_v40, %v6255_v7  ;;  %v6275_v53 = vpop.f32.mrf.mxu1  ;;  %8009 = vmatpush1.bf16.msra.mxu1 %v17914_v61  ;;  %v17935_v40 = vld [vmem:[%s25936_s5 + $0xe0] ss:$8 sps:$4 sm:$0xff]   ;;  %v17958_v61 = vld [vmem:[%s25936_s5 + $0x1b4] ss:$8 sps:$4 sm:$0xff]  }
 0x383   : > { %v6317_v25 = vpop.f32.mrf.mxu0  ;;  %8010 = vmatprep.subr.bf16.mxu1 %v17922_v36  ;;  %v17943_v53 = vld [vmem:[%s25936_s5 + $0xd4] ss:$8 sps:$4 sm:$0xff]  }
 0x384   : > { %v6318_v22 = vadd.f32 %v6317_v25, %v6257_v46  ;;  %v17925_v46 = vld [vmem:[%s25936_s5 + $0x4] ss:$8 sps:$4 sm:$0xff]   ;;  %v17938_v25 = vld [vmem:[%s25936_s5 + $0x1e0] ss:$8 sps:$4 sm:$0xff]  }
 0x385   : > { %v6321_v9 = vpop.f32.mrf.mxu0  ;;  %7969 = vmatprep.subr.bf16.mxu0 %v17925_v46  ;;  %v17970_v46 = vld [vmem:[%s25936_s5 + $0x194] ss:$8 sps:$4 sm:$0xff]  }
 0x386   : > { %v6322_v32 = vadd.f32 %v6321_v9, %v6261_v0  ;;  %8011 = vmatpush1.bf16.msra.mxu1 %v17920_v60  ;;  %7970 = vmatpush1.bf16.msra.mxu0 %v17923_v50 }
 0x387   : > { %v6323_v51 = vpop.f32.mrf.mxu0  ;;  %8012 = vmatprep.subr.bf16.mxu1 %v17928_v44  ;;  %7971 = vmatprep.subr.bf16.mxu0 %v17931_v31  ;;  %v17979_v31 = vld [vmem:[%s25936_s5 + $0x274] ss:$8 sps:$4 sm:$0xff]  }
 0x388   : > { %v6324_v11 = vadd.f32 %v6323_v51, %v6263_v29 }
 0x389   : > { %v6325_v2 = vpop.f32.mrf.mxu0 }
 0x38a   : > { %v6326_v43 = vadd.f32 %v6325_v2, %v6265_v49  ;;  %8013 = vmatpush1.bf16.msra.mxu1 %v17926_v38  ;;  %v17929_v49 = vld [vmem:[%s25936_s5 + $0xf0] ss:$8 sps:$4 sm:$0xff]  }
 0x38b   : > { %v6327_v8 = vpop.f32.mrf.mxu0  ;;  %7972 = vmatpush2.bf16.msra.mxu0 %v17929_v49  ;;  %8014 = vmatprep.subr.bf16.mxu1 %v17934_v33  ;;  %v17974_v49 = vld [vmem:[%s25936_s5 + $0x180] ss:$8 sps:$4 sm:$0xff]  }
 0x38c   : > { %v6328_v1 = vadd.f32 %v6327_v8, %v6267_v5  ;;  %v17932_v5 = vld [vmem:[%s25936_s5 + $0x1f0] ss:$8 sps:$4 sm:$0xff]  }
 0x38d   : > { %v6331_v52 = vpop.f32.mrf.mxu0  ;;  %v17941_v8 = vld [vmem:[%s25936_s5 + $0xd0] ss:$8 sps:$4 sm:$0xff]  }
 0x38e   : > { %v21678_v17 = vadd.f32 %v6331_v52, %v6271_v48  ;;  %8015 = vmatpush2.bf16.msra.mxu1 %v17932_v5  ;;  %v17944_v52 = vld [vmem:[%s25936_s5 + $0x1d0] ss:$8 sps:$4 sm:$0xff]  }
 0x38f   : > { %v6333_v34 = vpop.f32.mrf.mxu0  ;;  %8016 = vmatprep.subr.bf16.mxu1 %v17940_v20 }
 0x390   : > { %v21680_v15 = vadd.f32 %v6333_v34, %v6273_v39 }
 0x391   : > { %v6335_v4 = vpop.f32.mrf.mxu0 }
 0x392   : > { %8017 = vmatpush2.bf16.msra.mxu1 %v17938_v25  ;;  %v17952_v4 = vld [vmem:[%s25936_s5 + $0x1c4] ss:$8 sps:$4 sm:$0xff]  }
 0x393   : > { %v6336_v23 = vpop.f32.mrf.mxu0 }
 0x3ac   : > { %v6372_v55 = vpop.f32.mrf.mxu1 }
 0x3ad   : > { %v6373_v41 = vadd.f32 %v6372_v55, %v6312_v12  ;;  %v17937_v12 = vld [vmem:[%s25936_s5 + $0xe4] ss:$8 sps:$4 sm:$0xff]  }
 0x3ae   : > { %v6374_v27 = vpop.f32.mrf.mxu1  ;;  %7973 = vmatprep.subr.bf16.mxu0 %v17937_v12 }
 0x3af   : > { %v6375_v3 = vadd.f32 %v6374_v27, %v6314_v47  ;;  %7974 = vmatpush2.bf16.msra.mxu0 %v17935_v40 }
 0x3b0   : > { %v6376_v24 = vpop.f32.mrf.mxu1  ;;  %7975 = vmatprep.subr.bf16.mxu0 %v17943_v53 }
 0x3b1   : > { %v6377_v19 = vadd.f32 %v6376_v24, %v6316_v13 }
 0x3b2   : > { %v6378_v56 = vpop.f32.mrf.mxu1 }
 0x3b3   : > { %v6379_v28 = vadd.f32 %v6378_v56, %v6318_v22  ;;  %7976 = vmatpush2.bf16.msra.mxu0 %v17941_v8 }
 0x3b4   : > { %v6382_v7 = vpop.f32.mrf.mxu1 }
 0x3b5   : > { %v6383_v0 = vadd.f32 %v6382_v7, %v6322_v32  ;;  %v17946_v32 = vld [vmem:[%s25936_s5 + $0x1d4] ss:$8 sps:$4 sm:$0xff]  }
 0x3b6   : > { %v6384_v59 = vpop.f32.mrf.mxu1  ;;  %8018 = vmatprep.subr.bf16.mxu1 %v17946_v32  ;;  %v17967_v7 = vld [vmem:[%s25936_s5 + $0x94] ss:$8 sps:$4 sm:$0xff]  }
 0x3b7   : > { %v6385_v29 = vadd.f32 %v6384_v59, %v6324_v11  ;;  %8019 = vmatpush2.bf16.msra.mxu1 %v17944_v52  ;;  %v17968_v59 = vld [vmem:[%s25936_s5 + $0x190] ss:$8 sps:$4 sm:$0xff]  }
 0x3b8   : > { %v6386_v21 = vpop.f32.mrf.mxu1  ;;  %8020 = vmatprep.subr.bf16.mxu1 %v17952_v4 }
 0x3b9   : > { %v6387_v45 = vadd.f32 %v6386_v21, %v6326_v43  ;;  %v17976_v21 = vld [vmem:[%s25936_s5 + $0x184] ss:$8 sps:$4 sm:$0xff]  }
 0x3ba   : > { %v6388_v14 = vpop.f32.mrf.mxu1 }
 0x3bb   : > { %v6389_v35 = vadd.f32 %v6388_v14, %v6328_v1  ;;  %8021 = vmatpush2.bf16.msra.mxu1 %v17950_v58 }
 0x3bc   : > { %v6392_v39 = vpop.f32.mrf.mxu1  ;;  %8022 = vmatprep.subr.bf16.mxu1 %v17958_v61 }
 0x3bd   : > { %v6433_v48 = vpop.f32.mrf.mxu0  ;;  %v6393_v13 = vadd.f32 %v6392_v39, %v21678_v17  ;;  %v17949_v17 = vld [vmem:[%s25936_s5 + $0xc4] ss:$8 sps:$4 sm:$0xff]  }
 0x3be   : > { %v21748_v47 = vadd.f32 %v6433_v48, %v6373_v41  ;;  %v6394_v9 = vpop.f32.mrf.mxu1  ;;  %7977 = vmatprep.subr.bf16.mxu0 %v17949_v17  ;;  %v17953_v41 = vld [vmem:[%s25936_s5 + $0xb0] ss:$8 sps:$4 sm:$0xff]  }
 0x3bf   : > { %v6435_v30 = vpop.f32.mrf.mxu0  ;;  %v6395_v11 = vadd.f32 %v6394_v9, %v21680_v15  ;;  %7978 = vmatpush2.bf16.msra.mxu0 %v17947_v57  ;;  %8023 = vmatpush2.bf16.msra.mxu1 %v17956_v54 }
 0x3c0   : > { %v21760_v22 = vadd.f32 %v6435_v30, %v6375_v3  ;;  %v6396_v43 = vpop.f32.mrf.mxu1  ;;  %7979 = vmatprep.subr.bf16.mxu0 %v17955_v26  ;;  %v17964_v3 = vld [vmem:[%s25936_s5 + $0x1a4] ss:$8 sps:$4 sm:$0xff]  }
 0x3c1   : > { %v6437_v51 = vpop.f32.mrf.mxu0  ;;  %8024 = vmatprep.subr.bf16.mxu1 %v17964_v3 }
 0x3c2   : > { %v21766_v2 = vadd.f32 %v6437_v51, %v6377_v19  ;;  %v6397_v15 = vpop.f32.mrf.mxu1  ;;  %v17959_v19 = vld [vmem:[%s25936_s5 + $0xa0] ss:$8 sps:$4 sm:$0xff]  }
 0x3c3   : > { %v6439_v1 = vpop.f32.mrf.mxu0  ;;  %7980 = vmatpush2.bf16.msra.mxu0 %v17953_v41 }
 0x3c4   : > { %v21777_v34 = vadd.f32 %v6439_v1, %v6379_v28  ;;  %7981 = vmatprep.subr.bf16.mxu0 %v17961_v6  ;;  %v17962_v28 = vld [vmem:[%s25936_s5 + $0x1a0] ss:$8 sps:$4 sm:$0xff]  }
 0x3c5   : > { %v6443_v23 = vpop.f32.mrf.mxu0  ;;  %8025 = vmatpush2.bf16.msra.mxu1 %v17962_v28 }
 0x3c6   : > { %v21782_v16 = vadd.f32 %v6443_v23, %v6383_v0  ;;  %v17965_v0 = vld [vmem:[%s25936_s5 + $0x90] ss:$8 sps:$4 sm:$0xff]   ;;  %8026 = vmatprep.subr.bf16.mxu1 %v17970_v46 }
 0x3c7   : > { %v6445_v18 = vpop.f32.mrf.mxu0  ;;  %7982 = vmatpush2.bf16.msra.mxu0 %v17959_v19 }
 0x3c8   : > { %v21793_v10 = vadd.f32 %v6445_v18, %v6385_v29  ;;  %7983 = vmatprep.subr.bf16.mxu0 %v17967_v7  ;;  %v17973_v29 = vld [vmem:[%s25936_s5 + $0x84] ss:$8 sps:$4 sm:$0xff]  }
 0x3c9   : > { %v6447_v42 = vpop.f32.mrf.mxu0  ;;  %8027 = vmatpush2.bf16.msra.mxu1 %v17968_v59 }
 0x3ca   : > { %v21798_v55 = vadd.f32 %v6447_v42, %v6387_v45  ;;  %v17971_v45 = vld [vmem:[%s25936_s5 + $0x80] ss:$8 sps:$4 sm:$0xff]   ;;  %8028 = vmatprep.subr.bf16.mxu1 %v17976_v21 }
 0x3cb   : > { %v6449_v27 = vpop.f32.mrf.mxu0  ;;  %7984 = vmatpush2.bf16.msra.mxu0 %v17965_v0 }
 0x3cc   : > { %v21809_v60 = vadd.f32 %v6449_v27, %v6389_v35  ;;  %7985 = vmatprep.subr.bf16.mxu0 %v17973_v29 }
 0x3cd   : > { %v6453_v36 = vpop.f32.mrf.mxu0  ;;  %8029 = vmatpush2.bf16.msra.mxu1 %v17974_v49 }
 0x3ce   : > { %v21814_v24 = vadd.f32 %v6453_v36, %v6393_v13 }
 0x3cf   : > { %v6455_v56 = vpop.f32.mrf.mxu0  ;;  %7986 = vmatpush2.bf16.msra.mxu0 %v17971_v45 }
 0x3d0   : > { %v21825_v50 = vadd.f32 %v6455_v56, %v6395_v11  ;;  %8041 = vmatprep.subr.bf16.mxu0 %v17979_v31 }
 0x3d1   : > { %v6457_v38 = vpop.f32.mrf.mxu0 }
 0x3d3   : > { %v6458_v44 = vpop.f32.mrf.mxu0 }
 0x3ed   : > { %v6494_v5 = vpop.f32.mrf.mxu1 }
 0x3ee   : > { %v6495_v33 = vadd.f32 %v6494_v5, %v21748_v47 }
 0x3ef   : > { %v6496_v14 = vpop.f32.mrf.mxu1 }
 0x3f0   : > { %v6497_v12 = vadd.f32 %v6496_v14, %v21760_v22 }
 0x3f1   : > { %v6498_v48 = vpop.f32.mrf.mxu1 }
 0x3f2   : > { %v6531_v35 = vcombine.low %v6495_v33, %v6497_v12  ;;  %v6532_v20 = vcombine.high %v6495_v33, %v6497_v12  ;;  %v6499_v25 = vadd.f32 %v6498_v48, %v21766_v2 }
 0x3f3   : > { %v6500_v39 = vpop.f32.mrf.mxu1 }
 0x3f4   : > { %v6539_v40 = vrot.slane %v6531_v35, %v19360_v37  ;;  %v6546_v30 = vrot.slane %v6532_v20, %v19360_v37  ;;  %v6501_v13 = vadd.f32 %v6500_v39, %v21777_v34 }
 0x3f5   : > { %v6504_v53 = vpop.f32.mrf.mxu1 }
 0x3f6   : > { %v6547_v9 = vcombine.high %v6539_v40, %v6539_v40  ;;  %v6548_v32 = vcombine.high %v6546_v30, %v6546_v30  ;;  %v6555_v51 = vrot.slane %v6539_v40, %v19360_v37  ;;  %v6581_v47 = vcombine.low %v6499_v25, %v6501_v13 }
 0x3f7   : > { %v6582_v11 = vcombine.high %v6499_v25, %v6501_v13  ;;  %v6506_v22 = vpop.f32.mrf.mxu1  ;;  %v6562_v17 = vrot.slane %v6546_v30, %v19360_v37  ;;  %v21867_v15 = vadd.f32 %v6504_v53, %v21782_v16 }
 0x3f8   : > { %v6569_v43 = vrot.slane %v6547_v9, %v19360_v37  ;;  %v6576_v8 = vrot.slane %v6548_v32, %v19360_v37  ;;  %v6577_v1 = vcombine.high %v6555_v51, %v6555_v51  ;;  %v21861_v52 = vadd.f32 %v6506_v22, %v21793_v10 }
 0x3f9   : > { %v6589_v2 = vrot.slane %v6581_v47, %v19360_v37  ;;  %v6596_v34 = vrot.slane %v6582_v11, %v19360_v37  ;;  %v21869_v4 = vpop.f32.mrf.mxu1 }
 0x3fa   : > { %v6579_v23 = vcombine.high %v6569_v43, %v6569_v43  ;;  %v6746_v57 = vcombine.low %v6555_v51, %v6569_v43  ;;  %v6760_v18 = vrot.slane %v6577_v1, %v19360_v37  ;;  %v6791_v58 = vrot.slane %v6576_v8, %v19360_v37 }
 0x3fb   : > { %v16092_v26 = vcombine.high %v6562_v17, %v6576_v8  ;;  %v6597_v10 = vcombine.high %v6589_v2, %v6589_v2  ;;  %v6598_v61 = vcombine.high %v6596_v34, %v6596_v34  ;;  %v6605_v42 = vrot.slane %v6589_v2, %v19360_v37  ;;  %v21874_v41 = vpop.f32.mrf.mxu1 }
 0x3fc   : > { %v6753_v27 = vrot.slane %v6746_v57, %v19360_v37  ;;  %v6777_v54 = vcombine.low %v6579_v23, %v6562_v17  ;;  %v6612_v16 = vrot.slane %v6596_v34, %v19360_v37  ;;  %v6631_v6 = vcombine.low %v21867_v15, %v21861_v52 }
 0x3fd   : > { %v6815_v3 = vrot.slane %v16092_v26, %v19360_v37  ;;  %v6619_v36 = vrot.slane %v6597_v10, %v19360_v37  ;;  %v21883_v19 = vrot.slane %v6598_v61, %v19360_v37  ;;  %v6627_v56 = vcombine.high %v6605_v42, %v6605_v42  ;;  %v21885_v28 = vpop.f32.mrf.mxu1 }
 0x3fe   : > { %v6761_v7 = vcombine.low %v6753_v27, %v6760_v18  ;;  %v6762_v46 = vcombine.high %v6753_v27, %v6760_v18  ;;  %v6784_v38 = vrot.slane %v6777_v54, %v19360_v37  ;;  %v6628_v0 = vcombine.high %v6612_v16, %v6612_v16 }
 0x3ff   : > { %v6629_v44 = vcombine.high %v6619_v36, %v6619_v36  ;;  %v6822_v59 = vrot.slane %v6605_v42, %v19360_v37  ;;  %v6839_v29 = vcombine.low %v6619_v36, %v6627_v56  ;;  %v6870_v21 = vcombine.low %v6612_v16, %v21883_v19  ;;  %v21890_v45 = vpop.f32.mrf.mxu1 }
 0x400   : > { %v6769_v49 = vrot.slane %v6761_v7, %v19360_v37  ;;  %v6776_v31 = vrot.slane %v6762_v46, %v19360_v37  ;;  %v6792_v5 = vcombine.low %v6784_v38, %v6791_v58  ;;  %v6793_v14 = vcombine.high %v6784_v38, %v6791_v58 }
 0x401   : > { %v6823_v33 = vcombine.low %v6815_v3, %v6822_v59  ;;  %v6824_v12 = vcombine.high %v6815_v3, %v6822_v59  ;;  %v6846_v48 = vrot.slane %v6839_v29, %v19360_v37  ;;  %v6853_v35 = vrot.slane %v6629_v44, %v19360_v37  ;;  %v6518_v20 = vpop.f32.mrf.mxu1 }
 0x402   : > { %v6800_v39 = vrot.slane %v6792_v5, %v19360_v37  ;;  %v6807_v40 = vrot.slane %v6793_v14, %v19360_v37  ;;  %v7109_v30 = vsel %vm905_vm3, %v6769_v49, -inf  ;;  %v7116_v13 = vsel %vm905_vm3, %v6776_v31, -inf }
 0x403   : > { %v7110_v25 = vrot.slane %v7109_v30, 4  ;;  %v7117_v53 = vrot.slane %v7116_v13, 4  ;;  %v6831_v9 = vrot.slane %v6823_v33, %v19360_v37  ;;  %v6838_v32 = vrot.slane %v6824_v12, %v19360_v37  ;;  %v6519_v51 = vpop.f32.mrf.mxu1 }
 0x404   : > { %v7123_v47 = vsel %vm905_vm3, %v6800_v39, -inf  ;;  %v7130_v11 = vsel %vm905_vm3, %v6807_v40, -inf  ;;  %v6854_v22 = vcombine.low %v6846_v48, %v6853_v35  ;;  %v6855_v43 = vcombine.high %v6846_v48, %v6853_v35 }
 0x405   : > { %v7111_v8 = vmax.f32 %v7109_v30, %v7110_v25  ;;  %v7118_v1 = vmax.f32 %v7116_v13, %v7117_v53  ;;  %v7124_v17 = vrot.slane %v7123_v47, 4  ;;  %v7131_v2 = vrot.slane %v7130_v11, 4 }
 0x406   : > { %v6862_v34 = vrot.slane %v6854_v22, %v19360_v37  ;;  %v6869_v23 = vrot.slane %v6855_v43, %v19360_v37  ;;  %v6877_v57 = vrot.slane %v6870_v21, %v19360_v37  ;;  %v6884_v18 = vrot.slane %v6628_v0, %v19360_v37 }
 0x407   : > { %v7112_v58 = vrot.slane %v7111_v8, 2  ;;  %v7119_v26 = vrot.slane %v7118_v1, 2  ;;  %v7125_v10 = vmax.f32 %v7123_v47, %v7124_v17  ;;  %v7132_v61 = vmax.f32 %v7130_v11, %v7131_v2 }
 0x408   : > { %v6885_v42 = vcombine.low %v6877_v57, %v6884_v18  ;;  %v6886_v27 = vcombine.high %v6877_v57, %v6884_v18  ;;  %v7137_v54 = vsel %vm905_vm3, %v6831_v9, -inf  ;;  %v7144_v16 = vsel %vm905_vm3, %v6838_v32, -inf }
 0x409   : > { %v7113_v3 = vmax.f32 %v7111_v8, %v7112_v58  ;;  %v7120_v36 = vmax.f32 %v7118_v1, %v7119_v26  ;;  %v7126_v56 = vrot.slane %v7125_v10, 2  ;;  %v7133_v7 = vrot.slane %v7132_v61, 2 }
 0x40a   : > { %v6893_v46 = vrot.slane %v6885_v42, %v19360_v37  ;;  %v6900_v38 = vrot.slane %v6886_v27, %v19360_v37  ;;  %v7138_v44 = vrot.slane %v7137_v54, 4  ;;  %v7145_v0 = vrot.slane %v7144_v16, 4 }
 0x40b   : > { %v7114_v59 = vrot.slane %v7113_v3, 1  ;;  %v7121_v29 = vrot.slane %v7120_v36, 1  ;;  %v7127_v21 = vmax.f32 %v7125_v10, %v7126_v56  ;;  %v7134_v49 = vmax.f32 %v7132_v61, %v7133_v7 }
 0x40c   : > { %v7139_v31 = vmax.f32 %v7137_v54, %v7138_v44  ;;  %v7146_v5 = vmax.f32 %v7144_v16, %v7145_v0  ;;  %v7151_v14 = vsel %vm905_vm3, %v6862_v34, -inf  ;;  %v7158_v33 = vsel %vm905_vm3, %v6869_v23, -inf }
 0x40d   : > { %v21914_v12 = vmax.f32 %v7113_v3, %v7114_v59  ;;  %v21916_v48 = vmax.f32 %v7120_v36, %v7121_v29  ;;  %v7128_v35 = vrot.slane %v7127_v21, 1  ;;  %v7135_v20 = vrot.slane %v7134_v49, 1 }
 0x40e   : > { %v7140_v39 = vrot.slane %v7139_v31, 2  ;;  %v7147_v40 = vrot.slane %v7146_v5, 2  ;;  %v7152_v30 = vrot.slane %v7151_v14, 4  ;;  %v7159_v13 = vrot.slane %v7158_v33, 4 }
 0x40f   : > { %v21918_v25 = vmax.f32 %v7127_v21, %v7128_v35  ;;  %v21920_v53 = vmax.f32 %v7134_v49, %v7135_v20  ;;  %v7263_v9 = vmax.f32 %v21914_v12, 0.0  ;;  %v7264_v32 = vmax.f32 %v21916_v48, 0.0 }
 0x410   : > { %v7141_v51 = vmax.f32 %v7139_v31, %v7140_v39  ;;  %v7148_v47 = vmax.f32 %v7146_v5, %v7147_v40  ;;  %v7153_v11 = vmax.f32 %v7151_v14, %v7152_v30  ;;  %v21924_v22 = vmax.f32 %v7158_v33, %v7159_v13 }
 0x411   : > { %v7265_v43 = vmax.f32 %v21918_v25, 0.0  ;;  %v7266_v8 = vmax.f32 %v21920_v53, 0.0  ;;  %v7165_v1 = vsel %vm905_vm3, %v6893_v46, -inf  ;;  %v7172_v17 = vsel %vm905_vm3, %v6900_v38, -inf }
 0x412   : > { %v7142_v2 = vrot.slane %v7141_v51, 1  ;;  %v7149_v34 = vrot.slane %v7148_v47, 1  ;;  %v7154_v23 = vrot.slane %v7153_v11, 2  ;;  %v7161_v57 = vrot.slane %v21924_v22, 2 }
 0x413   : > { %v7166_v18 = vrot.slane %v7165_v1, 4  ;;  %v7173_v58 = vrot.slane %v7172_v17, 4  ;;  %v6630_v26 = vcombine.high %v21883_v19, %v21883_v19  ;;  %v6632_v10 = vcombine.high %v21867_v15, %v21861_v52 }
 0x414   : > { %v7143_v61 = vmax.f32 %v7141_v51, %v7142_v2  ;;  %v7150_v42 = vmax.f32 %v7148_v47, %v7149_v34  ;;  %v7155_v27 = vmax.f32 %v7153_v11, %v7154_v23  ;;  %v6639_v54 = vrot.slane %v6631_v6, %v19360_v37 }
 0x415   : > { %v7167_v16 = vmax.f32 %v7165_v1, %v7166_v18  ;;  %v21939_v3 = vmax.f32 %v7172_v17, %v7173_v58  ;;  %v6646_v36 = vrot.slane %v6632_v10, %v19360_v37  ;;  %v6509_v56 = vadd.f32 %v21869_v4, %v21798_v55 }
 0x416   : > { %v7156_v19 = vrot.slane %v7155_v27, 1  ;;  %v21944_v7 = vmax.f32 %v7143_v61, 0.0  ;;  %v21946_v46 = vmax.f32 %v7150_v42, 0.0  ;;  %v6647_v38 = vcombine.high %v6639_v54, %v6639_v54 }
 0x417   : > { %v7168_v44 = vrot.slane %v7167_v16, 2  ;;  %v7175_v0 = vrot.slane %v21939_v3, 2  ;;  %v6648_v59 = vcombine.high %v6646_v36, %v6646_v36  ;;  %v6655_v52 = vrot.slane %v6639_v54, %v19360_v37 }
 0x418   : > { %v7157_v15 = vmax.f32 %v7155_v27, %v7156_v19  ;;  %v21954_v6 = vsel %vm4215_vm9, %v21944_v7, %v7265_v43  ;;  %v6662_v55 = vrot.slane %v6646_v36, %v19360_v37  ;;  %v6669_v4 = vrot.slane %v6647_v38, %v19360_v37 }
 0x419   : > { %v7169_v29 = vmax.f32 %v7167_v16, %v7168_v44  ;;  %v6676_v21 = vrot.slane %v6648_v59, %v19360_v37  ;;  %v6901_v49 = vcombine.low %v6630_v26, %v6655_v52  ;;  %v6511_v31 = vadd.f32 %v21874_v41, %v21809_v60 }
 0x41a   : > { %v21961_v5 = vmax.f32 %v7157_v15, 0.0  ;;  %v6678_v14 = vcombine.high %v6662_v55, %v6662_v55  ;;  %v6915_v33 = vrot.slane %v6669_v4, %v19360_v37  ;;  %v16093_v35 = vcombine.high %v6655_v52, %v6669_v4 }
 0x41b   : > { %v7170_v20 = vrot.slane %v7169_v29, 1  ;;  %v6680_v39 = vcombine.high %v6676_v21, %v6676_v21  ;;  %v6908_v40 = vrot.slane %v6901_v49, %v19360_v37  ;;  %v6946_v30 = vrot.slane %v6662_v55, %v19360_v37 }
 0x41c   : > { %v6939_v13 = vrot.slane %v16093_v35, %v19360_v37  ;;  %v6963_v51 = vcombine.low %v6676_v21, %v6678_v14  ;;  %v6681_v47 = vcombine.low %v6509_v56, %v6511_v31  ;;  %v6682_v11 = vcombine.high %v6509_v56, %v6511_v31 }
 0x41d   : > { %v7171_v1 = vmax.f32 %v7169_v29, %v7170_v20  ;;  %v6916_v17 = vcombine.low %v6908_v40, %v6915_v33  ;;  %v6917_v60 = vcombine.high %v6908_v40, %v6915_v33  ;;  %v6977_v41 = vrot.slane %v6680_v39, %v19360_v37 }
 0x41e   : > { %v6947_v2 = vcombine.low %v6939_v13, %v6946_v30  ;;  %v6948_v34 = vcombine.high %v6939_v13, %v6946_v30  ;;  %v6970_v23 = vrot.slane %v6963_v51, %v19360_v37  ;;  %v6689_v18 = vrot.slane %v6681_v47, %v19360_v37 }
 0x41f   : > { %v21970_v58 = vmax.f32 %v7171_v1, 0.0  ;;  %v6924_v26 = vrot.slane %v6916_v17, %v19360_v37  ;;  %v6931_v10 = vrot.slane %v6917_v60, %v19360_v37  ;;  %v6696_v61 = vrot.slane %v6682_v11, %v19360_v37 }
 0x420   : > { %v6955_v42 = vrot.slane %v6947_v2, %v19360_v37  ;;  %v6962_v27 = vrot.slane %v6948_v34, %v19360_v37  ;;  %v6978_v54 = vcombine.low %v6970_v23, %v6977_v41  ;;  %v6979_v16 = vcombine.high %v6970_v23, %v6977_v41 }
 0x421   : > { %v7179_v36 = vsel %vm905_vm3, %v6924_v26, -inf  ;;  %v7186_v56 = vsel %vm905_vm3, %v6931_v10, -inf  ;;  %v6697_v19 = vcombine.high %v6689_v18, %v6689_v18  ;;  %v6698_v38 = vcombine.high %v6696_v61, %v6696_v61 }
 0x422   : > { %v6986_v44 = vrot.slane %v6978_v54, %v19360_v37  ;;  %v6993_v59 = vrot.slane %v6979_v16, %v19360_v37  ;;  %v7180_v52 = vrot.slane %v7179_v36, 4  ;;  %v7187_v15 = vrot.slane %v7186_v56, 4 }
 0x423   : > { %v7193_v55 = vsel %vm905_vm3, %v6955_v42, -inf  ;;  %v7200_v4 = vsel %vm905_vm3, %v6962_v27, -inf  ;;  %v6705_v29 = vrot.slane %v6689_v18, %v19360_v37  ;;  %v6712_v21 = vrot.slane %v6696_v61, %v19360_v37 }
 0x424   : > { %v7181_v49 = vmax.f32 %v7179_v36, %v7180_v52  ;;  %v7188_v31 = vmax.f32 %v7186_v56, %v7187_v15  ;;  %v7194_v14 = vrot.slane %v7193_v55, 4  ;;  %v7201_v33 = vrot.slane %v7200_v4, 4 }
 0x425   : > { %v7207_v35 = vsel %vm905_vm3, %v6986_v44, -inf  ;;  %v6719_v20 = vrot.slane %v6697_v19, %v19360_v37  ;;  %v6726_v39 = vrot.slane %v6698_v38, %v19360_v37  ;;  %v6727_v40 = vcombine.high %v6705_v29, %v6705_v29 }
 0x426   : > { %v7182_v30 = vrot.slane %v7181_v49, 2  ;;  %v7195_v13 = vmax.f32 %v7193_v55, %v7194_v14  ;;  %v7202_v51 = vmax.f32 %v7200_v4, %v7201_v33  ;;  %v7208_v47 = vrot.slane %v7207_v35, 4 }
 0x427   : > { %v6729_v11 = vcombine.high %v6719_v20, %v6719_v20  ;;  %v6994_v1 = vcombine.low %v6705_v29, %v6719_v20  ;;  %v7008_v17 = vrot.slane %v6727_v40, %v19360_v37  ;;  %v21990_v60 = vrot.slane %v6726_v39, %v19360_v37 }
 0x428   : > { %v7183_v41 = vmax.f32 %v7181_v49, %v7182_v30  ;;  %v7196_v2 = vrot.slane %v7195_v13, 2  ;;  %v21992_v34 = vmax.f32 %v7207_v35, %v7208_v47  ;;  %v16094_v23 = vcombine.high %v6712_v21, %v6726_v39 }
 0x429   : > { %v7001_v18 = vrot.slane %v6994_v1, %v19360_v37  ;;  %v7025_v26 = vcombine.low %v6729_v11, %v6712_v21  ;;  %v6515_v10 = vadd.f32 %v21885_v28, %v21814_v24  ;;  %v6517_v61 = vadd.f32 %v21890_v45, %v21825_v50 }
 0x42a   : > { %v7184_v42 = vrot.slane %v7183_v41, 1  ;;  %v7197_v27 = vmax.f32 %v7195_v13, %v7196_v2  ;;  %v7210_v54 = vrot.slane %v21992_v34, 2  ;;  %v7063_v16 = vrot.slane %v16094_v23, %v19360_v37 }
 0x42b   : > { %v7009_v36 = vcombine.low %v7001_v18, %v7008_v17  ;;  %v7010_v56 = vcombine.high %v7001_v18, %v7008_v17  ;;  %v22002_v19 = vrot.slane %v7025_v26, %v19360_v37  ;;  %v6731_v38 = vcombine.low %v6515_v10, %v6517_v61 }
 0x42c   : > { %v7185_v44 = vmax.f32 %v7183_v41, %v7184_v42  ;;  %v7198_v52 = vrot.slane %v7197_v27, 1  ;;  %v7162_v24 = vmax.f32 %v21924_v22, %v7161_v57  ;;  %v7176_v50 = vmax.f32 %v21939_v3, %v7175_v0 }
 0x42d   : > { %v7017_v28 = vrot.slane %v7009_v36, %v19360_v37  ;;  %v7024_v45 = vrot.slane %v7010_v56, %v19360_v37  ;;  %v7040_v15 = vcombine.low %v22002_v19, %v21990_v60  ;;  %v7041_v55 = vcombine.high %v22002_v19, %v21990_v60 }
 0x42e   : > { %v7199_v4 = vmax.f32 %v7197_v27, %v7198_v52  ;;  %v6738_v29 = vrot.slane %v6731_v38, %v19360_v37  ;;  %v7163_v21 = vrot.slane %v7162_v24, 1  ;;  %v7177_v49 = vrot.slane %v7176_v50, 1 }
 0x42f   : > { %v7048_v22 = vrot.slane %v7040_v15, %v19360_v37  ;;  %v7221_v57 = vsel %vm905_vm3, %v7017_v28, -inf  ;;  %v7189_v3 = vrot.slane %v7188_v31, 2  ;;  %v7203_v0 = vrot.slane %v7202_v51, 2 }
 0x430   : > { %v7222_v14 = vrot.slane %v7221_v57, 4  ;;  %v6745_v33 = vrot.slane %v6738_v29, %v19360_v37  ;;  %v7164_v35 = vmax.f32 %v7162_v24, %v7163_v21  ;;  %v7178_v20 = vmax.f32 %v7176_v50, %v7177_v49 }
 0x431   : > { %v7235_v39 = vsel %vm905_vm3, %v7048_v22, -inf  ;;  %v7190_v40 = vmax.f32 %v7188_v31, %v7189_v3  ;;  %v7204_v30 = vmax.f32 %v7202_v51, %v7203_v0  ;;  %v7214_v13 = vsel %vm905_vm3, %v6993_v59, -inf }
 0x432   : > { %v7223_v47 = vmax.f32 %v7221_v57, %v7222_v14  ;;  %v7236_v11 = vrot.slane %v7235_v39, 4  ;;  %v7070_v1 = vrot.slane %v6745_v33, %v19360_v37  ;;  %v7215_v17 = vrot.slane %v7214_v13, 4 }
 0x433   : > { %v7191_v41 = vrot.slane %v7190_v40, 1  ;;  %v7205_v2 = vrot.slane %v7204_v30, 1  ;;  %v7228_v23 = vsel %vm905_vm3, %v7024_v45, -inf  ;;  %v22024_v18 = vmax.f32 %v7164_v35, 0.0 }
 0x434   : > { %v7224_v26 = vrot.slane %v7223_v47, 2  ;;  %v7237_v10 = vmax.f32 %v7235_v39, %v7236_v11  ;;  %v7071_v61 = vcombine.low %v7063_v16, %v7070_v1  ;;  %v7072_v42 = vcombine.high %v7063_v16, %v7070_v1 }
 0x435   : > { %v7192_v27 = vmax.f32 %v7190_v40, %v7191_v41  ;;  %v7206_v31 = vmax.f32 %v7204_v30, %v7205_v2  ;;  %v7216_v51 = vmax.f32 %v7214_v13, %v7215_v17  ;;  %v7229_v36 = vrot.slane %v7228_v23, 4 }
 0x436   : > { %v7079_v59 = vrot.slane %v7071_v61, %v19360_v37  ;;  %v22028_v56 = vrot.slane %v7072_v42, %v19360_v37  ;;  %v22030_v38 = vmax.f32 %v7178_v20, 0.0  ;;  %v7310_v52 = vsel %vm4215_vm9, %v7266_v8, %v7264_v32 }
 0x437   : > { %v7217_v24 = vrot.slane %v7216_v51, 2  ;;  %v7230_v50 = vmax.f32 %v7228_v23, %v7229_v36  ;;  %v22037_v16 = vmax.f32 %v7192_v27, 0.0  ;;  %v22039_v28 = vmax.f32 %v7206_v31, 0.0 }
 0x438   : > { %v22042_v45 = vsel %vm905_vm3, %v7079_v59, -inf  ;;  %v7311_v15 = vsel %vm4217_vm10, %v21946_v46, %v7310_v52  ;;  %v7211_v29 = vmax.f32 %v21992_v34, %v7210_v54  ;;  %v7225_v21 = vmax.f32 %v7223_v47, %v7224_v26 }
 0x439   : > { %v7250_v48 = vrot.slane %v22042_v45, 4  ;;  %v7218_v49 = vmax.f32 %v7216_v51, %v7217_v24  ;;  %v7231_v22 = vrot.slane %v7230_v50, 2  ;;  %v7312_v32 = vsel %vm4219_vm11, %v22024_v18, %v7311_v15  ;;  %v17977_v51 = vld [vmem:[%s25936_s5 + $0x270] ss:$8 sps:$4 sm:$0xff]  }
 0x43a   : > { %v7313_v57 = vsel %vm4221_vm12, %v22030_v38, %v7312_v32  ;;  %v7212_v3 = vrot.slane %v7211_v29, 1  ;;  %v7226_v0 = vrot.slane %v7225_v21, 1  ;;  %v22052_v14 = vmax.f32 %v7185_v44, 0.0 }
 0x43b   : > { %v7219_v33 = vrot.slane %v7218_v49, 1  ;;  %v7232_v35 = vmax.f32 %v7230_v50, %v7231_v22  ;;  %v7314_v34 = vsel %vm4223_vm13, %v22037_v16, %v7313_v57  ;;  %v22056_v54 = vmax.f32 %v7199_v4, 0.0 }
 0x43c   : > { %v7315_v20 = vsel %vm4225_vm14, %v22039_v28, %v7314_v34  ;;  %v7213_v39 = vmax.f32 %v7211_v29, %v7212_v3  ;;  %v7227_v40 = vmax.f32 %v7225_v21, %v7226_v0  ;;  %v7303_v30 = vsel %vm4215_vm9, %v7265_v43, %v7263_v9  ;;  %v17982_v29 = vld [vmem:[%s25936_s5 + $0x264] ss:$8 sps:$4 sm:$0xff]  }
 0x43d   : > { %v7220_v44 = vmax.f32 %v7218_v49, %v7219_v33  ;;  %v7233_v13 = vrot.slane %v7232_v35, 1  ;;  %v7304_v47 = vsel %vm4217_vm10, %v21944_v7, %v7303_v30  ;;  %v7055_v4 = vrot.slane %v7041_v55, %v19360_v37 }
 0x43e   : > { %v22071_v11 = vmax.f32 %v7213_v39, 0.0  ;;  %v22073_v1 = vmax.f32 %v7227_v40, 0.0  ;;  %v7305_v12 = vsel %vm4219_vm11, %v21961_v5, %v7304_v47  ;;  %v7330_v25 = vsel %vm4215_vm9, %v21946_v46, %v7266_v8 }
 0x43f   : > { %v7234_v9 = vmax.f32 %v7232_v35, %v7233_v13  ;;  %v7278_v43 = vmax.f32 %v7220_v44, 0.0  ;;  %v7306_v17 = vsel %vm4221_vm12, %v21970_v58, %v7305_v12  ;;  %v7242_v60 = vsel %vm905_vm3, %v7055_v4, -inf  ;;  %v17983_v4 = vld [vmem:[%s25936_s5 + $0x250] ss:$8 sps:$4 sm:$0xff]  }
 0x440   : > { %v7307_v37 = vsel %vm4223_vm13, %v22052_v14, %v7306_v17  ;;  %v7243_v19 = vrot.slane %v7242_v60, 4  ;;  %v7331_v55 = vsel %vm4217_vm10, %v22024_v18, %v7330_v25  ;;  %v7238_v41 = vrot.slane %v7237_v10, 2 }
 0x441   : > { %v7280_v2 = vmax.f32 %v7234_v9, 0.0  ;;  %v7316_v53 = vsel %vm4227_vm15, %v7278_v43, %v7315_v20  ;;  %v7308_v8 = vsel %vm4225_vm14, %v22056_v54, %v7307_v37  ;;  %v7332_v23 = vsel %vm4219_vm11, %v22030_v38, %v7331_v55 }
 0x442   : > { %v7309_v26 = vsel %vm4227_vm15, %v22071_v11, %v7308_v8  ;;  %v7244_v61 = vmax.f32 %v7242_v60, %v7243_v19  ;;  %v7333_v42 = vsel %vm4221_vm12, %v22037_v16, %v7332_v23  ;;  %v7239_v27 = vmax.f32 %v7237_v10, %v7238_v41  ;;  %v17986_v41 = vld [vmem:[%s25936_s5 + $0x240] ss:$8 sps:$4 sm:$0xff]  }
 0x443   : > { %v7362_v31 = vpack.c.bf16 %v7280_v2, %v7316_v53  ;;  %v7361_v36 = vpack.c.bf16 %v22073_v1, %v7309_v26  ;;  %v7334_v59 = vsel %vm4223_vm13, %v22039_v28, %v7333_v42  ;;  %v7324_v52 = vsel %vm4217_vm10, %v21961_v5, %v21954_v6  ;;  %v17994_v42 = vld [vmem:[%s25936_s5 + $0x224] ss:$8 sps:$4 sm:$0xff]  }
 0x444   : > { %v7245_v24 = vrot.slane %v7244_v61, 2  ;;  %v7335_v50 = vsel %vm4225_vm14, %v7278_v43, %v7334_v59  ;;  %v7240_v15 = vrot.slane %v7239_v27, 1  ;;  %v7325_v10 = vsel %vm4219_vm11, %v21970_v58, %v7324_v52  ;;  %v17998_v59 = vld [vmem:[%s25936_s5 + $0x200] ss:$8 sps:$4 sm:$0xff]   ;;  %v18003_v52 = vld [vmem:[%s25936_s5 + $0x2f4] ss:$8 sps:$4 sm:$0xff]  }
 0x445   : > { %7987 = vmatprep.mubr.bf16.mxu0 %v7362_v31  ;;  %v7336_v21 = vsel %vm4227_vm15, %v7280_v2, %v7335_v50  ;;  %v7326_v49 = vsel %vm4221_vm12, %v22052_v14, %v7325_v10  ;;  %v7256_v6 = vsel %vm905_vm3, %v22028_v56, -inf  ;;  %v7350_v22 = vsel %vm4215_vm9, %v22024_v18, %v21946_v46  ;;  %v17980_v56 = vld [vmem:[%s25936_s5 + $0x260] ss:$8 sps:$4 sm:$0xff]   ;;  %v17997_v31 = vld [vmem:[%s25936_s5 + $0x214] ss:$8 sps:$4 sm:$0xff]  }
 0x446   : > { %7988 = vmatmul.mubr.bf16.vlgmr.msra.gmra.mxu0 %v7361_v36  ;;  %v7246_v32 = vmax.f32 %v7244_v61, %v7245_v24  ;;  %v7241_v57 = vmax.f32 %v7239_v27, %v7240_v15  ;;  %v7327_v3 = vsel %vm4223_vm13, %v22056_v54, %v7326_v49  ;;  %v7257_v0 = vrot.slane %v7256_v6, 4  ;;  %v17992_v27 = vld [vmem:[%s25936_s5 + $0x220] ss:$8 sps:$4 sm:$0xff]   ;;  %v18000_v36 = vld [vmem:[%s25936_s5 + $0x204] ss:$8 sps:$4 sm:$0xff]  }
 0x447   : > { %8042 = vmatpush1.bf16.msra.mxu0 %v17977_v51  ;;  %v7328_v33 = vsel %vm4225_vm14, %v22071_v11, %v7327_v3  ;;  %v7351_v35 = vsel %vm4217_vm10, %v22030_v38, %v7350_v22  ;;  %v7251_v46 = vmax.f32 %v22042_v45, %v7250_v48  ;;  %v7343_v18 = vsel %vm4215_vm9, %v21961_v5, %v21944_v7  ;;  %v17985_v38 = vld [vmem:[%s25936_s5 + $0x254] ss:$8 sps:$4 sm:$0xff]   ;;  %v17995_v51 = vld [vmem:[%s25936_s5 + $0x210] ss:$8 sps:$4 sm:$0xff]   ;;  %v18006_v50 = vld [vmem:[%s25936_s5 + $0x2e4] ss:$8 sps:$4 sm:$0xff]  }
 0x448   : > { %v7247_v34 = vrot.slane %v7246_v32, 1  ;;  %v7281_v20 = vmax.f32 %v7241_v57, 0.0  ;;  %v7329_v39 = vsel %vm4227_vm15, %v22073_v1, %v7328_v33  ;;  %v7258_v40 = vmax.f32 %v7256_v6, %v7257_v0  ;;  %8043 = vmatprep.subr.bf16.mxu0 %v17982_v29  ;;  %v18001_v24 = vld [vmem:[%s25936_s5 + $0x2f0] ss:$8 sps:$4 sm:$0xff]   ;;  %v18004_v15 = vld [vmem:[%s25936_s5 + $0x2e0] ss:$8 sps:$4 sm:$0xff]  }
 0x449   : > { %v7352_v30 = vsel %vm4219_vm11, %v22037_v16, %v7351_v35  ;;  %v7252_v44 = vrot.slane %v7251_v46, 2  ;;  %v7344_v45 = vsel %vm4217_vm10, %v21970_v58, %v7343_v18  ;;  %v18009_v10 = vld [vmem:[%s25936_s5 + $0x2d4] ss:$8 sps:$4 sm:$0xff]   ;;  %v18007_v29 = vld [vmem:[%s25936_s5 + $0x2d0] ss:$8 sps:$4 sm:$0xff]  }
 0x44a   : > { %v7248_v48 = vmax.f32 %v7246_v32, %v7247_v34  ;;  %v7363_v7 = vpack.c.bf16 %v7281_v20, %v7329_v39  ;;  %v7259_v5 = vrot.slane %v7258_v40, 2  ;;  %v7353_v13 = vsel %vm4221_vm12, %v22039_v28, %v7352_v30  ;;  %v17988_v28 = vld [vmem:[%s25936_s5 + $0x244] ss:$8 sps:$4 sm:$0xff]   ;;  %v18010_v49 = vld [vmem:[%s25936_s5 + $0x2c0] ss:$8 sps:$4 sm:$0xff]  }
 0x44b   : > { %v7354_v47 = vsel %vm4223_vm13, %v7278_v43, %v7353_v13  ;;  %8044 = vmatpush1.bf16.msra.mxu0 %v17980_v56  ;;  %v7253_v12 = vmax.f32 %v7251_v46, %v7252_v44  ;;  %v7345_v16 = vsel %vm4219_vm11, %v22052_v14, %v7344_v45  ;;  %v18015_v6 = vld [vmem:[%s25936_s5 + $0x2b4] ss:$8 sps:$4 sm:$0xff]   ;;  %v18013_v22 = vld [vmem:[%s25936_s5 + $0x2b0] ss:$8 sps:$4 sm:$0xff]   ;;  %v18018_v32 = vld [vmem:[%s25936_s5 + $0x2a4] ss:$8 sps:$4 sm:$0xff]  }
 0x44c   : > { %v7282_v25 = vmax.f32 %v7248_v48, 0.0  ;;  %v7260_v9 = vmax.f32 %v7258_v40, %v7259_v5  ;;  %v7355_v58 = vsel %vm4225_vm14, %v7280_v2, %v7354_v47  ;;  %8045 = vmatprep.subr.bf16.mxu0 %v17985_v38  ;;  %v7346_v43 = vsel %vm4221_vm12, %v22056_v54, %v7345_v16  ;;  %v18016_v57 = vld [vmem:[%s25936_s5 + $0x2a0] ss:$8 sps:$4 sm:$0xff]   ;;  %v18021_v3 = vld [vmem:[%s25936_s5 + $0x294] ss:$8 sps:$4 sm:$0xff]  }
 0x44d   : > { %v7254_v17 = vrot.slane %v7253_v12, 1  ;;  %v7347_v60 = vsel %vm4223_vm13, %v22071_v11, %v7346_v43  ;;  %v17991_v11 = vld [vmem:[%s25936_s5 + $0x234] ss:$8 sps:$4 sm:$0xff]   ;;  %v18019_v0 = vld [vmem:[%s25936_s5 + $0x290] ss:$8 sps:$4 sm:$0xff]  }
 0x44e   : > { %v7364_v37 = vpack.c.bf16 %v7282_v25, %v7336_v21  ;;  %v7261_v19 = vrot.slane %v7260_v9, 1  ;;  %v7356_v14 = vsel %vm4227_vm15, %v7282_v25, %v7355_v58  ;;  %v7348_v55 = vsel %vm4225_vm14, %v22073_v1, %v7347_v60  ;;  %v17989_v1 = vld [vmem:[%s25936_s5 + $0x230] ss:$8 sps:$4 sm:$0xff]   ;;  %v18012_v21 = vld [vmem:[%s25936_s5 + $0x2c4] ss:$8 sps:$4 sm:$0xff]  }
 0x44f   : > { %8046 = vmatpush1.bf16.msra.mxu0 %v17983_v4  ;;  %v7255_v2 = vmax.f32 %v7253_v12, %v7254_v17  ;;  %v7349_v53 = vsel %vm4227_vm15, %v7281_v20, %v7348_v55  ;;  %v18024_v33 = vld [vmem:[%s25936_s5 + $0x284] ss:$8 sps:$4 sm:$0xff]   ;;  %v18022_v35 = vld [vmem:[%s25936_s5 + $0x280] ss:$8 sps:$4 sm:$0xff]   ;;  %v18025_v56 = vld [vmem:[%s25516_s7 + $0x70] ss:$8 sps:$4 sm:$0xff]  }
 0x450   : > { %8030 = vmatprep.mubr.bf16.mxu1 %v7364_v37  ;;  %v7262_v54 = vmax.f32 %v7260_v9, %v7261_v19  ;;  %8047 = vmatprep.subr.bf16.mxu0 %v17988_v28  ;;  %v18027_v46 = vld [vmem:[%s25516_s7 + $0x74] ss:$8 sps:$4 sm:$0xff]   ;;  %v18028_v18 = vld [vmem:[%s25516_s7 + $0x170] ss:$8 sps:$4 sm:$0xff]   ;;  %v18033_v20 = vld [vmem:[%s25516_s7 + $0x64] ss:$8 sps:$4 sm:$0xff]  }
 0x451   : > { %8031 = vmatmul.mubr.bf16.vlgmr.msra.gmra.mxu1 %v7363_v7  ;;  %v7283_v8 = vmax.f32 %v7255_v2, 0.0  ;;  %v18030_v34 = vld [vmem:[%s25516_s7 + $0x174] ss:$8 sps:$4 sm:$0xff]   ;;  %8698 = vmatprep.subr.bf16.mxu1 %v18027_v46  ;;  %v18036_v39 = vld [vmem:[%s25516_s7 + $0x164] ss:$8 sps:$4 sm:$0xff]   ;;  %s18543_s5 = scalar_lea.vmem %s18542_s4, 32 }
 0x452   : > { %v7284_v23 = vmax.f32 %v7262_v54, 0.0  ;;  %8699 = vmatpush1.bf16.msra.mxu1 %v18025_v56  ;;  %v18031_v40 = vld [vmem:[%s25516_s7 + $0x60] ss:$8 sps:$4 sm:$0xff]   ;;  %v18039_v30 = vld [vmem:[%s25516_s7 + $0x54] ss:$8 sps:$4 sm:$0xff]   ;;  %p18545_p1 = scmp.lt.s32.totalorder %s18543_s5, %s18537_s28 }
 0x453   : > { %8048 = vmatpush1.bf16.msra.mxu0 %v17986_v41  ;;  %v7365_v26 = vpack.c.bf16 %v7283_v8, %v7349_v53  ;;  %8700 = vmatprep.subr.bf16.mxu1 %v18033_v20  ;;  %v18034_v38 = vld [vmem:[%s25516_s7 + $0x160] ss:$8 sps:$4 sm:$0xff]   ;;  %v18042_v44 = vld [vmem:[%s25516_s7 + $0x154] ss:$8 sps:$4 sm:$0xff]   ;;  %v18037_v45 = vld [vmem:[%s25516_s7 + $0x50] ss:$8 sps:$4 sm:$0xff]  }
 0x454   : > { %v7366_v61 = vpack.c.bf16 %v7284_v23, %v7356_v14  ;;  %8049 = vmatprep.subr.bf16.mxu0 %v17991_v11  ;;  %v18040_v48 = vld [vmem:[%s25516_s7 + $0x150] ss:$8 sps:$4 sm:$0xff]   ;;  %v18045_v7 = vld [vmem:[%s25516_s7 + $0x44] ss:$8 sps:$4 sm:$0xff]   ;;  %v18043_v13 = vld [vmem:[%s25516_s7 + $0x40] ss:$8 sps:$4 sm:$0xff]   ;;  %p18546_p2 = por %p18545_p1, %p18544_p0 }
 0x455   : > { %v18048_v5 = vld [vmem:[%s25516_s7 + $0x144] ss:$8 sps:$4 sm:$0xff]   ;;  %v18046_v47 = vld [vmem:[%s25516_s7 + $0x140] ss:$8 sps:$4 sm:$0xff]   ;;  %v18051_v4 = vld [vmem:[%s25516_s7 + $0x34] ss:$8 sps:$4 sm:$0xff]  }
 0x456   : > { %8073 = vmatprep.mubr.bf16.mxu0 %v7366_v61  ;;  %8701 = vmatpush1.bf16.msra.mxu1 %v18031_v40  ;;  %v18054_v12 = vld [vmem:[%s25516_s7 + $0x134] ss:$8 sps:$4 sm:$0xff]   ;;  %v18049_v16 = vld [vmem:[%s25516_s7 + $0x30] ss:$8 sps:$4 sm:$0xff]   ;;  %v18057_v9 = vld [vmem:[%s25516_s7 + $0x24] ss:$8 sps:$4 sm:$0xff]   ;;  %p18547_p3 = pnand %p18546_p2, %p18540_p13 }
 0x457   : > { %8050 = vmatpush1.bf16.msra.mxu0 %v17989_v1  ;;  %8702 = vmatprep.subr.bf16.mxu1 %v18039_v30  ;;  %v18052_v25 = vld [vmem:[%s25516_s7 + $0x130] ss:$8 sps:$4 sm:$0xff]   ;;  %v18060_v58 = vld [vmem:[%s25516_s7 + $0x124] ss:$8 sps:$4 sm:$0xff]   ;;  %v18055_v28 = vld [vmem:[%s25516_s7 + $0x20] ss:$8 sps:$4 sm:$0xff]  }
 0x458   : > { %8051 = vmatprep.subr.bf16.mxu0 %v17994_v42  ;;  %v18058_v43 = vld [vmem:[%s25516_s7 + $0x120] ss:$8 sps:$4 sm:$0xff]   ;;  %v18063_v17 = vld [vmem:[%s25516_s7 + $0x14] ss:$8 sps:$4 sm:$0xff]   ;;  %v18061_v37 = vld [vmem:[%s25516_s7 + $0x10] ss:$8 sps:$4 sm:$0xff]  }
 0x459   : > { %v18066_v60 = vld [vmem:[%s25516_s7 + $0x114] ss:$8 sps:$4 sm:$0xff]   ;;  %v18064_v19 = vld [vmem:[%s25516_s7 + $0x110] ss:$8 sps:$4 sm:$0xff]   ;;  %v18069_v14 = vld [vmem:[%s25516_s7 + $0x4] ss:$8 sps:$4 sm:$0xff]  }
 0x45a   : > { %8703 = vmatpush1.bf16.msra.mxu1 %v18037_v45  ;;  %v18072_v55 = vld [vmem:[%s25516_s7 + $0x104] ss:$8 sps:$4 sm:$0xff]   ;;  %v18067_v41 = vld [vmem:[%s25516_s7] ss:$8 sps:$4 sm:$0xff]   ;;  %v18075_v53 = vld [vmem:[%s25516_s7 + $0xf4] ss:$8 sps:$4 sm:$0xff]  }
 0x45b   : > { %8052 = vmatpush1.bf16.msra.mxu0 %v17992_v27  ;;  %8704 = vmatprep.subr.bf16.mxu1 %v18045_v7  ;;  %v18070_v2 = vld [vmem:[%s25516_s7 + $0x100] ss:$8 sps:$4 sm:$0xff]   ;;  %v18078_v54 = vld [vmem:[%s25516_s7 + $0x1f4] ss:$8 sps:$4 sm:$0xff]   ;;  %v18073_v11 = vld [vmem:[%s25516_s7 + $0xf0] ss:$8 sps:$4 sm:$0xff]  }
 0x45c   : > { %8053 = vmatprep.subr.bf16.mxu0 %v17997_v31  ;;  %v18076_v8 = vld [vmem:[%s25516_s7 + $0x1f0] ss:$8 sps:$4 sm:$0xff]   ;;  %v18081_v23 = vld [vmem:[%s25516_s7 + $0xe4] ss:$8 sps:$4 sm:$0xff]   ;;  %v18082_v61 = vld [vmem:[%s25516_s7 + $0x1e0] ss:$8 sps:$4 sm:$0xff]  }
 0x45d   : > { %v18084_v1 = vld [vmem:[%s25516_s7 + $0x1e4] ss:$8 sps:$4 sm:$0xff]   ;;  %v18087_v42 = vld [vmem:[%s25516_s7 + $0xd4] ss:$8 sps:$4 sm:$0xff]   ;;  %v18085_v31 = vld [vmem:[%s25516_s7 + $0xd0] ss:$8 sps:$4 sm:$0xff]  }
 0x45e   : > { %8705 = vmatpush1.bf16.msra.mxu1 %v18043_v13  ;;  %v18090_v27 = vld [vmem:[%s25516_s7 + $0x1d4] ss:$8 sps:$4 sm:$0xff]   ;;  %v18120_v56 = vld [vmem:[%s25516_s7 + $0x184] ss:$8 sps:$4 sm:$0xff]   ;;  %v7463_v20 = vld [vmem:[%s25515_s6] sm:$0x3] }
 0x45f   : > { %8054 = vmatpush1.bf16.msra.mxu0 %v17995_v51  ;;  %8706 = vmatprep.subr.bf16.mxu1 %v18051_v4  ;;  %v18088_v51 = vld [vmem:[%s25516_s7 + $0x1d0] ss:$8 sps:$4 sm:$0xff]   ;;  %v18123_v46 = vld [vmem:[%s25516_s7 + $0x274] ss:$8 sps:$4 sm:$0xff]   ;;  %v7472_v30 = vrot.slane %v7463_v20, %v25935_v63 }
 0x460   : > { %8055 = vmatprep.subr.bf16.mxu0 %v18000_v36  ;;  %v18093_v36 = vld [vmem:[%s25516_s7 + $0xc4] ss:$8 sps:$4 sm:$0xff]  }
 0x462   : > { %8707 = vmatpush1.bf16.msra.mxu1 %v18049_v16 }
 0x463   : > { %8056 = vmatpush1.bf16.msra.mxu0 %v17998_v59  ;;  %8708 = vmatprep.subr.bf16.mxu1 %v18057_v9  ;;  %v18096_v59 = vld [vmem:[%s25516_s7 + $0x1c4] ss:$8 sps:$4 sm:$0xff]  }
 0x464   : > { %8057 = vmatprep.subr.bf16.mxu0 %v18003_v52  ;;  %v18091_v52 = vld [vmem:[%s25516_s7 + $0xc0] ss:$8 sps:$4 sm:$0xff]  }
 0x466   : > { %8709 = vmatpush1.bf16.msra.mxu1 %v18055_v28 }
 0x467   : > { %8058 = vmatpush2.bf16.msra.mxu0 %v18001_v24  ;;  %8710 = vmatprep.subr.bf16.mxu1 %v18063_v17  ;;  %v18094_v24 = vld [vmem:[%s25516_s7 + $0x1c0] ss:$8 sps:$4 sm:$0xff]  }
 0x468   : > { %8059 = vmatprep.subr.bf16.mxu0 %v18006_v50  ;;  %v18099_v50 = vld [vmem:[%s25516_s7 + $0xb4] ss:$8 sps:$4 sm:$0xff]  }
 0x46a   : > { %8711 = vmatpush1.bf16.msra.mxu1 %v18061_v37 }
 0x46b   : > { %8060 = vmatpush2.bf16.msra.mxu0 %v18004_v15  ;;  %8712 = vmatprep.subr.bf16.mxu1 %v18069_v14  ;;  %v18102_v15 = vld [vmem:[%s25516_s7 + $0x1b4] ss:$8 sps:$4 sm:$0xff]  }
 0x46c   : > { %8061 = vmatprep.subr.bf16.mxu0 %v18009_v10  ;;  %v18097_v10 = vld [vmem:[%s25516_s7 + $0xb0] ss:$8 sps:$4 sm:$0xff]  }
 0x46e   : > { %8713 = vmatpush1.bf16.msra.mxu1 %v18067_v41 }
 0x46f   : > { %8062 = vmatpush2.bf16.msra.mxu0 %v18007_v29  ;;  %8714 = vmatprep.subr.bf16.mxu1 %v18075_v53  ;;  %v18100_v29 = vld [vmem:[%s25516_s7 + $0x1b0] ss:$8 sps:$4 sm:$0xff]  }
 0x470   : > { %8063 = vmatprep.subr.bf16.mxu0 %v18012_v21  ;;  %v18105_v21 = vld [vmem:[%s25516_s7 + $0xa4] ss:$8 sps:$4 sm:$0xff]  }
 0x472   : > { %8715 = vmatpush2.bf16.msra.mxu1 %v18073_v11  ;;  %v18126_v11 = vld [vmem:[%s25516_s7 + $0x264] ss:$8 sps:$4 sm:$0xff]  }
 0x473   : > { %8064 = vmatpush2.bf16.msra.mxu0 %v18010_v49  ;;  %8716 = vmatprep.subr.bf16.mxu1 %v18081_v23  ;;  %v18103_v49 = vld [vmem:[%s25516_s7 + $0xa0] ss:$8 sps:$4 sm:$0xff]  }
 0x474   : > { %8065 = vmatprep.subr.bf16.mxu0 %v18015_v6  ;;  %v18106_v6 = vld [vmem:[%s25516_s7 + $0x1a0] ss:$8 sps:$4 sm:$0xff]  }
 0x477   : > { %8066 = vmatpush2.bf16.msra.mxu0 %v18013_v22  ;;  %v18108_v22 = vld [vmem:[%s25516_s7 + $0x1a4] ss:$8 sps:$4 sm:$0xff]  }
 0x478   : > { %8067 = vmatprep.subr.bf16.mxu0 %v18018_v32  ;;  %v18111_v32 = vld [vmem:[%s25516_s7 + $0x94] ss:$8 sps:$4 sm:$0xff]  }
 0x47b   : > { %8068 = vmatpush2.bf16.msra.mxu0 %v18016_v57  ;;  %v18109_v57 = vld [vmem:[%s25516_s7 + $0x90] ss:$8 sps:$4 sm:$0xff]  }
 0x47c   : > { %8069 = vmatprep.subr.bf16.mxu0 %v18021_v3  ;;  %v18112_v3 = vld [vmem:[%s25516_s7 + $0x190] ss:$8 sps:$4 sm:$0xff]  }
 0x47f   : > { %8070 = vmatpush2.bf16.msra.mxu0 %v18019_v0  ;;  %v18114_v0 = vld [vmem:[%s25516_s7 + $0x194] ss:$8 sps:$4 sm:$0xff]  }
 0x480   : > { %8071 = vmatprep.subr.bf16.mxu0 %v18024_v33  ;;  %v18115_v33 = vld [vmem:[%s25516_s7 + $0x80] ss:$8 sps:$4 sm:$0xff]  }
 0x483   : > { %8072 = vmatpush2.bf16.msra.mxu0 %v18022_v35  ;;  %v18117_v35 = vld [vmem:[%s25516_s7 + $0x84] ss:$8 sps:$4 sm:$0xff]  }
 0x484   : > { %8739 = vmatprep.subr.bf16.mxu0 %v18030_v34 }
 0x486   : > { %8074 = vmatmul.mubr.bf16.vlgmr.msra.gmra.mxu0 %v7365_v26  ;;  %v18079_v26 = vld [vmem:[%s25516_s7 + $0xe0] ss:$8 sps:$4 sm:$0xff]  }
 0x487   : > { %8740 = vmatpush1.bf16.msra.mxu0 %v18028_v18  ;;  %8717 = vmatpush2.bf16.msra.mxu1 %v18079_v26  ;;  %v18118_v18 = vld [vmem:[%s25516_s7 + $0x180] ss:$8 sps:$4 sm:$0xff]  }
 0x488   : > { %8741 = vmatprep.subr.bf16.mxu0 %v18036_v39  ;;  %8718 = vmatprep.subr.bf16.mxu1 %v18087_v42  ;;  %v18124_v42 = vld [vmem:[%s25516_s7 + $0x260] ss:$8 sps:$4 sm:$0xff]  }
 0x48b   : > { %8742 = vmatpush1.bf16.msra.mxu0 %v18034_v38  ;;  %8719 = vmatpush2.bf16.msra.mxu1 %v18085_v31  ;;  %v22438_v38 = vrot.slane %v7463_v20, %v25934_v62  ;;  %v18157_v20 = vld [vmem:[%s25516_s7 + $0x2b0] ss:$8 sps:$4 sm:$0xff]  }
 0x48c   : > { %8743 = vmatprep.subr.bf16.mxu0 %v18042_v44  ;;  %8720 = vmatprep.subr.bf16.mxu1 %v18093_v36  ;;  %v18127_v36 = vld [vmem:[%s25516_s7 + $0x250] ss:$8 sps:$4 sm:$0xff]  }
 0x48f   : > { %8744 = vmatpush1.bf16.msra.mxu0 %v18040_v48  ;;  %8721 = vmatpush2.bf16.msra.mxu1 %v18091_v52  ;;  %v18130_v52 = vld [vmem:[%s25516_s7 + $0x240] ss:$8 sps:$4 sm:$0xff]  }
 0x490   : > { %8745 = vmatprep.subr.bf16.mxu0 %v18048_v5  ;;  %8722 = vmatprep.subr.bf16.mxu1 %v18099_v50  ;;  %v18133_v50 = vld [vmem:[%s25516_s7 + $0x230] ss:$8 sps:$4 sm:$0xff]  }
 0x493   : > { %8746 = vmatpush1.bf16.msra.mxu0 %v18046_v47  ;;  %8723 = vmatpush2.bf16.msra.mxu1 %v18097_v10  ;;  %v18136_v10 = vld [vmem:[%s25516_s7 + $0x220] ss:$8 sps:$4 sm:$0xff]  }
 0x494   : > { %8747 = vmatprep.subr.bf16.mxu0 %v18054_v12  ;;  %8724 = vmatprep.subr.bf16.mxu1 %v18105_v21  ;;  %v18139_v21 = vld [vmem:[%s25516_s7 + $0x210] ss:$8 sps:$4 sm:$0xff]  }
 0x497   : > { %8748 = vmatpush1.bf16.msra.mxu0 %v18052_v25  ;;  %8725 = vmatpush2.bf16.msra.mxu1 %v18103_v49  ;;  %v18144_v49 = vld [vmem:[%s25516_s7 + $0x204] ss:$8 sps:$4 sm:$0xff]  }
 0x498   : > { %8749 = vmatprep.subr.bf16.mxu0 %v18060_v58  ;;  %8726 = vmatprep.subr.bf16.mxu1 %v18111_v32  ;;  %v18145_v32 = vld [vmem:[%s25516_s7 + $0x2f0] ss:$8 sps:$4 sm:$0xff]  }
 0x49b   : > { %8750 = vmatpush1.bf16.msra.mxu0 %v18058_v43  ;;  %8727 = vmatpush2.bf16.msra.mxu1 %v18109_v57  ;;  %v18150_v57 = vld [vmem:[%s25516_s7 + $0x2e4] ss:$8 sps:$4 sm:$0xff]  }
 0x49c   : > { %8751 = vmatprep.subr.bf16.mxu0 %v18066_v60  ;;  %8728 = vmatprep.subr.bf16.mxu1 %v18117_v35  ;;  %v18156_v35 = vld [vmem:[%s25516_s7 + $0x2c4] ss:$8 sps:$4 sm:$0xff]  }
 0x49f   : > { %8752 = vmatpush1.bf16.msra.mxu0 %v18064_v19  ;;  %8729 = vmatpush2.bf16.msra.mxu1 %v18115_v33  ;;  %v18151_v33 = vld [vmem:[%s25516_s7 + $0x2d0] ss:$8 sps:$4 sm:$0xff]  }
 0x4a0   : > { %8753 = vmatprep.subr.bf16.mxu0 %v18072_v55  ;;  %8780 = vmatprep.subr.bf16.mxu1 %v18123_v46  ;;  %v18154_v46 = vld [vmem:[%s25516_s7 + $0x2c0] ss:$8 sps:$4 sm:$0xff]  }
 0x4a3   : > { %8754 = vmatpush1.bf16.msra.mxu0 %v18070_v2  ;;  %v18121_v2 = vld [vmem:[%s25516_s7 + $0x270] ss:$8 sps:$4 sm:$0xff]  }
 0x4a4   : > { %8755 = vmatprep.subr.bf16.mxu0 %v18078_v54 }
 0x4a7   : > { %8756 = vmatpush2.bf16.msra.mxu0 %v18076_v8 }
 0x4a8   : > { %8757 = vmatprep.subr.bf16.mxu0 %v18084_v1 }
 0x4ab   : > { %8758 = vmatpush2.bf16.msra.mxu0 %v18082_v61 }
 0x4ac   : > { %8759 = vmatprep.subr.bf16.mxu0 %v18090_v27  ;;  %v18129_v27 = vld [vmem:[%s25516_s7 + $0x254] ss:$8 sps:$4 sm:$0xff]  }
 0x4af   : > { %8760 = vmatpush2.bf16.msra.mxu0 %v18088_v51 }
 0x4b0   : > { %8761 = vmatprep.subr.bf16.mxu0 %v18096_v59  ;;  %v18132_v59 = vld [vmem:[%s25516_s7 + $0x244] ss:$8 sps:$4 sm:$0xff]  }
 0x4b3   : > { %8762 = vmatpush2.bf16.msra.mxu0 %v18094_v24  ;;  %v18135_v24 = vld [vmem:[%s25516_s7 + $0x234] ss:$8 sps:$4 sm:$0xff]  }
 0x4b4   : > { %8763 = vmatprep.subr.bf16.mxu0 %v18102_v15  ;;  %v18138_v15 = vld [vmem:[%s25516_s7 + $0x224] ss:$8 sps:$4 sm:$0xff]  }
 0x4b7   : > { %8764 = vmatpush2.bf16.msra.mxu0 %v18100_v29  ;;  %v18141_v29 = vld [vmem:[%s25516_s7 + $0x214] ss:$8 sps:$4 sm:$0xff]  }
 0x4b8   : > { %8765 = vmatprep.subr.bf16.mxu0 %v18108_v22  ;;  %v18147_v22 = vld [vmem:[%s25516_s7 + $0x2f4] ss:$8 sps:$4 sm:$0xff]  }
 0x4bb   : > { %8766 = vmatpush2.bf16.msra.mxu0 %v18106_v6  ;;  %v18142_v6 = vld [vmem:[%s25516_s7 + $0x200] ss:$8 sps:$4 sm:$0xff]  }
 0x4bc   : > { %8767 = vmatprep.subr.bf16.mxu0 %v18114_v0  ;;  %v18153_v0 = vld [vmem:[%s25516_s7 + $0x2d4] ss:$8 sps:$4 sm:$0xff]  }
 0x4bf   : > { %8768 = vmatpush2.bf16.msra.mxu0 %v18112_v3  ;;  %v18148_v3 = vld [vmem:[%s25516_s7 + $0x2e0] ss:$8 sps:$4 sm:$0xff]  }
 0x4c0   : > { %8769 = vmatprep.subr.bf16.mxu0 %v18120_v56 }
 0x4c3   : > { %8770 = vmatpush2.bf16.msra.mxu0 %v18118_v18  ;;  %v18159_v18 = vld [vmem:[%s25516_s7 + $0x2b4] ss:$8 sps:$4 sm:$0xff]  }
 0x506   : > { %v7989_v34 = vpop.f32.mrf.mxu0 }
 0x507   : > { %v7990_v48 = vadd.f32 %v7989_v34, %v22438_v38 }
 0x508   : > { %v7991_v39 = vpop.f32.mrf.mxu0 }
 0x509   : > { %v7992_v7 = vadd.f32 %v7991_v39, %v7472_v30  ;;  %v18162_v39 = vld [vmem:[%s25516_s7 + $0x2a4] ss:$8 sps:$4 sm:$0xff]  }
 0x50a   : > { %v22441_v44 = vpop.f32.mrf.mxu0 }
 0x50b   : > { %v7994_v56 = vadd.f32 %v22441_v44, %v22438_v38  ;;  %v18160_v38 = vld [vmem:[%s25516_s7 + $0x2a0] ss:$8 sps:$4 sm:$0xff]  }
 0x50c   : > { %v7995_v5 = vpop.f32.mrf.mxu0 }
 0x50d   : > { %v7996_v16 = vadd.f32 %v7995_v5, %v7472_v30  ;;  %v18165_v30 = vld [vmem:[%s25516_s7 + $0x294] ss:$8 sps:$4 sm:$0xff]  }
 0x511   : > { %v8032_v40 = vpop.f32.mrf.mxu1 }
 0x512   : > { %v8033_v47 = vadd.f32 %v8032_v40, %v7990_v48  ;;  %v18168_v48 = vld [vmem:[%s25516_s7 + $0x284] ss:$8 sps:$4 sm:$0xff]  }
 0x513   : > { %v8034_v45 = vpop.f32.mrf.mxu1 }
 0x514   : > { %v8035_v12 = vadd.f32 %v8034_v45, %v7992_v7  ;;  %v18163_v45 = vld [vmem:[%s25516_s7 + $0x290] ss:$8 sps:$4 sm:$0xff]  }
 0x515   : > { %v22444_v13 = vpop.f32.mrf.mxu1 }
 0x516   : > { %v8037_v34 = vadd.f32 %v22444_v13, %v7994_v56  ;;  %v18166_v13 = vld [vmem:[%s25516_s7 + $0x280] ss:$8 sps:$4 sm:$0xff]   ;;  %v18240_v56 = vld [vmem:[%s25518_s9 + $0x1c4] ss:$8 sps:$4 sm:$0xff]  }
 0x517   : > { %v8038_v9 = vpop.f32.mrf.mxu1 }
 0x518   : > { %v8039_v60 = vadd.f32 %v8038_v9, %v7996_v16  ;;  %v18171_v16 = vld [vmem:[%s25518_s9 + $0x74] ss:$8 sps:$4 sm:$0xff]  }
 0x519   : > { %v18174_v9 = vld [vmem:[%s25518_s9 + $0x174] ss:$8 sps:$4 sm:$0xff]   ;;  %9427 = vmatprep.subr.bf16.mxu0 %v18171_v16 }
 0x51a   : > { %v18267_v16 = vld [vmem:[%s25518_s9 + $0x274] ss:$8 sps:$4 sm:$0xff]  }
 0x546   : > { %v8075_v4 = vpop.f32.mrf.mxu0 }
 0x547   : > { %v8076_v25 = vadd.f32 %v8075_v4, %v8033_v47 }
 0x548   : > { %v8077_v58 = vpop.f32.mrf.mxu0 }
 0x549   : > { %v22446_v28 = vmax.f32 %v8076_v25, 0.0  ;;  %v8078_v43 = vadd.f32 %v8077_v58, %v8035_v12  ;;  %v18169_v12 = vld [vmem:[%s25518_s9 + $0x70] ss:$8 sps:$4 sm:$0xff]   ;;  %v18177_v58 = vld [vmem:[%s25518_s9 + $0x64] ss:$8 sps:$4 sm:$0xff]  }
 0x54a   : > { %v22448_v17 = vpop.f32.mrf.mxu0  ;;  %v18172_v25 = vld [vmem:[%s25518_s9 + $0x170] ss:$8 sps:$4 sm:$0xff]  }
 0x54b   : > { %v8085_v37 = vmax.f32 %v8078_v43, 0.0  ;;  %v8090_v14 = vrot.slane %v22446_v28, 1  ;;  %v8104_v53 = vpack.c.bf16 %v22446_v28, %v22446_v28  ;;  %v8080_v40 = vadd.f32 %v22448_v17, %v8037_v34  ;;  %v18175_v43 = vld [vmem:[%s25518_s9 + $0x60] ss:$8 sps:$4 sm:$0xff]   ;;  %v18243_v34 = vld [vmem:[%s25518_s9 + $0xb4] ss:$8 sps:$4 sm:$0xff]  }
 0x54c   : > { %v8081_v19 = vpop.f32.mrf.mxu0  ;;  %v8096_v5 = vrot.slane %v22446_v28, 2  ;;  %v18180_v28 = vld [vmem:[%s25518_s9 + $0x164] ss:$8 sps:$4 sm:$0xff]   ;;  %v18178_v17 = vld [vmem:[%s25518_s9 + $0x160] ss:$8 sps:$4 sm:$0xff]  }
 0x54d   : > { %v8082_v55 = vadd.f32 %v8081_v19, %v8039_v60  ;;  %v8105_v41 = vpack.c.bf16 %v8085_v37, %v8085_v37  ;;  %v8091_v54 = vrot.slane %v8085_v37, 1  ;;  %v8106_v1 = vpack.c.bf16 %v8090_v14, %v8090_v14  ;;  %v18183_v60 = vld [vmem:[%s25518_s9 + $0x54] ss:$8 sps:$4 sm:$0xff]   ;;  %v18181_v19 = vld [vmem:[%s25518_s9 + $0x50] ss:$8 sps:$4 sm:$0xff]  }
 0x54e   : > { %v8099_v26 = vrot.slane %v8085_v37, 2  ;;  %v8086_v44 = vmax.f32 %v8080_v40, 0.0  ;;  %v18186_v37 = vld [vmem:[%s25518_s9 + $0x154] ss:$8 sps:$4 sm:$0xff]   ;;  %v18184_v14 = vld [vmem:[%s25518_s9 + $0x150] ss:$8 sps:$4 sm:$0xff]  }
 0x54f   : > { %v8087_v8 = vmax.f32 %v8082_v55, 0.0  ;;  %8730 = vmatprep.mubr.bf16.mxu1 %v8105_v41  ;;  %v8107_v23 = vpack.c.bf16 %v8091_v54, %v8091_v54  ;;  %v18189_v55 = vld [vmem:[%s25518_s9 + $0x44] ss:$8 sps:$4 sm:$0xff]   ;;  %v18195_v54 = vld [vmem:[%s25518_s9 + $0x34] ss:$8 sps:$4 sm:$0xff]  }
 0x550   : > { %8731 = vmatmul.mubr.bf16.vlgmr.msra.gmra.mxu1 %v8104_v53  ;;  %v8097_v7 = vrot.slane %v8086_v44, 2  ;;  %v18192_v41 = vld [vmem:[%s25518_s9 + $0x144] ss:$8 sps:$4 sm:$0xff]   ;;  %v18190_v53 = vld [vmem:[%s25518_s9 + $0x140] ss:$8 sps:$4 sm:$0xff]  }
 0x551   : > { %v8100_v61 = vrot.slane %v8087_v8, 2  ;;  %8781 = vmatpush1.bf16.msra.mxu1 %v18121_v2  ;;  %8771 = vmatprep.mubr.bf16.mxu0 %v8107_v23  ;;  %v18187_v2 = vld [vmem:[%s25518_s9 + $0x40] ss:$8 sps:$4 sm:$0xff]   ;;  %v18193_v8 = vld [vmem:[%s25518_s9 + $0x30] ss:$8 sps:$4 sm:$0xff]  }
 0x552   : > { %8782 = vmatprep.subr.bf16.mxu1 %v18126_v11  ;;  %8772 = vmatmul.mubr.bf16.vlgmr.msra.gmra.mxu0 %v8106_v1  ;;  %v8098_v47 = vsel %vm707_vm0, %v8096_v5, %v8097_v7  ;;  %v18198_v11 = vld [vmem:[%s25518_s9 + $0x134] ss:$8 sps:$4 sm:$0xff]   ;;  %v18196_v23 = vld [vmem:[%s25518_s9 + $0x130] ss:$8 sps:$4 sm:$0xff]   ;;  %v18201_v1 = vld [vmem:[%s25518_s9 + $0x24] ss:$8 sps:$4 sm:$0xff]  }
 0x553   : > { %v8101_v31 = vsel %vm707_vm0, %v8099_v26, %v8100_v61  ;;  %v8108_v4 = vpack.c.bf16 %v8098_v47, %v8098_v47  ;;  %9428 = vmatpush1.bf16.msra.mxu0 %v18169_v12  ;;  %v18204_v26 = vld [vmem:[%s25518_s9 + $0x124] ss:$8 sps:$4 sm:$0xff]   ;;  %v18199_v61 = vld [vmem:[%s25518_s9 + $0x20] ss:$8 sps:$4 sm:$0xff]   ;;  %v18244_v40 = vld [vmem:[%s25518_s9 + $0x1b0] ss:$8 sps:$4 sm:$0xff]  }
 0x554   : > { %v8109_v51 = vpack.c.bf16 %v8101_v31, %v8101_v31  ;;  %9429 = vmatprep.subr.bf16.mxu0 %v18177_v58  ;;  %v18210_v31 = vld [vmem:[%s25518_s9 + $0x114] ss:$8 sps:$4 sm:$0xff]   ;;  %v18250_v44 = vld [vmem:[%s25518_s9 + $0x1a0] ss:$8 sps:$4 sm:$0xff]   ;;  %v18256_v47 = vld [vmem:[%s25518_s9 + $0x190] ss:$8 sps:$4 sm:$0xff]  }
 0x555   : > { %8783 = vmatpush1.bf16.msra.mxu1 %v18124_v42  ;;  %v18202_v42 = vld [vmem:[%s25518_s9 + $0x120] ss:$8 sps:$4 sm:$0xff]   ;;  %v18255_v7 = vld [vmem:[%s25518_s9 + $0x94] ss:$8 sps:$4 sm:$0xff]   ;;  %v18264_v12 = vld [vmem:[%s25518_s9 + $0x184] ss:$8 sps:$4 sm:$0xff]  }
 0x556   : > { %8812 = vmatprep.mubr.bf16.mxu1 %v8109_v51  ;;  %8784 = vmatprep.subr.bf16.mxu1 %v18129_v27  ;;  %v18207_v27 = vld [vmem:[%s25518_s9 + $0x14] ss:$8 sps:$4 sm:$0xff]   ;;  %v18205_v51 = vld [vmem:[%s25518_s9 + $0x10] ss:$8 sps:$4 sm:$0xff]   ;;  %vm15746_vm0 = vcmask 24576  }
 0x557   : > { %9430 = vmatpush1.bf16.msra.mxu0 %v18175_v43  ;;  %v18258_v5 = vld [vmem:[%s25518_s9 + $0x194] ss:$8 sps:$4 sm:$0xff]  }
 0x558   : > { %9431 = vmatprep.subr.bf16.mxu0 %v18183_v60 }
 0x559   : > { %8785 = vmatpush1.bf16.msra.mxu1 %v18127_v36  ;;  %v18208_v36 = vld [vmem:[%s25518_s9 + $0x110] ss:$8 sps:$4 sm:$0xff]  }
 0x55a   : > { %8786 = vmatprep.subr.bf16.mxu1 %v18132_v59  ;;  %v18213_v59 = vld [vmem:[%s25518_s9 + $0x4] ss:$8 sps:$4 sm:$0xff]  }
 0x55b   : > { %9432 = vmatpush1.bf16.msra.mxu0 %v18181_v19 }
 0x55c   : > { %9433 = vmatprep.subr.bf16.mxu0 %v18189_v55 }
 0x55d   : > { %8787 = vmatpush1.bf16.msra.mxu1 %v18130_v52  ;;  %v18216_v52 = vld [vmem:[%s25518_s9 + $0x104] ss:$8 sps:$4 sm:$0xff]  }
 0x55e   : > { %8788 = vmatprep.subr.bf16.mxu1 %v18135_v24  ;;  %v18211_v24 = vld [vmem:[%s25518_s9] ss:$8 sps:$4 sm:$0xff]  }
 0x55f   : > { %9434 = vmatpush1.bf16.msra.mxu0 %v18187_v2 }
 0x560   : > { %9435 = vmatprep.subr.bf16.mxu0 %v18195_v54 }
 0x561   : > { %8789 = vmatpush1.bf16.msra.mxu1 %v18133_v50  ;;  %v18214_v50 = vld [vmem:[%s25518_s9 + $0x100] ss:$8 sps:$4 sm:$0xff]  }
 0x562   : > { %8790 = vmatprep.subr.bf16.mxu1 %v18138_v15  ;;  %v18219_v15 = vld [vmem:[%s25518_s9 + $0xf4] ss:$8 sps:$4 sm:$0xff]  }
 0x563   : > { %9436 = vmatpush1.bf16.msra.mxu0 %v18193_v8 }
 0x564   : > { %9437 = vmatprep.subr.bf16.mxu0 %v18201_v1 }
 0x565   : > { %8791 = vmatpush1.bf16.msra.mxu1 %v18136_v10  ;;  %v18222_v10 = vld [vmem:[%s25518_s9 + $0x1f4] ss:$8 sps:$4 sm:$0xff]  }
 0x566   : > { %8792 = vmatprep.subr.bf16.mxu1 %v18141_v29  ;;  %v18217_v29 = vld [vmem:[%s25518_s9 + $0xf0] ss:$8 sps:$4 sm:$0xff]  }
 0x567   : > { %9438 = vmatpush1.bf16.msra.mxu0 %v18199_v61 }
 0x568   : > { %9439 = vmatprep.subr.bf16.mxu0 %v18207_v27 }
 0x569   : > { %8793 = vmatpush1.bf16.msra.mxu1 %v18139_v21  ;;  %v18220_v21 = vld [vmem:[%s25518_s9 + $0x1f0] ss:$8 sps:$4 sm:$0xff]  }
 0x56a   : > { %8794 = vmatprep.subr.bf16.mxu1 %v18144_v49  ;;  %v18225_v49 = vld [vmem:[%s25518_s9 + $0xe4] ss:$8 sps:$4 sm:$0xff]  }
 0x56b   : > { %9440 = vmatpush1.bf16.msra.mxu0 %v18205_v51 }
 0x56c   : > { %9441 = vmatprep.subr.bf16.mxu0 %v18213_v59  ;;  %v18265_v59 = vld [vmem:[%s25518_s9 + $0x270] ss:$8 sps:$4 sm:$0xff]  }
 0x56d   : > { %8795 = vmatpush1.bf16.msra.mxu1 %v18142_v6  ;;  %v18228_v6 = vld [vmem:[%s25518_s9 + $0x1e4] ss:$8 sps:$4 sm:$0xff]  }
 0x56e   : > { %8796 = vmatprep.subr.bf16.mxu1 %v18147_v22  ;;  %v18223_v22 = vld [vmem:[%s25518_s9 + $0xe0] ss:$8 sps:$4 sm:$0xff]  }
 0x56f   : > { %9442 = vmatpush1.bf16.msra.mxu0 %v18211_v24 }
 0x570   : > { %9443 = vmatprep.subr.bf16.mxu0 %v18219_v15 }
 0x571   : > { %8797 = vmatpush2.bf16.msra.mxu1 %v18145_v32  ;;  %v18226_v32 = vld [vmem:[%s25518_s9 + $0x1e0] ss:$8 sps:$4 sm:$0xff]  }
 0x572   : > { %8798 = vmatprep.subr.bf16.mxu1 %v18150_v57  ;;  %v18231_v57 = vld [vmem:[%s25518_s9 + $0xd4] ss:$8 sps:$4 sm:$0xff]  }
 0x573   : > { %9444 = vmatpush2.bf16.msra.mxu0 %v18217_v29 }
 0x574   : > { %9445 = vmatprep.subr.bf16.mxu0 %v18225_v49  ;;  %v18268_v49 = vld [vmem:[%s25518_s9 + $0x260] ss:$8 sps:$4 sm:$0xff]  }
 0x575   : > { %8799 = vmatpush2.bf16.msra.mxu1 %v18148_v3  ;;  %v18234_v3 = vld [vmem:[%s25518_s9 + $0x1d4] ss:$8 sps:$4 sm:$0xff]  }
 0x576   : > { %8800 = vmatprep.subr.bf16.mxu1 %v18153_v0  ;;  %v18229_v0 = vld [vmem:[%s25518_s9 + $0xd0] ss:$8 sps:$4 sm:$0xff]  }
 0x577   : > { %9446 = vmatpush2.bf16.msra.mxu0 %v18223_v22  ;;  %v18271_v22 = vld [vmem:[%s25518_s9 + $0x250] ss:$8 sps:$4 sm:$0xff]  }
 0x578   : > { %9447 = vmatprep.subr.bf16.mxu0 %v18231_v57  ;;  %v18274_v57 = vld [vmem:[%s25518_s9 + $0x240] ss:$8 sps:$4 sm:$0xff]  }
 0x579   : > { %8801 = vmatpush2.bf16.msra.mxu1 %v18151_v33  ;;  %v18232_v33 = vld [vmem:[%s25518_s9 + $0x1d0] ss:$8 sps:$4 sm:$0xff]  }
 0x57a   : > { %8802 = vmatprep.subr.bf16.mxu1 %v18156_v35  ;;  %v18237_v35 = vld [vmem:[%s25518_s9 + $0xc4] ss:$8 sps:$4 sm:$0xff]  }
 0x57b   : > { %9448 = vmatpush2.bf16.msra.mxu0 %v18229_v0  ;;  %v18277_v0 = vld [vmem:[%s25518_s9 + $0x230] ss:$8 sps:$4 sm:$0xff]  }
 0x57c   : > { %9449 = vmatprep.subr.bf16.mxu0 %v18237_v35  ;;  %v18280_v35 = vld [vmem:[%s25518_s9 + $0x220] ss:$8 sps:$4 sm:$0xff]  }
 0x57d   : > { %8803 = vmatpush2.bf16.msra.mxu1 %v18154_v46  ;;  %v18235_v46 = vld [vmem:[%s25518_s9 + $0xc0] ss:$8 sps:$4 sm:$0xff]  }
 0x57e   : > { %8804 = vmatprep.subr.bf16.mxu1 %v18159_v18  ;;  %v18238_v18 = vld [vmem:[%s25518_s9 + $0x1c0] ss:$8 sps:$4 sm:$0xff]  }
 0x57f   : > { %9450 = vmatpush2.bf16.msra.mxu0 %v18235_v46  ;;  %v18283_v46 = vld [vmem:[%s25518_s9 + $0x210] ss:$8 sps:$4 sm:$0xff]  }
 0x580   : > { %9451 = vmatprep.subr.bf16.mxu0 %v18243_v34  ;;  %v18286_v34 = vld [vmem:[%s25518_s9 + $0x200] ss:$8 sps:$4 sm:$0xff]  }
 0x581   : > { %8805 = vmatpush2.bf16.msra.mxu1 %v18157_v20  ;;  %v18246_v20 = vld [vmem:[%s25518_s9 + $0x1b4] ss:$8 sps:$4 sm:$0xff]  }
 0x582   : > { %8806 = vmatprep.subr.bf16.mxu1 %v18162_v39  ;;  %v18241_v39 = vld [vmem:[%s25518_s9 + $0xb0] ss:$8 sps:$4 sm:$0xff]  }
 0x583   : > { %9452 = vmatpush2.bf16.msra.mxu0 %v18241_v39  ;;  %v18289_v39 = vld [vmem:[%s25518_s9 + $0x2f0] ss:$8 sps:$4 sm:$0xff]  }
 0x585   : > { %8807 = vmatpush2.bf16.msra.mxu1 %v18160_v38  ;;  %v18249_v38 = vld [vmem:[%s25518_s9 + $0xa4] ss:$8 sps:$4 sm:$0xff]  }
 0x586   : > { %8808 = vmatprep.subr.bf16.mxu1 %v18165_v30  ;;  %v18247_v30 = vld [vmem:[%s25518_s9 + $0xa0] ss:$8 sps:$4 sm:$0xff]   ;;  %9453 = vmatprep.subr.bf16.mxu0 %v18249_v38 }
 0x587   : > { %9454 = vmatpush2.bf16.msra.mxu0 %v18247_v30  ;;  %v18292_v38 = vld [vmem:[%s25518_s9 + $0x2e0] ss:$8 sps:$4 sm:$0xff]   ;;  %v18297_v30 = vld [vmem:[%s25518_s9 + $0x2d4] ss:$8 sps:$4 sm:$0xff]  }
 0x588   : > { %9455 = vmatprep.subr.bf16.mxu0 %v18255_v7  ;;  %v18303_v7 = vld [vmem:[%s25518_s9 + $0x2b4] ss:$8 sps:$4 sm:$0xff]  }
 0x589   : > { %8809 = vmatpush2.bf16.msra.mxu1 %v18163_v45  ;;  %v18252_v45 = vld [vmem:[%s25518_s9 + $0x1a4] ss:$8 sps:$4 sm:$0xff]  }
 0x58a   : > { %8810 = vmatprep.subr.bf16.mxu1 %v18168_v48  ;;  %v18253_v48 = vld [vmem:[%s25518_s9 + $0x90] ss:$8 sps:$4 sm:$0xff]  }
 0x58b   : > { %9456 = vmatpush2.bf16.msra.mxu0 %v18253_v48  ;;  %v18298_v48 = vld [vmem:[%s25518_s9 + $0x2c0] ss:$8 sps:$4 sm:$0xff]  }
 0x58d   : > { %8811 = vmatpush2.bf16.msra.mxu1 %v18166_v13  ;;  %v18261_v13 = vld [vmem:[%s25518_s9 + $0x84] ss:$8 sps:$4 sm:$0xff]  }
 0x58e   : > { %9468 = vmatprep.subr.bf16.mxu1 %v18174_v9  ;;  %9457 = vmatprep.subr.bf16.mxu0 %v18261_v13  ;;  %v18306_v13 = vld [vmem:[%s25518_s9 + $0x2a4] ss:$8 sps:$4 sm:$0xff]  }
 0x590   : > { %8813 = vmatmul.mubr.bf16.vlgmr.msra.gmra.mxu1 %v8108_v4  ;;  %v18259_v4 = vld [vmem:[%s25518_s9 + $0x80] ss:$8 sps:$4 sm:$0xff]  }
 0x591   : > { %9469 = vmatpush1.bf16.msra.mxu1 %v18172_v25  ;;  %v18262_v25 = vld [vmem:[%s25518_s9 + $0x180] ss:$8 sps:$4 sm:$0xff]   ;;  %9458 = vmatpush2.bf16.msra.mxu0 %v18259_v4  ;;  %v18309_v4 = vld [vmem:[%s25518_s9 + $0x294] ss:$8 sps:$4 sm:$0xff]  }
 0x592   : > { %9470 = vmatprep.subr.bf16.mxu1 %v18180_v28  ;;  %9509 = vmatprep.subr.bf16.mxu0 %v18267_v16  ;;  %v18312_v16 = vld [vmem:[%s25518_s9 + $0x284] ss:$8 sps:$4 sm:$0xff]  }
 0x595   : > { %9471 = vmatpush1.bf16.msra.mxu1 %v18178_v17 }
 0x596   : > { %9472 = vmatprep.subr.bf16.mxu1 %v18186_v37 }
 0x599   : > { %9473 = vmatpush1.bf16.msra.mxu1 %v18184_v14  ;;  %v8206_v14 = vld [vmem:[%s25517_s8] sm:$0x3] }
 0x59a   : > { %9474 = vmatprep.subr.bf16.mxu1 %v18192_v41  ;;  %v8211_v55 = vrot.slane %v8206_v14, %v25934_v62  ;;  %v8215_v41 = vrot.slane %v8206_v14, %v25935_v63  ;;  %v18319_v14 = vld [vmem:[%s25520_s11 + $0x60] ss:$8 sps:$4 sm:$0xff]  }
 0x59d   : > { %9475 = vmatpush1.bf16.msra.mxu1 %v18190_v53 }
 0x59e   : > { %9476 = vmatprep.subr.bf16.mxu1 %v18198_v11 }
 0x5a1   : > { %9477 = vmatpush1.bf16.msra.mxu1 %v18196_v23 }
 0x5a2   : > { %9478 = vmatprep.subr.bf16.mxu1 %v18204_v26 }
 0x5a5   : > { %9479 = vmatpush1.bf16.msra.mxu1 %v18202_v42 }
 0x5a6   : > { %9480 = vmatprep.subr.bf16.mxu1 %v18210_v31 }
 0x5a9   : > { %9481 = vmatpush1.bf16.msra.mxu1 %v18208_v36 }
 0x5aa   : > { %9482 = vmatprep.subr.bf16.mxu1 %v18216_v52 }
 0x5ad   : > { %9483 = vmatpush1.bf16.msra.mxu1 %v18214_v50 }
 0x5ae   : > { %9484 = vmatprep.subr.bf16.mxu1 %v18222_v10  ;;  %v18270_v10 = vld [vmem:[%s25518_s9 + $0x264] ss:$8 sps:$4 sm:$0xff]  }
 0x5b1   : > { %9485 = vmatpush2.bf16.msra.mxu1 %v18220_v21 }
 0x5b2   : > { %9486 = vmatprep.subr.bf16.mxu1 %v18228_v6  ;;  %v18273_v6 = vld [vmem:[%s25518_s9 + $0x254] ss:$8 sps:$4 sm:$0xff]  }
 0x5b5   : > { %9487 = vmatpush2.bf16.msra.mxu1 %v18226_v32  ;;  %v18276_v32 = vld [vmem:[%s25518_s9 + $0x244] ss:$8 sps:$4 sm:$0xff]  }
 0x5b6   : > { %9488 = vmatprep.subr.bf16.mxu1 %v18234_v3  ;;  %v18279_v3 = vld [vmem:[%s25518_s9 + $0x234] ss:$8 sps:$4 sm:$0xff]  }
 0x5b9   : > { %9489 = vmatpush2.bf16.msra.mxu1 %v18232_v33  ;;  %v18282_v33 = vld [vmem:[%s25518_s9 + $0x224] ss:$8 sps:$4 sm:$0xff]  }
 0x5ba   : > { %9490 = vmatprep.subr.bf16.mxu1 %v18240_v56  ;;  %v18285_v56 = vld [vmem:[%s25518_s9 + $0x214] ss:$8 sps:$4 sm:$0xff]  }
 0x5bd   : > { %9491 = vmatpush2.bf16.msra.mxu1 %v18238_v18  ;;  %v18288_v18 = vld [vmem:[%s25518_s9 + $0x204] ss:$8 sps:$4 sm:$0xff]  }
 0x5be   : > { %9492 = vmatprep.subr.bf16.mxu1 %v18246_v20  ;;  %v18291_v20 = vld [vmem:[%s25518_s9 + $0x2f4] ss:$8 sps:$4 sm:$0xff]  }
 0x5c1   : > { %9493 = vmatpush2.bf16.msra.mxu1 %v18244_v40  ;;  %v18294_v40 = vld [vmem:[%s25518_s9 + $0x2e4] ss:$8 sps:$4 sm:$0xff]  }
 0x5c2   : > { %9494 = vmatprep.subr.bf16.mxu1 %v18252_v45  ;;  %v18300_v45 = vld [vmem:[%s25518_s9 + $0x2c4] ss:$8 sps:$4 sm:$0xff]  }
 0x5c5   : > { %9495 = vmatpush2.bf16.msra.mxu1 %v18250_v44  ;;  %v18295_v44 = vld [vmem:[%s25518_s9 + $0x2d0] ss:$8 sps:$4 sm:$0xff]  }
 0x5c6   : > { %9496 = vmatprep.subr.bf16.mxu1 %v18258_v5  ;;  %v18301_v5 = vld [vmem:[%s25518_s9 + $0x2b0] ss:$8 sps:$4 sm:$0xff]  }
 0x5c9   : > { %9497 = vmatpush2.bf16.msra.mxu1 %v18256_v47  ;;  %v18304_v47 = vld [vmem:[%s25518_s9 + $0x2a0] ss:$8 sps:$4 sm:$0xff]  }
 0x5ca   : > { %9498 = vmatprep.subr.bf16.mxu1 %v18264_v12  ;;  %v18307_v12 = vld [vmem:[%s25518_s9 + $0x290] ss:$8 sps:$4 sm:$0xff]  }
 0x5cd   : > { %9499 = vmatpush2.bf16.msra.mxu1 %v18262_v25  ;;  %v18310_v25 = vld [vmem:[%s25518_s9 + $0x280] ss:$8 sps:$4 sm:$0xff]  }
 0x610   : > { %v8732_v9 = vpop.f32.mrf.mxu1 }
 0x611   : > { %v8733_v2 = vadd.f32 %v8732_v9, %v8211_v55  ;;  %v18322_v55 = vld [vmem:[%s25520_s11 + $0x160] ss:$8 sps:$4 sm:$0xff]  }
 0x612   : > { %v8734_v58 = vpop.f32.mrf.mxu1  ;;  %v8773_v28 = vpop.f32.mrf.mxu0 }
 0x613   : > { %v8735_v53 = vadd.f32 %v8734_v58, %v8215_v41  ;;  %v8774_v54 = vadd.f32 %v8773_v28, %v8733_v2  ;;  %v18313_v28 = vld [vmem:[%s25520_s11 + $0x70] ss:$8 sps:$4 sm:$0xff]   ;;  %v18327_v41 = vld [vmem:[%s25520_s11 + $0x54] ss:$8 sps:$4 sm:$0xff]  }
 0x614   : > { %v8736_v43 = vpop.f32.mrf.mxu1  ;;  %v8775_v17 = vpop.f32.mrf.mxu0  ;;  %v18330_v2 = vld [vmem:[%s25520_s11 + $0x154] ss:$8 sps:$4 sm:$0xff]  }
 0x615   : > { %v8776_v8 = vadd.f32 %v8775_v17, %v8735_v53  ;;  %v18315_v43 = vld [vmem:[%s25520_s11 + $0x74] ss:$8 sps:$4 sm:$0xff]   ;;  %v18316_v17 = vld [vmem:[%s25520_s11 + $0x170] ss:$8 sps:$4 sm:$0xff]  }
 0x616   : > { %v8737_v60 = vpop.f32.mrf.mxu1  ;;  %v8777_v37 = vpop.f32.mrf.mxu0  ;;  %10156 = vmatprep.subr.bf16.mxu1 %v18315_v43  ;;  %v18325_v53 = vld [vmem:[%s25520_s11 + $0x50] ss:$8 sps:$4 sm:$0xff]   ;;  %v18411_v43 = vld [vmem:[%s25520_s11 + $0x274] ss:$8 sps:$4 sm:$0xff]  }
 0x617   : > { %v18318_v60 = vld [vmem:[%s25520_s11 + $0x174] ss:$8 sps:$4 sm:$0xff]   ;;  %v18321_v37 = vld [vmem:[%s25520_s11 + $0x64] ss:$8 sps:$4 sm:$0xff]  }
 0x618   : > { %v8778_v19 = vpop.f32.mrf.mxu0 }
 0x619   : > { %v18324_v19 = vld [vmem:[%s25520_s11 + $0x164] ss:$8 sps:$4 sm:$0xff]  }
 0x650   : > { %v8814_v11 = vpop.f32.mrf.mxu1 }
 0x651   : > { %v8815_v23 = vadd.f32 %v8814_v11, %v8774_v54  ;;  %v18328_v54 = vld [vmem:[%s25520_s11 + $0x150] ss:$8 sps:$4 sm:$0xff]   ;;  %v18333_v11 = vld [vmem:[%s25520_s11 + $0x44] ss:$8 sps:$4 sm:$0xff]  }
 0x652   : > { %v8816_v1 = vpop.f32.mrf.mxu1 }
 0x653   : > { %v22753_v26 = vmax.f32 %v8815_v23, 0.0  ;;  %v8817_v61 = vadd.f32 %v8816_v1, %v8776_v8  ;;  %v18336_v8 = vld [vmem:[%s25520_s11 + $0x144] ss:$8 sps:$4 sm:$0xff]   ;;  %v18331_v23 = vld [vmem:[%s25520_s11 + $0x40] ss:$8 sps:$4 sm:$0xff]  }
 0x654   : > { %v8818_v42 = vpop.f32.mrf.mxu1  ;;  %v18334_v1 = vld [vmem:[%s25520_s11 + $0x140] ss:$8 sps:$4 sm:$0xff]  }
 0x655   : > { %v8822_v27 = vmax.f32 %v8817_v61, 0.0  ;;  %v8825_v31 = vrot.slane %v22753_v26, 1  ;;  %v8833_v24 = vpack.c.bf16 %v22753_v26, %v22753_v26  ;;  %v8829_v9 = vrot.slane %v22753_v26, 2  ;;  %v18339_v26 = vld [vmem:[%s25520_s11 + $0x34] ss:$8 sps:$4 sm:$0xff]  }
 0x656   : > { %v8819_v51 = vpop.f32.mrf.mxu1  ;;  %v18342_v61 = vld [vmem:[%s25520_s11 + $0x134] ss:$8 sps:$4 sm:$0xff]   ;;  %v18337_v42 = vld [vmem:[%s25520_s11 + $0x30] ss:$8 sps:$4 sm:$0xff]  }
 0x657   : > { %v8834_v36 = vpack.c.bf16 %v8822_v27, %v8822_v27  ;;  %v8826_v52 = vrot.slane %v8822_v27, 1  ;;  %v8830_v50 = vrot.slane %v8822_v27, 2  ;;  %v8835_v29 = vpack.c.bf16 %v8825_v31, %v8825_v31  ;;  %v18340_v27 = vld [vmem:[%s25520_s11 + $0x130] ss:$8 sps:$4 sm:$0xff]   ;;  %v18345_v31 = vld [vmem:[%s25520_s11 + $0x24] ss:$8 sps:$4 sm:$0xff]  }
 0x658   : > { %v8837_v58 = vpack.c.bf16 %v8829_v9, %v8829_v9  ;;  %v18348_v51 = vld [vmem:[%s25520_s11 + $0x124] ss:$8 sps:$4 sm:$0xff]   ;;  %v18400_v9 = vld [vmem:[%s25520_s11 + $0x190] ss:$8 sps:$4 sm:$0xff]  }
 0x659   : > { %9459 = vmatprep.mubr.bf16.mxu0 %v8834_v36  ;;  %v8836_v15 = vpack.c.bf16 %v8826_v52, %v8826_v52  ;;  %v8838_v21 = vpack.c.bf16 %v8830_v50, %v8830_v50  ;;  %v18343_v36 = vld [vmem:[%s25520_s11 + $0x20] ss:$8 sps:$4 sm:$0xff]   ;;  %v18351_v52 = vld [vmem:[%s25520_s11 + $0x14] ss:$8 sps:$4 sm:$0xff]   ;;  %v18349_v50 = vld [vmem:[%s25520_s11 + $0x10] ss:$8 sps:$4 sm:$0xff]  }
 0x65a   : > { %9460 = vmatmul.mubr.bf16.vlgmr.msra.gmra.mxu0 %v8833_v24  ;;  %v18354_v24 = vld [vmem:[%s25520_s11 + $0x114] ss:$8 sps:$4 sm:$0xff]  }
 0x65b   : > { %9510 = vmatpush1.bf16.msra.mxu0 %v18265_v59  ;;  %9500 = vmatprep.mubr.bf16.mxu1 %v8836_v15  ;;  %v18346_v59 = vld [vmem:[%s25520_s11 + $0x120] ss:$8 sps:$4 sm:$0xff]   ;;  %v18352_v15 = vld [vmem:[%s25520_s11 + $0x110] ss:$8 sps:$4 sm:$0xff]  }
 0x65c   : > { %9541 = vmatprep.mubr.bf16.mxu0 %v8838_v21  ;;  %9501 = vmatmul.mubr.bf16.vlgmr.msra.gmra.mxu1 %v8835_v29  ;;  %v18360_v29 = vld [vmem:[%s25520_s11 + $0x104] ss:$8 sps:$4 sm:$0xff]   ;;  %v18355_v21 = vld [vmem:[%s25520_s11] ss:$8 sps:$4 sm:$0xff]  }
 0x65d   : > { %9511 = vmatprep.subr.bf16.mxu0 %v18270_v10  ;;  %10157 = vmatpush1.bf16.msra.mxu1 %v18313_v28  ;;  %v18357_v10 = vld [vmem:[%s25520_s11 + $0x4] ss:$8 sps:$4 sm:$0xff]  }
 0x65e   : > { %10158 = vmatprep.subr.bf16.mxu1 %v18321_v37  ;;  %v18408_v28 = vld [vmem:[%s25520_s11 + $0x184] ss:$8 sps:$4 sm:$0xff]  }
 0x65f   : > { %9512 = vmatpush1.bf16.msra.mxu0 %v18268_v49  ;;  %v18358_v49 = vld [vmem:[%s25520_s11 + $0x100] ss:$8 sps:$4 sm:$0xff]  }
 0x660   : > { %9513 = vmatprep.subr.bf16.mxu0 %v18273_v6  ;;  %v18363_v6 = vld [vmem:[%s25520_s11 + $0xf4] ss:$8 sps:$4 sm:$0xff]  }
 0x661   : > { %10159 = vmatpush1.bf16.msra.mxu1 %v18319_v14 }
 0x662   : > { %10160 = vmatprep.subr.bf16.mxu1 %v18327_v41 }
 0x663   : > { %9514 = vmatpush1.bf16.msra.mxu0 %v18271_v22  ;;  %v18366_v22 = vld [vmem:[%s25520_s11 + $0x1f4] ss:$8 sps:$4 sm:$0xff]  }
 0x664   : > { %9515 = vmatprep.subr.bf16.mxu0 %v18276_v32  ;;  %v18361_v32 = vld [vmem:[%s25520_s11 + $0xf0] ss:$8 sps:$4 sm:$0xff]  }
 0x665   : > { %10161 = vmatpush1.bf16.msra.mxu1 %v18325_v53 }
 0x666   : > { %10162 = vmatprep.subr.bf16.mxu1 %v18333_v11 }
 0x667   : > { %9516 = vmatpush1.bf16.msra.mxu0 %v18274_v57  ;;  %v18364_v57 = vld [vmem:[%s25520_s11 + $0x1f0] ss:$8 sps:$4 sm:$0xff]  }
 0x668   : > { %9517 = vmatprep.subr.bf16.mxu0 %v18279_v3  ;;  %v18369_v3 = vld [vmem:[%s25520_s11 + $0xe4] ss:$8 sps:$4 sm:$0xff]  }
 0x669   : > { %10163 = vmatpush1.bf16.msra.mxu1 %v18331_v23 }
 0x66a   : > { %10164 = vmatprep.subr.bf16.mxu1 %v18339_v26 }
 0x66b   : > { %9518 = vmatpush1.bf16.msra.mxu0 %v18277_v0  ;;  %v18372_v0 = vld [vmem:[%s25520_s11 + $0x1e4] ss:$8 sps:$4 sm:$0xff]  }
 0x66c   : > { %9519 = vmatprep.subr.bf16.mxu0 %v18282_v33  ;;  %v18367_v33 = vld [vmem:[%s25520_s11 + $0xe0] ss:$8 sps:$4 sm:$0xff]  }
 0x66d   : > { %10165 = vmatpush1.bf16.msra.mxu1 %v18337_v42 }
 0x66e   : > { %10166 = vmatprep.subr.bf16.mxu1 %v18345_v31 }
 0x66f   : > { %9520 = vmatpush1.bf16.msra.mxu0 %v18280_v35  ;;  %v18370_v35 = vld [vmem:[%s25520_s11 + $0x1e0] ss:$8 sps:$4 sm:$0xff]  }
 0x670   : > { %9521 = vmatprep.subr.bf16.mxu0 %v18285_v56  ;;  %v18375_v56 = vld [vmem:[%s25520_s11 + $0xd4] ss:$8 sps:$4 sm:$0xff]  }
 0x671   : > { %10167 = vmatpush1.bf16.msra.mxu1 %v18343_v36 }
 0x672   : > { %10168 = vmatprep.subr.bf16.mxu1 %v18351_v52 }
 0x673   : > { %9522 = vmatpush1.bf16.msra.mxu0 %v18283_v46  ;;  %v18378_v46 = vld [vmem:[%s25520_s11 + $0x1d4] ss:$8 sps:$4 sm:$0xff]  }
 0x674   : > { %9523 = vmatprep.subr.bf16.mxu0 %v18288_v18  ;;  %v18373_v18 = vld [vmem:[%s25520_s11 + $0xd0] ss:$8 sps:$4 sm:$0xff]  }
 0x675   : > { %10169 = vmatpush1.bf16.msra.mxu1 %v18349_v50 }
 0x676   : > { %10170 = vmatprep.subr.bf16.mxu1 %v18357_v10  ;;  %v18409_v10 = vld [vmem:[%s25520_s11 + $0x270] ss:$8 sps:$4 sm:$0xff]  }
 0x677   : > { %9524 = vmatpush1.bf16.msra.mxu0 %v18286_v34  ;;  %v18376_v34 = vld [vmem:[%s25520_s11 + $0x1d0] ss:$8 sps:$4 sm:$0xff]  }
 0x678   : > { %9525 = vmatprep.subr.bf16.mxu0 %v18291_v20  ;;  %v18381_v20 = vld [vmem:[%s25520_s11 + $0xc4] ss:$8 sps:$4 sm:$0xff]  }
 0x679   : > { %10171 = vmatpush1.bf16.msra.mxu1 %v18355_v21 }
 0x67a   : > { %10172 = vmatprep.subr.bf16.mxu1 %v18363_v6 }
 0x67b   : > { %9526 = vmatpush2.bf16.msra.mxu0 %v18289_v39  ;;  %v18384_v39 = vld [vmem:[%s25520_s11 + $0x1c4] ss:$8 sps:$4 sm:$0xff]  }
 0x67c   : > { %9527 = vmatprep.subr.bf16.mxu0 %v18294_v40  ;;  %v18379_v40 = vld [vmem:[%s25520_s11 + $0xc0] ss:$8 sps:$4 sm:$0xff]  }
 0x67d   : > { %10173 = vmatpush2.bf16.msra.mxu1 %v18361_v32 }
 0x67e   : > { %10174 = vmatprep.subr.bf16.mxu1 %v18369_v3  ;;  %v18412_v3 = vld [vmem:[%s25520_s11 + $0x260] ss:$8 sps:$4 sm:$0xff]  }
 0x67f   : > { %9528 = vmatpush2.bf16.msra.mxu0 %v18292_v38  ;;  %v18382_v38 = vld [vmem:[%s25520_s11 + $0x1c0] ss:$8 sps:$4 sm:$0xff]  }
 0x680   : > { %9529 = vmatprep.subr.bf16.mxu0 %v18297_v30  ;;  %v18387_v30 = vld [vmem:[%s25520_s11 + $0xb4] ss:$8 sps:$4 sm:$0xff]  }
 0x681   : > { %10175 = vmatpush2.bf16.msra.mxu1 %v18367_v33  ;;  %v18415_v33 = vld [vmem:[%s25520_s11 + $0x250] ss:$8 sps:$4 sm:$0xff]  }
 0x682   : > { %10176 = vmatprep.subr.bf16.mxu1 %v18375_v56  ;;  %v18418_v56 = vld [vmem:[%s25520_s11 + $0x240] ss:$8 sps:$4 sm:$0xff]  }
 0x683   : > { %9530 = vmatpush2.bf16.msra.mxu0 %v18295_v44  ;;  %v18390_v44 = vld [vmem:[%s25520_s11 + $0x1b4] ss:$8 sps:$4 sm:$0xff]  }
 0x684   : > { %9531 = vmatprep.subr.bf16.mxu0 %v18300_v45  ;;  %v18385_v45 = vld [vmem:[%s25520_s11 + $0xb0] ss:$8 sps:$4 sm:$0xff]  }
 0x685   : > { %10177 = vmatpush2.bf16.msra.mxu1 %v18373_v18  ;;  %v18421_v18 = vld [vmem:[%s25520_s11 + $0x230] ss:$8 sps:$4 sm:$0xff]  }
 0x686   : > { %10178 = vmatprep.subr.bf16.mxu1 %v18381_v20  ;;  %v18424_v20 = vld [vmem:[%s25520_s11 + $0x220] ss:$8 sps:$4 sm:$0xff]  }
 0x687   : > { %9532 = vmatpush2.bf16.msra.mxu0 %v18298_v48  ;;  %v18388_v48 = vld [vmem:[%s25520_s11 + $0x1b0] ss:$8 sps:$4 sm:$0xff]  }
 0x688   : > { %9533 = vmatprep.subr.bf16.mxu0 %v18303_v7  ;;  %v18393_v7 = vld [vmem:[%s25520_s11 + $0xa4] ss:$8 sps:$4 sm:$0xff]  }
 0x689   : > { %10179 = vmatpush2.bf16.msra.mxu1 %v18379_v40  ;;  %v18427_v40 = vld [vmem:[%s25520_s11 + $0x210] ss:$8 sps:$4 sm:$0xff]  }
 0x68a   : > { %10180 = vmatprep.subr.bf16.mxu1 %v18387_v30  ;;  %v18430_v30 = vld [vmem:[%s25520_s11 + $0x200] ss:$8 sps:$4 sm:$0xff]  }
 0x68b   : > { %9534 = vmatpush2.bf16.msra.mxu0 %v18301_v5  ;;  %v18391_v5 = vld [vmem:[%s25520_s11 + $0xa0] ss:$8 sps:$4 sm:$0xff]  }
 0x68c   : > { %9535 = vmatprep.subr.bf16.mxu0 %v18306_v13  ;;  %v18394_v13 = vld [vmem:[%s25520_s11 + $0x1a0] ss:$8 sps:$4 sm:$0xff]  }
 0x68d   : > { %10181 = vmatpush2.bf16.msra.mxu1 %v18385_v45  ;;  %v18433_v45 = vld [vmem:[%s25520_s11 + $0x2f0] ss:$8 sps:$4 sm:$0xff]  }
 0x68e   : > { %10182 = vmatprep.subr.bf16.mxu1 %v18393_v7  ;;  %v18436_v7 = vld [vmem:[%s25520_s11 + $0x2e0] ss:$8 sps:$4 sm:$0xff]  }
 0x68f   : > { %9536 = vmatpush2.bf16.msra.mxu0 %v18304_v47  ;;  %v18396_v47 = vld [vmem:[%s25520_s11 + $0x1a4] ss:$8 sps:$4 sm:$0xff]  }
 0x690   : > { %9537 = vmatprep.subr.bf16.mxu0 %v18309_v4  ;;  %v18397_v4 = vld [vmem:[%s25520_s11 + $0x90] ss:$8 sps:$4 sm:$0xff]  }
 0x691   : > { %10183 = vmatpush2.bf16.msra.mxu1 %v18391_v5  ;;  %v18441_v5 = vld [vmem:[%s25520_s11 + $0x2d4] ss:$8 sps:$4 sm:$0xff]  }
 0x693   : > { %9538 = vmatpush2.bf16.msra.mxu0 %v18307_v12  ;;  %v18399_v12 = vld [vmem:[%s25520_s11 + $0x94] ss:$8 sps:$4 sm:$0xff]  }
 0x694   : > { %9539 = vmatprep.subr.bf16.mxu0 %v18312_v16  ;;  %v18402_v16 = vld [vmem:[%s25520_s11 + $0x194] ss:$8 sps:$4 sm:$0xff]   ;;  %10184 = vmatprep.subr.bf16.mxu1 %v18399_v12 }
 0x695   : > { %10185 = vmatpush2.bf16.msra.mxu1 %v18397_v4  ;;  %v18442_v4 = vld [vmem:[%s25520_s11 + $0x2c0] ss:$8 sps:$4 sm:$0xff]   ;;  %v18447_v12 = vld [vmem:[%s25520_s11 + $0x2b4] ss:$8 sps:$4 sm:$0xff]  }
 0x697   : > { %9540 = vmatpush2.bf16.msra.mxu0 %v18310_v25  ;;  %v18405_v25 = vld [vmem:[%s25520_s11 + $0x84] ss:$8 sps:$4 sm:$0xff]  }
 0x698   : > { %10197 = vmatprep.subr.bf16.mxu0 %v18318_v60  ;;  %10186 = vmatprep.subr.bf16.mxu1 %v18405_v25  ;;  %v18450_v25 = vld [vmem:[%s25520_s11 + $0x2a4] ss:$8 sps:$4 sm:$0xff]  }
 0x69a   : > { %9542 = vmatmul.mubr.bf16.vlgmr.msra.gmra.mxu0 %v8837_v58  ;;  %v18403_v58 = vld [vmem:[%s25520_s11 + $0x80] ss:$8 sps:$4 sm:$0xff]  }
 0x69b   : > { %10198 = vmatpush1.bf16.msra.mxu0 %v18316_v17  ;;  %v18406_v17 = vld [vmem:[%s25520_s11 + $0x180] ss:$8 sps:$4 sm:$0xff]   ;;  %10187 = vmatpush2.bf16.msra.mxu1 %v18403_v58  ;;  %v18453_v58 = vld [vmem:[%s25520_s11 + $0x294] ss:$8 sps:$4 sm:$0xff]  }
 0x69c   : > { %10199 = vmatprep.subr.bf16.mxu0 %v18324_v19  ;;  %10238 = vmatprep.subr.bf16.mxu1 %v18411_v43  ;;  %v18456_v43 = vld [vmem:[%s25520_s11 + $0x284] ss:$8 sps:$4 sm:$0xff]  }
 0x69f   : > { %10200 = vmatpush1.bf16.msra.mxu0 %v18322_v55 }
 0x6a0   : > { %10201 = vmatprep.subr.bf16.mxu0 %v18330_v2 }
 0x6a3   : > { %10202 = vmatpush1.bf16.msra.mxu0 %v18328_v54  ;;  %v8935_v54 = vld [vmem:[%s25519_s10] sm:$0x3] }
 0x6a4   : > { %10203 = vmatprep.subr.bf16.mxu0 %v18336_v8  ;;  %v8940_v11 = vrot.slane %v8935_v54, %v25934_v62  ;;  %v8944_v8 = vrot.slane %v8935_v54, %v25935_v63  ;;  %v10345_v54 = vld [vmem:[%s25522_s13 + $0x180] sm:$0xff] }
 0x6a7   : > { %10204 = vmatpush1.bf16.msra.mxu0 %v18334_v1 }
 0x6a8   : > { %10205 = vmatprep.subr.bf16.mxu0 %v18342_v61 }
 0x6ab   : > { %10206 = vmatpush1.bf16.msra.mxu0 %v18340_v27 }
 0x6ac   : > { %10207 = vmatprep.subr.bf16.mxu0 %v18348_v51 }
 0x6af   : > { %10208 = vmatpush1.bf16.msra.mxu0 %v18346_v59 }
 0x6b0   : > { %10209 = vmatprep.subr.bf16.mxu0 %v18354_v24 }
 0x6b3   : > { %10210 = vmatpush1.bf16.msra.mxu0 %v18352_v15 }
 0x6b4   : > { %10211 = vmatprep.subr.bf16.mxu0 %v18360_v29 }
 0x6b7   : > { %10212 = vmatpush1.bf16.msra.mxu0 %v18358_v49 }
 0x6b8   : > { %10213 = vmatprep.subr.bf16.mxu0 %v18366_v22  ;;  %v18414_v22 = vld [vmem:[%s25520_s11 + $0x264] ss:$8 sps:$4 sm:$0xff]  }
 0x6bb   : > { %10214 = vmatpush2.bf16.msra.mxu0 %v18364_v57 }
 0x6bc   : > { %10215 = vmatprep.subr.bf16.mxu0 %v18372_v0  ;;  %v18417_v0 = vld [vmem:[%s25520_s11 + $0x254] ss:$8 sps:$4 sm:$0xff]  }
 0x6bf   : > { %10216 = vmatpush2.bf16.msra.mxu0 %v18370_v35  ;;  %v18420_v35 = vld [vmem:[%s25520_s11 + $0x244] ss:$8 sps:$4 sm:$0xff]  }
 0x6c0   : > { %10217 = vmatprep.subr.bf16.mxu0 %v18378_v46  ;;  %v18423_v46 = vld [vmem:[%s25520_s11 + $0x234] ss:$8 sps:$4 sm:$0xff]  }
 0x6c3   : > { %10218 = vmatpush2.bf16.msra.mxu0 %v18376_v34  ;;  %v18426_v34 = vld [vmem:[%s25520_s11 + $0x224] ss:$8 sps:$4 sm:$0xff]  }
 0x6c4   : > { %10219 = vmatprep.subr.bf16.mxu0 %v18384_v39  ;;  %v18429_v39 = vld [vmem:[%s25520_s11 + $0x214] ss:$8 sps:$4 sm:$0xff]  }
 0x6c7   : > { %10220 = vmatpush2.bf16.msra.mxu0 %v18382_v38  ;;  %v18432_v38 = vld [vmem:[%s25520_s11 + $0x204] ss:$8 sps:$4 sm:$0xff]  }
 0x6c8   : > { %10221 = vmatprep.subr.bf16.mxu0 %v18390_v44  ;;  %v18435_v44 = vld [vmem:[%s25520_s11 + $0x2f4] ss:$8 sps:$4 sm:$0xff]  }
 0x6cb   : > { %10222 = vmatpush2.bf16.msra.mxu0 %v18388_v48  ;;  %v18438_v48 = vld [vmem:[%s25520_s11 + $0x2e4] ss:$8 sps:$4 sm:$0xff]  }
 0x6cc   : > { %10223 = vmatprep.subr.bf16.mxu0 %v18396_v47  ;;  %v18444_v47 = vld [vmem:[%s25520_s11 + $0x2c4] ss:$8 sps:$4 sm:$0xff]  }
 0x6cf   : > { %10224 = vmatpush2.bf16.msra.mxu0 %v18394_v13  ;;  %v18439_v13 = vld [vmem:[%s25520_s11 + $0x2d0] ss:$8 sps:$4 sm:$0xff]  }
 0x6d0   : > { %10225 = vmatprep.subr.bf16.mxu0 %v18402_v16  ;;  %v18445_v16 = vld [vmem:[%s25520_s11 + $0x2b0] ss:$8 sps:$4 sm:$0xff]  }
 0x6d3   : > { %10226 = vmatpush2.bf16.msra.mxu0 %v18400_v9  ;;  %v18448_v9 = vld [vmem:[%s25520_s11 + $0x2a0] ss:$8 sps:$4 sm:$0xff]  }
 0x6d4   : > { %10227 = vmatprep.subr.bf16.mxu0 %v18408_v28  ;;  %v18451_v28 = vld [vmem:[%s25520_s11 + $0x290] ss:$8 sps:$4 sm:$0xff]  }
 0x6d7   : > { %10228 = vmatpush2.bf16.msra.mxu0 %v18406_v17  ;;  %v18454_v17 = vld [vmem:[%s25520_s11 + $0x280] ss:$8 sps:$4 sm:$0xff]  }
 0x71a   : > { %v9461_v60 = vpop.f32.mrf.mxu0 }
 0x71b   : > { %v9462_v23 = vadd.f32 %v9461_v60, %v8940_v11  ;;  %v10349_v11 = vld [vmem:[%s25522_s13 + $0x1a0] sm:$0xff] }
 0x71c   : > { %v9463_v37 = vpop.f32.mrf.mxu0  ;;  %v9502_v19 = vpop.f32.mrf.mxu1 }
 0x71d   : > { %v9464_v1 = vadd.f32 %v9463_v37, %v8944_v8  ;;  %v9503_v26 = vadd.f32 %v9502_v19, %v9462_v23  ;;  %v10353_v19 = vld [vmem:[%s25522_s13 + $0x1c0] sm:$0xff] }
 0x71e   : > { %v9465_v14 = vpop.f32.mrf.mxu0  ;;  %v9504_v55 = vpop.f32.mrf.mxu1 }
 0x71f   : > { %v9505_v42 = vadd.f32 %v9504_v55, %v9464_v1  ;;  %v10357_v14 = vld [vmem:[%s25522_s13 + $0x1e0] sm:$0xff]  ;;  %v10354_v55 = vld [vmem:[%s25522_s13 + $0x1c8] sm:$0xff]  ;;  %v16528_v1 = vcombine.high %v10345_v54, %v10349_v11 }
 0x720   : > { %v9466_v41 = vpop.f32.mrf.mxu0  ;;  %v9506_v2 = vpop.f32.mrf.mxu1 }
 0x721   : > { %v16535_v41 = vcombine.low %v10353_v19, %v10357_v14  ;;  %v16536_v2 = vcombine.high %v10353_v19, %v10357_v14  ;;  %v10417_v19 = vld [vmem:[%s25522_s13 + $0x3c0] sm:$0xff] }
 0x722   : > { %v9507_v53 = vpop.f32.mrf.mxu1  ;;  %v10421_v14 = vld [vmem:[%s25522_s13 + $0x3e0] sm:$0xff] }
 0x723   : > { %v10358_v53 = vld [vmem:[%s25522_s13 + $0x1e8] sm:$0xff]  ;;  %11107 = vmatprep.subr.bf16.mxu0 %v16536_v2 }
 0x724   : > { %v16537_v8 = vcombine.low %v10354_v55, %v10358_v53  ;;  %v16538_v23 = vcombine.high %v10354_v55, %v10358_v53  ;;  %v10418_v55 = vld [vmem:[%s25522_s13 + $0x3c8] sm:$0xff] }
 0x75a   : > { %v9543_v61 = vpop.f32.mrf.mxu0 }
 0x75b   : > { %v9544_v27 = vadd.f32 %v9543_v61, %v9503_v26  ;;  %v10346_v26 = vld [vmem:[%s25522_s13 + $0x188] sm:$0xff] }
 0x75c   : > { %v9545_v31 = vpop.f32.mrf.mxu0  ;;  %v10350_v61 = vld [vmem:[%s25522_s13 + $0x1a8] sm:$0xff] }
 0x75d   : > { %v23052_v51 = vmax.f32 %v9544_v27, 0.0  ;;  %v9546_v36 = vadd.f32 %v9545_v31, %v9505_v42  ;;  %v10337_v42 = vld [vmem:[%s25522_s13 + $0x140] sm:$0xff]  ;;  %v16530_v27 = vcombine.high %v10346_v26, %v10350_v61 }
 0x75e   : > { %v9547_v59 = vpop.f32.mrf.mxu0  ;;  %v10341_v31 = vld [vmem:[%s25522_s13 + $0x160] sm:$0xff] }
 0x75f   : > { %v9551_v52 = vmax.f32 %v9546_v36, 0.0  ;;  %v9554_v24 = vrot.slane %v23052_v51, 1  ;;  %v9562_v21 = vpack.c.bf16 %v23052_v51, %v23052_v51  ;;  %v9558_v60 = vrot.slane %v23052_v51, 2  ;;  %v10338_v51 = vld [vmem:[%s25522_s13 + $0x148] sm:$0xff] }
 0x760   : > { %v9548_v50 = vpop.f32.mrf.mxu0  ;;  %v10342_v36 = vld [vmem:[%s25522_s13 + $0x168] sm:$0xff]  ;;  %v16527_v59 = vcombine.low %v10345_v54, %v10349_v11  ;;  %v16600_v54 = vcombine.high %v10417_v19, %v10421_v14 }
 0x761   : > { %v9563_v15 = vpack.c.bf16 %v9551_v52, %v9551_v52  ;;  %v9555_v29 = vrot.slane %v9551_v52, 1  ;;  %v9559_v49 = vrot.slane %v9551_v52, 2  ;;  %v9564_v32 = vpack.c.bf16 %v9554_v24, %v9554_v24 }
 0x762   : > { %v9566_v37 = vpack.c.bf16 %v9558_v60, %v9558_v60  ;;  %v16529_v52 = vcombine.low %v10346_v26, %v10350_v61  ;;  %v16520_v24 = vcombine.high %v10337_v42, %v10341_v31  ;;  %v16522_v50 = vcombine.high %v10338_v51, %v10342_v36  ;;  %v10414_v26 = vld [vmem:[%s25522_s13 + $0x3a8] sm:$0xff] }
 0x763   : > { %10188 = vmatprep.mubr.bf16.mxu1 %v9563_v15  ;;  %v9565_v6 = vpack.c.bf16 %v9555_v29, %v9555_v29  ;;  %v9567_v57 = vpack.c.bf16 %v9559_v49, %v9559_v49  ;;  %v10329_v15 = vld [vmem:[%s25522_s13 + $0x100] sm:$0xff]  ;;  %v10330_v29 = vld [vmem:[%s25522_s13 + $0x108] sm:$0xff]  ;;  %v16519_v49 = vcombine.low %v10337_v42, %v10341_v31  ;;  %v16599_v61 = vcombine.low %v10417_v19, %v10421_v14 }
 0x764   : > { %10189 = vmatmul.mubr.bf16.vlgmr.msra.gmra.mxu1 %v9562_v21  ;;  %v10334_v21 = vld [vmem:[%s25522_s13 + $0x128] sm:$0xff]  ;;  %v10361_v19 = vld [vmem:[%s25522_s13 + $0x200] sm:$0xff] }
 0x765   : > { %10239 = vmatpush1.bf16.msra.mxu1 %v18409_v10  ;;  %10229 = vmatprep.mubr.bf16.mxu0 %v9565_v6  ;;  %v10333_v10 = vld [vmem:[%s25522_s13 + $0x120] sm:$0xff]  ;;  %v16521_v6 = vcombine.low %v10338_v51, %v10342_v36 }
 0x766   : > { %10270 = vmatprep.mubr.bf16.mxu1 %v9567_v57  ;;  %10230 = vmatmul.mubr.bf16.vlgmr.msra.gmra.mxu0 %v9564_v32  ;;  %v16514_v32 = vcombine.high %v10330_v29, %v10334_v21  ;;  %v10321_v57 = vld [vmem:[%s25522_s13 + $0xc0] sm:$0xff] }
 0x767   : > { %10240 = vmatprep.subr.bf16.mxu1 %v18414_v22  ;;  %11108 = vmatpush1.bf16.msra.mxu0 %v16535_v41  ;;  %v16512_v22 = vcombine.high %v10329_v15, %v10333_v10  ;;  %v10422_v41 = vld [vmem:[%s25522_s13 + $0x3e8] sm:$0xff]  ;;  %v10401_v51 = vld [vmem:[%s25522_s13 + $0x340] sm:$0xff] }
 0x768   : > { %11109 = vmatprep.subr.bf16.mxu0 %v16528_v1  ;;  %v16602_v11 = vcombine.high %v10418_v55, %v10422_v41  ;;  %v10410_v1 = vld [vmem:[%s25522_s13 + $0x388] sm:$0xff]  ;;  %v16601_v42 = vcombine.low %v10418_v55, %v10422_v41  ;;  %v10405_v36 = vld [vmem:[%s25522_s13 + $0x360] sm:$0xff] }
 0x769   : > { %10241 = vmatpush1.bf16.msra.mxu1 %v18412_v3  ;;  %v10325_v3 = vld [vmem:[%s25522_s13 + $0xe0] sm:$0xff]  ;;  %v16594_v31 = vcombine.high %v10410_v1, %v10414_v26  ;;  %v10362_v55 = vld [vmem:[%s25522_s13 + $0x208] sm:$0xff] }
 0x76a   : > { %10242 = vmatprep.subr.bf16.mxu1 %v18417_v0  ;;  %v10322_v0 = vld [vmem:[%s25522_s13 + $0xc8] sm:$0xff]  ;;  %v10365_v14 = vld [vmem:[%s25522_s13 + $0x220] sm:$0xff] }
 0x76b   : > { %11110 = vmatpush1.bf16.msra.mxu0 %v16527_v59  ;;  %v10402_v59 = vld [vmem:[%s25522_s13 + $0x348] sm:$0xff] }
 0x76c   : > { %11111 = vmatprep.subr.bf16.mxu0 %v16520_v24  ;;  %v10366_v41 = vld [vmem:[%s25522_s13 + $0x228] sm:$0xff] }
 0x76d   : > { %10243 = vmatpush1.bf16.msra.mxu1 %v18415_v33  ;;  %v10326_v33 = vld [vmem:[%s25522_s13 + $0xe8] sm:$0xff] }
 0x76e   : > { %10244 = vmatprep.subr.bf16.mxu1 %v18420_v35  ;;  %v16511_v35 = vcombine.low %v10329_v15, %v10333_v10  ;;  %v16584_v15 = vcombine.high %v10401_v51, %v10405_v36 }
 0x76f   : > { %11112 = vmatpush1.bf16.msra.mxu0 %v16519_v49  ;;  %v10393_v49 = vld [vmem:[%s25522_s13 + $0x300] sm:$0xff] }
 0x770   : > { %11113 = vmatprep.subr.bf16.mxu0 %v16512_v22  ;;  %v10394_v22 = vld [vmem:[%s25522_s13 + $0x308] sm:$0xff] }
 0x771   : > { %10245 = vmatpush1.bf16.msra.mxu1 %v18418_v56  ;;  %v16513_v56 = vcombine.low %v10330_v29, %v10334_v21  ;;  %v16583_v29 = vcombine.low %v10401_v51, %v10405_v36 }
 0x772   : > { %10246 = vmatprep.subr.bf16.mxu1 %v18423_v46  ;;  %v16504_v46 = vcombine.high %v10321_v57, %v10325_v3 }
 0x773   : > { %11114 = vmatpush1.bf16.msra.mxu0 %v16511_v35 }
 0x774   : > { %11115 = vmatprep.subr.bf16.mxu0 %v16504_v46 }
 0x775   : > { %10247 = vmatpush1.bf16.msra.mxu1 %v18421_v18  ;;  %v16506_v18 = vcombine.high %v10322_v0, %v10326_v33 }
 0x776   : > { %10248 = vmatprep.subr.bf16.mxu1 %v18426_v34  ;;  %v10313_v34 = vld [vmem:[%s25522_s13 + $0x80] sm:$0xff] }
 0x779   : > { %10249 = vmatpush1.bf16.msra.mxu1 %v18424_v20  ;;  %v10317_v20 = vld [vmem:[%s25522_s13 + $0xa0] sm:$0xff] }
 0x77a   : > { %10250 = vmatprep.subr.bf16.mxu1 %v18429_v39  ;;  %v10314_v39 = vld [vmem:[%s25522_s13 + $0x88] sm:$0xff] }
 0x77d   : > { %10251 = vmatpush1.bf16.msra.mxu1 %v18427_v40  ;;  %v10318_v40 = vld [vmem:[%s25522_s13 + $0xa8] sm:$0xff] }
 0x77e   : > { %10252 = vmatprep.subr.bf16.mxu1 %v18432_v38  ;;  %v16503_v38 = vcombine.low %v10321_v57, %v10325_v3  ;;  %v10398_v3 = vld [vmem:[%s25522_s13 + $0x328] sm:$0xff] }
 0x77f   : > { %v16577_v35 = vcombine.low %v10394_v22, %v10398_v3 }
 0x780   : > { %11116 = vmatpush1.bf16.msra.mxu0 %v16503_v38  ;;  %v10378_v38 = vld [vmem:[%s25522_s13 + $0x288] sm:$0xff] }
 0x781   : > { %10253 = vmatpush1.bf16.msra.mxu1 %v18430_v30  ;;  %v16505_v30 = vcombine.low %v10322_v0, %v10326_v33  ;;  %v10385_v0 = vld [vmem:[%s25522_s13 + $0x2c0] sm:$0xff] }
 0x782   : > { %10254 = vmatprep.subr.bf16.mxu1 %v18435_v44  ;;  %v16496_v44 = vcombine.high %v10313_v34, %v10317_v20  ;;  %v10389_v33 = vld [vmem:[%s25522_s13 + $0x2e0] sm:$0xff] }
 0x783   : > { %v16568_v46 = vcombine.high %v10385_v0, %v10389_v33 }
 0x784   : > { %11117 = vmatprep.subr.bf16.mxu0 %v16496_v44  ;;  %v16567_v44 = vcombine.low %v10385_v0, %v10389_v33 }
 0x785   : > { %10255 = vmatpush2.bf16.msra.mxu1 %v18433_v45  ;;  %v16498_v45 = vcombine.high %v10314_v39, %v10318_v40 }
 0x786   : > { %10256 = vmatprep.subr.bf16.mxu1 %v18438_v48  ;;  %v10305_v48 = vld [vmem:[%s25522_s13 + $0x40] sm:$0xff] }
 0x789   : > { %10257 = vmatpush2.bf16.msra.mxu1 %v18436_v7  ;;  %v10309_v7 = vld [vmem:[%s25522_s13 + $0x60] sm:$0xff] }
 0x78a   : > { %10258 = vmatprep.subr.bf16.mxu1 %v18441_v5  ;;  %v10306_v5 = vld [vmem:[%s25522_s13 + $0x48] sm:$0xff] }
 0x78d   : > { %10259 = vmatpush2.bf16.msra.mxu1 %v18439_v13  ;;  %v10310_v13 = vld [vmem:[%s25522_s13 + $0x68] sm:$0xff] }
 0x78e   : > { %10260 = vmatprep.subr.bf16.mxu1 %v18444_v47  ;;  %v16495_v47 = vcombine.low %v10313_v34, %v10317_v20  ;;  %v10390_v34 = vld [vmem:[%s25522_s13 + $0x2e8] sm:$0xff]  ;;  %v10377_v20 = vld [vmem:[%s25522_s13 + $0x280] sm:$0xff] }
 0x790   : > { %11118 = vmatpush1.bf16.msra.mxu0 %v16495_v47  ;;  %v10370_v47 = vld [vmem:[%s25522_s13 + $0x248] sm:$0xff] }
 0x791   : > { %10261 = vmatpush2.bf16.msra.mxu1 %v18442_v4  ;;  %v16497_v4 = vcombine.low %v10314_v39, %v10318_v40  ;;  %v10381_v40 = vld [vmem:[%s25522_s13 + $0x2a0] sm:$0xff] }
 0x792   : > { %10262 = vmatprep.subr.bf16.mxu1 %v18447_v12  ;;  %v16488_v12 = vcombine.high %v10305_v48, %v10309_v7 }
 0x794   : > { %11119 = vmatprep.subr.bf16.mxu0 %v16488_v12  ;;  %v23334_v12 = vld [vmem:[%s25522_s13 + $0x1d0] sm:$0xff] }
 0x795   : > { %10263 = vmatpush2.bf16.msra.mxu1 %v18445_v16  ;;  %v16490_v16 = vcombine.high %v10306_v5, %v10310_v13 }
 0x796   : > { %10264 = vmatprep.subr.bf16.mxu1 %v18450_v25  ;;  %v10297_v25 = vld [vmem:[%s25522_s13] sm:$0xff] }
 0x799   : > { %10265 = vmatpush2.bf16.msra.mxu1 %v18448_v9  ;;  %v10301_v9 = vld [vmem:[%s25522_s13 + $0x20] sm:$0xff] }
 0x79a   : > { %10266 = vmatprep.subr.bf16.mxu1 %v18453_v58  ;;  %v10298_v58 = vld [vmem:[%s25522_s13 + $0x8] sm:$0xff]  ;;  %v16480_v60 = vcombine.high %v10297_v25, %v10301_v9  ;;  %v16479_v2 = vcombine.low %v10297_v25, %v10301_v9  ;;  %v23344_v25 = vld [vmem:[%s25522_s13 + $0x1d8] sm:$0xff] }
 0x79b   : > { %v23349_v9 = vld [vmem:[%s25522_s13 + $0x1f8] sm:$0xff] }
 0x79d   : > { %10267 = vmatpush2.bf16.msra.mxu1 %v18451_v28  ;;  %v10302_v28 = vld [vmem:[%s25522_s13 + $0x28] sm:$0xff] }
 0x79e   : > { %10268 = vmatprep.subr.bf16.mxu1 %v18456_v43  ;;  %v16487_v43 = vcombine.low %v10305_v48, %v10309_v7  ;;  %v16481_v53 = vcombine.low %v10298_v58, %v10302_v28  ;;  %v16560_v48 = vcombine.high %v10377_v20, %v10381_v40  ;;  %v10369_v7 = vld [vmem:[%s25522_s13 + $0x240] sm:$0xff] }
 0x7a0   : > { %11120 = vmatpush1.bf16.msra.mxu0 %v16487_v43  ;;  %v16541_v43 = vcombine.low %v23344_v25, %v23349_v9 }
 0x7a1   : > { %10269 = vmatpush2.bf16.msra.mxu1 %v18454_v17  ;;  %v16489_v17 = vcombine.low %v10306_v5, %v10310_v13  ;;  %11121 = vmatprep.subr.bf16.mxu0 %v16480_v60  ;;  %v10373_v5 = vld [vmem:[%s25522_s13 + $0x260] sm:$0xff] }
 0x7a2   : > { %11148 = vmatprep.subr.bf16.mxu1 %v16538_v23  ;;  %v10413_v23 = vld [vmem:[%s25522_s13 + $0x3a0] sm:$0xff]  ;;  %v16552_v60 = vcombine.high %v10369_v7, %v10373_v5 }
 0x7a4   : > { %10271 = vmatmul.mubr.bf16.vlgmr.msra.gmra.mxu1 %v9566_v37  ;;  %v16482_v37 = vcombine.high %v10298_v58, %v10302_v28  ;;  %11122 = vmatpush1.bf16.msra.mxu0 %v16479_v2  ;;  %v16559_v58 = vcombine.low %v10377_v20, %v10381_v40  ;;  %v16551_v2 = vcombine.low %v10369_v7, %v10373_v5 }
 0x7a5   : > { %11149 = vmatpush1.bf16.msra.mxu1 %v16537_v8  ;;  %v10409_v8 = vld [vmem:[%s25522_s13 + $0x380] sm:$0xff]  ;;  %11123 = vmatprep.subr.bf16.mxu0 %v16600_v54  ;;  %v16544_v54 = vcombine.high %v10361_v19, %v10365_v14 }
 0x7a6   : > { %11150 = vmatprep.subr.bf16.mxu1 %v16530_v27  ;;  %v16592_v27 = vcombine.high %v10409_v8, %v10413_v23  ;;  %v16591_v24 = vcombine.low %v10409_v8, %v10413_v23  ;;  %v16543_v8 = vcombine.low %v10361_v19, %v10365_v14  ;;  %v16545_v23 = vcombine.low %v10362_v55, %v10366_v41 }
 0x7a8   : > { %11124 = vmatpush2.bf16.msra.mxu0 %v16599_v61 }
 0x7a9   : > { %11151 = vmatpush1.bf16.msra.mxu1 %v16529_v52  ;;  %v10406_v52 = vld [vmem:[%s25522_s13 + $0x368] sm:$0xff]  ;;  %11125 = vmatprep.subr.bf16.mxu0 %v16592_v27 }
 0x7aa   : > { %11152 = vmatprep.subr.bf16.mxu1 %v16522_v50  ;;  %v16593_v50 = vcombine.low %v10410_v1, %v10414_v26  ;;  %v16586_v10 = vcombine.high %v10402_v59, %v10406_v52  ;;  %v16585_v21 = vcombine.low %v10402_v59, %v10406_v52  ;;  %v16542_v26 = vcombine.high %v23344_v25, %v23349_v9  ;;  %v10336_v25 = vld [vmem:[%s25522_s13 + $0x138] sm:$0xff] }
 0x7ac   : > { %11126 = vmatpush2.bf16.msra.mxu0 %v16591_v24  ;;  %v9664_v24 = vld [vmem:[%s25521_s12] sm:$0x3] }
 0x7ad   : > { %11153 = vmatpush1.bf16.msra.mxu1 %v16521_v6  ;;  %11127 = vmatprep.subr.bf16.mxu0 %v16584_v15  ;;  %v10397_v6 = vld [vmem:[%s25522_s13 + $0x320] sm:$0xff]  ;;  %v9673_v15 = vrot.slane %v9664_v24, %v25935_v63 }
 0x7ae   : > { %11154 = vmatprep.subr.bf16.mxu1 %v16514_v32  ;;  %v16575_v32 = vcombine.low %v10393_v49, %v10397_v6  ;;  %v16576_v57 = vcombine.high %v10393_v49, %v10397_v6 }
 0x7b0   : > { %11128 = vmatpush2.bf16.msra.mxu0 %v16583_v29 }
 0x7b1   : > { %11155 = vmatpush1.bf16.msra.mxu1 %v16513_v56  ;;  %v16578_v56 = vcombine.high %v10394_v22, %v10398_v3  ;;  %11129 = vmatprep.subr.bf16.mxu0 %v16576_v57 }
 0x7b2   : > { %11156 = vmatprep.subr.bf16.mxu1 %v16506_v18  ;;  %v10386_v18 = vld [vmem:[%s25522_s13 + $0x2c8] sm:$0xff] }
 0x7b3   : > { %v16570_v39 = vcombine.high %v10386_v18, %v10390_v34 }
 0x7b4   : > { %11130 = vmatpush2.bf16.msra.mxu0 %v16575_v32 }
 0x7b5   : > { %11157 = vmatpush1.bf16.msra.mxu1 %v16505_v30  ;;  %v10382_v30 = vld [vmem:[%s25522_s13 + $0x2a8] sm:$0xff]  ;;  %11131 = vmatprep.subr.bf16.mxu0 %v16568_v46 }
 0x7b6   : > { %11158 = vmatprep.subr.bf16.mxu1 %v16498_v45  ;;  %v16569_v45 = vcombine.low %v10386_v18, %v10390_v34  ;;  %v16562_v13 = vcombine.high %v10378_v38, %v10382_v30 }
 0x7b8   : > { %11132 = vmatpush2.bf16.msra.mxu0 %v16567_v44 }
 0x7b9   : > { %11159 = vmatpush1.bf16.msra.mxu1 %v16497_v4  ;;  %v10374_v4 = vld [vmem:[%s25522_s13 + $0x268] sm:$0xff]  ;;  %11133 = vmatprep.subr.bf16.mxu0 %v16560_v48 }
 0x7ba   : > { %11160 = vmatprep.subr.bf16.mxu1 %v16490_v16  ;;  %v23339_v16 = vld [vmem:[%s25522_s13 + $0x1f0] sm:$0xff] }
 0x7bb   : > { %v16539_v28 = vcombine.low %v23334_v12, %v23339_v16  ;;  %v16540_v1 = vcombine.high %v23334_v12, %v23339_v16  ;;  %v10335_v12 = vld [vmem:[%s25522_s13 + $0x130] sm:$0xff]  ;;  %v10332_v16 = vld [vmem:[%s25522_s13 + $0x118] sm:$0xff] }
 0x7bc   : > { %11134 = vmatpush2.bf16.msra.mxu0 %v16559_v58  ;;  %v10352_v58 = vld [vmem:[%s25522_s13 + $0x1b8] sm:$0xff] }
 0x7bd   : > { %11161 = vmatpush1.bf16.msra.mxu1 %v16489_v17  ;;  %v16561_v17 = vcombine.low %v10378_v38, %v10382_v30  ;;  %11135 = vmatprep.subr.bf16.mxu0 %v16552_v60 }
 0x7be   : > { %11162 = vmatprep.subr.bf16.mxu1 %v16482_v37  ;;  %v16554_v37 = vcombine.high %v10370_v47, %v10374_v4 }
 0x7c0   : > { %11136 = vmatpush2.bf16.msra.mxu0 %v16551_v2  ;;  %v10344_v2 = vld [vmem:[%s25522_s13 + $0x178] sm:$0xff] }
 0x7c1   : > { %11163 = vmatpush1.bf16.msra.mxu1 %v16481_v53  ;;  %v16553_v53 = vcombine.low %v10370_v47, %v10374_v4  ;;  %11137 = vmatprep.subr.bf16.mxu0 %v16544_v54  ;;  %v10351_v47 = vld [vmem:[%s25522_s13 + $0x1b0] sm:$0xff]  ;;  %v10348_v4 = vld [vmem:[%s25522_s13 + $0x198] sm:$0xff] }
 0x7c2   : > { %11164 = vmatprep.subr.bf16.mxu1 %v16602_v11  ;;  %v16546_v11 = vcombine.high %v10362_v55, %v10366_v41  ;;  %v16534_v14 = vcombine.high %v10348_v4, %v10352_v58  ;;  %v10343_v55 = vld [vmem:[%s25522_s13 + $0x170] sm:$0xff]  ;;  %v10340_v41 = vld [vmem:[%s25522_s13 + $0x158] sm:$0xff]  ;;  %v16533_v54 = vcombine.low %v10348_v4, %v10352_v58 }
 0x7c3   : > { %v10411_v4 = vld [vmem:[%s25522_s13 + $0x390] sm:$0xff] }
 0x7c4   : > { %11138 = vmatpush2.bf16.msra.mxu0 %v16543_v8  ;;  %v16526_v8 = vcombine.high %v10340_v41, %v10344_v2  ;;  %v10415_v58 = vld [vmem:[%s25522_s13 + $0x3b0] sm:$0xff] }
 0x7c5   : > { %11165 = vmatpush2.bf16.msra.mxu1 %v16601_v42  ;;  %11189 = vmatprep.subr.bf16.mxu0 %v16540_v1  ;;  %v16518_v1 = vcombine.high %v10332_v16, %v10336_v25 }
 0x7c6   : > { %11166 = vmatprep.subr.bf16.mxu1 %v16594_v31 }
 0x7c9   : > { %11167 = vmatpush2.bf16.msra.mxu1 %v16593_v50  ;;  %v9669_v50 = vrot.slane %v9664_v24, %v25934_v62  ;;  %v10319_v24 = vld [vmem:[%s25522_s13 + $0xb0] sm:$0xff] }
 0x7ca   : > { %11168 = vmatprep.subr.bf16.mxu1 %v16586_v10 }
 0x7cd   : > { %11169 = vmatpush2.bf16.msra.mxu1 %v16585_v21 }
 0x7ce   : > { %11170 = vmatprep.subr.bf16.mxu1 %v16578_v56 }
 0x7d1   : > { %11171 = vmatpush2.bf16.msra.mxu1 %v16577_v35 }
 0x7d2   : > { %11172 = vmatprep.subr.bf16.mxu1 %v16570_v39 }
 0x7d5   : > { %11173 = vmatpush2.bf16.msra.mxu1 %v16569_v45 }
 0x7d6   : > { %11174 = vmatprep.subr.bf16.mxu1 %v16562_v13  ;;  %v10347_v13 = vld [vmem:[%s25522_s13 + $0x190] sm:$0xff] }
 0x7d7   : > { %v16532_v19 = vcombine.high %v10347_v13, %v10351_v47 }
 0x7d9   : > { %11175 = vmatpush2.bf16.msra.mxu1 %v16561_v17 }
 0x7da   : > { %11176 = vmatprep.subr.bf16.mxu1 %v16554_v37  ;;  %v10339_v37 = vld [vmem:[%s25522_s13 + $0x150] sm:$0xff] }
 0x7db   : > { %v16523_v9 = vcombine.low %v10339_v37, %v10343_v55 }
 0x7dd   : > { %11177 = vmatpush2.bf16.msra.mxu1 %v16553_v53  ;;  %v16531_v53 = vcombine.low %v10347_v13, %v10351_v47 }
 0x7de   : > { %11178 = vmatprep.subr.bf16.mxu1 %v16546_v11  ;;  %v16524_v11 = vcombine.high %v10339_v37, %v10343_v55  ;;  %v10416_v37 = vld [vmem:[%s25522_s13 + $0x3b8] sm:$0xff]  ;;  %v16596_v55 = vcombine.high %v10411_v4, %v10415_v58 }
 0x7e1   : > { %11179 = vmatpush2.bf16.msra.mxu1 %v16545_v23  ;;  %v10331_v23 = vld [vmem:[%s25522_s13 + $0x110] sm:$0xff] }
 0x7e2   : > { %11230 = vmatprep.subr.bf16.mxu1 %v16542_v26  ;;  %v10323_v26 = vld [vmem:[%s25522_s13 + $0xd0] sm:$0xff] }
 0x824   : > { %v10190_v61 = vpop.f32.mrf.mxu1 }
 0x825   : > { %v10191_v10 = vadd.f32 %v10190_v61, %v9669_v50  ;;  %v10327_v61 = vld [vmem:[%s25522_s13 + $0xf0] sm:$0xff]  ;;  %v10316_v50 = vld [vmem:[%s25522_s13 + $0x98] sm:$0xff] }
 0x826   : > { %v10192_v42 = vpop.f32.mrf.mxu1  ;;  %v10231_v27 = vpop.f32.mrf.mxu0 }
 0x827   : > { %v10193_v29 = vadd.f32 %v10192_v42, %v9673_v15  ;;  %v10232_v21 = vadd.f32 %v10231_v27, %v10191_v10  ;;  %v10324_v42 = vld [vmem:[%s25522_s13 + $0xd8] sm:$0xff]  ;;  %v16507_v10 = vcombine.low %v10323_v26, %v10327_v61 }
 0x828   : > { %v10194_v31 = vpop.f32.mrf.mxu1  ;;  %v10233_v51 = vpop.f32.mrf.mxu0  ;;  %v10328_v27 = vld [vmem:[%s25522_s13 + $0xf8] sm:$0xff] }
 0x829   : > { %v10234_v6 = vadd.f32 %v10233_v51, %v10193_v29  ;;  %v16515_v31 = vcombine.low %v10331_v23, %v10335_v12  ;;  %v16517_v51 = vcombine.low %v10332_v16, %v10336_v25  ;;  %v10320_v15 = vld [vmem:[%s25522_s13 + $0xb8] sm:$0xff]  ;;  %v16509_v29 = vcombine.low %v10324_v42, %v10328_v27  ;;  %v10395_v25 = vld [vmem:[%s25522_s13 + $0x310] sm:$0xff] }
 0x82a   : > { %v10195_v36 = vpop.f32.mrf.mxu1  ;;  %v10235_v59 = vpop.f32.mrf.mxu0 }
 0x82b   : > { %v16508_v36 = vcombine.high %v10323_v26, %v10327_v61  ;;  %v16510_v59 = vcombine.high %v10324_v42, %v10328_v27  ;;  %v10387_v27 = vld [vmem:[%s25522_s13 + $0x2d0] sm:$0xff] }
 0x82c   : > { %v10236_v52 = vpop.f32.mrf.mxu0 }
 0x82d   : > { %v10315_v52 = vld [vmem:[%s25522_s13 + $0x90] sm:$0xff] }
 0x864   : > { %v10272_v49 = vpop.f32.mrf.mxu1 }
 0x865   : > { %v10273_v22 = vadd.f32 %v10272_v49, %v10232_v21  ;;  %v16500_v21 = vcombine.high %v10315_v52, %v10319_v24  ;;  %v16502_v49 = vcombine.high %v10316_v50, %v10320_v15 }
 0x866   : > { %v10274_v32 = vpop.f32.mrf.mxu1 }
 0x867   : > { %v10279_v57 = vsel %vm905_vm3, %v10273_v22, -inf  ;;  %v10275_v3 = vadd.f32 %v10274_v32, %v10234_v6  ;;  %v10307_v6 = vld [vmem:[%s25522_s13 + $0x50] sm:$0xff]  ;;  %v10308_v32 = vld [vmem:[%s25522_s13 + $0x58] sm:$0xff] }
 0x868   : > { %v10280_v0 = vrot.slane %v10279_v57, 4  ;;  %v10276_v33 = vpop.f32.mrf.mxu1  ;;  %v10311_v22 = vld [vmem:[%s25522_s13 + $0x70] sm:$0xff] }
 0x869   : > { %v10286_v35 = vsel %vm905_vm3, %v10275_v3, -inf  ;;  %v16499_v3 = vcombine.low %v10315_v52, %v10319_v24  ;;  %v16492_v33 = vcombine.high %v10307_v6, %v10311_v22 }
 0x86a   : > { %v10281_v56 = vmax.f32 %v10279_v57, %v10280_v0  ;;  %v10287_v46 = vrot.slane %v10286_v35, 4  ;;  %v10277_v18 = vpop.f32.mrf.mxu1  ;;  %v10312_v57 = vld [vmem:[%s25522_s13 + $0x78] sm:$0xff]  ;;  %v16501_v0 = vcombine.low %v10316_v50, %v10320_v15  ;;  %v10379_v15 = vld [vmem:[%s25522_s13 + $0x290] sm:$0xff] }
 0x86b   : > { %v10300_v18 = vld [vmem:[%s25522_s13 + $0x18] sm:$0xff] }
 0x86c   : > { %v10282_v34 = vrot.slane %v10281_v56, 2  ;;  %v10288_v20 = vmax.f32 %v10286_v35, %v10287_v46  ;;  %v16494_v35 = vcombine.high %v10308_v32, %v10312_v57  ;;  %v10303_v46 = vld [vmem:[%s25522_s13 + $0x30] sm:$0xff] }
 0x86e   : > { %v10283_v39 = vmax.f32 %v10281_v56, %v10282_v34  ;;  %v10289_v40 = vrot.slane %v10288_v20, 2  ;;  %v10299_v56 = vld [vmem:[%s25522_s13 + $0x10] sm:$0xff]  ;;  %v10304_v34 = vld [vmem:[%s25522_s13 + $0x38] sm:$0xff] }
 0x870   : > { %v10284_v38 = vrot.slane %v10283_v39, 1  ;;  %v10290_v30 = vmax.f32 %v10288_v20, %v10289_v40  ;;  %v16491_v20 = vcombine.low %v10307_v6, %v10311_v22  ;;  %v16484_v40 = vcombine.high %v10299_v56, %v10303_v46 }
 0x872   : > { %v10285_v44 = vmax.f32 %v10283_v39, %v10284_v38  ;;  %v10291_v45 = vrot.slane %v10290_v30, 1  ;;  %v16493_v39 = vcombine.low %v10308_v32, %v10312_v57  ;;  %v16486_v38 = vcombine.high %v10300_v18, %v10304_v34  ;;  %v10371_v57 = vld [vmem:[%s25522_s13 + $0x250] sm:$0xff] }
 0x874   : > { %v10292_v48 = vmax.f32 %v10290_v30, %v10291_v45  ;;  %v10293_v7 = vmax.f32 %v10285_v44, 0.0  ;;  %v10419_v30 = vld [vmem:[%s25522_s13 + $0x3d0] sm:$0xff]  ;;  %v10420_v45 = vld [vmem:[%s25522_s13 + $0x3d8] sm:$0xff] }
 0x875   : > { %v10423_v44 = vld [vmem:[%s25522_s13 + $0x3f0] sm:$0xff] }
 0x876   : > { %v10294_v5 = vmax.f32 %v10292_v48, 0.0  ;;  %v23390_v60 = vpack.c.bf16 %v10293_v7, %v10293_v7  ;;  %v10424_v48 = vld [vmem:[%s25522_s13 + $0x3f8] sm:$0xff]  ;;  %v16483_v7 = vcombine.low %v10299_v56, %v10303_v46  ;;  %v16604_v13 = vcombine.high %v10419_v30, %v10423_v44 }
 0x877   : > { %v16606_v47 = vcombine.high %v10420_v45, %v10424_v48 }
 0x878   : > { %v10296_v17 = vpack.c.bf16 %v10294_v5, %v10294_v5  ;;  %v16485_v5 = vcombine.low %v10300_v18, %v10304_v34  ;;  %v10363_v34 = vld [vmem:[%s25522_s13 + $0x210] sm:$0xff] }
 0x87a   : > { %11139 = vmatprep.mubr.bf16.mxu0 %v10296_v17  ;;  %11180 = vmatprep.mubr.bf16.mxu1 %v10296_v17 }
 0x87b   : > { %11140 = vmatmul.mubr.bf16.vlgmr.msra.gmra.mxu0 %v23390_v60  ;;  %11181 = vmatmul.mubr.bf16.vlgmr.msra.gmra.mxu1 %v23390_v60 }
 0x87c   : > { %11190 = vmatpush1.bf16.msra.mxu0 %v16539_v28  ;;  %11231 = vmatpush1.bf16.msra.mxu1 %v16541_v43  ;;  %v16525_v28 = vcombine.low %v10340_v41, %v10344_v2  ;;  %v16516_v43 = vcombine.high %v10331_v23, %v10335_v12  ;;  %v10403_v2 = vld [vmem:[%s25522_s13 + $0x350] sm:$0xff] }
 0x87d   : > { %11221 = vmatprep.mubr.bf16.mxu0 %v10296_v17  ;;  %11262 = vmatprep.mubr.bf16.mxu1 %v10296_v17  ;;  %v10412_v17 = vld [vmem:[%s25522_s13 + $0x398] sm:$0xff] }
 0x87e   : > { %11191 = vmatprep.subr.bf16.mxu0 %v16532_v19  ;;  %11232 = vmatprep.subr.bf16.mxu1 %v16534_v14  ;;  %v16603_v19 = vcombine.low %v10419_v30, %v10423_v44  ;;  %v16605_v14 = vcombine.low %v10420_v45, %v10424_v48  ;;  %v16598_v41 = vcombine.high %v10412_v17, %v10416_v37  ;;  %v11343_v48 = vld [vmem:[%s25524_s15 + $0x1c0] sm:$0xff] }
 0x87f   : > { %v16597_v23 = vcombine.low %v10412_v17, %v10416_v37  ;;  %v11335_v37 = vld [vmem:[%s25524_s15 + $0x180] sm:$0xff] }
 0x880   : > { %11192 = vmatpush1.bf16.msra.mxu0 %v16531_v53  ;;  %11233 = vmatpush1.bf16.msra.mxu1 %v16533_v54  ;;  %v10407_v53 = vld [vmem:[%s25522_s13 + $0x370] sm:$0xff]  ;;  %v10404_v54 = vld [vmem:[%s25522_s13 + $0x358] sm:$0xff] }
 0x881   : > { %11193 = vmatprep.subr.bf16.mxu0 %v16524_v11  ;;  %11234 = vmatprep.subr.bf16.mxu1 %v16526_v8  ;;  %v10408_v11 = vld [vmem:[%s25522_s13 + $0x378] sm:$0xff]  ;;  %v16595_v8 = vcombine.low %v10411_v4, %v10415_v58  ;;  %v16588_v12 = vcombine.high %v10403_v2, %v10407_v53 }
 0x882   : > { %v16590_v16 = vcombine.high %v10404_v54, %v10408_v11  ;;  %v16589_v26 = vcombine.low %v10404_v54, %v10408_v11  ;;  %v11327_v11 = vld [vmem:[%s25524_s15 + $0x140] sm:$0xff] }
 0x884   : > { %11194 = vmatpush1.bf16.msra.mxu0 %v16523_v9  ;;  %11235 = vmatpush1.bf16.msra.mxu1 %v16525_v28  ;;  %v10399_v9 = vld [vmem:[%s25522_s13 + $0x330] sm:$0xff]  ;;  %v10396_v28 = vld [vmem:[%s25522_s13 + $0x318] sm:$0xff] }
 0x885   : > { %11195 = vmatprep.subr.bf16.mxu0 %v16516_v43  ;;  %11236 = vmatprep.subr.bf16.mxu1 %v16518_v1  ;;  %v10400_v43 = vld [vmem:[%s25522_s13 + $0x338] sm:$0xff]  ;;  %v16587_v1 = vcombine.low %v10403_v2, %v10407_v53  ;;  %v16580_v61 = vcombine.high %v10395_v25, %v10399_v9 }
 0x886   : > { %v16582_v42 = vcombine.high %v10396_v28, %v10400_v43  ;;  %v16581_v52 = vcombine.low %v10396_v28, %v10400_v43  ;;  %v11319_v43 = vld [vmem:[%s25524_s15 + $0x100] sm:$0xff] }
 0x888   : > { %11196 = vmatpush1.bf16.msra.mxu0 %v16515_v31  ;;  %11237 = vmatpush1.bf16.msra.mxu1 %v16517_v51  ;;  %v10391_v31 = vld [vmem:[%s25522_s13 + $0x2f0] sm:$0xff]  ;;  %v10388_v51 = vld [vmem:[%s25522_s13 + $0x2d8] sm:$0xff] }
 0x889   : > { %11197 = vmatprep.subr.bf16.mxu0 %v16508_v36  ;;  %11238 = vmatprep.subr.bf16.mxu1 %v16510_v59  ;;  %v10392_v36 = vld [vmem:[%s25522_s13 + $0x2f8] sm:$0xff]  ;;  %v16579_v59 = vcombine.low %v10395_v25, %v10399_v9  ;;  %v16572_v24 = vcombine.high %v10387_v27, %v10391_v31 }
 0x88a   : > { %v16574_v50 = vcombine.high %v10388_v51, %v10392_v36  ;;  %v16573_v6 = vcombine.low %v10388_v51, %v10392_v36  ;;  %v11311_v51 = vld [vmem:[%s25524_s15 + $0xc0] sm:$0xff] }
 0x88b   : > { %v11315_v36 = vld [vmem:[%s25524_s15 + $0xe0] sm:$0xff] }
 0x88c   : > { %11198 = vmatpush1.bf16.msra.mxu0 %v16507_v10  ;;  %11239 = vmatpush1.bf16.msra.mxu1 %v16509_v29  ;;  %v10383_v10 = vld [vmem:[%s25522_s13 + $0x2b0] sm:$0xff]  ;;  %v10380_v29 = vld [vmem:[%s25522_s13 + $0x298] sm:$0xff] }
 0x88d   : > { %11199 = vmatprep.subr.bf16.mxu0 %v16500_v21  ;;  %11240 = vmatprep.subr.bf16.mxu1 %v16502_v49  ;;  %v10384_v21 = vld [vmem:[%s25522_s13 + $0x2b8] sm:$0xff]  ;;  %v16571_v49 = vcombine.low %v10387_v27, %v10391_v31  ;;  %v16564_v22 = vcombine.high %v10379_v15, %v10383_v10 }
 0x88e   : > { %v16566_v32 = vcombine.high %v10380_v29, %v10384_v21  ;;  %v16565_v56 = vcombine.low %v10380_v29, %v10384_v21  ;;  %v23643_v29 = vld [vmem:[%s25524_s15 + $0xdc0] sm:$0xff]  ;;  %v16632_v21 = vcombine.high %v11311_v51, %v11315_v36 }
 0x890   : > { %11200 = vmatpush1.bf16.msra.mxu0 %v16499_v3  ;;  %11241 = vmatpush1.bf16.msra.mxu1 %v16501_v0  ;;  %v10375_v3 = vld [vmem:[%s25522_s13 + $0x270] sm:$0xff]  ;;  %v10372_v0 = vld [vmem:[%s25522_s13 + $0x258] sm:$0xff] }
 0x891   : > { %11201 = vmatprep.subr.bf16.mxu0 %v16492_v33  ;;  %11242 = vmatprep.subr.bf16.mxu1 %v16494_v35  ;;  %v10376_v33 = vld [vmem:[%s25522_s13 + $0x278] sm:$0xff]  ;;  %v16563_v35 = vcombine.low %v10379_v15, %v10383_v10  ;;  %v16556_v46 = vcombine.high %v10371_v57, %v10375_v3  ;;  %v23633_v15 = vld [vmem:[%s25524_s15 + $0x9c0] sm:$0xff] }
 0x892   : > { %v16558_v18 = vcombine.high %v10372_v0, %v10376_v33  ;;  %v16557_v30 = vcombine.low %v10372_v0, %v10376_v33  ;;  %v23638_v10 = vld [vmem:[%s25524_s15 + $0x9e0] sm:$0xff] }
 0x893   : > { %v11435_v0 = vld [vmem:[%s25524_s15 + $0x4a0] sm:$0xff] }
 0x894   : > { %11202 = vmatpush1.bf16.msra.mxu0 %v16491_v20  ;;  %11243 = vmatpush1.bf16.msra.mxu1 %v16493_v39  ;;  %v10367_v20 = vld [vmem:[%s25522_s13 + $0x230] sm:$0xff]  ;;  %v10364_v39 = vld [vmem:[%s25522_s13 + $0x218] sm:$0xff] }
 0x895   : > { %11203 = vmatprep.subr.bf16.mxu0 %v16484_v40  ;;  %11244 = vmatprep.subr.bf16.mxu1 %v16486_v38  ;;  %v10368_v40 = vld [vmem:[%s25522_s13 + $0x238] sm:$0xff]  ;;  %v16555_v38 = vcombine.low %v10371_v57, %v10375_v3  ;;  %v16548_v44 = vcombine.high %v10363_v34, %v10367_v20  ;;  %v11307_v57 = vld [vmem:[%s25524_s15 + $0xa0] sm:$0xff] }
 0x896   : > { %v16550_v45 = vcombine.high %v10364_v39, %v10368_v40  ;;  %v16549_v4 = vcombine.low %v10364_v39, %v10368_v40  ;;  %v11431_v3 = vld [vmem:[%s25524_s15 + $0x480] sm:$0xff] }
 0x897   : > { %v11423_v39 = vld [vmem:[%s25524_s15 + $0x440] sm:$0xff] }
 0x898   : > { %11204 = vmatpush1.bf16.msra.mxu0 %v16483_v7  ;;  %11245 = vmatpush1.bf16.msra.mxu1 %v16485_v5  ;;  %v11347_v7 = vld [vmem:[%s25524_s15 + $0x1e0] sm:$0xff] }
 0x899   : > { %11205 = vmatprep.subr.bf16.mxu0 %v16604_v13  ;;  %11246 = vmatprep.subr.bf16.mxu1 %v16606_v47  ;;  %v11471_v5 = vld [vmem:[%s25524_s15 + $0x5c0] sm:$0xff]  ;;  %v16547_v47 = vcombine.low %v10363_v34, %v10367_v20  ;;  %v16664_v58 = vcombine.high %v11343_v48, %v11347_v7 }
 0x89a   : > { %v11475_v13 = vld [vmem:[%s25524_s15 + $0x5e0] sm:$0xff] }
 0x89b   : > { %v16792_v17 = vcombine.high %v11471_v5, %v11475_v13  ;;  %v16791_v2 = vcombine.low %v11471_v5, %v11475_v13  ;;  %v11295_v34 = vld [vmem:[%s25524_s15 + $0x40] sm:$0xff] }
 0x89c   : > { %11206 = vmatpush2.bf16.msra.mxu0 %v16603_v19  ;;  %11247 = vmatpush2.bf16.msra.mxu1 %v16605_v14  ;;  %v11339_v19 = vld [vmem:[%s25524_s15 + $0x1a0] sm:$0xff] }
 0x89d   : > { %11207 = vmatprep.subr.bf16.mxu0 %v16596_v55  ;;  %11248 = vmatprep.subr.bf16.mxu1 %v16598_v41  ;;  %v11463_v14 = vld [vmem:[%s25524_s15 + $0x580] sm:$0xff]  ;;  %v16663_v41 = vcombine.low %v11343_v48, %v11347_v7  ;;  %v16656_v53 = vcombine.high %v11335_v37, %v11339_v19 }
 0x89e   : > { %v11467_v55 = vld [vmem:[%s25524_s15 + $0x5a0] sm:$0xff] }
 0x89f   : > { %v16784_v54 = vcombine.high %v11463_v14, %v11467_v55  ;;  %v16783_v25 = vcombine.low %v11463_v14, %v11467_v55  ;;  %v11299_v20 = vld [vmem:[%s25524_s15 + $0x60] sm:$0xff] }
 0x8a0   : > { %11208 = vmatpush2.bf16.msra.mxu0 %v16595_v8  ;;  %11249 = vmatpush2.bf16.msra.mxu1 %v16597_v23  ;;  %v11331_v8 = vld [vmem:[%s25524_s15 + $0x160] sm:$0xff] }
 0x8a1   : > { %11209 = vmatprep.subr.bf16.mxu0 %v16588_v12  ;;  %11250 = vmatprep.subr.bf16.mxu1 %v16590_v16  ;;  %v11455_v23 = vld [vmem:[%s25524_s15 + $0x540] sm:$0xff]  ;;  %v16655_v16 = vcombine.low %v11335_v37, %v11339_v19  ;;  %v16648_v9 = vcombine.high %v11327_v11, %v11331_v8 }
 0x8a2   : > { %v11459_v12 = vld [vmem:[%s25524_s15 + $0x560] sm:$0xff] }
 0x8a3   : > { %v16776_v28 = vcombine.high %v11455_v23, %v11459_v12  ;;  %v11427_v40 = vld [vmem:[%s25524_s15 + $0x460] sm:$0xff] }
 0x8a4   : > { %11210 = vmatpush2.bf16.msra.mxu0 %v16587_v1  ;;  %11251 = vmatpush2.bf16.msra.mxu1 %v16589_v26  ;;  %v11323_v1 = vld [vmem:[%s25524_s15 + $0x120] sm:$0xff] }
 0x8a5   : > { %11211 = vmatprep.subr.bf16.mxu0 %v16580_v61  ;;  %11252 = vmatprep.subr.bf16.mxu1 %v16582_v42  ;;  %v11451_v26 = vld [vmem:[%s25524_s15 + $0x520] sm:$0xff]  ;;  %v16647_v61 = vcombine.low %v11327_v11, %v11331_v8  ;;  %v16775_v42 = vcombine.low %v11455_v23, %v11459_v12  ;;  %v16640_v27 = vcombine.high %v11319_v43, %v11323_v1 }
 0x8a6   : > { %v11287_v48 = vld [vmem:[%s25524_s15] sm:$0xff] }
 0x8a7   : > { %v11291_v7 = vld [vmem:[%s25524_s15 + $0x20] sm:$0xff] }
 0x8a8   : > { %11212 = vmatpush2.bf16.msra.mxu0 %v16579_v59  ;;  %11253 = vmatpush2.bf16.msra.mxu1 %v16581_v52  ;;  %v11439_v59 = vld [vmem:[%s25524_s15 + $0x4c0] sm:$0xff] }
 0x8a9   : > { %11213 = vmatprep.subr.bf16.mxu0 %v16572_v24  ;;  %11254 = vmatprep.subr.bf16.mxu1 %v16574_v50  ;;  %v11443_v52 = vld [vmem:[%s25524_s15 + $0x4e0] sm:$0xff]  ;;  %v16639_v24 = vcombine.low %v11319_v43, %v11323_v1 }
 0x8aa   : > { %v11415_v5 = vld [vmem:[%s25524_s15 + $0x400] sm:$0xff] }
 0x8ab   : > { %v11419_v13 = vld [vmem:[%s25524_s15 + $0x420] sm:$0xff] }
 0x8ac   : > { %11214 = vmatpush2.bf16.msra.mxu0 %v16571_v49  ;;  %11255 = vmatpush2.bf16.msra.mxu1 %v16573_v6  ;;  %v16760_v49 = vcombine.high %v11439_v59, %v11443_v52  ;;  %v11303_v6 = vld [vmem:[%s25524_s15 + $0x80] sm:$0xff] }
 0x8ad   : > { %11215 = vmatprep.subr.bf16.mxu0 %v16564_v22  ;;  %11256 = vmatprep.subr.bf16.mxu1 %v16566_v32  ;;  %v16919_v22 = vcombine.low %v23633_v15, %v23638_v10  ;;  %v23653_v32 = vld [vmem:[%s25524_s15 + $0xde0] sm:$0xff] }
 0x8ae   : > { %v17047_v33 = vcombine.low %v23643_v29, %v23653_v32  ;;  %v11407_v37 = vld [vmem:[%s25524_s15 + $0x3c0] sm:$0xff] }
 0x8af   : > { %v11411_v19 = vld [vmem:[%s25524_s15 + $0x3e0] sm:$0xff] }
 0x8b0   : > { %11216 = vmatpush2.bf16.msra.mxu0 %v16563_v35  ;;  %11257 = vmatpush2.bf16.msra.mxu1 %v16565_v56  ;;  %v16631_v35 = vcombine.low %v11311_v51, %v11315_v36  ;;  %v16759_v56 = vcombine.low %v11439_v59, %v11443_v52  ;;  %v11535_v14 = vld [vmem:[%s25524_s15 + $0x7c0] sm:$0xff] }
 0x8b1   : > { %11217 = vmatprep.subr.bf16.mxu0 %v16556_v46  ;;  %11258 = vmatprep.subr.bf16.mxu1 %v16558_v18  ;;  %v16624_v46 = vcombine.high %v11303_v6, %v11307_v57  ;;  %v16752_v18 = vcombine.high %v11431_v3, %v11435_v0  ;;  %v11539_v55 = vld [vmem:[%s25524_s15 + $0x7e0] sm:$0xff] }
 0x8b2   : > { %v11399_v11 = vld [vmem:[%s25524_s15 + $0x380] sm:$0xff] }
 0x8b3   : > { %v11403_v8 = vld [vmem:[%s25524_s15 + $0x3a0] sm:$0xff] }
 0x8b4   : > { %11218 = vmatpush2.bf16.msra.mxu0 %v16555_v38  ;;  %11259 = vmatpush2.bf16.msra.mxu1 %v16557_v30  ;;  %v16623_v38 = vcombine.low %v11303_v6, %v11307_v57  ;;  %v16751_v30 = vcombine.low %v11431_v3, %v11435_v0  ;;  %v11527_v23 = vld [vmem:[%s25524_s15 + $0x780] sm:$0xff] }
 0x8b5   : > { %11219 = vmatprep.subr.bf16.mxu0 %v16548_v44  ;;  %11260 = vmatprep.subr.bf16.mxu1 %v16550_v45  ;;  %v16616_v44 = vcombine.high %v11295_v34, %v11299_v20  ;;  %v16744_v45 = vcombine.high %v11423_v39, %v11427_v40  ;;  %v11531_v12 = vld [vmem:[%s25524_s15 + $0x7a0] sm:$0xff] }
 0x8b6   : > { %v11391_v43 = vld [vmem:[%s25524_s15 + $0x340] sm:$0xff] }
 0x8b7   : > { %v11395_v1 = vld [vmem:[%s25524_s15 + $0x360] sm:$0xff] }
 0x8b8   : > { %11220 = vmatpush2.bf16.msra.mxu0 %v16547_v47  ;;  %11261 = vmatpush2.bf16.msra.mxu1 %v16549_v4  ;;  %v16615_v47 = vcombine.low %v11295_v34, %v11299_v20  ;;  %v16743_v4 = vcombine.low %v11423_v39, %v11427_v40  ;;  %v11383_v51 = vld [vmem:[%s25524_s15 + $0x300] sm:$0xff] }
 0x8b9   : > { %14401 = vmatprep.subr.bf16.mxu0 %v16664_v58  ;;  %14442 = vmatprep.subr.bf16.mxu1 %v16792_v17  ;;  %v16608_v58 = vcombine.high %v11287_v48, %v11291_v7  ;;  %v16736_v17 = vcombine.high %v11415_v5, %v11419_v13  ;;  %v11387_v36 = vld [vmem:[%s25524_s15 + $0x320] sm:$0xff] }
 0x8ba   : > { %v11511_v59 = vld [vmem:[%s25524_s15 + $0x700] sm:$0xff] }
 0x8bb   : > { %11222 = vmatmul.mubr.bf16.vlgmr.msra.gmra.mxu0 %v23390_v60  ;;  %11263 = vmatmul.mubr.bf16.vlgmr.msra.gmra.mxu1 %v23390_v60  ;;  %v11447_v60 = vld [vmem:[%s25524_s15 + $0x500] sm:$0xff] }
 0x8bc   : > { %14402 = vmatpush1.bf16.msra.mxu0 %v16663_v41  ;;  %14443 = vmatpush1.bf16.msra.mxu1 %v16791_v2  ;;  %v16768_v31 = vcombine.high %v11447_v60, %v11451_v26  ;;  %v16767_v50 = vcombine.low %v11447_v60, %v11451_v26  ;;  %v16607_v41 = vcombine.low %v11287_v48, %v11291_v7  ;;  %v11519_v60 = vld [vmem:[%s25524_s15 + $0x740] sm:$0xff] }
 0x8bd   : > { %14403 = vmatprep.subr.bf16.mxu0 %v16656_v53  ;;  %14444 = vmatprep.subr.bf16.mxu1 %v16784_v54  ;;  %v16735_v2 = vcombine.low %v11415_v5, %v11419_v13  ;;  %v16728_v53 = vcombine.high %v11407_v37, %v11411_v19  ;;  %v16856_v54 = vcombine.high %v11535_v14, %v11539_v55  ;;  %v11523_v26 = vld [vmem:[%s25524_s15 + $0x760] sm:$0xff] }
 0x8be   : > { %v11515_v52 = vld [vmem:[%s25524_s15 + $0x720] sm:$0xff] }
 0x8bf   : > { %v11375_v6 = vld [vmem:[%s25524_s15 + $0x2c0] sm:$0xff] }
 0x8c0   : > { %14404 = vmatpush1.bf16.msra.mxu0 %v16655_v16  ;;  %14445 = vmatpush1.bf16.msra.mxu1 %v16783_v25  ;;  %v16727_v16 = vcombine.low %v11407_v37, %v11411_v19  ;;  %v16855_v25 = vcombine.low %v11535_v14, %v11539_v55  ;;  %v11379_v57 = vld [vmem:[%s25524_s15 + $0x2e0] sm:$0xff] }
 0x8c1   : > { %14405 = vmatprep.subr.bf16.mxu0 %v16648_v9  ;;  %14446 = vmatprep.subr.bf16.mxu1 %v16776_v28  ;;  %v16720_v9 = vcombine.high %v11399_v11, %v11403_v8  ;;  %v16848_v28 = vcombine.high %v11527_v23, %v11531_v12  ;;  %v11503_v3 = vld [vmem:[%s25524_s15 + $0x6c0] sm:$0xff] }
 0x8c2   : > { %v11507_v0 = vld [vmem:[%s25524_s15 + $0x6e0] sm:$0xff] }
 0x8c3   : > { %v11367_v34 = vld [vmem:[%s25524_s15 + $0x280] sm:$0xff] }
 0x8c4   : > { %14406 = vmatpush1.bf16.msra.mxu0 %v16647_v61  ;;  %14447 = vmatpush1.bf16.msra.mxu1 %v16775_v42  ;;  %v16719_v61 = vcombine.low %v11399_v11, %v11403_v8  ;;  %v16847_v42 = vcombine.low %v11527_v23, %v11531_v12  ;;  %v11371_v20 = vld [vmem:[%s25524_s15 + $0x2a0] sm:$0xff]  ;;  %v16920_v23 = vcombine.high %v23633_v15, %v23638_v10 }
 0x8c5   : > { %14407 = vmatprep.subr.bf16.mxu0 %v16640_v27  ;;  %14448 = vmatprep.subr.bf16.mxu1 %v16768_v31  ;;  %v16712_v27 = vcombine.high %v11391_v43, %v11395_v1  ;;  %v16840_v31 = vcombine.high %v11519_v60, %v11523_v26  ;;  %v11495_v39 = vld [vmem:[%s25524_s15 + $0x680] sm:$0xff]  ;;  %v17048_v12 = vcombine.high %v23643_v29, %v23653_v32 }
 0x8c6   : > { %v11499_v40 = vld [vmem:[%s25524_s15 + $0x6a0] sm:$0xff] }
 0x8c7   : > { %v11359_v48 = vld [vmem:[%s25524_s15 + $0x240] sm:$0xff] }
 0x8c8   : > { %14408 = vmatpush1.bf16.msra.mxu0 %v16639_v24  ;;  %14449 = vmatpush1.bf16.msra.mxu1 %v16767_v50  ;;  %v16711_v24 = vcombine.low %v11391_v43, %v11395_v1  ;;  %v16839_v50 = vcombine.low %v11519_v60, %v11523_v26  ;;  %v11363_v7 = vld [vmem:[%s25524_s15 + $0x260] sm:$0xff] }
 0x8c9   : > { %14409 = vmatprep.subr.bf16.mxu0 %v16632_v21  ;;  %14450 = vmatprep.subr.bf16.mxu1 %v16760_v49  ;;  %v16704_v21 = vcombine.high %v11383_v51, %v11387_v36  ;;  %v16832_v49 = vcombine.high %v11511_v59, %v11515_v52  ;;  %v11487_v5 = vld [vmem:[%s25524_s15 + $0x640] sm:$0xff] }
 0x8ca   : > { %v11491_v13 = vld [vmem:[%s25524_s15 + $0x660] sm:$0xff] }
 0x8cb   : > { %v11351_v37 = vld [vmem:[%s25524_s15 + $0x200] sm:$0xff] }
 0x8cc   : > { %14410 = vmatpush1.bf16.msra.mxu0 %v16631_v35  ;;  %14451 = vmatpush1.bf16.msra.mxu1 %v16759_v56  ;;  %v16703_v35 = vcombine.low %v11383_v51, %v11387_v36  ;;  %v16831_v56 = vcombine.low %v11511_v59, %v11515_v52  ;;  %v11355_v19 = vld [vmem:[%s25524_s15 + $0x220] sm:$0xff] }
 0x8cd   : > { %14411 = vmatprep.subr.bf16.mxu0 %v16624_v46  ;;  %14452 = vmatprep.subr.bf16.mxu1 %v16752_v18  ;;  %v16696_v46 = vcombine.high %v11375_v6, %v11379_v57  ;;  %v16824_v18 = vcombine.high %v11503_v3, %v11507_v0  ;;  %v11479_v14 = vld [vmem:[%s25524_s15 + $0x600] sm:$0xff]  ;;  %v16671_v11 = vcombine.low %v11351_v37, %v11355_v19 }
 0x8ce   : > { %v11483_v55 = vld [vmem:[%s25524_s15 + $0x620] sm:$0xff] }
 0x8cf   : > { %v16799_v8 = vcombine.low %v11479_v14, %v11483_v55  ;;  %v11703_v15 = vld [vmem:[%s25524_s15 + $0xd00] sm:$0xff] }
 0x8d0   : > { %14412 = vmatpush1.bf16.msra.mxu0 %v16623_v38  ;;  %14453 = vmatpush1.bf16.msra.mxu1 %v16751_v30  ;;  %v16695_v38 = vcombine.low %v11375_v6, %v11379_v57  ;;  %v16823_v30 = vcombine.low %v11503_v3, %v11507_v0  ;;  %v11591_v6 = vld [vmem:[%s25524_s15 + $0x980] sm:$0xff] }
 0x8d1   : > { %14413 = vmatprep.subr.bf16.mxu0 %v16616_v44  ;;  %14454 = vmatprep.subr.bf16.mxu1 %v16744_v45  ;;  %v16688_v44 = vcombine.high %v11367_v34, %v11371_v20  ;;  %v16816_v45 = vcombine.high %v11495_v39, %v11499_v40  ;;  %v11595_v0 = vld [vmem:[%s25524_s15 + $0x9a0] sm:$0xff] }
 0x8d2   : > { %v11707_v10 = vld [vmem:[%s25524_s15 + $0xd20] sm:$0xff] }
 0x8d4   : > { %14414 = vmatpush1.bf16.msra.mxu0 %v16615_v47  ;;  %14455 = vmatpush1.bf16.msra.mxu1 %v16743_v4  ;;  %v16687_v47 = vcombine.low %v11367_v34, %v11371_v20  ;;  %v16815_v4 = vcombine.low %v11495_v39, %v11499_v40 }
 0x8d5   : > { %14415 = vmatprep.subr.bf16.mxu0 %v16608_v58  ;;  %14456 = vmatprep.subr.bf16.mxu1 %v16736_v17  ;;  %v16680_v58 = vcombine.high %v11359_v48, %v11363_v7  ;;  %v16808_v17 = vcombine.high %v11487_v5, %v11491_v13 }
 0x8d8   : > { %14416 = vmatpush1.bf16.msra.mxu0 %v16607_v41  ;;  %14457 = vmatpush1.bf16.msra.mxu1 %v16735_v2  ;;  %v16679_v41 = vcombine.low %v11359_v48, %v11363_v7  ;;  %v16807_v2 = vcombine.low %v11487_v5, %v11491_v13  ;;  %v11711_v48 = vld [vmem:[%s25524_s15 + $0xd40] sm:$0xff]  ;;  %v16911_v5 = vcombine.low %v11591_v6, %v11595_v0 }
 0x8d9   : > { %14417 = vmatprep.subr.bf16.mxu0 %v16728_v53  ;;  %14458 = vmatprep.subr.bf16.mxu1 %v16856_v54  ;;  %v16672_v53 = vcombine.high %v11351_v37, %v11355_v19  ;;  %v16800_v54 = vcombine.high %v11479_v14, %v11483_v55  ;;  %v11715_v7 = vld [vmem:[%s25524_s15 + $0xd60] sm:$0xff] }
 0x8da   : > { %v11567_v37 = vld [vmem:[%s25524_s15 + $0x8c0] sm:$0xff] }
 0x8db   : > { %v11571_v19 = vld [vmem:[%s25524_s15 + $0x8e0] sm:$0xff] }
 0x8dc   : > { %14418 = vmatpush2.bf16.msra.mxu0 %v16727_v16  ;;  %14459 = vmatpush2.bf16.msra.mxu1 %v16855_v25  ;;  %v25937_v16 = vld [vmem:[#allocation13_spill] sm:$0xff] }
 0x8dd   : > { %14419 = vmatprep.subr.bf16.mxu0 %v16720_v9  ;;  %14460 = vmatprep.subr.bf16.mxu1 %v16848_v28  ;;  %v11077_v25 = vsub.s32 2, %v25937_v16  ;;  %v23794_v9 = vld [vmem:[%s25523_s14] sm:$0xff]  ;;  %v11081_v28 = vsub.s32 3, %v25937_v16 }
 0x8de   : > { %v11070_v43 = vrot.slane %v23794_v9, %v25934_v62  ;;  %v11074_v60 = vrot.slane %v23794_v9, %v25935_v63  ;;  %v11695_v14 = vld [vmem:[%s25524_s15 + $0xcc0] sm:$0xff] }
 0x8df   : > { %v11078_v1 = vrot.slane %v23794_v9, %v11077_v25  ;;  %v11082_v26 = vrot.slane %v23794_v9, %v11081_v28  ;;  %v11699_v55 = vld [vmem:[%s25524_s15 + $0xce0] sm:$0xff] }
 0x8e0   : > { %14420 = vmatpush2.bf16.msra.mxu0 %v16719_v61  ;;  %14461 = vmatpush2.bf16.msra.mxu1 %v16847_v42 }
 0x8e1   : > { %14421 = vmatprep.subr.bf16.mxu0 %v16712_v27  ;;  %14462 = vmatprep.subr.bf16.mxu1 %v16840_v31 }
 0x8e4   : > { %14422 = vmatpush2.bf16.msra.mxu0 %v16711_v24  ;;  %14463 = vmatpush2.bf16.msra.mxu1 %v16839_v50 }
 0x8e5   : > { %14423 = vmatprep.subr.bf16.mxu0 %v16704_v21  ;;  %14464 = vmatprep.subr.bf16.mxu1 %v16832_v49 }
 0x8e8   : > { %14424 = vmatpush2.bf16.msra.mxu0 %v16703_v35  ;;  %14465 = vmatpush2.bf16.msra.mxu1 %v16831_v56  ;;  %v11719_v35 = vld [vmem:[%s25524_s15 + $0xd80] sm:$0xff] }
 0x8e9   : > { %14425 = vmatprep.subr.bf16.mxu0 %v16696_v46  ;;  %14466 = vmatprep.subr.bf16.mxu1 %v16824_v18  ;;  %v11723_v56 = vld [vmem:[%s25524_s15 + $0xda0] sm:$0xff] }
 0x8ea   : > { %v17039_v13 = vcombine.low %v11719_v35, %v11723_v56 }
 0x8ec   : > { %14426 = vmatpush2.bf16.msra.mxu0 %v16695_v38  ;;  %14467 = vmatpush2.bf16.msra.mxu1 %v16823_v30  ;;  %v16912_v38 = vcombine.high %v11591_v6, %v11595_v0  ;;  %v17040_v30 = vcombine.high %v11719_v35, %v11723_v56  ;;  %v11663_v35 = vld [vmem:[%s25524_s15 + $0xbc0] sm:$0xff] }
 0x8ed   : > { %14427 = vmatprep.subr.bf16.mxu0 %v16688_v44  ;;  %14468 = vmatprep.subr.bf16.mxu1 %v16816_v45  ;;  %v11583_v44 = vld [vmem:[%s25524_s15 + $0x940] sm:$0xff] }
 0x8ee   : > { %v11587_v45 = vld [vmem:[%s25524_s15 + $0x960] sm:$0xff] }
 0x8ef   : > { %v16903_v29 = vcombine.low %v11583_v44, %v11587_v45  ;;  %v11667_v56 = vld [vmem:[%s25524_s15 + $0xbe0] sm:$0xff] }
 0x8f0   : > { %14428 = vmatpush2.bf16.msra.mxu0 %v16687_v47  ;;  %14469 = vmatpush2.bf16.msra.mxu1 %v16815_v4  ;;  %v16904_v47 = vcombine.high %v11583_v44, %v11587_v45  ;;  %v17032_v4 = vcombine.high %v11711_v48, %v11715_v7  ;;  %v16984_v44 = vcombine.high %v11663_v35, %v11667_v56 }
 0x8f1   : > { %14429 = vmatprep.subr.bf16.mxu0 %v16680_v58  ;;  %14470 = vmatprep.subr.bf16.mxu1 %v16808_v17  ;;  %v11575_v58 = vld [vmem:[%s25524_s15 + $0x900] sm:$0xff] }
 0x8f2   : > { %v11579_v17 = vld [vmem:[%s25524_s15 + $0x920] sm:$0xff] }
 0x8f3   : > { %v16896_v32 = vcombine.high %v11575_v58, %v11579_v17 }
 0x8f4   : > { %14430 = vmatpush2.bf16.msra.mxu0 %v16679_v41  ;;  %14471 = vmatpush2.bf16.msra.mxu1 %v16807_v2  ;;  %v16895_v41 = vcombine.low %v11575_v58, %v11579_v17  ;;  %v17023_v2 = vcombine.low %v11703_v15, %v11707_v10 }
 0x8f5   : > { %14431 = vmatprep.subr.bf16.mxu0 %v16672_v53  ;;  %14472 = vmatprep.subr.bf16.mxu1 %v16800_v54  ;;  %v16888_v53 = vcombine.high %v11567_v37, %v11571_v19  ;;  %v17016_v54 = vcombine.high %v11695_v14, %v11699_v55 }
 0x8f8   : > { %14432 = vmatpush2.bf16.msra.mxu0 %v16671_v11  ;;  %14473 = vmatpush2.bf16.msra.mxu1 %v16799_v8  ;;  %v11559_v11 = vld [vmem:[%s25524_s15 + $0x880] sm:$0xff] }
 0x8f9   : > { %14483 = vmatprep.subr.bf16.mxu0 %v16920_v23  ;;  %14524 = vmatprep.subr.bf16.mxu1 %v17048_v12  ;;  %v11563_v8 = vld [vmem:[%s25524_s15 + $0x8a0] sm:$0xff] }
 0x8fa   : > { %v11687_v23 = vld [vmem:[%s25524_s15 + $0xc80] sm:$0xff] }
 0x8fb   : > { %v11691_v12 = vld [vmem:[%s25524_s15 + $0xca0] sm:$0xff] }
 0x93b   : > { %v11141_v61 = vpop.f32.mrf.mxu0  ;;  %v11182_v42 = vpop.f32.mrf.mxu1 }
 0x93c   : > { %v11142_v27 = vadd.f32 %v11141_v61, %v11070_v43  ;;  %v11183_v31 = vadd.f32 %v11182_v42, %v11078_v1  ;;  %v16887_v43 = vcombine.low %v11567_v37, %v11571_v19  ;;  %v17015_v1 = vcombine.low %v11695_v14, %v11699_v55  ;;  %v11551_v61 = vld [vmem:[%s25524_s15 + $0x840] sm:$0xff] }
 0x93d   : > { %v11143_v51 = vpop.f32.mrf.mxu0  ;;  %v11184_v36 = vpop.f32.mrf.mxu1  ;;  %v11555_v42 = vld [vmem:[%s25524_s15 + $0x860] sm:$0xff] }
 0x93e   : > { %v11144_v59 = vadd.f32 %v11143_v51, %v11074_v60  ;;  %v11185_v52 = vadd.f32 %v11184_v36, %v11082_v26  ;;  %v11271_v24 = vmax.f32 %v11142_v27, 0.0  ;;  %v11273_v50 = vmax.f32 %v11183_v31, 0.0  ;;  %v11679_v27 = vld [vmem:[%s25524_s15 + $0xc40] sm:$0xff] }
 0x93f   : > { %v11145_v21 = vpop.f32.mrf.mxu0  ;;  %v11186_v49 = vpop.f32.mrf.mxu1  ;;  %v16880_v60 = vcombine.high %v11559_v11, %v11563_v8  ;;  %v17008_v26 = vcombine.high %v11687_v23, %v11691_v12  ;;  %v11683_v31 = vld [vmem:[%s25524_s15 + $0xc60] sm:$0xff]  ;;  %v16879_v51 = vcombine.low %v11559_v11, %v11563_v8  ;;  %v17007_v36 = vcombine.low %v11687_v23, %v11691_v12 }
 0x940   : > { %v11272_v57 = vmax.f32 %v11144_v59, 0.0  ;;  %v11274_v3 = vmax.f32 %v11185_v52, 0.0  ;;  %v23823_v39 = vpack.c.bf16 %v11271_v24, %v11271_v24  ;;  %v23825_v40 = vpack.c.bf16 %v11273_v50, %v11273_v50  ;;  %v11543_v24 = vld [vmem:[%s25524_s15 + $0x800] sm:$0xff] }
 0x941   : > { %v11146_v46 = vpop.f32.mrf.mxu0  ;;  %v11187_v18 = vpop.f32.mrf.mxu1  ;;  %v16872_v59 = vcombine.high %v11551_v61, %v11555_v42  ;;  %v17000_v52 = vcombine.high %v11679_v27, %v11683_v31  ;;  %v11547_v50 = vld [vmem:[%s25524_s15 + $0x820] sm:$0xff]  ;;  %v16871_v6 = vcombine.low %v11551_v61, %v11555_v42 }
 0x942   : > { %v23819_v34 = vpack.c.bf16 %v11272_v57, %v11272_v57  ;;  %v23821_v20 = vpack.c.bf16 %v11274_v3, %v11274_v3  ;;  %v11671_v21 = vld [vmem:[%s25524_s15 + $0xc00] sm:$0xff]  ;;  %v16999_v57 = vcombine.low %v11679_v27, %v11683_v31  ;;  %v16864_v3 = vcombine.high %v11543_v24, %v11547_v50 }
 0x943   : > { %v11675_v49 = vld [vmem:[%s25524_s15 + $0xc20] sm:$0xff] }
 0x944   : > { %14433 = vmatprep.mubr.bf16.mxu0 %v23819_v34  ;;  %14474 = vmatprep.mubr.bf16.mxu1 %v23821_v20  ;;  %v16992_v0 = vcombine.high %v11671_v21, %v11675_v49  ;;  %v11791_v46 = vld [vmem:[%s25524_s15 + $0xfc0] sm:$0xff] }
 0x945   : > { %14434 = vmatmul.mubr.bf16.vlgmr.msra.gmra.mxu0 %v23823_v39  ;;  %14475 = vmatmul.mubr.bf16.vlgmr.msra.gmra.mxu1 %v23825_v40  ;;  %v11795_v18 = vld [vmem:[%s25524_s15 + $0xfe0] sm:$0xff] }
 0x946   : > { %14484 = vmatpush1.bf16.msra.mxu0 %v16919_v22  ;;  %14525 = vmatpush1.bf16.msra.mxu1 %v17047_v33  ;;  %v17031_v22 = vcombine.low %v11711_v48, %v11715_v7  ;;  %v17024_v33 = vcombine.high %v11703_v15, %v11707_v10  ;;  %v17112_v45 = vcombine.high %v11791_v46, %v11795_v18  ;;  %v11655_v48 = vld [vmem:[%s25524_s15 + $0xb80] sm:$0xff] }
 0x947   : > { %14485 = vmatprep.subr.bf16.mxu0 %v16912_v38  ;;  %14526 = vmatprep.subr.bf16.mxu1 %v17040_v30  ;;  %v16863_v38 = vcombine.low %v11543_v24, %v11547_v50  ;;  %v16991_v30 = vcombine.low %v11671_v21, %v11675_v49  ;;  %v11659_v7 = vld [vmem:[%s25524_s15 + $0xba0] sm:$0xff]  ;;  %v11085_v49 = vsub.s32 4, %v25937_v16 }
 0x948   : > { %v16976_v58 = vcombine.high %v11655_v48, %v11659_v7  ;;  %v11647_v15 = vld [vmem:[%s25524_s15 + $0xb40] sm:$0xff] }
 0x949   : > { %v11651_v10 = vld [vmem:[%s25524_s15 + $0xb60] sm:$0xff] }
 0x94a   : > { %14486 = vmatpush1.bf16.msra.mxu0 %v16911_v5  ;;  %14527 = vmatpush1.bf16.msra.mxu1 %v17039_v13  ;;  %v11783_v5 = vld [vmem:[%s25524_s15 + $0xf80] sm:$0xff]  ;;  %v16968_v37 = vcombine.high %v11647_v15, %v11651_v10 }
 0x94b   : > { %14487 = vmatprep.subr.bf16.mxu0 %v16904_v47  ;;  %14528 = vmatprep.subr.bf16.mxu1 %v17032_v4  ;;  %v11787_v13 = vld [vmem:[%s25524_s15 + $0xfa0] sm:$0xff]  ;;  %v16983_v47 = vcombine.low %v11663_v35, %v11667_v56  ;;  %v17111_v4 = vcombine.low %v11791_v46, %v11795_v18  ;;  %v11089_v35 = vsub.s32 5, %v25937_v16  ;;  %v11097_v18 = vsub.s32 7, %v25937_v16 }
 0x94c   : > { %v17104_v17 = vcombine.high %v11783_v5, %v11787_v13  ;;  %v11639_v14 = vld [vmem:[%s25524_s15 + $0xb00] sm:$0xff] }
 0x94d   : > { %v11643_v55 = vld [vmem:[%s25524_s15 + $0xb20] sm:$0xff] }
 0x94e   : > { %14488 = vmatpush1.bf16.msra.mxu0 %v16903_v29  ;;  %14529 = vmatpush1.bf16.msra.mxu1 %v17031_v22  ;;  %v11775_v29 = vld [vmem:[%s25524_s15 + $0xf40] sm:$0xff]  ;;  %v16960_v11 = vcombine.high %v11639_v14, %v11643_v55 }
 0x94f   : > { %14489 = vmatprep.subr.bf16.mxu0 %v16896_v32  ;;  %14530 = vmatprep.subr.bf16.mxu1 %v17024_v33  ;;  %v11779_v22 = vld [vmem:[%s25524_s15 + $0xf60] sm:$0xff]  ;;  %v16975_v32 = vcombine.low %v11655_v48, %v11659_v7  ;;  %v17103_v33 = vcombine.low %v11783_v5, %v11787_v13 }
 0x950   : > { %v17096_v19 = vcombine.high %v11775_v29, %v11779_v22  ;;  %v11631_v23 = vld [vmem:[%s25524_s15 + $0xac0] sm:$0xff] }
 0x951   : > { %v11635_v12 = vld [vmem:[%s25524_s15 + $0xae0] sm:$0xff] }
 0x952   : > { %14490 = vmatpush1.bf16.msra.mxu0 %v16895_v41  ;;  %14531 = vmatpush1.bf16.msra.mxu1 %v17023_v2  ;;  %v11767_v41 = vld [vmem:[%s25524_s15 + $0xf00] sm:$0xff]  ;;  %v16952_v61 = vcombine.high %v11631_v23, %v11635_v12 }
 0x953   : > { %14491 = vmatprep.subr.bf16.mxu0 %v16888_v53  ;;  %14532 = vmatprep.subr.bf16.mxu1 %v17016_v54  ;;  %v11771_v2 = vld [vmem:[%s25524_s15 + $0xf20] sm:$0xff]  ;;  %v16967_v53 = vcombine.low %v11647_v15, %v11651_v10  ;;  %v17095_v54 = vcombine.low %v11775_v29, %v11779_v22 }
 0x954   : > { %v17088_v8 = vcombine.high %v11767_v41, %v11771_v2  ;;  %v11623_v27 = vld [vmem:[%s25524_s15 + $0xa80] sm:$0xff] }
 0x955   : > { %v11627_v31 = vld [vmem:[%s25524_s15 + $0xaa0] sm:$0xff] }
 0x956   : > { %14492 = vmatpush1.bf16.msra.mxu0 %v16887_v43  ;;  %14533 = vmatpush1.bf16.msra.mxu1 %v17015_v1  ;;  %v11759_v43 = vld [vmem:[%s25524_s15 + $0xec0] sm:$0xff]  ;;  %v16944_v24 = vcombine.high %v11623_v27, %v11627_v31  ;;  %v16943_v56 = vcombine.low %v11623_v27, %v11627_v31 }
 0x957   : > { %14493 = vmatprep.subr.bf16.mxu0 %v16880_v60  ;;  %14534 = vmatprep.subr.bf16.mxu1 %v17008_v26  ;;  %v11763_v1 = vld [vmem:[%s25524_s15 + $0xee0] sm:$0xff]  ;;  %v16959_v60 = vcombine.low %v11639_v14, %v11643_v55  ;;  %v17087_v26 = vcombine.low %v11767_v41, %v11771_v2  ;;  %v11476_v14 = vld [vmem:[%s25524_s15 + $0x5e8] sm:$0xff] }
 0x958   : > { %v17080_v42 = vcombine.high %v11759_v43, %v11763_v1  ;;  %v11615_v21 = vld [vmem:[%s25524_s15 + $0xa40] sm:$0xff] }
 0x959   : > { %v11611_v7 = vld [vmem:[%s25524_s15 + $0xa20] sm:$0xff] }
 0x95a   : > { %14494 = vmatpush1.bf16.msra.mxu0 %v16879_v51  ;;  %14535 = vmatpush1.bf16.msra.mxu1 %v17007_v36  ;;  %v11751_v51 = vld [vmem:[%s25524_s15 + $0xe80] sm:$0xff] }
 0x95b   : > { %14495 = vmatprep.subr.bf16.mxu0 %v16872_v59  ;;  %14536 = vmatprep.subr.bf16.mxu1 %v17000_v52  ;;  %v11755_v36 = vld [vmem:[%s25524_s15 + $0xea0] sm:$0xff]  ;;  %v16951_v59 = vcombine.low %v11631_v23, %v11635_v12  ;;  %v17079_v52 = vcombine.low %v11759_v43, %v11763_v1 }
 0x95c   : > { %v17072_v50 = vcombine.high %v11751_v51, %v11755_v36  ;;  %v17071_v46 = vcombine.low %v11751_v51, %v11755_v36  ;;  %v11735_v5 = vld [vmem:[%s25524_s15 + $0xe00] sm:$0xff]  ;;  %v11340_v51 = vld [vmem:[%s25524_s15 + $0x1a8] sm:$0xff] }
 0x95d   : > { %v11739_v13 = vld [vmem:[%s25524_s15 + $0xe20] sm:$0xff]  ;;  %v11464_v36 = vld [vmem:[%s25524_s15 + $0x588] sm:$0xff] }
 0x95e   : > { %14496 = vmatpush1.bf16.msra.mxu0 %v16871_v6  ;;  %14537 = vmatpush1.bf16.msra.mxu1 %v16999_v57  ;;  %v11093_v6 = vsub.s32 6, %v25937_v16  ;;  %v11619_v57 = vld [vmem:[%s25524_s15 + $0xa60] sm:$0xff]  ;;  %v17056_v22 = vcombine.high %v11735_v5, %v11739_v13 }
 0x95f   : > { %14497 = vmatprep.subr.bf16.mxu0 %v16864_v3  ;;  %14538 = vmatprep.subr.bf16.mxu1 %v16992_v0  ;;  %v11743_v3 = vld [vmem:[%s25524_s15 + $0xe40] sm:$0xff] }
 0x960   : > { %v11747_v0 = vld [vmem:[%s25524_s15 + $0xe60] sm:$0xff]  ;;  %v11094_v48 = vrot.slane %v23794_v9, %v11093_v6 }
 0x962   : > { %14498 = vmatpush1.bf16.msra.mxu0 %v16863_v38  ;;  %14539 = vmatpush1.bf16.msra.mxu1 %v16991_v30  ;;  %v16936_v38 = vcombine.high %v11615_v21, %v11619_v57  ;;  %v17064_v30 = vcombine.high %v11743_v3, %v11747_v0 }
 0x963   : > { %14499 = vmatprep.subr.bf16.mxu0 %v16984_v44  ;;  %14540 = vmatprep.subr.bf16.mxu1 %v17112_v45  ;;  %v11607_v44 = vld [vmem:[%s25524_s15 + $0xa00] sm:$0xff]  ;;  %v11086_v45 = vrot.slane %v23794_v9, %v11085_v49 }
 0x964   : > { %v16928_v29 = vcombine.high %v11607_v44, %v11611_v7  ;;  %v16927_v2 = vcombine.low %v11607_v44, %v11611_v7  ;;  %v11460_v44 = vld [vmem:[%s25524_s15 + $0x568] sm:$0xff] }
 0x966   : > { %14500 = vmatpush2.bf16.msra.mxu0 %v16983_v47  ;;  %14541 = vmatpush2.bf16.msra.mxu1 %v17111_v4  ;;  %v11090_v47 = vrot.slane %v23794_v9, %v11089_v35  ;;  %v11098_v4 = vrot.slane %v23794_v9, %v11097_v18  ;;  %v11472_v9 = vld [vmem:[%s25524_s15 + $0x5c8] sm:$0xff] }
 0x967   : > { %14501 = vmatprep.subr.bf16.mxu0 %v16976_v58  ;;  %14542 = vmatprep.subr.bf16.mxu1 %v17104_v17  ;;  %v16935_v58 = vcombine.low %v11615_v21, %v11619_v57  ;;  %v17063_v17 = vcombine.low %v11743_v3, %v11747_v0  ;;  %v16793_v3 = vcombine.low %v11472_v9, %v11476_v14 }
 0x96a   : > { %14502 = vmatpush2.bf16.msra.mxu0 %v16975_v32  ;;  %14543 = vmatpush2.bf16.msra.mxu1 %v17103_v33  ;;  %v11344_v32 = vld [vmem:[%s25524_s15 + $0x1c8] sm:$0xff] }
 0x96b   : > { %14503 = vmatprep.subr.bf16.mxu0 %v16968_v37  ;;  %14544 = vmatprep.subr.bf16.mxu1 %v17096_v19  ;;  %v11348_v19 = vld [vmem:[%s25524_s15 + $0x1e8] sm:$0xff] }
 0x96c   : > { %v16666_v1 = vcombine.high %v11344_v32, %v11348_v19 }
 0x96e   : > { %14504 = vmatpush2.bf16.msra.mxu0 %v16967_v53  ;;  %14545 = vmatpush2.bf16.msra.mxu1 %v17095_v54 }
 0x96f   : > { %14505 = vmatprep.subr.bf16.mxu0 %v16960_v11  ;;  %14546 = vmatprep.subr.bf16.mxu1 %v17088_v8  ;;  %v17055_v11 = vcombine.low %v11735_v5, %v11739_v13  ;;  %v11320_v13 = vld [vmem:[%s25524_s15 + $0x108] sm:$0xff] }
 0x972   : > { %14506 = vmatpush2.bf16.msra.mxu0 %v16959_v60  ;;  %14547 = vmatpush2.bf16.msra.mxu1 %v17087_v26  ;;  %v16794_v60 = vcombine.high %v11472_v9, %v11476_v14 }
 0x973   : > { %14507 = vmatprep.subr.bf16.mxu0 %v16952_v61  ;;  %14548 = vmatprep.subr.bf16.mxu1 %v17080_v42  ;;  %v11336_v42 = vld [vmem:[%s25524_s15 + $0x188] sm:$0xff] }
 0x974   : > { %v16658_v0 = vcombine.high %v11336_v42, %v11340_v51 }
 0x976   : > { %14508 = vmatpush2.bf16.msra.mxu0 %v16951_v59  ;;  %14549 = vmatpush2.bf16.msra.mxu1 %v17079_v52  ;;  %v11468_v59 = vld [vmem:[%s25524_s15 + $0x5a8] sm:$0xff] }
 0x977   : > { %14509 = vmatprep.subr.bf16.mxu0 %v16944_v24  ;;  %14550 = vmatprep.subr.bf16.mxu1 %v17072_v50  ;;  %v16665_v50 = vcombine.low %v11344_v32, %v11348_v19  ;;  %v11316_v32 = vld [vmem:[%s25524_s15 + $0xe8] sm:$0xff] }
 0x97a   : > { %14510 = vmatpush2.bf16.msra.mxu0 %v16943_v56  ;;  %14551 = vmatpush2.bf16.msra.mxu1 %v17071_v46  ;;  %v16786_v56 = vcombine.high %v11464_v36, %v11468_v59  ;;  %v11328_v46 = vld [vmem:[%s25524_s15 + $0x148] sm:$0xff] }
 0x97b   : > { %v11223_v15 = vpop.f32.mrf.mxu0  ;;  %v11264_v10 = vpop.f32.mrf.mxu1  ;;  %14511 = vmatprep.subr.bf16.mxu0 %v16936_v38  ;;  %14552 = vmatprep.subr.bf16.mxu1 %v17064_v30  ;;  %v11332_v38 = vld [vmem:[%s25524_s15 + $0x168] sm:$0xff] }
 0x97c   : > { %v11224_v33 = vadd.f32 %v11223_v15, %v11086_v45  ;;  %v11265_v37 = vadd.f32 %v11264_v10, %v11094_v48  ;;  %v11456_v30 = vld [vmem:[%s25524_s15 + $0x548] sm:$0xff]  ;;  %v16657_v45 = vcombine.low %v11336_v42, %v11340_v51  ;;  %v16785_v48 = vcombine.low %v11464_v36, %v11468_v59 }
 0x97d   : > { %v11225_v55 = vpop.f32.mrf.mxu0  ;;  %v11266_v41 = vpop.f32.mrf.mxu1  ;;  %v16650_v7 = vcombine.high %v11328_v46, %v11332_v38  ;;  %v16778_v5 = vcombine.high %v11456_v30, %v11460_v44  ;;  %v16777_v15 = vcombine.low %v11456_v30, %v11460_v44  ;;  %v11288_v51 = vld [vmem:[%s25524_s15 + $0x8] sm:$0xff] }
 0x97e   : > { %v11226_v53 = vadd.f32 %v11225_v55, %v11090_v47  ;;  %v11267_v54 = vadd.f32 %v11266_v41, %v11098_v4  ;;  %14512 = vmatpush2.bf16.msra.mxu0 %v16935_v58  ;;  %14553 = vmatpush2.bf16.msra.mxu1 %v17063_v17  ;;  %v11275_v8 = vmax.f32 %v11224_v33, 0.0  ;;  %v11277_v23 = vmax.f32 %v11265_v37, 0.0  ;;  %v11324_v47 = vld [vmem:[%s25524_s15 + $0x128] sm:$0xff] }
 0x97f   : > { %v11227_v12 = vpop.f32.mrf.mxu0  ;;  %v11268_v43 = vpop.f32.mrf.mxu1  ;;  %14513 = vmatprep.subr.bf16.mxu0 %v16928_v29  ;;  %14554 = vmatprep.subr.bf16.mxu1 %v17056_v22  ;;  %v11448_v4 = vld [vmem:[%s25524_s15 + $0x508] sm:$0xff]  ;;  %v16649_v17 = vcombine.low %v11328_v46, %v11332_v38  ;;  %v16642_v10 = vcombine.high %v11320_v13, %v11324_v47  ;;  %v16641_v19 = vcombine.low %v11320_v13, %v11324_v47 }
 0x980   : > { %v11276_v26 = vmax.f32 %v11226_v53, 0.0  ;;  %v11278_v61 = vmax.f32 %v11267_v54, 0.0  ;;  %v24049_v21 = vpack.c.bf16 %v11275_v8, %v11275_v8  ;;  %v24051_v57 = vpack.c.bf16 %v11277_v23, %v11277_v23  ;;  %v11452_v58 = vld [vmem:[%s25524_s15 + $0x528] sm:$0xff] }
 0x981   : > { %v11228_v27 = vpop.f32.mrf.mxu0  ;;  %v11269_v31 = vpop.f32.mrf.mxu1  ;;  %v16770_v29 = vcombine.high %v11448_v4, %v11452_v58  ;;  %v11312_v22 = vld [vmem:[%s25524_s15 + $0xc8] sm:$0xff]  ;;  %v16769_v9 = vcombine.low %v11448_v4, %v11452_v58 }
 0x982   : > { %v24045_v52 = vpack.c.bf16 %v11276_v26, %v11276_v26  ;;  %v24047_v24 = vpack.c.bf16 %v11278_v61, %v11278_v61  ;;  %14514 = vmatpush2.bf16.msra.mxu0 %v16927_v2  ;;  %14555 = vmatpush2.bf16.msra.mxu1 %v17055_v11  ;;  %v11440_v33 = vld [vmem:[%s25524_s15 + $0x4c8] sm:$0xff]  ;;  %v16634_v14 = vcombine.high %v11312_v22, %v11316_v32 }
 0x983   : > { %14565 = vmatprep.subr.bf16.mxu0 %v16666_v1  ;;  %14606 = vmatprep.subr.bf16.mxu1 %v16794_v60  ;;  %v11444_v37 = vld [vmem:[%s25524_s15 + $0x4e8] sm:$0xff]  ;;  %v16633_v11 = vcombine.low %v11312_v22, %v11316_v32 }
 0x984   : > { %14515 = vmatprep.mubr.bf16.mxu0 %v24045_v52  ;;  %14556 = vmatprep.mubr.bf16.mxu1 %v24047_v24  ;;  %v16762_v55 = vcombine.high %v11440_v33, %v11444_v37  ;;  %v11304_v41 = vld [vmem:[%s25524_s15 + $0x88] sm:$0xff]  ;;  %v16761_v8 = vcombine.low %v11440_v33, %v11444_v37 }
 0x985   : > { %14516 = vmatmul.mubr.bf16.vlgmr.msra.gmra.mxu0 %v24049_v21  ;;  %14557 = vmatmul.mubr.bf16.vlgmr.msra.gmra.mxu1 %v24051_v57  ;;  %v11308_v2 = vld [vmem:[%s25524_s15 + $0xa8] sm:$0xff] }
 0x986   : > { %14566 = vmatpush1.bf16.msra.mxu0 %v16665_v50  ;;  %14597 = vmatprep.mubr.bf16.mxu0 %v23819_v34  ;;  %v11432_v53 = vld [vmem:[%s25524_s15 + $0x488] sm:$0xff]  ;;  %v16626_v23 = vcombine.high %v11304_v41, %v11308_v2  ;;  %v16625_v61 = vcombine.low %v11304_v41, %v11308_v2 }
 0x987   : > { %14607 = vmatpush1.bf16.msra.mxu1 %v16793_v3  ;;  %14638 = vmatprep.mubr.bf16.mxu1 %v23821_v20  ;;  %v11436_v54 = vld [vmem:[%s25524_s15 + $0x4a8] sm:$0xff] }
 0x988   : > { %14567 = vmatprep.subr.bf16.mxu0 %v16658_v0  ;;  %14608 = vmatprep.subr.bf16.mxu1 %v16786_v56  ;;  %v16754_v12 = vcombine.high %v11432_v53, %v11436_v54  ;;  %v11296_v43 = vld [vmem:[%s25524_s15 + $0x48] sm:$0xff]  ;;  %v16753_v42 = vcombine.low %v11432_v53, %v11436_v54 }
 0x989   : > { %v11300_v1 = vld [vmem:[%s25524_s15 + $0x68] sm:$0xff] }
 0x98a   : > { %14568 = vmatpush1.bf16.msra.mxu0 %v16657_v45  ;;  %v11424_v60 = vld [vmem:[%s25524_s15 + $0x448] sm:$0xff]  ;;  %v16618_v27 = vcombine.high %v11296_v43, %v11300_v1  ;;  %v16617_v3 = vcombine.low %v11296_v43, %v11300_v1 }
 0x98b   : > { %14609 = vmatpush1.bf16.msra.mxu1 %v16785_v48  ;;  %14569 = vmatprep.subr.bf16.mxu0 %v16650_v7  ;;  %v11428_v26 = vld [vmem:[%s25524_s15 + $0x468] sm:$0xff] }
 0x98c   : > { %14610 = vmatprep.subr.bf16.mxu1 %v16778_v5  ;;  %v16746_v31 = vcombine.high %v11424_v60, %v11428_v26  ;;  %v11292_v36 = vld [vmem:[%s25524_s15 + $0x28] sm:$0xff]  ;;  %v16745_v0 = vcombine.low %v11424_v60, %v11428_v26 }
 0x98d   : > { %v11416_v59 = vld [vmem:[%s25524_s15 + $0x408] sm:$0xff]  ;;  %v16610_v56 = vcombine.high %v11288_v51, %v11292_v36  ;;  %v16609_v48 = vcombine.low %v11288_v51, %v11292_v36 }
 0x98e   : > { %14570 = vmatpush1.bf16.msra.mxu0 %v16649_v17  ;;  %v11420_v50 = vld [vmem:[%s25524_s15 + $0x428] sm:$0xff] }
 0x98f   : > { %14611 = vmatpush1.bf16.msra.mxu1 %v16777_v15  ;;  %14571 = vmatprep.subr.bf16.mxu0 %v16642_v10  ;;  %v16738_v46 = vcombine.high %v11416_v59, %v11420_v50  ;;  %v11408_v38 = vld [vmem:[%s25524_s15 + $0x3c8] sm:$0xff]  ;;  %v16737_v7 = vcombine.low %v11416_v59, %v11420_v50 }
 0x990   : > { %14612 = vmatprep.subr.bf16.mxu1 %v16770_v29  ;;  %v11412_v30 = vld [vmem:[%s25524_s15 + $0x3e8] sm:$0xff] }
 0x991   : > { %v11536_v44 = vld [vmem:[%s25524_s15 + $0x7c8] sm:$0xff]  ;;  %v16730_v5 = vcombine.high %v11408_v38, %v11412_v30  ;;  %v16729_v15 = vcombine.low %v11408_v38, %v11412_v30 }
 0x992   : > { %14572 = vmatpush1.bf16.msra.mxu0 %v16641_v19  ;;  %v11540_v45 = vld [vmem:[%s25524_s15 + $0x7e8] sm:$0xff] }
 0x993   : > { %14613 = vmatpush1.bf16.msra.mxu1 %v16769_v9  ;;  %14573 = vmatprep.subr.bf16.mxu0 %v16634_v14  ;;  %v16858_v13 = vcombine.high %v11536_v44, %v11540_v45  ;;  %v11400_v47 = vld [vmem:[%s25524_s15 + $0x388] sm:$0xff]  ;;  %v16857_v10 = vcombine.low %v11536_v44, %v11540_v45 }
 0x994   : > { %14614 = vmatprep.subr.bf16.mxu1 %v16762_v55  ;;  %v11404_v4 = vld [vmem:[%s25524_s15 + $0x3a8] sm:$0xff] }
 0x995   : > { %v11528_v58 = vld [vmem:[%s25524_s15 + $0x788] sm:$0xff]  ;;  %v16722_v29 = vcombine.high %v11400_v47, %v11404_v4  ;;  %v16721_v9 = vcombine.low %v11400_v47, %v11404_v4 }
 0x996   : > { %14574 = vmatpush1.bf16.msra.mxu0 %v16633_v11  ;;  %v11532_v17 = vld [vmem:[%s25524_s15 + $0x7a8] sm:$0xff] }
 0x997   : > { %14615 = vmatpush1.bf16.msra.mxu1 %v16761_v8  ;;  %14575 = vmatprep.subr.bf16.mxu0 %v16626_v23  ;;  %v16850_v22 = vcombine.high %v11528_v58, %v11532_v17  ;;  %v11392_v32 = vld [vmem:[%s25524_s15 + $0x348] sm:$0xff]  ;;  %v16849_v14 = vcombine.low %v11528_v58, %v11532_v17 }
 0x998   : > { %14616 = vmatprep.subr.bf16.mxu1 %v16754_v12  ;;  %v11396_v33 = vld [vmem:[%s25524_s15 + $0x368] sm:$0xff] }
 0x999   : > { %v11520_v37 = vld [vmem:[%s25524_s15 + $0x748] sm:$0xff]  ;;  %v16714_v55 = vcombine.high %v11392_v32, %v11396_v33  ;;  %v16713_v8 = vcombine.low %v11392_v32, %v11396_v33 }
 0x99a   : > { %14576 = vmatpush1.bf16.msra.mxu0 %v16625_v61  ;;  %v11524_v19 = vld [vmem:[%s25524_s15 + $0x768] sm:$0xff] }
 0x99b   : > { %14617 = vmatpush1.bf16.msra.mxu1 %v16753_v42  ;;  %14577 = vmatprep.subr.bf16.mxu0 %v16618_v27  ;;  %v16842_v41 = vcombine.high %v11520_v37, %v11524_v19  ;;  %v11384_v2 = vld [vmem:[%s25524_s15 + $0x308] sm:$0xff]  ;;  %v16841_v23 = vcombine.low %v11520_v37, %v11524_v19 }
 0x99c   : > { %14618 = vmatprep.subr.bf16.mxu1 %v16746_v31  ;;  %v11388_v53 = vld [vmem:[%s25524_s15 + $0x328] sm:$0xff] }
 0x99d   : > { %v11512_v54 = vld [vmem:[%s25524_s15 + $0x708] sm:$0xff]  ;;  %v16706_v12 = vcombine.high %v11384_v2, %v11388_v53  ;;  %v16705_v42 = vcombine.low %v11384_v2, %v11388_v53 }
 0x99e   : > { %14578 = vmatpush1.bf16.msra.mxu0 %v16617_v3  ;;  %v11516_v11 = vld [vmem:[%s25524_s15 + $0x728] sm:$0xff] }
 0x99f   : > { %14619 = vmatpush1.bf16.msra.mxu1 %v16745_v0  ;;  %14579 = vmatprep.subr.bf16.mxu0 %v16610_v56  ;;  %v16834_v43 = vcombine.high %v11512_v54, %v11516_v11  ;;  %v11376_v1 = vld [vmem:[%s25524_s15 + $0x2c8] sm:$0xff]  ;;  %v16833_v27 = vcombine.low %v11512_v54, %v11516_v11 }
 0x9a0   : > { %14620 = vmatprep.subr.bf16.mxu1 %v16738_v46  ;;  %v11380_v60 = vld [vmem:[%s25524_s15 + $0x2e8] sm:$0xff] }
 0x9a1   : > { %v11504_v26 = vld [vmem:[%s25524_s15 + $0x6c8] sm:$0xff]  ;;  %v16698_v31 = vcombine.high %v11376_v1, %v11380_v60  ;;  %v16697_v0 = vcombine.low %v11376_v1, %v11380_v60 }
 0x9a2   : > { %14580 = vmatpush1.bf16.msra.mxu0 %v16609_v48  ;;  %v11508_v61 = vld [vmem:[%s25524_s15 + $0x6e8] sm:$0xff] }
 0x9a3   : > { %14621 = vmatpush1.bf16.msra.mxu1 %v16737_v7  ;;  %14581 = vmatprep.subr.bf16.mxu0 %v16730_v5  ;;  %v16826_v51 = vcombine.high %v11504_v26, %v11508_v61  ;;  %v11368_v36 = vld [vmem:[%s25524_s15 + $0x288] sm:$0xff]  ;;  %v16825_v56 = vcombine.low %v11504_v26, %v11508_v61 }
 0x9a4   : > { %14622 = vmatprep.subr.bf16.mxu1 %v16858_v13  ;;  %v11372_v59 = vld [vmem:[%s25524_s15 + $0x2a8] sm:$0xff] }
 0x9a5   : > { %v11496_v50 = vld [vmem:[%s25524_s15 + $0x688] sm:$0xff]  ;;  %v16690_v46 = vcombine.high %v11368_v36, %v11372_v59  ;;  %v16689_v7 = vcombine.low %v11368_v36, %v11372_v59 }
 0x9a6   : > { %14582 = vmatpush2.bf16.msra.mxu0 %v16729_v15  ;;  %v11500_v3 = vld [vmem:[%s25524_s15 + $0x6a8] sm:$0xff] }
 0x9a7   : > { %14623 = vmatpush2.bf16.msra.mxu1 %v16857_v10  ;;  %14583 = vmatprep.subr.bf16.mxu0 %v16722_v29  ;;  %v16818_v38 = vcombine.high %v11496_v50, %v11500_v3  ;;  %v11360_v30 = vld [vmem:[%s25524_s15 + $0x248] sm:$0xff]  ;;  %v16817_v5 = vcombine.low %v11496_v50, %v11500_v3 }
 0x9a8   : > { %14624 = vmatprep.subr.bf16.mxu1 %v16850_v22  ;;  %v11364_v44 = vld [vmem:[%s25524_s15 + $0x268] sm:$0xff] }
 0x9a9   : > { %v11488_v45 = vld [vmem:[%s25524_s15 + $0x648] sm:$0xff]  ;;  %v16682_v13 = vcombine.high %v11360_v30, %v11364_v44  ;;  %v16681_v10 = vcombine.low %v11360_v30, %v11364_v44 }
 0x9aa   : > { %14584 = vmatpush2.bf16.msra.mxu0 %v16721_v9  ;;  %v11492_v48 = vld [vmem:[%s25524_s15 + $0x668] sm:$0xff] }
 0x9ab   : > { %14625 = vmatpush2.bf16.msra.mxu1 %v16849_v14  ;;  %14585 = vmatprep.subr.bf16.mxu0 %v16714_v55  ;;  %v16810_v47 = vcombine.high %v11488_v45, %v11492_v48  ;;  %v11352_v4 = vld [vmem:[%s25524_s15 + $0x208] sm:$0xff]  ;;  %v16809_v29 = vcombine.low %v11488_v45, %v11492_v48 }
 0x9ac   : > { %14626 = vmatprep.subr.bf16.mxu1 %v16842_v41  ;;  %v11356_v58 = vld [vmem:[%s25524_s15 + $0x228] sm:$0xff] }
 0x9ad   : > { %v11480_v17 = vld [vmem:[%s25524_s15 + $0x608] sm:$0xff]  ;;  %v16674_v22 = vcombine.high %v11352_v4, %v11356_v58  ;;  %v16673_v14 = vcombine.low %v11352_v4, %v11356_v58 }
 0x9ae   : > { %14586 = vmatpush2.bf16.msra.mxu0 %v16713_v8  ;;  %v11484_v15 = vld [vmem:[%s25524_s15 + $0x628] sm:$0xff] }
 0x9af   : > { %14627 = vmatpush2.bf16.msra.mxu1 %v16841_v23  ;;  %14587 = vmatprep.subr.bf16.mxu0 %v16706_v12  ;;  %v16802_v32 = vcombine.high %v11480_v17, %v11484_v15  ;;  %v11600_v33 = vld [vmem:[%s25524_s15 + $0x9c8] sm:$0xff]  ;;  %v16801_v55 = vcombine.low %v11480_v17, %v11484_v15 }
 0x9b0   : > { %14628 = vmatprep.subr.bf16.mxu1 %v16834_v43  ;;  %v11604_v37 = vld [vmem:[%s25524_s15 + $0x9e8] sm:$0xff] }
 0x9b1   : > { %v11728_v19 = vld [vmem:[%s25524_s15 + $0xdc8] sm:$0xff]  ;;  %v16922_v41 = vcombine.high %v11600_v33, %v11604_v37  ;;  %v16921_v11 = vcombine.low %v11600_v33, %v11604_v37 }
 0x9b2   : > { %14588 = vmatpush2.bf16.msra.mxu0 %v16705_v42  ;;  %v11732_v9 = vld [vmem:[%s25524_s15 + $0xde8] sm:$0xff] }
 0x9b3   : > { %14629 = vmatpush2.bf16.msra.mxu1 %v16833_v27  ;;  %14589 = vmatprep.subr.bf16.mxu0 %v16698_v31  ;;  %v17050_v2 = vcombine.high %v11728_v19, %v11732_v9  ;;  %v11592_v53 = vld [vmem:[%s25524_s15 + $0x988] sm:$0xff]  ;;  %v17049_v12 = vcombine.low %v11728_v19, %v11732_v9 }
 0x9b4   : > { %14630 = vmatprep.subr.bf16.mxu1 %v16826_v51  ;;  %v11596_v54 = vld [vmem:[%s25524_s15 + $0x9a8] sm:$0xff] }
 0x9b5   : > { %v11720_v8 = vld [vmem:[%s25524_s15 + $0xd88] sm:$0xff]  ;;  %v16914_v43 = vcombine.high %v11592_v53, %v11596_v54  ;;  %v16913_v27 = vcombine.low %v11592_v53, %v11596_v54 }
 0x9b6   : > { %14590 = vmatpush2.bf16.msra.mxu0 %v16697_v0  ;;  %v11724_v23 = vld [vmem:[%s25524_s15 + $0xda8] sm:$0xff] }
 0x9b7   : > { %14631 = vmatpush2.bf16.msra.mxu1 %v16825_v56  ;;  %14591 = vmatprep.subr.bf16.mxu0 %v16690_v46  ;;  %v11584_v1 = vld [vmem:[%s25524_s15 + $0x948] sm:$0xff]  ;;  %v17042_v26 = vcombine.high %v11720_v8, %v11724_v23  ;;  %v17041_v31 = vcombine.low %v11720_v8, %v11724_v23 }
 0x9b8   : > { %14632 = vmatprep.subr.bf16.mxu1 %v16818_v38  ;;  %v11588_v60 = vld [vmem:[%s25524_s15 + $0x968] sm:$0xff] }
 0x9b9   : > { %v11712_v61 = vld [vmem:[%s25524_s15 + $0xd48] sm:$0xff]  ;;  %v16906_v51 = vcombine.high %v11584_v1, %v11588_v60  ;;  %v16905_v56 = vcombine.low %v11584_v1, %v11588_v60 }
 0x9ba   : > { %14592 = vmatpush2.bf16.msra.mxu0 %v16689_v7  ;;  %v11716_v42 = vld [vmem:[%s25524_s15 + $0xd68] sm:$0xff] }
 0x9bb   : > { %14633 = vmatpush2.bf16.msra.mxu1 %v16817_v5  ;;  %14593 = vmatprep.subr.bf16.mxu0 %v16682_v13  ;;  %v17034_v36 = vcombine.high %v11712_v61, %v11716_v42  ;;  %v11576_v59 = vld [vmem:[%s25524_s15 + $0x908] sm:$0xff]  ;;  %v17033_v46 = vcombine.low %v11712_v61, %v11716_v42 }
 0x9bc   : > { %14634 = vmatprep.subr.bf16.mxu1 %v16810_v47  ;;  %v11580_v50 = vld [vmem:[%s25524_s15 + $0x928] sm:$0xff] }
 0x9bd   : > { %v11704_v3 = vld [vmem:[%s25524_s15 + $0xd08] sm:$0xff]  ;;  %v16898_v38 = vcombine.high %v11576_v59, %v11580_v50  ;;  %v16897_v5 = vcombine.low %v11576_v59, %v11580_v50 }
 0x9be   : > { %14594 = vmatpush2.bf16.msra.mxu0 %v16681_v10  ;;  %v11708_v0 = vld [vmem:[%s25524_s15 + $0xd28] sm:$0xff] }
 0x9bf   : > { %14635 = vmatpush2.bf16.msra.mxu1 %v16809_v29  ;;  %14595 = vmatprep.subr.bf16.mxu0 %v16674_v22  ;;  %v17026_v30 = vcombine.high %v11704_v3, %v11708_v0  ;;  %v11568_v44 = vld [vmem:[%s25524_s15 + $0x8c8] sm:$0xff]  ;;  %v17025_v13 = vcombine.low %v11704_v3, %v11708_v0 }
 0x9c0   : > { %14636 = vmatprep.subr.bf16.mxu1 %v16802_v32  ;;  %v11572_v45 = vld [vmem:[%s25524_s15 + $0x8e8] sm:$0xff] }
 0x9c1   : > { %v11696_v48 = vld [vmem:[%s25524_s15 + $0xcc8] sm:$0xff]  ;;  %v16890_v47 = vcombine.high %v11568_v44, %v11572_v45  ;;  %v16889_v29 = vcombine.low %v11568_v44, %v11572_v45 }
 0x9c2   : > { %14596 = vmatpush2.bf16.msra.mxu0 %v16673_v14  ;;  %v11700_v7 = vld [vmem:[%s25524_s15 + $0xce8] sm:$0xff] }
 0x9c3   : > { %14637 = vmatpush2.bf16.msra.mxu1 %v16801_v55  ;;  %14647 = vmatprep.subr.bf16.mxu0 %v16922_v41  ;;  %v17018_v4 = vcombine.high %v11696_v48, %v11700_v7  ;;  %v11560_v58 = vld [vmem:[%s25524_s15 + $0x888] sm:$0xff]  ;;  %v17017_v22 = vcombine.low %v11696_v48, %v11700_v7 }
 0x9c4   : > { %14688 = vmatprep.subr.bf16.mxu1 %v17050_v2  ;;  %v11564_v17 = vld [vmem:[%s25524_s15 + $0x8a8] sm:$0xff] }
 0x9c5   : > { %14598 = vmatmul.mubr.bf16.vlgmr.msra.gmra.mxu0 %v23823_v39  ;;  %v11688_v15 = vld [vmem:[%s25524_s15 + $0xc88] sm:$0xff]  ;;  %v16882_v32 = vcombine.high %v11560_v58, %v11564_v17  ;;  %v16881_v55 = vcombine.low %v11560_v58, %v11564_v17 }
 0x9c6   : > { %14639 = vmatmul.mubr.bf16.vlgmr.msra.gmra.mxu1 %v23825_v40  ;;  %14648 = vmatpush1.bf16.msra.mxu0 %v16921_v11  ;;  %v11692_v10 = vld [vmem:[%s25524_s15 + $0xca8] sm:$0xff] }
 0x9c7   : > { %14679 = vmatprep.mubr.bf16.mxu0 %v24045_v52  ;;  %14689 = vmatpush1.bf16.msra.mxu1 %v17049_v12  ;;  %v17010_v33 = vcombine.high %v11688_v15, %v11692_v10  ;;  %v11552_v37 = vld [vmem:[%s25524_s15 + $0x848] sm:$0xff]  ;;  %v17009_v41 = vcombine.low %v11688_v15, %v11692_v10 }
 0x9c8   : > { %14720 = vmatprep.mubr.bf16.mxu1 %v24047_v24  ;;  %14649 = vmatprep.subr.bf16.mxu0 %v16914_v43  ;;  %v11556_v19 = vld [vmem:[%s25524_s15 + $0x868] sm:$0xff] }
 0x9c9   : > { %14690 = vmatprep.subr.bf16.mxu1 %v17042_v26  ;;  %v11680_v9 = vld [vmem:[%s25524_s15 + $0xc48] sm:$0xff]  ;;  %v16874_v2 = vcombine.high %v11552_v37, %v11556_v19  ;;  %v16873_v12 = vcombine.low %v11552_v37, %v11556_v19 }
 0x9ca   : > { %14650 = vmatpush1.bf16.msra.mxu0 %v16913_v27  ;;  %v11684_v14 = vld [vmem:[%s25524_s15 + $0xc68] sm:$0xff] }
 0x9cb   : > { %14691 = vmatpush1.bf16.msra.mxu1 %v17041_v31  ;;  %14651 = vmatprep.subr.bf16.mxu0 %v16906_v51  ;;  %v17002_v53 = vcombine.high %v11680_v9, %v11684_v14  ;;  %v11544_v54 = vld [vmem:[%s25524_s15 + $0x808] sm:$0xff]  ;;  %v17001_v43 = vcombine.low %v11680_v9, %v11684_v14 }
 0x9cc   : > { %14692 = vmatprep.subr.bf16.mxu1 %v17034_v36  ;;  %v11548_v11 = vld [vmem:[%s25524_s15 + $0x828] sm:$0xff] }
 0x9cd   : > { %v11672_v8 = vld [vmem:[%s25524_s15 + $0xc08] sm:$0xff]  ;;  %v16866_v1 = vcombine.high %v11544_v54, %v11548_v11  ;;  %v16865_v31 = vcombine.low %v11544_v54, %v11548_v11 }
 0x9ce   : > { %14652 = vmatpush1.bf16.msra.mxu0 %v16905_v56  ;;  %v11676_v23 = vld [vmem:[%s25524_s15 + $0xc28] sm:$0xff] }
 0x9cf   : > { %14693 = vmatpush1.bf16.msra.mxu1 %v17033_v46  ;;  %14653 = vmatprep.subr.bf16.mxu0 %v16898_v38  ;;  %v16994_v60 = vcombine.high %v11672_v8, %v11676_v23  ;;  %v11664_v26 = vld [vmem:[%s25524_s15 + $0xbc8] sm:$0xff]  ;;  %v16993_v51 = vcombine.low %v11672_v8, %v11676_v23 }
 0x9d0   : > { %14694 = vmatprep.subr.bf16.mxu1 %v17026_v30  ;;  %v11668_v61 = vld [vmem:[%s25524_s15 + $0xbe8] sm:$0xff] }
 0x9d1   : > { %v11792_v42 = vld [vmem:[%s25524_s15 + $0xfc8] sm:$0xff]  ;;  %v16986_v36 = vcombine.high %v11664_v26, %v11668_v61  ;;  %v16985_v46 = vcombine.low %v11664_v26, %v11668_v61 }
 0x9d2   : > { %14654 = vmatpush1.bf16.msra.mxu0 %v16897_v5  ;;  %v11796_v27 = vld [vmem:[%s25524_s15 + $0xfe8] sm:$0xff] }
 0x9d3   : > { %14695 = vmatpush1.bf16.msra.mxu1 %v17025_v13  ;;  %14655 = vmatprep.subr.bf16.mxu0 %v16890_v47  ;;  %v17114_v59 = vcombine.high %v11792_v42, %v11796_v27  ;;  %v11656_v50 = vld [vmem:[%s25524_s15 + $0xb88] sm:$0xff]  ;;  %v17113_v38 = vcombine.low %v11792_v42, %v11796_v27 }
 0x9d4   : > { %14696 = vmatprep.subr.bf16.mxu1 %v17018_v4  ;;  %v11660_v3 = vld [vmem:[%s25524_s15 + $0xba8] sm:$0xff] }
 0x9d5   : > { %v11784_v0 = vld [vmem:[%s25524_s15 + $0xf88] sm:$0xff]  ;;  %v16978_v30 = vcombine.high %v11656_v50, %v11660_v3  ;;  %v16977_v13 = vcombine.low %v11656_v50, %v11660_v3 }
 0x9d6   : > { %14656 = vmatpush1.bf16.msra.mxu0 %v16889_v29  ;;  %v11788_v56 = vld [vmem:[%s25524_s15 + $0xfa8] sm:$0xff] }
 0x9d7   : > { %14697 = vmatpush1.bf16.msra.mxu1 %v17017_v22  ;;  %14657 = vmatprep.subr.bf16.mxu0 %v16882_v32  ;;  %v17106_v44 = vcombine.high %v11784_v0, %v11788_v56  ;;  %v11648_v45 = vld [vmem:[%s25524_s15 + $0xb48] sm:$0xff]  ;;  %v17105_v47 = vcombine.low %v11784_v0, %v11788_v56 }
 0x9d8   : > { %14698 = vmatprep.subr.bf16.mxu1 %v17010_v33  ;;  %v11652_v48 = vld [vmem:[%s25524_s15 + $0xb68] sm:$0xff] }
 0x9d9   : > { %v11776_v7 = vld [vmem:[%s25524_s15 + $0xf48] sm:$0xff]  ;;  %v16970_v4 = vcombine.high %v11648_v45, %v11652_v48  ;;  %v16969_v22 = vcombine.low %v11648_v45, %v11652_v48  ;;  %v11345_v48 = vld [vmem:[%s25524_s15 + $0x1d0] sm:$0xff] }
 0x9da   : > { %14658 = vmatpush1.bf16.msra.mxu0 %v16881_v55  ;;  %v11780_v5 = vld [vmem:[%s25524_s15 + $0xf68] sm:$0xff] }
 0x9db   : > { %14699 = vmatpush1.bf16.msra.mxu1 %v17009_v41  ;;  %14659 = vmatprep.subr.bf16.mxu0 %v16874_v2  ;;  %v17098_v58 = vcombine.high %v11776_v7, %v11780_v5  ;;  %v11640_v17 = vld [vmem:[%s25524_s15 + $0xb08] sm:$0xff]  ;;  %v17097_v32 = vcombine.low %v11776_v7, %v11780_v5  ;;  %v11349_v7 = vld [vmem:[%s25524_s15 + $0x1f0] sm:$0xff] }
 0x9dc   : > { %14700 = vmatprep.subr.bf16.mxu1 %v17002_v53  ;;  %v11644_v15 = vld [vmem:[%s25524_s15 + $0xb28] sm:$0xff]  ;;  %v11473_v5 = vld [vmem:[%s25524_s15 + $0x5d0] sm:$0xff] }
 0x9dd   : > { %v11768_v10 = vld [vmem:[%s25524_s15 + $0xf08] sm:$0xff]  ;;  %v16962_v33 = vcombine.high %v11640_v17, %v11644_v15  ;;  %v16961_v41 = vcombine.low %v11640_v17, %v11644_v15  ;;  %v24438_v17 = vld [vmem:[%s25525_s16] sm:$0xff] }
 0x9de   : > { %14660 = vmatpush1.bf16.msra.mxu0 %v16873_v12  ;;  %v11772_v29 = vld [vmem:[%s25524_s15 + $0xf28] sm:$0xff] }
 0x9df   : > { %14701 = vmatpush1.bf16.msra.mxu1 %v17001_v43  ;;  %14661 = vmatprep.subr.bf16.mxu0 %v16866_v1  ;;  %v17090_v37 = vcombine.high %v11768_v10, %v11772_v29  ;;  %v11632_v19 = vld [vmem:[%s25524_s15 + $0xac8] sm:$0xff]  ;;  %v17089_v2 = vcombine.low %v11768_v10, %v11772_v29  ;;  %v11337_v10 = vld [vmem:[%s25524_s15 + $0x190] sm:$0xff] }
 0x9e0   : > { %14702 = vmatprep.subr.bf16.mxu1 %v16994_v60  ;;  %v11636_v9 = vld [vmem:[%s25524_s15 + $0xae8] sm:$0xff]  ;;  %v11341_v29 = vld [vmem:[%s25524_s15 + $0x1b0] sm:$0xff] }
 0x9e1   : > { %v11760_v14 = vld [vmem:[%s25524_s15 + $0xec8] sm:$0xff]  ;;  %v16954_v53 = vcombine.high %v11632_v19, %v11636_v9  ;;  %v16953_v43 = vcombine.low %v11632_v19, %v11636_v9  ;;  %v14368_v9 = vrot.slane %v24438_v17, %v25935_v63  ;;  %v11461_v63 = vld [vmem:[%s25524_s15 + $0x570] sm:$0xff] }
 0x9e2   : > { %14662 = vmatpush1.bf16.msra.mxu0 %v16865_v31  ;;  %v11764_v55 = vld [vmem:[%s25524_s15 + $0xee8] sm:$0xff] }
 0x9e3   : > { %14703 = vmatpush1.bf16.msra.mxu1 %v16993_v51  ;;  %14663 = vmatprep.subr.bf16.mxu0 %v16986_v36  ;;  %v17082_v54 = vcombine.high %v11760_v14, %v11764_v55  ;;  %v11624_v11 = vld [vmem:[%s25524_s15 + $0xa88] sm:$0xff]  ;;  %v17081_v1 = vcombine.low %v11760_v14, %v11764_v55  ;;  %v16660_v14 = vcombine.high %v11337_v10, %v11341_v29  ;;  %v11333_v55 = vld [vmem:[%s25524_s15 + $0x170] sm:$0xff] }
 0x9e4   : > { %14704 = vmatprep.subr.bf16.mxu1 %v17114_v59  ;;  %v11628_v8 = vld [vmem:[%s25524_s15 + $0xaa8] sm:$0xff] }
 0x9e5   : > { %v11752_v23 = vld [vmem:[%s25524_s15 + $0xe88] sm:$0xff]  ;;  %v16946_v60 = vcombine.high %v11624_v11, %v11628_v8  ;;  %v16945_v51 = vcombine.low %v11624_v11, %v11628_v8  ;;  %v16659_v8 = vcombine.low %v11337_v10, %v11341_v29  ;;  %v11433_v10 = vld [vmem:[%s25524_s15 + $0x490] sm:$0xff] }
 0x9e6   : > { %14664 = vmatpush2.bf16.msra.mxu0 %v16985_v46  ;;  %v11756_v12 = vld [vmem:[%s25524_s15 + $0xea8] sm:$0xff]  ;;  %v11437_v29 = vld [vmem:[%s25524_s15 + $0x4b0] sm:$0xff] }
 0x9e7   : > { %14705 = vmatpush2.bf16.msra.mxu1 %v17113_v38  ;;  %14665 = vmatprep.subr.bf16.mxu0 %v16978_v30  ;;  %v17074_v26 = vcombine.high %v11752_v23, %v11756_v12  ;;  %v11616_v61 = vld [vmem:[%s25524_s15 + $0xa48] sm:$0xff]  ;;  %v17073_v36 = vcombine.low %v11752_v23, %v11756_v12 }
 0x9e8   : > { %14706 = vmatprep.subr.bf16.mxu1 %v17106_v44  ;;  %v11620_v42 = vld [vmem:[%s25524_s15 + $0xa68] sm:$0xff] }
 0x9e9   : > { %v11744_v27 = vld [vmem:[%s25524_s15 + $0xe48] sm:$0xff]  ;;  %v16938_v59 = vcombine.high %v11616_v61, %v11620_v42  ;;  %v16937_v38 = vcombine.low %v11616_v61, %v11620_v42  ;;  %v11321_v42 = vld [vmem:[%s25524_s15 + $0x110] sm:$0xff] }
 0x9ea   : > { %14666 = vmatpush2.bf16.msra.mxu0 %v16977_v13  ;;  %v11748_v31 = vld [vmem:[%s25524_s15 + $0xe68] sm:$0xff]  ;;  %v11477_v13 = vld [vmem:[%s25524_s15 + $0x5f0] sm:$0xff] }
 0x9eb   : > { %14707 = vmatpush2.bf16.msra.mxu1 %v17105_v47  ;;  %14667 = vmatprep.subr.bf16.mxu0 %v16970_v4  ;;  %v17066_v50 = vcombine.high %v11744_v27, %v11748_v31  ;;  %v11608_v3 = vld [vmem:[%s25524_s15 + $0xa08] sm:$0xff]  ;;  %v17065_v30 = vcombine.low %v11744_v27, %v11748_v31  ;;  %v16796_v15 = vcombine.high %v11473_v5, %v11477_v13  ;;  %v11325_v27 = vld [vmem:[%s25524_s15 + $0x130] sm:$0xff] }
 0x9ec   : > { %14708 = vmatprep.subr.bf16.mxu1 %v17098_v58  ;;  %v11612_v0 = vld [vmem:[%s25524_s15 + $0xa28] sm:$0xff]  ;;  %v16668_v58 = vcombine.high %v11345_v48, %v11349_v7  ;;  %v16795_v19 = vcombine.low %v11473_v5, %v11477_v13  ;;  %v16643_v5 = vcombine.low %v11321_v42, %v11325_v27 }
 0x9ed   : > { %v11736_v56 = vld [vmem:[%s25524_s15 + $0xe08] sm:$0xff]  ;;  %v16930_v44 = vcombine.high %v11608_v3, %v11612_v0  ;;  %v16929_v47 = vcombine.low %v11608_v3, %v11612_v0 }
 0x9ee   : > { %14668 = vmatpush2.bf16.msra.mxu0 %v16969_v22  ;;  %v11740_v46 = vld [vmem:[%s25524_s15 + $0xe28] sm:$0xff]  ;;  %v16667_v22 = vcombine.low %v11345_v48, %v11349_v7  ;;  %v11441_v48 = vld [vmem:[%s25524_s15 + $0x4d0] sm:$0xff] }
 0x9ef   : > { %14709 = vmatpush2.bf16.msra.mxu1 %v17097_v32  ;;  %14669 = vmatprep.subr.bf16.mxu0 %v16962_v33  ;;  %v17058_v45 = vcombine.high %v11736_v56, %v11740_v46  ;;  %v17057_v4 = vcombine.low %v11736_v56, %v11740_v46  ;;  %v14364_v32 = vrot.slane %v24438_v17, %v25934_v62  ;;  %v11465_v33 = vld [vmem:[%s25524_s15 + $0x590] sm:$0xff] }
 0x9f0   : > { %14710 = vmatprep.subr.bf16.mxu1 %v17090_v37  ;;  %v11469_v37 = vld [vmem:[%s25524_s15 + $0x5b0] sm:$0xff] }
 0x9f1   : > { %v11329_v62 = vld [vmem:[%s25524_s15 + $0x150] sm:$0xff] }
 0x9f2   : > { %14670 = vmatpush2.bf16.msra.mxu0 %v16961_v41  ;;  %v16651_v3 = vcombine.low %v11329_v62, %v11333_v55  ;;  %v11445_v7 = vld [vmem:[%s25524_s15 + $0x4f0] sm:$0xff] }
 0x9f3   : > { %14711 = vmatpush2.bf16.msra.mxu1 %v17089_v2  ;;  %14671 = vmatprep.subr.bf16.mxu0 %v16954_v53  ;;  %v16788_v53 = vcombine.high %v11465_v33, %v11469_v37 }
 0x9f4   : > { %14712 = vmatprep.subr.bf16.mxu1 %v17082_v54  ;;  %v11457_v54 = vld [vmem:[%s25524_s15 + $0x550] sm:$0xff] }
 0x9f5   : > { %v16780_v61 = vcombine.high %v11457_v54, %v11461_v63  ;;  %v16779_v46 = vcombine.low %v11457_v54, %v11461_v63  ;;  %v11289_v54 = vld [vmem:[%s25524_s15 + $0x10] sm:$0xff] }
 0x9f6   : > { %14672 = vmatpush2.bf16.msra.mxu0 %v16953_v43  ;;  %v16787_v43 = vcombine.low %v11465_v33, %v11469_v37  ;;  %v16756_v37 = vcombine.high %v11433_v10, %v11437_v29  ;;  %v11293_v63 = vld [vmem:[%s25524_s15 + $0x30] sm:$0xff] }
 0x9f7   : > { %14713 = vmatpush2.bf16.msra.mxu1 %v17081_v1  ;;  %14673 = vmatprep.subr.bf16.mxu0 %v16946_v60  ;;  %v16652_v1 = vcombine.high %v11329_v62, %v11333_v55  ;;  %v11429_v62 = vld [vmem:[%s25524_s15 + $0x470] sm:$0xff] }
 0x9f8   : > { %14714 = vmatprep.subr.bf16.mxu1 %v17074_v26 }
 0x9fa   : > { %14674 = vmatpush2.bf16.msra.mxu0 %v16945_v51 }
 0x9fb   : > { %14715 = vmatpush2.bf16.msra.mxu1 %v17073_v36  ;;  %14675 = vmatprep.subr.bf16.mxu0 %v16938_v59  ;;  %v11449_v36 = vld [vmem:[%s25524_s15 + $0x510] sm:$0xff] }
 0x9fc   : > { %14716 = vmatprep.subr.bf16.mxu1 %v17066_v50  ;;  %v11453_v59 = vld [vmem:[%s25524_s15 + $0x530] sm:$0xff] }
 0x9fd   : > { %v16771_v13 = vcombine.low %v11449_v36, %v11453_v59 }
 0x9fe   : > { %14676 = vmatpush2.bf16.msra.mxu0 %v16937_v38  ;;  %v16644_v38 = vcombine.high %v11321_v42, %v11325_v27  ;;  %v11537_v42 = vld [vmem:[%s25524_s15 + $0x7d0] sm:$0xff] }
 0x9ff   : > { %14717 = vmatpush2.bf16.msra.mxu1 %v17065_v30  ;;  %14677 = vmatprep.subr.bf16.mxu0 %v16930_v44  ;;  %v16772_v30 = vcombine.high %v11449_v36, %v11453_v59  ;;  %v11313_v44 = vld [vmem:[%s25524_s15 + $0xd0] sm:$0xff] }
 0xa00   : > { %14718 = vmatprep.subr.bf16.mxu1 %v17058_v45  ;;  %v11317_v45 = vld [vmem:[%s25524_s15 + $0xf0] sm:$0xff] }
 0xa01   : > { %v11541_v27 = vld [vmem:[%s25524_s15 + $0x7f0] sm:$0xff] }
 0xa02   : > { %14678 = vmatpush2.bf16.msra.mxu0 %v16929_v47  ;;  %v16636_v47 = vcombine.high %v11313_v44, %v11317_v45  ;;  %v16860_v59 = vcombine.high %v11537_v42, %v11541_v27 }
 0xa03   : > { %14719 = vmatpush2.bf16.msra.mxu1 %v17057_v4  ;;  %14729 = vmatprep.subr.bf16.mxu0 %v16668_v58  ;;  %v16764_v4 = vcombine.high %v11441_v48, %v11445_v7  ;;  %v11305_v58 = vld [vmem:[%s25524_s15 + $0x90] sm:$0xff] }
 0xa04   : > { %14770 = vmatprep.subr.bf16.mxu1 %v16796_v15  ;;  %v11309_v15 = vld [vmem:[%s25524_s15 + $0xb0] sm:$0xff] }
 0xa05   : > { %14680 = vmatmul.mubr.bf16.vlgmr.msra.gmra.mxu0 %v24049_v21  ;;  %v14435_v41 = vpop.f32.mrf.mxu0  ;;  %v14476_v2 = vpop.f32.mrf.mxu1  ;;  %v16628_v33 = vcombine.high %v11305_v58, %v11309_v15  ;;  %v16627_v55 = vcombine.low %v11305_v58, %v11309_v15 }
 0xa06   : > { %14721 = vmatmul.mubr.bf16.vlgmr.msra.gmra.mxu1 %v24051_v57  ;;  %v14436_v11 = vadd.f32 %v14435_v41, %v14364_v32  ;;  %14730 = vmatpush1.bf16.msra.mxu0 %v16667_v22  ;;  %v16635_v22 = vcombine.low %v11313_v44, %v11317_v45  ;;  %v16763_v32 = vcombine.low %v11441_v48, %v11445_v7  ;;  %v11393_v48 = vld [vmem:[%s25524_s15 + $0x350] sm:$0xff] }
 0xa07   : > { %14761 = vmatprep.mubr.bf16.mxu0 %v23819_v34  ;;  %14771 = vmatpush1.bf16.msra.mxu1 %v16795_v19  ;;  %v14437_v23 = vpop.f32.mrf.mxu0  ;;  %v14478_v12 = vpop.f32.mrf.mxu1  ;;  %v11297_v19 = vld [vmem:[%s25524_s15 + $0x50] sm:$0xff]  ;;  %v16755_v41 = vcombine.low %v11433_v10, %v11437_v29 }
 0xa08   : > { %v24471_v60 = vadd.f32 %v14476_v2, %v14436_v11  ;;  %14802 = vmatprep.mubr.bf16.mxu1 %v23821_v20  ;;  %v14438_v26 = vadd.f32 %v14437_v23, %v14368_v9  ;;  %14731 = vmatprep.subr.bf16.mxu0 %v16660_v14  ;;  %v11301_v9 = vld [vmem:[%s25524_s15 + $0x70] sm:$0xff] }
 0xa09   : > { %14772 = vmatprep.subr.bf16.mxu1 %v16788_v53  ;;  %v14439_v31 = vpop.f32.mrf.mxu0  ;;  %v14480_v51 = vpop.f32.mrf.mxu1  ;;  %v11425_v14 = vld [vmem:[%s25524_s15 + $0x450] sm:$0xff]  ;;  %v16620_v2 = vcombine.high %v11297_v19, %v11301_v9  ;;  %v16619_v23 = vcombine.low %v11297_v19, %v11301_v9 }
 0xa0a   : > { %v24486_v50 = vadd.f32 %v14478_v12, %v14438_v26  ;;  %14732 = vmatpush1.bf16.msra.mxu0 %v16659_v8  ;;  %v16748_v53 = vcombine.high %v11425_v14, %v11429_v62  ;;  %v11417_v11 = vld [vmem:[%s25524_s15 + $0x410] sm:$0xff]  ;;  %v16747_v12 = vcombine.low %v11425_v14, %v11429_v62  ;;  %v16611_v31 = vcombine.low %v11289_v54, %v11293_v63 }
 0xa0b   : > { %14773 = vmatpush1.bf16.msra.mxu1 %v16787_v43  ;;  %v14440_v0 = vpop.f32.mrf.mxu0  ;;  %v14481_v56 = vpop.f32.mrf.mxu1  ;;  %14733 = vmatprep.subr.bf16.mxu0 %v16652_v1  ;;  %v11421_v8 = vld [vmem:[%s25524_s15 + $0x430] sm:$0xff]  ;;  %v16612_v43 = vcombine.high %v11289_v54, %v11293_v63 }
 0xa0c   : > { %14774 = vmatprep.subr.bf16.mxu1 %v16780_v61  ;;  %v16740_v1 = vcombine.high %v11417_v11, %v11421_v8  ;;  %v11409_v26 = vld [vmem:[%s25524_s15 + $0x3d0] sm:$0xff]  ;;  %v16739_v51 = vcombine.low %v11417_v11, %v11421_v8 }
 0xa0d   : > { %v11413_v61 = vld [vmem:[%s25524_s15 + $0x3f0] sm:$0xff] }
 0xa0e   : > { %14734 = vmatpush1.bf16.msra.mxu0 %v16651_v3  ;;  %v16732_v36 = vcombine.high %v11409_v26, %v11413_v61  ;;  %v11401_v3 = vld [vmem:[%s25524_s15 + $0x390] sm:$0xff] }
 0xa0f   : > { %14775 = vmatpush1.bf16.msra.mxu1 %v16779_v46  ;;  %14735 = vmatprep.subr.bf16.mxu0 %v16644_v38  ;;  %v11405_v0 = vld [vmem:[%s25524_s15 + $0x3b0] sm:$0xff]  ;;  %v16731_v38 = vcombine.low %v11409_v26, %v11413_v61 }
 0xa10   : > { %14776 = vmatprep.subr.bf16.mxu1 %v16772_v30  ;;  %v11529_v56 = vld [vmem:[%s25524_s15 + $0x790] sm:$0xff]  ;;  %v16859_v30 = vcombine.low %v11537_v42, %v11541_v27  ;;  %v16724_v44 = vcombine.high %v11401_v3, %v11405_v0 }
 0xa11   : > { %v11533_v46 = vld [vmem:[%s25524_s15 + $0x7b0] sm:$0xff] }
 0xa12   : > { %14736 = vmatpush1.bf16.msra.mxu0 %v16643_v5  ;;  %v16852_v45 = vcombine.high %v11529_v56, %v11533_v46  ;;  %v11397_v7 = vld [vmem:[%s25524_s15 + $0x370] sm:$0xff] }
 0xa13   : > { %14777 = vmatpush1.bf16.msra.mxu1 %v16771_v13  ;;  %14737 = vmatprep.subr.bf16.mxu0 %v16636_v47  ;;  %v11521_v5 = vld [vmem:[%s25524_s15 + $0x750] sm:$0xff]  ;;  %v16723_v47 = vcombine.low %v11401_v3, %v11405_v0  ;;  %v16716_v58 = vcombine.high %v11393_v48, %v11397_v7 }
 0xa14   : > { %14778 = vmatprep.subr.bf16.mxu1 %v16764_v4  ;;  %v11525_v13 = vld [vmem:[%s25524_s15 + $0x770] sm:$0xff]  ;;  %v16851_v4 = vcombine.low %v11529_v56, %v11533_v46 }
 0xa15   : > { %v16844_v15 = vcombine.high %v11521_v5, %v11525_v13  ;;  %v11385_v10 = vld [vmem:[%s25524_s15 + $0x310] sm:$0xff] }
 0xa16   : > { %14738 = vmatpush1.bf16.msra.mxu0 %v16635_v22  ;;  %v11389_v29 = vld [vmem:[%s25524_s15 + $0x330] sm:$0xff] }
 0xa17   : > { %14779 = vmatpush1.bf16.msra.mxu1 %v16763_v32  ;;  %14739 = vmatprep.subr.bf16.mxu0 %v16628_v33  ;;  %v11513_v22 = vld [vmem:[%s25524_s15 + $0x710] sm:$0xff]  ;;  %v16715_v33 = vcombine.low %v11393_v48, %v11397_v7  ;;  %v16708_v19 = vcombine.high %v11385_v10, %v11389_v29 }
 0xa18   : > { %14780 = vmatprep.subr.bf16.mxu1 %v16756_v37  ;;  %v11517_v32 = vld [vmem:[%s25524_s15 + $0x730] sm:$0xff]  ;;  %v16843_v37 = vcombine.low %v11521_v5, %v11525_v13 }
 0xa19   : > { %v16836_v9 = vcombine.high %v11513_v22, %v11517_v32  ;;  %v11377_v14 = vld [vmem:[%s25524_s15 + $0x2d0] sm:$0xff] }
 0xa1a   : > { %14740 = vmatpush1.bf16.msra.mxu0 %v16627_v55  ;;  %v11381_v62 = vld [vmem:[%s25524_s15 + $0x2f0] sm:$0xff] }
 0xa1b   : > { %14781 = vmatpush1.bf16.msra.mxu1 %v16755_v41  ;;  %14741 = vmatprep.subr.bf16.mxu0 %v16620_v2  ;;  %v11505_v55 = vld [vmem:[%s25524_s15 + $0x6d0] sm:$0xff]  ;;  %v16707_v2 = vcombine.low %v11385_v10, %v11389_v29  ;;  %v16700_v54 = vcombine.high %v11377_v14, %v11381_v62 }
 0xa1c   : > { %14782 = vmatprep.subr.bf16.mxu1 %v16748_v53  ;;  %v11509_v41 = vld [vmem:[%s25524_s15 + $0x6f0] sm:$0xff]  ;;  %v16835_v53 = vcombine.low %v11513_v22, %v11517_v32 }
 0xa1d   : > { %v16828_v63 = vcombine.high %v11505_v55, %v11509_v41  ;;  %v11369_v11 = vld [vmem:[%s25524_s15 + $0x290] sm:$0xff] }
 0xa1e   : > { %14742 = vmatpush1.bf16.msra.mxu0 %v16619_v23  ;;  %v11373_v8 = vld [vmem:[%s25524_s15 + $0x2b0] sm:$0xff] }
 0xa1f   : > { %14783 = vmatpush1.bf16.msra.mxu1 %v16747_v12  ;;  %14743 = vmatprep.subr.bf16.mxu0 %v16612_v43  ;;  %v11497_v23 = vld [vmem:[%s25524_s15 + $0x690] sm:$0xff]  ;;  %v16699_v43 = vcombine.low %v11377_v14, %v11381_v62  ;;  %v16692_v26 = vcombine.high %v11369_v11, %v11373_v8 }
 0xa20   : > { %14784 = vmatprep.subr.bf16.mxu1 %v16740_v1  ;;  %v11501_v12 = vld [vmem:[%s25524_s15 + $0x6b0] sm:$0xff]  ;;  %v16827_v1 = vcombine.low %v11505_v55, %v11509_v41 }
 0xa21   : > { %v16820_v61 = vcombine.high %v11497_v23, %v11501_v12  ;;  %v11361_v42 = vld [vmem:[%s25524_s15 + $0x250] sm:$0xff] }
 0xa22   : > { %14744 = vmatpush1.bf16.msra.mxu0 %v16611_v31  ;;  %v11365_v27 = vld [vmem:[%s25524_s15 + $0x270] sm:$0xff] }
 0xa23   : > { %14785 = vmatpush1.bf16.msra.mxu1 %v16739_v51  ;;  %14745 = vmatprep.subr.bf16.mxu0 %v16732_v36  ;;  %v11489_v31 = vld [vmem:[%s25524_s15 + $0x650] sm:$0xff]  ;;  %v16691_v36 = vcombine.low %v11369_v11, %v11373_v8  ;;  %v16684_v3 = vcombine.high %v11361_v42, %v11365_v27 }
 0xa24   : > { %14786 = vmatprep.subr.bf16.mxu1 %v16860_v59  ;;  %v11493_v51 = vld [vmem:[%s25524_s15 + $0x670] sm:$0xff]  ;;  %v16819_v59 = vcombine.low %v11497_v23, %v11501_v12 }
 0xa25   : > { %v16812_v0 = vcombine.high %v11489_v31, %v11493_v51  ;;  %v11353_v56 = vld [vmem:[%s25524_s15 + $0x210] sm:$0xff] }
 0xa26   : > { %14746 = vmatpush2.bf16.msra.mxu0 %v16731_v38  ;;  %v11357_v46 = vld [vmem:[%s25524_s15 + $0x230] sm:$0xff] }
 0xa27   : > { %14787 = vmatpush2.bf16.msra.mxu1 %v16859_v30  ;;  %14747 = vmatprep.subr.bf16.mxu0 %v16724_v44  ;;  %v11481_v38 = vld [vmem:[%s25524_s15 + $0x610] sm:$0xff]  ;;  %v16683_v44 = vcombine.low %v11361_v42, %v11365_v27  ;;  %v16676_v48 = vcombine.high %v11353_v56, %v11357_v46 }
 0xa28   : > { %14788 = vmatprep.subr.bf16.mxu1 %v16852_v45  ;;  %v11485_v30 = vld [vmem:[%s25524_s15 + $0x630] sm:$0xff]  ;;  %v16811_v45 = vcombine.low %v11489_v31, %v11493_v51 }
 0xa29   : > { %v16804_v7 = vcombine.high %v11481_v38, %v11485_v30  ;;  %v11601_v5 = vld [vmem:[%s25524_s15 + $0x9d0] sm:$0xff] }
 0xa2a   : > { %14748 = vmatpush2.bf16.msra.mxu0 %v16723_v47  ;;  %v11605_v13 = vld [vmem:[%s25524_s15 + $0x9f0] sm:$0xff] }
 0xa2b   : > { %14789 = vmatpush2.bf16.msra.mxu1 %v16851_v4  ;;  %14749 = vmatprep.subr.bf16.mxu0 %v16716_v58  ;;  %v11729_v47 = vld [vmem:[%s25524_s15 + $0xdd0] sm:$0xff]  ;;  %v16675_v58 = vcombine.low %v11353_v56, %v11357_v46  ;;  %v16924_v10 = vcombine.high %v11601_v5, %v11605_v13 }
 0xa2c   : > { %14790 = vmatprep.subr.bf16.mxu1 %v16844_v15  ;;  %v11733_v4 = vld [vmem:[%s25524_s15 + $0xdf0] sm:$0xff]  ;;  %v16803_v15 = vcombine.low %v11481_v38, %v11485_v30 }
 0xa2d   : > { %v17052_v29 = vcombine.high %v11729_v47, %v11733_v4  ;;  %v11593_v22 = vld [vmem:[%s25524_s15 + $0x990] sm:$0xff] }
 0xa2e   : > { %14750 = vmatpush2.bf16.msra.mxu0 %v16715_v33  ;;  %v11597_v32 = vld [vmem:[%s25524_s15 + $0x9b0] sm:$0xff]  ;;  %v16923_v33 = vcombine.low %v11601_v5, %v11605_v13 }
 0xa2f   : > { %14791 = vmatpush2.bf16.msra.mxu1 %v16843_v37  ;;  %14751 = vmatprep.subr.bf16.mxu0 %v16708_v19  ;;  %v11721_v37 = vld [vmem:[%s25524_s15 + $0xd90] sm:$0xff]  ;;  %v16916_v14 = vcombine.high %v11593_v22, %v11597_v32  ;;  %v16915_v8 = vcombine.low %v11593_v22, %v11597_v32 }
 0xa30   : > { %14792 = vmatprep.subr.bf16.mxu1 %v16836_v9  ;;  %v11725_v19 = vld [vmem:[%s25524_s15 + $0xdb0] sm:$0xff]  ;;  %v17051_v9 = vcombine.low %v11729_v47, %v11733_v4 }
 0xa31   : > { %v11585_v62 = vld [vmem:[%s25524_s15 + $0x950] sm:$0xff] }
 0xa32   : > { %14752 = vmatpush2.bf16.msra.mxu0 %v16707_v2  ;;  %v11589_v55 = vld [vmem:[%s25524_s15 + $0x970] sm:$0xff] }
 0xa33   : > { %14793 = vmatpush2.bf16.msra.mxu1 %v16835_v53  ;;  %14753 = vmatprep.subr.bf16.mxu0 %v16700_v54  ;;  %v17044_v53 = vcombine.high %v11721_v37, %v11725_v19  ;;  %v11713_v54 = vld [vmem:[%s25524_s15 + $0xd50] sm:$0xff] }
 0xa34   : > { %14794 = vmatprep.subr.bf16.mxu1 %v16828_v63  ;;  %v11717_v63 = vld [vmem:[%s25524_s15 + $0xd70] sm:$0xff] }
 0xa35   : > { %v17036_v42 = vcombine.high %v11713_v54, %v11717_v63  ;;  %v11581_v27 = vld [vmem:[%s25524_s15 + $0x930] sm:$0xff]  ;;  %v17035_v46 = vcombine.low %v11713_v54, %v11717_v63 }
 0xa36   : > { %14754 = vmatpush2.bf16.msra.mxu0 %v16699_v43  ;;  %v17043_v43 = vcombine.low %v11721_v37, %v11725_v19  ;;  %v11553_v19 = vld [vmem:[%s25524_s15 + $0x850] sm:$0xff] }
 0xa37   : > { %14795 = vmatpush2.bf16.msra.mxu1 %v16827_v1  ;;  %14755 = vmatprep.subr.bf16.mxu0 %v16692_v26  ;;  %v16908_v1 = vcombine.high %v11585_v62, %v11589_v55  ;;  %v11545_v54 = vld [vmem:[%s25524_s15 + $0x810] sm:$0xff] }
 0xa38   : > { %14796 = vmatprep.subr.bf16.mxu1 %v16820_v61  ;;  %v11549_v63 = vld [vmem:[%s25524_s15 + $0x830] sm:$0xff] }
 0xa3a   : > { %14756 = vmatpush2.bf16.msra.mxu0 %v16691_v36  ;;  %v11705_v36 = vld [vmem:[%s25524_s15 + $0xd10] sm:$0xff] }
 0xa3b   : > { %14797 = vmatpush2.bf16.msra.mxu1 %v16819_v59  ;;  %14757 = vmatprep.subr.bf16.mxu0 %v16684_v3  ;;  %v16907_v3 = vcombine.low %v11585_v62, %v11589_v55  ;;  %v11685_v62 = vld [vmem:[%s25524_s15 + $0xc70] sm:$0xff] }
 0xa3c   : > { %14798 = vmatprep.subr.bf16.mxu1 %v16812_v0 }
 0xa3e   : > { %14758 = vmatpush2.bf16.msra.mxu0 %v16683_v44  ;;  %v11569_v44 = vld [vmem:[%s25524_s15 + $0x8d0] sm:$0xff] }
 0xa3f   : > { %14799 = vmatpush2.bf16.msra.mxu1 %v16811_v45  ;;  %14759 = vmatprep.subr.bf16.mxu0 %v16676_v48  ;;  %v11573_v45 = vld [vmem:[%s25524_s15 + $0x8f0] sm:$0xff] }
 0xa40   : > { %14800 = vmatprep.subr.bf16.mxu1 %v16804_v7  ;;  %v11697_v48 = vld [vmem:[%s25524_s15 + $0xcd0] sm:$0xff]  ;;  %v16892_v47 = vcombine.high %v11569_v44, %v11573_v45  ;;  %v16891_v22 = vcombine.low %v11569_v44, %v11573_v45 }
 0xa41   : > { %v11701_v7 = vld [vmem:[%s25524_s15 + $0xcf0] sm:$0xff] }
 0xa42   : > { %14760 = vmatpush2.bf16.msra.mxu0 %v16675_v58  ;;  %v17020_v4 = vcombine.high %v11697_v48, %v11701_v7  ;;  %v11561_v58 = vld [vmem:[%s25524_s15 + $0x890] sm:$0xff]  ;;  %v17019_v32 = vcombine.low %v11697_v48, %v11701_v7 }
 0xa43   : > { %14801 = vmatpush2.bf16.msra.mxu1 %v16803_v15  ;;  %14811 = vmatprep.subr.bf16.mxu0 %v16924_v10  ;;  %v11565_v15 = vld [vmem:[%s25524_s15 + $0x8b0] sm:$0xff] }
 0xa44   : > { %14852 = vmatprep.subr.bf16.mxu1 %v17052_v29  ;;  %v11689_v10 = vld [vmem:[%s25524_s15 + $0xc90] sm:$0xff]  ;;  %v16883_v55 = vcombine.low %v11561_v58, %v11565_v15 }
 0xa45   : > { %v14517_v41 = vpop.f32.mrf.mxu0  ;;  %v14558_v2 = vpop.f32.mrf.mxu1  ;;  %14762 = vmatmul.mubr.bf16.vlgmr.msra.gmra.mxu0 %v23823_v39  ;;  %v11693_v29 = vld [vmem:[%s25524_s15 + $0xcb0] sm:$0xff] }
 0xa46   : > { %v14518_v11 = vadd.f32 %v14517_v41, %v24471_v60  ;;  %14803 = vmatmul.mubr.bf16.vlgmr.msra.gmra.mxu1 %v23825_v40  ;;  %14812 = vmatpush1.bf16.msra.mxu0 %v16923_v33  ;;  %v11577_v60 = vld [vmem:[%s25524_s15 + $0x910] sm:$0xff]  ;;  %v16884_v33 = vcombine.high %v11561_v58, %v11565_v15  ;;  %v17012_v37 = vcombine.high %v11689_v10, %v11693_v29 }
 0xa47   : > { %14843 = vmatprep.mubr.bf16.mxu0 %v24045_v52  ;;  %14853 = vmatpush1.bf16.msra.mxu1 %v17051_v9  ;;  %v14519_v23 = vpop.f32.mrf.mxu0  ;;  %v14560_v12 = vpop.f32.mrf.mxu1  ;;  %v16900_v38 = vcombine.high %v11577_v60, %v11581_v27  ;;  %v16899_v5 = vcombine.low %v11577_v60, %v11581_v27  ;;  %v11557_v9 = vld [vmem:[%s25524_s15 + $0x870] sm:$0xff]  ;;  %v17011_v41 = vcombine.low %v11689_v10, %v11693_v29 }
 0xa48   : > { %v24672_v26 = vadd.f32 %v14558_v2, %v14518_v11  ;;  %14884 = vmatprep.mubr.bf16.mxu1 %v24047_v24  ;;  %v14520_v61 = vadd.f32 %v14519_v23, %v24486_v50  ;;  %14813 = vmatprep.subr.bf16.mxu0 %v16916_v14  ;;  %v11709_v50 = vld [vmem:[%s25524_s15 + $0xd30] sm:$0xff]  ;;  %v16876_v2 = vcombine.high %v11553_v19, %v11557_v9 }
 0xa49   : > { %v14521_v31 = vpop.f32.mrf.mxu0  ;;  %v14562_v51 = vpop.f32.mrf.mxu1  ;;  %14854 = vmatprep.subr.bf16.mxu1 %v17044_v53  ;;  %v17028_v30 = vcombine.high %v11705_v36, %v11709_v50  ;;  %v17027_v13 = vcombine.low %v11705_v36, %v11709_v50  ;;  %v11681_v14 = vld [vmem:[%s25524_s15 + $0xc50] sm:$0xff]  ;;  %v16875_v23 = vcombine.low %v11553_v19, %v11557_v9 }
 0xa4a   : > { %v24688_v59 = vadd.f32 %v14560_v12, %v14520_v61  ;;  %14814 = vmatpush1.bf16.msra.mxu0 %v16915_v8  ;;  %v17004_v53 = vcombine.high %v11681_v14, %v11685_v62  ;;  %v11673_v11 = vld [vmem:[%s25524_s15 + $0xc10] sm:$0xff]  ;;  %v17003_v12 = vcombine.low %v11681_v14, %v11685_v62  ;;  %v16867_v31 = vcombine.low %v11545_v54, %v11549_v63 }
 0xa4b   : > { %14855 = vmatpush1.bf16.msra.mxu1 %v17043_v43  ;;  %v14522_v0 = vpop.f32.mrf.mxu0  ;;  %v14563_v56 = vpop.f32.mrf.mxu1  ;;  %14815 = vmatprep.subr.bf16.mxu0 %v16908_v1  ;;  %v11677_v8 = vld [vmem:[%s25524_s15 + $0xc30] sm:$0xff]  ;;  %v16868_v43 = vcombine.high %v11545_v54, %v11549_v63 }
 0xa4c   : > { %14856 = vmatprep.subr.bf16.mxu1 %v17036_v42  ;;  %v16996_v1 = vcombine.high %v11673_v11, %v11677_v8  ;;  %v11665_v61 = vld [vmem:[%s25524_s15 + $0xbd0] sm:$0xff]  ;;  %v16995_v51 = vcombine.low %v11673_v11, %v11677_v8 }
 0xa4d   : > { %v11669_v42 = vld [vmem:[%s25524_s15 + $0xbf0] sm:$0xff] }
 0xa4e   : > { %14816 = vmatpush1.bf16.msra.mxu0 %v16907_v3  ;;  %v11793_v60 = vld [vmem:[%s25524_s15 + $0xfd0] sm:$0xff]  ;;  %v16988_v36 = vcombine.high %v11665_v61, %v11669_v42 }
 0xa4f   : > { %14857 = vmatpush1.bf16.msra.mxu1 %v17035_v46  ;;  %14817 = vmatprep.subr.bf16.mxu0 %v16900_v38  ;;  %v11797_v27 = vld [vmem:[%s25524_s15 + $0xff0] sm:$0xff]  ;;  %v16987_v38 = vcombine.low %v11665_v61, %v11669_v42 }
 0xa50   : > { %14858 = vmatprep.subr.bf16.mxu1 %v17028_v30  ;;  %v17116_v50 = vcombine.high %v11793_v60, %v11797_v27  ;;  %v11657_v3 = vld [vmem:[%s25524_s15 + $0xb90] sm:$0xff]  ;;  %v17115_v30 = vcombine.low %v11793_v60, %v11797_v27 }
 0xa51   : > { %v11661_v0 = vld [vmem:[%s25524_s15 + $0xbb0] sm:$0xff] }
 0xa52   : > { %14818 = vmatpush1.bf16.msra.mxu0 %v16899_v5  ;;  %v11785_v56 = vld [vmem:[%s25524_s15 + $0xf90] sm:$0xff]  ;;  %v16980_v44 = vcombine.high %v11657_v3, %v11661_v0 }
 0xa53   : > { %14859 = vmatpush1.bf16.msra.mxu1 %v17027_v13  ;;  %14819 = vmatprep.subr.bf16.mxu0 %v16892_v47  ;;  %v11789_v46 = vld [vmem:[%s25524_s15 + $0xfb0] sm:$0xff]  ;;  %v16979_v47 = vcombine.low %v11657_v3, %v11661_v0 }
 0xa54   : > { %14860 = vmatprep.subr.bf16.mxu1 %v17020_v4  ;;  %v17108_v45 = vcombine.high %v11785_v56, %v11789_v46  ;;  %v11649_v48 = vld [vmem:[%s25524_s15 + $0xb50] sm:$0xff]  ;;  %v17107_v4 = vcombine.low %v11785_v56, %v11789_v46 }
 0xa55   : > { %v11653_v7 = vld [vmem:[%s25524_s15 + $0xb70] sm:$0xff] }
 0xa56   : > { %14820 = vmatpush1.bf16.msra.mxu0 %v16891_v22  ;;  %v11777_v5 = vld [vmem:[%s25524_s15 + $0xf50] sm:$0xff]  ;;  %v16972_v58 = vcombine.high %v11649_v48, %v11653_v7 }
 0xa57   : > { %14861 = vmatpush1.bf16.msra.mxu1 %v17019_v32  ;;  %14821 = vmatprep.subr.bf16.mxu0 %v16884_v33  ;;  %v11781_v13 = vld [vmem:[%s25524_s15 + $0xf70] sm:$0xff]  ;;  %v16971_v33 = vcombine.low %v11649_v48, %v11653_v7 }
 0xa58   : > { %14862 = vmatprep.subr.bf16.mxu1 %v17012_v37  ;;  %v17100_v15 = vcombine.high %v11777_v5, %v11781_v13  ;;  %v11641_v10 = vld [vmem:[%s25524_s15 + $0xb10] sm:$0xff]  ;;  %v17099_v37 = vcombine.low %v11777_v5, %v11781_v13  ;;  %v11346_v5 = vld [vmem:[%s25524_s15 + $0x1d8] sm:$0xff] }
 0xa59   : > { %v11645_v29 = vld [vmem:[%s25524_s15 + $0xb30] sm:$0xff]  ;;  %v11350_v13 = vld [vmem:[%s25524_s15 + $0x1f8] sm:$0xff] }
 0xa5a   : > { %14822 = vmatpush1.bf16.msra.mxu0 %v16883_v55  ;;  %v11769_v22 = vld [vmem:[%s25524_s15 + $0xf10] sm:$0xff]  ;;  %v16964_v19 = vcombine.high %v11641_v10, %v11645_v29 }
 0xa5b   : > { %14863 = vmatpush1.bf16.msra.mxu1 %v17011_v41  ;;  %14823 = vmatprep.subr.bf16.mxu0 %v16876_v2  ;;  %v11773_v32 = vld [vmem:[%s25524_s15 + $0xf30] sm:$0xff]  ;;  %v16963_v2 = vcombine.low %v11641_v10, %v11645_v29  ;;  %v16670_v10 = vcombine.high %v11346_v5, %v11350_v13 }
 0xa5c   : > { %14864 = vmatprep.subr.bf16.mxu1 %v17004_v53  ;;  %v17092_v9 = vcombine.high %v11769_v22, %v11773_v32  ;;  %v11633_v14 = vld [vmem:[%s25524_s15 + $0xad0] sm:$0xff]  ;;  %v17091_v53 = vcombine.low %v11769_v22, %v11773_v32  ;;  %v11338_v22 = vld [vmem:[%s25524_s15 + $0x198] sm:$0xff] }
 0xa5d   : > { %v11637_v62 = vld [vmem:[%s25524_s15 + $0xaf0] sm:$0xff]  ;;  %v11342_v32 = vld [vmem:[%s25524_s15 + $0x1b8] sm:$0xff] }
 0xa5e   : > { %14824 = vmatpush1.bf16.msra.mxu0 %v16875_v23  ;;  %v11761_v55 = vld [vmem:[%s25524_s15 + $0xed0] sm:$0xff]  ;;  %v16956_v54 = vcombine.high %v11633_v14, %v11637_v62 }
 0xa5f   : > { %14865 = vmatpush1.bf16.msra.mxu1 %v17003_v12  ;;  %14825 = vmatprep.subr.bf16.mxu0 %v16868_v43  ;;  %v11765_v41 = vld [vmem:[%s25524_s15 + $0xef0] sm:$0xff]  ;;  %v16955_v43 = vcombine.low %v11633_v14, %v11637_v62  ;;  %v14376_v62 = vrot.slane %v24438_v17, %v11081_v28  ;;  %v11462_v28 = vld [vmem:[%s25524_s15 + $0x578] sm:$0xff] }
 0xa60   : > { %14866 = vmatprep.subr.bf16.mxu1 %v16996_v1  ;;  %v17084_v63 = vcombine.high %v11761_v55, %v11765_v41  ;;  %v11625_v11 = vld [vmem:[%s25524_s15 + $0xa90] sm:$0xff]  ;;  %v17083_v1 = vcombine.low %v11761_v55, %v11765_v41  ;;  %v16662_v55 = vcombine.high %v11338_v22, %v11342_v32  ;;  %v11334_v41 = vld [vmem:[%s25524_s15 + $0x178] sm:$0xff] }
 0xa61   : > { %v11629_v8 = vld [vmem:[%s25524_s15 + $0xab0] sm:$0xff] }
 0xa62   : > { %14826 = vmatpush1.bf16.msra.mxu0 %v16867_v31  ;;  %v11753_v23 = vld [vmem:[%s25524_s15 + $0xe90] sm:$0xff]  ;;  %v16948_v61 = vcombine.high %v11625_v11, %v11629_v8 }
 0xa63   : > { %14867 = vmatpush1.bf16.msra.mxu1 %v16995_v51  ;;  %14827 = vmatprep.subr.bf16.mxu0 %v16988_v36  ;;  %v11757_v12 = vld [vmem:[%s25524_s15 + $0xeb0] sm:$0xff]  ;;  %v16947_v36 = vcombine.low %v11625_v11, %v11629_v8  ;;  %v16661_v11 = vcombine.low %v11338_v22, %v11342_v32 }
 0xa64   : > { %14868 = vmatprep.subr.bf16.mxu1 %v17116_v50  ;;  %v17076_v42 = vcombine.high %v11753_v23, %v11757_v12  ;;  %v11617_v60 = vld [vmem:[%s25524_s15 + $0xa50] sm:$0xff]  ;;  %v17075_v50 = vcombine.low %v11753_v23, %v11757_v12 }
 0xa65   : > { %v11621_v27 = vld [vmem:[%s25524_s15 + $0xa70] sm:$0xff] }
 0xa66   : > { %14828 = vmatpush2.bf16.msra.mxu0 %v16987_v38  ;;  %v11745_v31 = vld [vmem:[%s25524_s15 + $0xe50] sm:$0xff]  ;;  %v16940_v3 = vcombine.high %v11617_v60, %v11621_v27 }
 0xa67   : > { %14869 = vmatpush2.bf16.msra.mxu1 %v17115_v30  ;;  %14829 = vmatprep.subr.bf16.mxu0 %v16980_v44  ;;  %v11749_v51 = vld [vmem:[%s25524_s15 + $0xe70] sm:$0xff]  ;;  %v16939_v44 = vcombine.low %v11617_v60, %v11621_v27  ;;  %v11322_v60 = vld [vmem:[%s25524_s15 + $0x118] sm:$0xff] }
 0xa68   : > { %14870 = vmatprep.subr.bf16.mxu1 %v17108_v45  ;;  %v17068_v0 = vcombine.high %v11745_v31, %v11749_v51  ;;  %v11609_v56 = vld [vmem:[%s25524_s15 + $0xa10] sm:$0xff]  ;;  %v17067_v45 = vcombine.low %v11745_v31, %v11749_v51  ;;  %v11450_v31 = vld [vmem:[%s25524_s15 + $0x518] sm:$0xff] }
 0xa69   : > { %v11613_v46 = vld [vmem:[%s25524_s15 + $0xa30] sm:$0xff] }
 0xa6a   : > { %14830 = vmatpush2.bf16.msra.mxu0 %v16979_v47  ;;  %v11737_v38 = vld [vmem:[%s25524_s15 + $0xe10] sm:$0xff]  ;;  %v16932_v48 = vcombine.high %v11609_v56, %v11613_v46  ;;  %v11474_v47 = vld [vmem:[%s25524_s15 + $0x5d8] sm:$0xff] }
 0xa6b   : > { %14871 = vmatpush2.bf16.msra.mxu1 %v17107_v4  ;;  %14831 = vmatprep.subr.bf16.mxu0 %v16972_v58  ;;  %v11741_v30 = vld [vmem:[%s25524_s15 + $0xe30] sm:$0xff]  ;;  %v11478_v4 = vld [vmem:[%s25524_s15 + $0x5f8] sm:$0xff]  ;;  %v16931_v58 = vcombine.low %v11609_v56, %v11613_v46 }
 0xa6c   : > { %14872 = vmatprep.subr.bf16.mxu1 %v17100_v15  ;;  %v17060_v7 = vcombine.high %v11737_v38, %v11741_v30  ;;  %v17059_v15 = vcombine.low %v11737_v38, %v11741_v30  ;;  %v16798_v29 = vcombine.high %v11474_v47, %v11478_v4  ;;  %v16797_v14 = vcombine.low %v11474_v47, %v11478_v4  ;;  %v11314_v30 = vld [vmem:[%s25524_s15 + $0xd8] sm:$0xff] }
 0xa6d   : > { %v11306_v4 = vld [vmem:[%s25524_s15 + $0x98] sm:$0xff] }
 0xa6e   : > { %14832 = vmatpush2.bf16.msra.mxu0 %v16971_v33  ;;  %v14372_v33 = vrot.slane %v24438_v17, %v11077_v25  ;;  %v11330_v25 = vld [vmem:[%s25524_s15 + $0x158] sm:$0xff] }
 0xa6f   : > { %14873 = vmatpush2.bf16.msra.mxu1 %v17099_v37  ;;  %14833 = vmatprep.subr.bf16.mxu0 %v16964_v19  ;;  %v16669_v37 = vcombine.low %v11346_v5, %v11350_v13  ;;  %v11466_v19 = vld [vmem:[%s25524_s15 + $0x598] sm:$0xff]  ;;  %v16654_v12 = vcombine.high %v11330_v25, %v11334_v41 }
 0xa70   : > { %14874 = vmatprep.subr.bf16.mxu1 %v17092_v9  ;;  %v11470_v9 = vld [vmem:[%s25524_s15 + $0x5b8] sm:$0xff] }
 0xa71   : > { %v16789_v23 = vcombine.low %v11466_v19, %v11470_v9 }
 0xa72   : > { %14834 = vmatpush2.bf16.msra.mxu0 %v16963_v2 }
 0xa73   : > { %14875 = vmatpush2.bf16.msra.mxu1 %v17091_v53  ;;  %14835 = vmatprep.subr.bf16.mxu0 %v16956_v54  ;;  %v16790_v53 = vcombine.high %v11466_v19, %v11470_v9  ;;  %v11458_v54 = vld [vmem:[%s25524_s15 + $0x558] sm:$0xff] }
 0xa74   : > { %14876 = vmatprep.subr.bf16.mxu1 %v17084_v63  ;;  %v11302_v19 = vld [vmem:[%s25524_s15 + $0x78] sm:$0xff] }
 0xa75   : > { %v11426_v9 = vld [vmem:[%s25524_s15 + $0x458] sm:$0xff] }
 0xa76   : > { %14836 = vmatpush2.bf16.msra.mxu0 %v16955_v43 }
 0xa77   : > { %14877 = vmatpush2.bf16.msra.mxu1 %v17083_v1  ;;  %14837 = vmatprep.subr.bf16.mxu0 %v16948_v61 }
 0xa78   : > { %14878 = vmatprep.subr.bf16.mxu1 %v17076_v42  ;;  %v16782_v42 = vcombine.high %v11458_v54, %v11462_v28 }
 0xa7a   : > { %14838 = vmatpush2.bf16.msra.mxu0 %v16947_v36 }
 0xa7b   : > { %14879 = vmatpush2.bf16.msra.mxu1 %v17075_v50  ;;  %14839 = vmatprep.subr.bf16.mxu0 %v16940_v3  ;;  %v16653_v50 = vcombine.low %v11330_v25, %v11334_v41 }
 0xa7c   : > { %14880 = vmatprep.subr.bf16.mxu1 %v17068_v0  ;;  %v16781_v0 = vcombine.low %v11458_v54, %v11462_v28  ;;  %v11418_v54 = vld [vmem:[%s25524_s15 + $0x418] sm:$0xff] }
 0xa7d   : > { %v11422_v28 = vld [vmem:[%s25524_s15 + $0x438] sm:$0xff] }
 0xa7e   : > { %14840 = vmatpush2.bf16.msra.mxu0 %v16939_v44  ;;  %v11318_v44 = vld [vmem:[%s25524_s15 + $0xf8] sm:$0xff] }
 0xa7f   : > { %14881 = vmatpush2.bf16.msra.mxu1 %v17067_v45  ;;  %14841 = vmatprep.subr.bf16.mxu0 %v16932_v48  ;;  %v11442_v45 = vld [vmem:[%s25524_s15 + $0x4d8] sm:$0xff]  ;;  %v16638_v13 = vcombine.high %v11314_v30, %v11318_v44 }
 0xa80   : > { %14882 = vmatprep.subr.bf16.mxu1 %v17060_v7  ;;  %v11446_v48 = vld [vmem:[%s25524_s15 + $0x4f8] sm:$0xff] }
 0xa81   : > { %v16766_v47 = vcombine.high %v11442_v45, %v11446_v48  ;;  %v16765_v22 = vcombine.low %v11442_v45, %v11446_v48  ;;  %v11526_v45 = vld [vmem:[%s25524_s15 + $0x778] sm:$0xff] }
 0xa82   : > { %14842 = vmatpush2.bf16.msra.mxu0 %v16931_v58  ;;  %v11310_v58 = vld [vmem:[%s25524_s15 + $0xb8] sm:$0xff] }
 0xa83   : > { %14883 = vmatpush2.bf16.msra.mxu1 %v17059_v15  ;;  %14893 = vmatprep.subr.bf16.mxu0 %v16670_v10  ;;  %v11434_v15 = vld [vmem:[%s25524_s15 + $0x498] sm:$0xff]  ;;  %v16630_v32 = vcombine.high %v11306_v4, %v11310_v58 }
 0xa84   : > { %14934 = vmatprep.subr.bf16.mxu1 %v16798_v29  ;;  %v11438_v10 = vld [vmem:[%s25524_s15 + $0x4b8] sm:$0xff]  ;;  %v16637_v29 = vcombine.low %v11314_v30, %v11318_v44 }
 0xa85   : > { %v14599_v2 = vpop.f32.mrf.mxu0  ;;  %14844 = vmatmul.mubr.bf16.vlgmr.msra.gmra.mxu0 %v24049_v21  ;;  %v11398_v30 = vld [vmem:[%s25524_s15 + $0x378] sm:$0xff] }
 0xa86   : > { %v14600_v17 = vadd.f32 %v14599_v2, %v14372_v33  ;;  %v14640_v63 = vpop.f32.mrf.mxu1  ;;  %14885 = vmatmul.mubr.bf16.vlgmr.msra.gmra.mxu1 %v24051_v57  ;;  %14894 = vmatpush1.bf16.msra.mxu0 %v16669_v37  ;;  %v16758_v33 = vcombine.high %v11434_v15, %v11438_v10  ;;  %v11298_v37 = vld [vmem:[%s25524_s15 + $0x58] sm:$0xff] }
 0xa87   : > { %14925 = vmatprep.mubr.bf16.mxu0 %v23819_v34  ;;  %14935 = vmatpush1.bf16.msra.mxu1 %v16797_v14  ;;  %v14601_v8 = vpop.f32.mrf.mxu0  ;;  %v11326_v34 = vld [vmem:[%s25524_s15 + $0x138] sm:$0xff]  ;;  %v16622_v25 = vcombine.high %v11298_v37, %v11302_v19 }
 0xa88   : > { %v24879_v43 = vadd.f32 %v14640_v63, %v14600_v17  ;;  %14966 = vmatprep.mubr.bf16.mxu1 %v23821_v20  ;;  %v14602_v1 = vadd.f32 %v14601_v8, %v14376_v62  ;;  %v14642_v61 = vpop.f32.mrf.mxu1  ;;  %14895 = vmatprep.subr.bf16.mxu0 %v16662_v55  ;;  %v11454_v20 = vld [vmem:[%s25524_s15 + $0x538] sm:$0xff]  ;;  %v16646_v56 = vcombine.high %v11322_v60, %v11326_v34 }
 0xa89   : > { %v14603_v27 = vpop.f32.mrf.mxu0  ;;  %14936 = vmatprep.subr.bf16.mxu1 %v16790_v53  ;;  %v16774_v38 = vcombine.high %v11450_v31, %v11454_v20  ;;  %v16645_v7 = vcombine.low %v11322_v60, %v11326_v34  ;;  %v16773_v5 = vcombine.low %v11450_v31, %v11454_v20  ;;  %v11430_v14 = vld [vmem:[%s25524_s15 + $0x478] sm:$0xff]  ;;  %v16629_v62 = vcombine.low %v11306_v4, %v11310_v58 }
 0xa8a   : > { %v24894_v51 = vadd.f32 %v14642_v61, %v14602_v1  ;;  %v14644_v36 = vpop.f32.mrf.mxu1  ;;  %14896 = vmatpush1.bf16.msra.mxu0 %v16661_v11  ;;  %v16757_v55 = vcombine.low %v11434_v15, %v11438_v10  ;;  %v16750_v41 = vcombine.high %v11426_v9, %v11430_v14  ;;  %v11290_v2 = vld [vmem:[%s25524_s15 + $0x18] sm:$0xff]  ;;  %v16621_v17 = vcombine.low %v11298_v37, %v11302_v19 }
 0xa8b   : > { %14937 = vmatpush1.bf16.msra.mxu1 %v16789_v23  ;;  %v14604_v3 = vpop.f32.mrf.mxu0  ;;  %14897 = vmatprep.subr.bf16.mxu0 %v16654_v12  ;;  %v11294_v53 = vld [vmem:[%s25524_s15 + $0x38] sm:$0xff]  ;;  %v16749_v63 = vcombine.low %v11426_v9, %v11430_v14  ;;  %v16742_v8 = vcombine.high %v11418_v54, %v11422_v28  ;;  %v16741_v60 = vcombine.low %v11418_v54, %v11422_v28 }
 0xa8c   : > { %v14645_v46 = vpop.f32.mrf.mxu1  ;;  %14938 = vmatprep.subr.bf16.mxu1 %v16782_v42  ;;  %v16614_v11 = vcombine.high %v11290_v2, %v11294_v53  ;;  %v11410_v23 = vld [vmem:[%s25524_s15 + $0x3d8] sm:$0xff]  ;;  %v16613_v42 = vcombine.low %v11290_v2, %v11294_v53 }
 0xa8d   : > { %v11414_v12 = vld [vmem:[%s25524_s15 + $0x3f8] sm:$0xff] }
 0xa8e   : > { %14898 = vmatpush1.bf16.msra.mxu0 %v16653_v50  ;;  %v11538_v1 = vld [vmem:[%s25524_s15 + $0x7d8] sm:$0xff]  ;;  %v16734_v34 = vcombine.high %v11410_v23, %v11414_v12  ;;  %v16733_v3 = vcombine.low %v11410_v23, %v11414_v12 }
 0xa8f   : > { %14939 = vmatpush1.bf16.msra.mxu1 %v16781_v0  ;;  %14899 = vmatprep.subr.bf16.mxu0 %v16646_v56  ;;  %v11542_v61 = vld [vmem:[%s25524_s15 + $0x7f8] sm:$0xff] }
 0xa90   : > { %14940 = vmatprep.subr.bf16.mxu1 %v16774_v38  ;;  %v16862_v27 = vcombine.high %v11538_v1, %v11542_v61  ;;  %v11402_v31 = vld [vmem:[%s25524_s15 + $0x398] sm:$0xff]  ;;  %v16861_v0 = vcombine.low %v11538_v1, %v11542_v61 }
 0xa91   : > { %v11406_v20 = vld [vmem:[%s25524_s15 + $0x3b8] sm:$0xff] }
 0xa92   : > { %14900 = vmatpush1.bf16.msra.mxu0 %v16645_v7  ;;  %v11530_v36 = vld [vmem:[%s25524_s15 + $0x798] sm:$0xff]  ;;  %v16726_v56 = vcombine.high %v11402_v31, %v11406_v20  ;;  %v16725_v48 = vcombine.low %v11402_v31, %v11406_v20 }
 0xa93   : > { %14941 = vmatpush1.bf16.msra.mxu1 %v16773_v5  ;;  %14901 = vmatprep.subr.bf16.mxu0 %v16638_v13  ;;  %v11534_v50 = vld [vmem:[%s25524_s15 + $0x7b8] sm:$0xff] }
 0xa94   : > { %14942 = vmatprep.subr.bf16.mxu1 %v16766_v47  ;;  %v16854_v46 = vcombine.high %v11530_v36, %v11534_v50  ;;  %v11394_v38 = vld [vmem:[%s25524_s15 + $0x358] sm:$0xff]  ;;  %v16853_v7 = vcombine.low %v11530_v36, %v11534_v50 }
 0xa95   : > { %v11522_v44 = vld [vmem:[%s25524_s15 + $0x758] sm:$0xff]  ;;  %v16718_v5 = vcombine.high %v11394_v38, %v11398_v30  ;;  %v16717_v10 = vcombine.low %v11394_v38, %v11398_v30 }
 0xa96   : > { %14902 = vmatpush1.bf16.msra.mxu0 %v16637_v29  ;;  %v16846_v13 = vcombine.high %v11522_v44, %v11526_v45  ;;  %v11386_v47 = vld [vmem:[%s25524_s15 + $0x318] sm:$0xff]  ;;  %v16845_v29 = vcombine.low %v11522_v44, %v11526_v45 }
 0xa97   : > { %14943 = vmatpush1.bf16.msra.mxu1 %v16765_v22  ;;  %14903 = vmatprep.subr.bf16.mxu0 %v16630_v32  ;;  %v11390_v4 = vld [vmem:[%s25524_s15 + $0x338] sm:$0xff] }
 0xa98   : > { %14944 = vmatprep.subr.bf16.mxu1 %v16758_v33  ;;  %v11514_v58 = vld [vmem:[%s25524_s15 + $0x718] sm:$0xff]  ;;  %v16710_v22 = vcombine.high %v11386_v47, %v11390_v4  ;;  %v16709_v14 = vcombine.low %v11386_v47, %v11390_v4 }
 0xa99   : > { %v11518_v15 = vld [vmem:[%s25524_s15 + $0x738] sm:$0xff] }
 0xa9a   : > { %14904 = vmatpush1.bf16.msra.mxu0 %v16629_v62  ;;  %v16838_v32 = vcombine.high %v11514_v58, %v11518_v15  ;;  %v11378_v33 = vld [vmem:[%s25524_s15 + $0x2d8] sm:$0xff]  ;;  %v16837_v62 = vcombine.low %v11514_v58, %v11518_v15 }
 0xa9b   : > { %14945 = vmatpush1.bf16.msra.mxu1 %v16757_v55  ;;  %14905 = vmatprep.subr.bf16.mxu0 %v16622_v25  ;;  %v11382_v37 = vld [vmem:[%s25524_s15 + $0x2f8] sm:$0xff] }
 0xa9c   : > { %14946 = vmatprep.subr.bf16.mxu1 %v16750_v41  ;;  %v11506_v19 = vld [vmem:[%s25524_s15 + $0x6d8] sm:$0xff]  ;;  %v16702_v55 = vcombine.high %v11378_v33, %v11382_v37  ;;  %v16701_v28 = vcombine.low %v11378_v33, %v11382_v37 }
 0xa9d   : > { %v11510_v9 = vld [vmem:[%s25524_s15 + $0x6f8] sm:$0xff] }
 0xa9e   : > { %14906 = vmatpush1.bf16.msra.mxu0 %v16621_v17  ;;  %v16830_v25 = vcombine.high %v11506_v19, %v11510_v9  ;;  %v11370_v41 = vld [vmem:[%s25524_s15 + $0x298] sm:$0xff]  ;;  %v16829_v17 = vcombine.low %v11506_v19, %v11510_v9 }
 0xa9f   : > { %14947 = vmatpush1.bf16.msra.mxu1 %v16749_v63  ;;  %14907 = vmatprep.subr.bf16.mxu0 %v16614_v11  ;;  %v11374_v2 = vld [vmem:[%s25524_s15 + $0x2b8] sm:$0xff] }
 0xaa0   : > { %14948 = vmatprep.subr.bf16.mxu1 %v16742_v8  ;;  %v11498_v53 = vld [vmem:[%s25524_s15 + $0x698] sm:$0xff]  ;;  %v16694_v63 = vcombine.high %v11370_v41, %v11374_v2  ;;  %v16693_v61 = vcombine.low %v11370_v41, %v11374_v2 }
 0xaa1   : > { %v11502_v54 = vld [vmem:[%s25524_s15 + $0x6b8] sm:$0xff] }
 0xaa2   : > { %14908 = vmatpush1.bf16.msra.mxu0 %v16613_v42  ;;  %v16822_v11 = vcombine.high %v11498_v53, %v11502_v54  ;;  %v11362_v8 = vld [vmem:[%s25524_s15 + $0x258] sm:$0xff]  ;;  %v16821_v42 = vcombine.low %v11498_v53, %v11502_v54 }
 0xaa3   : > { %14949 = vmatpush1.bf16.msra.mxu1 %v16741_v60  ;;  %14909 = vmatprep.subr.bf16.mxu0 %v16734_v34  ;;  %v11366_v23 = vld [vmem:[%s25524_s15 + $0x278] sm:$0xff] }
 0xaa4   : > { %14950 = vmatprep.subr.bf16.mxu1 %v16862_v27  ;;  %v11490_v12 = vld [vmem:[%s25524_s15 + $0x658] sm:$0xff]  ;;  %v16686_v60 = vcombine.high %v11362_v8, %v11366_v23  ;;  %v16685_v50 = vcombine.low %v11362_v8, %v11366_v23 }
 0xaa5   : > { %v11494_v1 = vld [vmem:[%s25524_s15 + $0x678] sm:$0xff] }
 0xaa6   : > { %14910 = vmatpush2.bf16.msra.mxu0 %v16733_v3  ;;  %v16814_v34 = vcombine.high %v11490_v12, %v11494_v1  ;;  %v11354_v27 = vld [vmem:[%s25524_s15 + $0x218] sm:$0xff]  ;;  %v16813_v3 = vcombine.low %v11490_v12, %v11494_v1 }
 0xaa7   : > { %14951 = vmatpush2.bf16.msra.mxu1 %v16861_v0  ;;  %14911 = vmatprep.subr.bf16.mxu0 %v16726_v56  ;;  %v11358_v31 = vld [vmem:[%s25524_s15 + $0x238] sm:$0xff] }
 0xaa8   : > { %14952 = vmatprep.subr.bf16.mxu1 %v16854_v46  ;;  %v11482_v20 = vld [vmem:[%s25524_s15 + $0x618] sm:$0xff]  ;;  %v16678_v0 = vcombine.high %v11354_v27, %v11358_v31  ;;  %v16677_v45 = vcombine.low %v11354_v27, %v11358_v31 }
 0xaa9   : > { %v11486_v36 = vld [vmem:[%s25524_s15 + $0x638] sm:$0xff] }
 0xaaa   : > { %14912 = vmatpush2.bf16.msra.mxu0 %v16725_v48  ;;  %v16806_v56 = vcombine.high %v11482_v20, %v11486_v36  ;;  %v11602_v46 = vld [vmem:[%s25524_s15 + $0x9d8] sm:$0xff]  ;;  %v16805_v48 = vcombine.low %v11482_v20, %v11486_v36 }
 0xaab   : > { %14953 = vmatpush2.bf16.msra.mxu1 %v16853_v7  ;;  %14913 = vmatprep.subr.bf16.mxu0 %v16718_v5  ;;  %v11606_v38 = vld [vmem:[%s25524_s15 + $0x9f8] sm:$0xff] }
 0xaac   : > { %14954 = vmatprep.subr.bf16.mxu1 %v16846_v13  ;;  %v11730_v30 = vld [vmem:[%s25524_s15 + $0xdd8] sm:$0xff]  ;;  %v16926_v7 = vcombine.high %v11602_v46, %v11606_v38  ;;  %v16925_v4 = vcombine.low %v11602_v46, %v11606_v38 }
 0xaad   : > { %v11734_v44 = vld [vmem:[%s25524_s15 + $0xdf8] sm:$0xff] }
 0xaae   : > { %14914 = vmatpush2.bf16.msra.mxu0 %v16717_v10  ;;  %v17054_v5 = vcombine.high %v11730_v30, %v11734_v44  ;;  %v11594_v13 = vld [vmem:[%s25524_s15 + $0x998] sm:$0xff]  ;;  %v17053_v10 = vcombine.low %v11730_v30, %v11734_v44 }
 0xaaf   : > { %14955 = vmatpush2.bf16.msra.mxu1 %v16845_v29  ;;  %14915 = vmatprep.subr.bf16.mxu0 %v16710_v22  ;;  %v11598_v47 = vld [vmem:[%s25524_s15 + $0x9b8] sm:$0xff] }
 0xab0   : > { %14956 = vmatprep.subr.bf16.mxu1 %v16838_v32  ;;  %v11722_v58 = vld [vmem:[%s25524_s15 + $0xd98] sm:$0xff]  ;;  %v16918_v29 = vcombine.high %v11594_v13, %v11598_v47 }
 0xab1   : > { %v11726_v15 = vld [vmem:[%s25524_s15 + $0xdb8] sm:$0xff] }
 0xab2   : > { %14916 = vmatpush2.bf16.msra.mxu0 %v16709_v14  ;;  %v11586_v22 = vld [vmem:[%s25524_s15 + $0x958] sm:$0xff]  ;;  %v17046_v37 = vcombine.high %v11722_v58, %v11726_v15 }
 0xab3   : > { %14957 = vmatpush2.bf16.msra.mxu1 %v16837_v62  ;;  %14917 = vmatprep.subr.bf16.mxu0 %v16702_v55  ;;  %v11590_v32 = vld [vmem:[%s25524_s15 + $0x978] sm:$0xff]  ;;  %v16917_v55 = vcombine.low %v11594_v13, %v11598_v47 }
 0xab4   : > { %14958 = vmatprep.subr.bf16.mxu1 %v16830_v25  ;;  %v11714_v19 = vld [vmem:[%s25524_s15 + $0xd58] sm:$0xff]  ;;  %v17045_v25 = vcombine.low %v11722_v58, %v11726_v15  ;;  %v16910_v41 = vcombine.high %v11586_v22, %v11590_v32 }
 0xab5   : > { %v11718_v9 = vld [vmem:[%s25524_s15 + $0xd78] sm:$0xff] }
 0xab6   : > { %14918 = vmatpush2.bf16.msra.mxu0 %v16701_v28  ;;  %v11706_v28 = vld [vmem:[%s25524_s15 + $0xd18] sm:$0xff]  ;;  %v17037_v8 = vcombine.low %v11714_v19, %v11718_v9 }
 0xab7   : > { %14959 = vmatpush2.bf16.msra.mxu1 %v16829_v17  ;;  %14919 = vmatprep.subr.bf16.mxu0 %v16694_v63  ;;  %v16909_v63 = vcombine.low %v11586_v22, %v11590_v32  ;;  %v11546_v15 = vld [vmem:[%s25524_s15 + $0x818] sm:$0xff] }
 0xab8   : > { %14960 = vmatprep.subr.bf16.mxu1 %v16822_v11  ;;  %v11678_v22 = vld [vmem:[%s25524_s15 + $0xc38] sm:$0xff] }
 0xaba   : > { %14920 = vmatpush2.bf16.msra.mxu0 %v16693_v61  ;;  %v11570_v61 = vld [vmem:[%s25524_s15 + $0x8d8] sm:$0xff] }
 0xabb   : > { %14961 = vmatpush2.bf16.msra.mxu1 %v16821_v42  ;;  %14921 = vmatprep.subr.bf16.mxu0 %v16686_v60  ;;  %v11574_v42 = vld [vmem:[%s25524_s15 + $0x8f8] sm:$0xff] }
 0xabc   : > { %14962 = vmatprep.subr.bf16.mxu1 %v16814_v34  ;;  %v11698_v60 = vld [vmem:[%s25524_s15 + $0xcd8] sm:$0xff]  ;;  %v16894_v20 = vcombine.high %v11570_v61, %v11574_v42  ;;  %v16893_v46 = vcombine.low %v11570_v61, %v11574_v42 }
 0xabd   : > { %v11702_v34 = vld [vmem:[%s25524_s15 + $0xcf8] sm:$0xff] }
 0xabe   : > { %14922 = vmatpush2.bf16.msra.mxu0 %v16685_v50  ;;  %v17022_v36 = vcombine.high %v11698_v60, %v11702_v34  ;;  %v11562_v50 = vld [vmem:[%s25524_s15 + $0x898] sm:$0xff]  ;;  %v17021_v38 = vcombine.low %v11698_v60, %v11702_v34 }
 0xabf   : > { %14963 = vmatpush2.bf16.msra.mxu1 %v16813_v3  ;;  %14923 = vmatprep.subr.bf16.mxu0 %v16678_v0  ;;  %v11566_v3 = vld [vmem:[%s25524_s15 + $0x8b8] sm:$0xff] }
 0xac0   : > { %14964 = vmatprep.subr.bf16.mxu1 %v16806_v56  ;;  %v11690_v0 = vld [vmem:[%s25524_s15 + $0xc98] sm:$0xff]  ;;  %v16886_v30 = vcombine.high %v11562_v50, %v11566_v3  ;;  %v16885_v13 = vcombine.low %v11562_v50, %v11566_v3 }
 0xac1   : > { %v11694_v56 = vld [vmem:[%s25524_s15 + $0xcb8] sm:$0xff] }
 0xac2   : > { %14924 = vmatpush2.bf16.msra.mxu0 %v16677_v45  ;;  %v17014_v44 = vcombine.high %v11690_v0, %v11694_v56  ;;  %v11554_v45 = vld [vmem:[%s25524_s15 + $0x858] sm:$0xff]  ;;  %v17013_v47 = vcombine.low %v11690_v0, %v11694_v56 }
 0xac3   : > { %14965 = vmatpush2.bf16.msra.mxu1 %v16805_v48  ;;  %14975 = vmatprep.subr.bf16.mxu0 %v16926_v7  ;;  %v11558_v48 = vld [vmem:[%s25524_s15 + $0x878] sm:$0xff] }
 0xac4   : > { %15016 = vmatprep.subr.bf16.mxu1 %v17054_v5  ;;  %v11682_v7 = vld [vmem:[%s25524_s15 + $0xc58] sm:$0xff]  ;;  %v16877_v32 = vcombine.low %v11554_v45, %v11558_v48 }
 0xac5   : > { %v14681_v33 = vpop.f32.mrf.mxu0  ;;  %14926 = vmatmul.mubr.bf16.vlgmr.msra.gmra.mxu0 %v23823_v39  ;;  %v11686_v5 = vld [vmem:[%s25524_s15 + $0xc78] sm:$0xff] }
 0xac6   : > { %v14682_v14 = vadd.f32 %v14681_v33, %v24879_v43  ;;  %v14722_v62 = vpop.f32.mrf.mxu1  ;;  %14967 = vmatmul.mubr.bf16.vlgmr.msra.gmra.mxu1 %v23825_v40  ;;  %14976 = vmatpush1.bf16.msra.mxu0 %v16925_v4  ;;  %v17038_v43 = vcombine.high %v11714_v19, %v11718_v9  ;;  %v11578_v40 = vld [vmem:[%s25524_s15 + $0x918] sm:$0xff]  ;;  %v16878_v4 = vcombine.high %v11554_v45, %v11558_v48 }
 0xac7   : > { %15007 = vmatprep.mubr.bf16.mxu0 %v24045_v52  ;;  %15017 = vmatpush1.bf16.msra.mxu1 %v17053_v10  ;;  %v25080_v39 = vpop.f32.mrf.mxu0  ;;  %v11582_v52 = vld [vmem:[%s25524_s15 + $0x938] sm:$0xff]  ;;  %v17006_v58 = vcombine.high %v11682_v7, %v11686_v5  ;;  %v17005_v33 = vcombine.low %v11682_v7, %v11686_v5 }
 0xac8   : > { %v25082_v2 = vadd.f32 %v14722_v62, %v14682_v14  ;;  %15048 = vmatprep.mubr.bf16.mxu1 %v24047_v24  ;;  %v25085_v53 = vpop.f32.mrf.mxu1  ;;  %14977 = vmatprep.subr.bf16.mxu0 %v16918_v29  ;;  %v11710_v24 = vld [vmem:[%s25524_s15 + $0xd38] sm:$0xff]  ;;  %v16902_v23 = vcombine.high %v11578_v40, %v11582_v52  ;;  %v16901_v27 = vcombine.low %v11578_v40, %v11582_v52 }
 0xac9   : > { %v14685_v54 = vpop.f32.mrf.mxu0  ;;  %15018 = vmatprep.subr.bf16.mxu1 %v17046_v37  ;;  %v17030_v1 = vcombine.high %v11706_v28, %v11710_v24  ;;  %v17029_v31 = vcombine.low %v11706_v28, %v11710_v24  ;;  %v11550_v10 = vld [vmem:[%s25524_s15 + $0x838] sm:$0xff] }
 0xaca   : > { %v14726_v17 = vpop.f32.mrf.mxu1  ;;  %14978 = vmatpush1.bf16.msra.mxu0 %v16917_v55  ;;  %v11674_v29 = vld [vmem:[%s25524_s15 + $0xc18] sm:$0xff]  ;;  %v16870_v37 = vcombine.high %v11546_v15, %v11550_v10 }
 0xacb   : > { %15019 = vmatpush1.bf16.msra.mxu1 %v17045_v25  ;;  %v14686_v11 = vpop.f32.mrf.mxu0  ;;  %14979 = vmatprep.subr.bf16.mxu0 %v16910_v41  ;;  %v16998_v19 = vcombine.high %v11674_v29, %v11678_v22  ;;  %v11666_v9 = vld [vmem:[%s25524_s15 + $0xbd8] sm:$0xff]  ;;  %v16869_v25 = vcombine.low %v11546_v15, %v11550_v10  ;;  %v16997_v41 = vcombine.low %v11674_v29, %v11678_v22 }
 0xacc   : > { %v14727_v12 = vpop.f32.mrf.mxu1  ;;  %15020 = vmatprep.subr.bf16.mxu1 %v17038_v43  ;;  %v11670_v14 = vld [vmem:[%s25524_s15 + $0xbf8] sm:$0xff] }
 0xacd   : > { %v11794_v62 = vld [vmem:[%s25524_s15 + $0xfd8] sm:$0xff]  ;;  %v16990_v43 = vcombine.high %v11666_v9, %v11670_v14  ;;  %v16989_v17 = vcombine.low %v11666_v9, %v11670_v14 }
 0xace   : > { %14980 = vmatpush1.bf16.msra.mxu0 %v16909_v63  ;;  %v11798_v55 = vld [vmem:[%s25524_s15 + $0xff8] sm:$0xff] }
 0xacf   : > { %15021 = vmatpush1.bf16.msra.mxu1 %v17037_v8  ;;  %14981 = vmatprep.subr.bf16.mxu0 %v16902_v23  ;;  %v17118_v40 = vcombine.high %v11794_v62, %v11798_v55  ;;  %v11658_v52 = vld [vmem:[%s25524_s15 + $0xb98] sm:$0xff]  ;;  %v17117_v63 = vcombine.low %v11794_v62, %v11798_v55 }
 0xad0   : > { %15022 = vmatprep.subr.bf16.mxu1 %v17030_v1  ;;  %v11662_v54 = vld [vmem:[%s25524_s15 + $0xbb8] sm:$0xff] }
 0xad1   : > { %v11786_v28 = vld [vmem:[%s25524_s15 + $0xf98] sm:$0xff]  ;;  %v16982_v11 = vcombine.high %v11658_v52, %v11662_v54  ;;  %v16981_v42 = vcombine.low %v11658_v52, %v11662_v54  ;;  %v14684_v54 = vadd.f32 %v25080_v39, %v24894_v51  ;;  %v15058_v39 = vmax.f32 %v24688_v59, 0.0  ;;  %v18462_v59 = vld [vmem:[%s25526_s17 + $0xf0] sm:$0xff]  }
 0xad2   : > { %14982 = vmatpush1.bf16.msra.mxu0 %v16901_v27  ;;  %v11790_v24 = vld [vmem:[%s25524_s15 + $0xfb8] sm:$0xff] }
 0xad3   : > { %15023 = vmatpush1.bf16.msra.mxu1 %v17029_v31  ;;  %14983 = vmatprep.subr.bf16.mxu0 %v16894_v20  ;;  %v17110_v8 = vcombine.high %v11786_v28, %v11790_v24  ;;  %v11650_v23 = vld [vmem:[%s25524_s15 + $0xb58] sm:$0xff]  ;;  %v17109_v60 = vcombine.low %v11786_v28, %v11790_v24 }
 0xad4   : > { %15024 = vmatprep.subr.bf16.mxu1 %v17022_v36  ;;  %v11654_v12 = vld [vmem:[%s25524_s15 + $0xb78] sm:$0xff] }
 0xad5   : > { %v11778_v1 = vld [vmem:[%s25524_s15 + $0xf58] sm:$0xff]  ;;  %v16974_v34 = vcombine.high %v11650_v23, %v11654_v12  ;;  %v16973_v3 = vcombine.low %v11650_v23, %v11654_v12 }
 0xad6   : > { %14984 = vmatpush1.bf16.msra.mxu0 %v16893_v46  ;;  %v11782_v61 = vld [vmem:[%s25524_s15 + $0xf78] sm:$0xff] }
 0xad7   : > { %15025 = vmatpush1.bf16.msra.mxu1 %v17021_v38  ;;  %14985 = vmatprep.subr.bf16.mxu0 %v16886_v30  ;;  %v17102_v27 = vcombine.high %v11778_v1, %v11782_v61  ;;  %v11642_v31 = vld [vmem:[%s25524_s15 + $0xb18] sm:$0xff]  ;;  %v17101_v0 = vcombine.low %v11778_v1, %v11782_v61 }
 0xad8   : > { %15026 = vmatprep.subr.bf16.mxu1 %v17014_v44  ;;  %v11646_v20 = vld [vmem:[%s25524_s15 + $0xb38] sm:$0xff] }
 0xad9   : > { %v11770_v36 = vld [vmem:[%s25524_s15 + $0xf18] sm:$0xff]  ;;  %v16966_v56 = vcombine.high %v11642_v31, %v11646_v20  ;;  %v16965_v48 = vcombine.low %v11642_v31, %v11646_v20  ;;  %v18463_v20 = vld [vmem:[%s25526_s17 + $0x30] sm:$0xff]  }
 0xada   : > { %14986 = vmatpush1.bf16.msra.mxu0 %v16885_v13  ;;  %v11774_v50 = vld [vmem:[%s25524_s15 + $0xf38] sm:$0xff] }
 0xadb   : > { %15027 = vmatpush1.bf16.msra.mxu1 %v17013_v47  ;;  %14987 = vmatprep.subr.bf16.mxu0 %v16878_v4  ;;  %v17094_v46 = vcombine.high %v11770_v36, %v11774_v50  ;;  %v11634_v38 = vld [vmem:[%s25524_s15 + $0xad8] sm:$0xff]  ;;  %v17093_v7 = vcombine.low %v11770_v36, %v11774_v50  ;;  %v18465_v50 = vld [vmem:[%s25526_s17 + $0x68] sm:$0xff]  }
 0xadc   : > { %15028 = vmatprep.subr.bf16.mxu1 %v17006_v58  ;;  %v11638_v30 = vld [vmem:[%s25524_s15 + $0xaf8] sm:$0xff] }
 0xadd   : > { %v11762_v44 = vld [vmem:[%s25524_s15 + $0xed8] sm:$0xff]  ;;  %v16958_v5 = vcombine.high %v11634_v38, %v11638_v30  ;;  %v16957_v10 = vcombine.low %v11634_v38, %v11638_v30  ;;  %v18468_v30 = vld [vmem:[%s25526_s17 + $0xa8] sm:$0xff]  }
 0xade   : > { %14988 = vmatpush1.bf16.msra.mxu0 %v16877_v32  ;;  %v11766_v45 = vld [vmem:[%s25524_s15 + $0xef8] sm:$0xff] }
 0xadf   : > { %15029 = vmatpush1.bf16.msra.mxu1 %v17005_v33  ;;  %14989 = vmatprep.subr.bf16.mxu0 %v16870_v37  ;;  %v17086_v13 = vcombine.high %v11762_v44, %v11766_v45  ;;  %v11626_v47 = vld [vmem:[%s25524_s15 + $0xa98] sm:$0xff]  ;;  %v17085_v29 = vcombine.low %v11762_v44, %v11766_v45  ;;  %v18469_v44 = vld [vmem:[%s25526_s17 + $0x60] sm:$0xff]  }
 0xae0   : > { %15030 = vmatprep.subr.bf16.mxu1 %v16998_v19  ;;  %v11630_v4 = vld [vmem:[%s25524_s15 + $0xab8] sm:$0xff] }
 0xae1   : > { %v11754_v58 = vld [vmem:[%s25524_s15 + $0xe98] sm:$0xff]  ;;  %v16950_v22 = vcombine.high %v11626_v47, %v11630_v4  ;;  %v16949_v14 = vcombine.low %v11626_v47, %v11630_v4 }
 0xae2   : > { %14990 = vmatpush1.bf16.msra.mxu0 %v16869_v25  ;;  %v11758_v15 = vld [vmem:[%s25524_s15 + $0xeb8] sm:$0xff] }
 0xae3   : > { %15031 = vmatpush1.bf16.msra.mxu1 %v16997_v41  ;;  %14991 = vmatprep.subr.bf16.mxu0 %v16990_v43  ;;  %v17078_v32 = vcombine.high %v11754_v58, %v11758_v15  ;;  %v11618_v33 = vld [vmem:[%s25524_s15 + $0xa58] sm:$0xff]  ;;  %v17077_v62 = vcombine.low %v11754_v58, %v11758_v15  ;;  %v18477_v15 = vld [vmem:[%s25526_s17 + $0x50] sm:$0xff]  }
 0xae4   : > { %15032 = vmatprep.subr.bf16.mxu1 %v17118_v40  ;;  %v11622_v37 = vld [vmem:[%s25524_s15 + $0xa78] sm:$0xff] }
 0xae5   : > { %v11746_v19 = vld [vmem:[%s25524_s15 + $0xe58] sm:$0xff]  ;;  %v16942_v55 = vcombine.high %v11618_v33, %v11622_v37  ;;  %v16941_v28 = vcombine.low %v11618_v33, %v11622_v37  ;;  %v18482_v33 = vld [vmem:[%s25526_s17 + $0xc8] sm:$0xff]  }
 0xae6   : > { %14992 = vmatpush2.bf16.msra.mxu0 %v16989_v17  ;;  %v11750_v9 = vld [vmem:[%s25524_s15 + $0xe78] sm:$0xff]  ;;  %v18483_v37 = vld [vmem:[%s25526_s17 + $0x8] sm:$0xff]  }
 0xae7   : > { %15033 = vmatpush2.bf16.msra.mxu1 %v17117_v63  ;;  %14993 = vmatprep.subr.bf16.mxu0 %v16982_v11  ;;  %v17070_v25 = vcombine.high %v11746_v19, %v11750_v9  ;;  %v11610_v41 = vld [vmem:[%s25524_s15 + $0xa18] sm:$0xff]  ;;  %v17069_v24 = vcombine.low %v11746_v19, %v11750_v9  ;;  %v14725_v11 = vadd.f32 %v25085_v53, %v14684_v54  ;;  %v18484_v19 = vld [vmem:[%s25526_s17 + $0x88] sm:$0xff]   ;;  %v18485_v9 = vld [vmem:[%s25526_s17 + $0x40] sm:$0xff]  }
 0xae8   : > { %15034 = vmatprep.subr.bf16.mxu1 %v17110_v8  ;;  %v11614_v43 = vld [vmem:[%s25524_s15 + $0xa38] sm:$0xff]  ;;  %v18491_v54 = vld [vmem:[%s25526_s17 + $0x170] sm:$0xff]  }
 0xae9   : > { %v11738_v40 = vld [vmem:[%s25524_s15 + $0xe18] sm:$0xff]  ;;  %v16934_v17 = vcombine.high %v11610_v41, %v11614_v43  ;;  %v16933_v8 = vcombine.low %v11610_v41, %v11614_v43  ;;  %v15060_v1 = vmax.f32 %v14725_v11, 0.0  ;;  %v15059_v43 = vmax.f32 %v25082_v2, 0.0  ;;  %v18508_v11 = vld [vmem:[%s25526_s17 + $0x1b0] sm:$0xff]  }
 0xaea   : > { %14994 = vmatpush2.bf16.msra.mxu0 %v16981_v42  ;;  %v11742_v52 = vld [vmem:[%s25524_s15 + $0xe38] sm:$0xff]  ;;  %v18461_v42 = vld [vmem:[%s25526_s17 + $0x70] sm:$0xff]  }
 0xaeb   : > { %15035 = vmatpush2.bf16.msra.mxu1 %v17109_v60  ;;  %14995 = vmatprep.subr.bf16.mxu0 %v16974_v34  ;;  %v17062_v63 = vcombine.high %v11738_v40, %v11742_v52  ;;  %v17061_v23 = vcombine.low %v11738_v40, %v11742_v52  ;;  %v18457_v12 = vld [vmem:[%s25526_s17 + $0x78] sm:$0xff]   ;;  %v15066_v60 = vpack.c.bf16 %v15058_v39, %v15058_v39  ;;  %v18511_v39 = vld [vmem:[%s25526_s17 + $0x1e0] sm:$0xff]  }
 0xaec   : > { %15036 = vmatprep.subr.bf16.mxu1 %v17102_v27  ;;  %v18458_v51 = vld [vmem:[%s25526_s17 + $0xf8] sm:$0xff]   ;;  %v15068_v27 = vpack.c.bf16 %v15060_v1, %v15060_v1  ;;  %v18496_v1 = vld [vmem:[%s25526_s17 + $0x120] sm:$0xff]  }
 0xaed   : > { %v18459_v53 = vld [vmem:[%s25526_s17 + $0x38] sm:$0xff]  }
 0xaee   : > { %14996 = vmatpush2.bf16.msra.mxu0 %v16973_v3  ;;  %v18460_v61 = vld [vmem:[%s25526_s17 + $0xb8] sm:$0xff]  }
 0xaef   : > { %15037 = vmatpush2.bf16.msra.mxu1 %v17101_v0  ;;  %14997 = vmatprep.subr.bf16.mxu0 %v16966_v56  ;;  %v18474_v47 = vld [vmem:[%s25526_s17 + $0xd8] sm:$0xff]  }
 0xaf0   : > { %15038 = vmatprep.subr.bf16.mxu1 %v17094_v46  ;;  %v18467_v46 = vld [vmem:[%s25526_s17 + $0x28] sm:$0xff]   ;;  %v18475_v4 = vld [vmem:[%s25526_s17 + $0x18] sm:$0xff]  }
 0xaf1   : > { %v18476_v58 = vld [vmem:[%s25526_s17 + $0x98] sm:$0xff]  }
 0xaf2   : > { %14998 = vmatpush2.bf16.msra.mxu0 %v16965_v48  ;;  %v18470_v48 = vld [vmem:[%s25526_s17 + $0xe0] sm:$0xff]   ;;  %v18489_v41 = vld [vmem:[%s25526_s17 + $0x178] sm:$0xff]  }
 0xaf3   : > { %15039 = vmatpush2.bf16.msra.mxu1 %v17093_v7  ;;  %14999 = vmatprep.subr.bf16.mxu0 %v16958_v5  ;;  %v18471_v7 = vld [vmem:[%s25526_s17 + $0x20] sm:$0xff]   ;;  %v18505_v40 = vld [vmem:[%s25526_s17 + $0x1f8] sm:$0xff]  }
 0xaf4   : > { %15040 = vmatprep.subr.bf16.mxu1 %v17086_v13  ;;  %v18472_v5 = vld [vmem:[%s25526_s17 + $0xa0] sm:$0xff]   ;;  %v18473_v13 = vld [vmem:[%s25526_s17 + $0x58] sm:$0xff]  }
 0xaf5   : > { %v18506_v2 = vld [vmem:[%s25526_s17 + $0x1b8] sm:$0xff]  }
 0xaf6   : > { %15000 = vmatpush2.bf16.msra.mxu0 %v16957_v10  ;;  %v18478_v10 = vld [vmem:[%s25526_s17 + $0xd0] sm:$0xff]  }
 0xaf7   : > { %15041 = vmatpush2.bf16.msra.mxu1 %v17085_v29  ;;  %15001 = vmatprep.subr.bf16.mxu0 %v16950_v22  ;;  %v18479_v29 = vld [vmem:[%s25526_s17 + $0x10] sm:$0xff]  }
 0xaf8   : > { %15042 = vmatprep.subr.bf16.mxu1 %v17078_v32  ;;  %v18480_v22 = vld [vmem:[%s25526_s17 + $0x90] sm:$0xff]   ;;  %v18481_v32 = vld [vmem:[%s25526_s17 + $0x48] sm:$0xff]  }
 0xafa   : > { %15002 = vmatpush2.bf16.msra.mxu0 %v16949_v14  ;;  %v18486_v14 = vld [vmem:[%s25526_s17 + $0xc0] sm:$0xff]  }
 0xafb   : > { %15043 = vmatpush2.bf16.msra.mxu1 %v17077_v62  ;;  %15003 = vmatprep.subr.bf16.mxu0 %v16942_v55  ;;  %v18487_v62 = vld [vmem:[%s25526_s17] sm:$0xff]   ;;  %v15057_v55 = vmax.f32 %v24672_v26, 0.0  ;;  %v18490_v26 = vld [vmem:[%s25526_s17 + $0x138] sm:$0xff]  }
 0xafc   : > { %15044 = vmatprep.subr.bf16.mxu1 %v17070_v25  ;;  %v18488_v25 = vld [vmem:[%s25526_s17 + $0x80] sm:$0xff]  }
 0xafd   : > { %v15065_v52 = vpack.c.bf16 %v15057_v55, %v15057_v55 }
 0xafe   : > { %15004 = vmatpush2.bf16.msra.mxu0 %v16941_v28  ;;  %v15067_v28 = vpack.c.bf16 %v15059_v43, %v15059_v43 }
 0xaff   : > { %15045 = vmatpush2.bf16.msra.mxu1 %v17069_v24  ;;  %15005 = vmatprep.subr.bf16.mxu0 %v16934_v17  ;;  %v18507_v24 = vld [vmem:[%s25526_s17 + $0x1f0] sm:$0xff]  }
 0xb00   : > { %15046 = vmatprep.subr.bf16.mxu1 %v17062_v63  ;;  %v18492_v17 = vld [vmem:[%s25526_s17 + $0x130] sm:$0xff]   ;;  %v18493_v63 = vld [vmem:[%s25526_s17 + $0x168] sm:$0xff]  }
 0xb02   : > { %15006 = vmatpush2.bf16.msra.mxu0 %v16933_v8  ;;  %v18509_v8 = vld [vmem:[%s25526_s17 + $0x1e8] sm:$0xff]  }
 0xb03   : > { %15047 = vmatpush2.bf16.msra.mxu1 %v17061_v23  ;;  %17187 = vmatprep.subr.bf16.mxu0 %v18457_v12  ;;  %v18494_v23 = vld [vmem:[%s25526_s17 + $0x128] sm:$0xff]   ;;  %v18495_v12 = vld [vmem:[%s25526_s17 + $0x160] sm:$0xff]  }
 0xb04   : > { %17209 = vmatprep.subr.bf16.mxu1 %v18458_v51  ;;  %v18510_v51 = vld [vmem:[%s25526_s17 + $0x1a8] sm:$0xff]  }
 0xb05   : > { %v25262_v34 = vpop.f32.mrf.mxu0  ;;  %15008 = vmatmul.mubr.bf16.vlgmr.msra.gmra.mxu0 %v24049_v21  ;;  %v18464_v21 = vld [vmem:[%s25526_s17 + $0xb0] sm:$0xff]  }
 0xb06   : > { %v25268_v31 = vpop.f32.mrf.mxu1  ;;  %15049 = vmatmul.mubr.bf16.vlgmr.msra.gmra.mxu1 %v24051_v57  ;;  %17188 = vmatpush3.bf16.msra.mxu0 %v18459_v53  ;;  %v18466_v57 = vld [vmem:[%s25526_s17 + $0xe8] sm:$0xff]   ;;  %v18497_v53 = vld [vmem:[%s25526_s17 + $0x158] sm:$0xff]  }
 0xb07   : > { %15618 = vmatprep.mubr.bf16.mxu0 %v15066_v60  ;;  %17210 = vmatpush3.bf16.msra.mxu1 %v18460_v61  ;;  %v25274_v36 = vpop.f32.mrf.mxu0  ;;  %v18512_v61 = vld [vmem:[%s25526_s17 + $0x1a0] sm:$0xff]   ;;  %v18498_v60 = vld [vmem:[%s25526_s17 + $0x118] sm:$0xff]  }
 0xb08   : > { %15658 = vmatprep.mubr.bf16.mxu1 %v15068_v27  ;;  %v25282_v3 = vpop.f32.mrf.mxu1  ;;  %17189 = vmatprep.subr.bf16.mxu0 %v18461_v42  ;;  %v18513_v42 = vld [vmem:[%s25526_s17 + $0x1d8] sm:$0xff]  }
 0xb09   : > { %v14767_v0 = vpop.f32.mrf.mxu0  ;;  %17211 = vmatprep.subr.bf16.mxu1 %v18462_v59  ;;  %v18499_v59 = vld [vmem:[%s25526_s17 + $0x150] sm:$0xff]   ;;  %v18514_v27 = vld [vmem:[%s25526_s17 + $0x198] sm:$0xff]  }
 0xb0a   : > { %v14808_v56 = vpop.f32.mrf.mxu1  ;;  %17190 = vmatpush3.bf16.msra.mxu0 %v18463_v20  ;;  %v18500_v20 = vld [vmem:[%s25526_s17 + $0x110] sm:$0xff]   ;;  %v18536_v0 = vld [vmem:[%s25525_s16] sm:$0xff] }
 0xb0b   : > { %17212 = vmatpush3.bf16.msra.mxu1 %v18464_v21  ;;  %v14768_v38 = vpop.f32.mrf.mxu0  ;;  %17191 = vmatprep.subr.bf16.mxu0 %v18465_v50  ;;  %v18501_v21 = vld [vmem:[%s25526_s17 + $0x148] sm:$0xff]   ;;  %v14380_v56 = vrot.slane %v18536_v0, %v11085_v49 }
 0xb0c   : > { %v14809_v45 = vpop.f32.mrf.mxu1  ;;  %17213 = vmatprep.subr.bf16.mxu1 %v18466_v57  ;;  %v18502_v50 = vld [vmem:[%s25526_s17 + $0x108] sm:$0xff]   ;;  %v18503_v57 = vld [vmem:[%s25526_s17 + $0x140] sm:$0xff]  }
 0xb0d   : > { %v18504_v38 = vld [vmem:[%s25526_s17 + $0x100] sm:$0xff]  }
 0xb0e   : > { %17192 = vmatpush3.bf16.msra.mxu0 %v18467_v46  ;;  %v14384_v46 = vrot.slane %v18536_v0, %v11089_v35 }
 0xb0f   : > { %17214 = vmatpush3.bf16.msra.mxu1 %v18468_v30  ;;  %17193 = vmatprep.subr.bf16.mxu0 %v18469_v44  ;;  %v14764_v30 = vadd.f32 %v25262_v34, %v14380_v56 }
 0xb10   : > { %17215 = vmatprep.subr.bf16.mxu1 %v18470_v48  ;;  %v14766_v44 = vadd.f32 %v25274_v36, %v14384_v46  ;;  %v18516_v36 = vld [vmem:[%s25526_s17 + $0x190] sm:$0xff]  }
 0xb11   : > { %v14805_v45 = vadd.f32 %v25268_v31, %v14764_v30  ;;  %v18515_v31 = vld [vmem:[%s25526_s17 + $0x1d0] sm:$0xff]  }
 0xb12   : > { %17194 = vmatpush3.bf16.msra.mxu0 %v18471_v7  ;;  %v14807_v7 = vadd.f32 %v25282_v3, %v14766_v44 }
 0xb13   : > { %17216 = vmatpush3.bf16.msra.mxu1 %v18472_v5  ;;  %17195 = vmatprep.subr.bf16.mxu0 %v18473_v13 }
 0xb14   : > { %17217 = vmatprep.subr.bf16.mxu1 %v18474_v47 }
 0xb16   : > { %17196 = vmatpush3.bf16.msra.mxu0 %v18475_v4 }
 0xb17   : > { %17218 = vmatpush3.bf16.msra.mxu1 %v18476_v58  ;;  %17197 = vmatprep.subr.bf16.mxu0 %v18477_v15 }
 0xb18   : > { %17219 = vmatprep.subr.bf16.mxu1 %v18478_v10 }
 0xb1a   : > { %17198 = vmatpush3.bf16.msra.mxu0 %v18479_v29 }
 0xb1b   : > { %17220 = vmatpush3.bf16.msra.mxu1 %v18480_v22  ;;  %17199 = vmatprep.subr.bf16.mxu0 %v18481_v32 }
 0xb1c   : > { %17221 = vmatprep.subr.bf16.mxu1 %v18482_v33  ;;  %v18517_v33 = vld [vmem:[%s25526_s17 + $0x1c8] sm:$0xff]  }
 0xb1e   : > { %17200 = vmatpush3.bf16.msra.mxu0 %v18483_v37 }
 0xb1f   : > { %17222 = vmatpush3.bf16.msra.mxu1 %v18484_v19  ;;  %17201 = vmatprep.subr.bf16.mxu0 %v18485_v9  ;;  %v18518_v19 = vld [vmem:[%s25526_s17 + $0x188] sm:$0xff]   ;;  %v18519_v9 = vld [vmem:[%s25526_s17 + $0x1c0] sm:$0xff]  }
 0xb20   : > { %17223 = vmatprep.subr.bf16.mxu1 %v18486_v14  ;;  %v18520_v14 = vld [vmem:[%s25526_s17 + $0x180] sm:$0xff]  }
 0xb22   : > { %17202 = vmatpush3.bf16.msra.mxu0 %v18487_v62 }
 0xb23   : > { %17224 = vmatpush3.bf16.msra.mxu1 %v18488_v25  ;;  %17231 = vmatprep.subr.bf16.mxu0 %v18489_v41 }
 0xb24   : > { %17253 = vmatprep.subr.bf16.mxu1 %v18505_v40 }
 0xb25   : > { %15619 = vmatmul.mubr.bf16.vlgmr.msra.gmra.mxu0 %v15065_v52 }
 0xb26   : > { %15659 = vmatmul.mubr.bf16.vlgmr.msra.gmra.mxu1 %v15067_v28  ;;  %17232 = vmatpush3.bf16.msra.mxu0 %v18490_v26 }
 0xb27   : > { %17233 = vmatprep.subr.bf16.mxu0 %v18491_v54  ;;  %17254 = vmatpush3.bf16.msra.mxu1 %v18506_v2  ;;  %v14388_v54 = vrot.slane %v18536_v0, %v11093_v6  ;;  %v14392_v2 = vrot.slane %v18536_v0, %v11097_v18 }
 0xb28   : > { %17255 = vmatprep.subr.bf16.mxu1 %v18507_v24 }
 0xb2a   : > { %17234 = vmatpush3.bf16.msra.mxu0 %v18492_v17 }
 0xb2b   : > { %17235 = vmatprep.subr.bf16.mxu0 %v18493_v63  ;;  %17256 = vmatpush3.bf16.msra.mxu1 %v18508_v11 }
 0xb2c   : > { %17257 = vmatprep.subr.bf16.mxu1 %v18509_v8 }
 0xb2e   : > { %17236 = vmatpush3.bf16.msra.mxu0 %v18494_v23 }
 0xb2f   : > { %17237 = vmatprep.subr.bf16.mxu0 %v18495_v12  ;;  %17258 = vmatpush3.bf16.msra.mxu1 %v18510_v51 }
 0xb30   : > { %17259 = vmatprep.subr.bf16.mxu1 %v18511_v39 }
 0xb32   : > { %17238 = vmatpush3.bf16.msra.mxu0 %v18496_v1 }
 0xb33   : > { %17239 = vmatprep.subr.bf16.mxu0 %v18497_v53  ;;  %17260 = vmatpush3.bf16.msra.mxu1 %v18512_v61 }
 0xb34   : > { %17261 = vmatprep.subr.bf16.mxu1 %v18513_v42 }
 0xb36   : > { %17240 = vmatpush3.bf16.msra.mxu0 %v18498_v60 }
 0xb37   : > { %17241 = vmatprep.subr.bf16.mxu0 %v18499_v59  ;;  %17262 = vmatpush3.bf16.msra.mxu1 %v18514_v27 }
 0xb38   : > { %17263 = vmatprep.subr.bf16.mxu1 %v18515_v31 }
 0xb3a   : > { %17242 = vmatpush3.bf16.msra.mxu0 %v18500_v20 }
 0xb3b   : > { %17243 = vmatprep.subr.bf16.mxu0 %v18501_v21  ;;  %17264 = vmatpush3.bf16.msra.mxu1 %v18516_v36 }
 0xb3c   : > { %17265 = vmatprep.subr.bf16.mxu1 %v18517_v33 }
 0xb3e   : > { %17244 = vmatpush3.bf16.msra.mxu0 %v18502_v50  ;;  %v15201_v50 = vld [vmem:[%s25527_s18] sm:$0x1] }
 0xb3f   : > { %17245 = vmatprep.subr.bf16.mxu0 %v18503_v57  ;;  %17266 = vmatpush3.bf16.msra.mxu1 %v18518_v19 }
 0xb40   : > { %17267 = vmatprep.subr.bf16.mxu1 %v18519_v9 }
 0xb42   : > { %17246 = vmatpush3.bf16.msra.mxu0 %v18504_v38 }
 0xb43   : > { %17268 = vmatpush3.bf16.msra.mxu1 %v18520_v14 }
 0xb45   : > { %v14845_v48 = vpop.f32.mrf.mxu0 }
 0xb46   : > { %v14846_v49 = vadd.f32 %v14845_v48, %v14805_v45  ;;  %v14886_v5 = vpop.f32.mrf.mxu1 }
 0xb47   : > { %v14847_v13 = vpop.f32.mrf.mxu0 }
 0xb48   : > { %v14887_v35 = vadd.f32 %v14886_v5, %v14846_v49  ;;  %v14848_v47 = vadd.f32 %v14847_v13, %v14807_v7  ;;  %v14888_v4 = vpop.f32.mrf.mxu1 }
 0xb49   : > { %v14849_v58 = vpop.f32.mrf.mxu0 }
 0xb4a   : > { %v14889_v15 = vadd.f32 %v14888_v4, %v14848_v47  ;;  %v14890_v10 = vpop.f32.mrf.mxu1  ;;  %v15061_v29 = vmax.f32 %v14887_v35, 0.0 }
 0xb4b   : > { %v14850_v22 = vpop.f32.mrf.mxu0 }
 0xb4c   : > { %v15062_v34 = vmax.f32 %v14889_v15, 0.0  ;;  %v14891_v32 = vpop.f32.mrf.mxu1  ;;  %v15069_v37 = vpack.c.bf16 %v15061_v29, %v15061_v29 }
 0xb4e   : > { %v15070_v3 = vpack.c.bf16 %v15062_v34, %v15062_v34 }
 0xb50   : > { %15698 = vmatprep.mubr.bf16.mxu0 %v15070_v3 }
 0xb51   : > { %15699 = vmatmul.mubr.bf16.vlgmr.msra.gmra.mxu0 %v15069_v37 }
 0xb85   : > { %v14927_v62 = vpop.f32.mrf.mxu0 }
 0xb86   : > { %v14968_v55 = vpop.f32.mrf.mxu1  ;;  %v14928_v28 = vadd.f32 %v14927_v62, %v14388_v54 }
 0xb87   : > { %v14929_v25 = vpop.f32.mrf.mxu0 }
 0xb88   : > { %v14970_v41 = vpop.f32.mrf.mxu1  ;;  %v14930_v24 = vadd.f32 %v14929_v25, %v14392_v2  ;;  %v14969_v17 = vadd.f32 %v14968_v55, %v14928_v28 }
 0xb89   : > { %v14931_v43 = vpop.f32.mrf.mxu0 }
 0xb8a   : > { %v14972_v40 = vpop.f32.mrf.mxu1  ;;  %v14971_v11 = vadd.f32 %v14970_v41, %v14930_v24 }
 0xb8b   : > { %v14932_v26 = vpop.f32.mrf.mxu0 }
 0xb8c   : > { %v14973_v52 = vpop.f32.mrf.mxu1 }
 0xbc5   : > { %v15009_v63 = vpop.f32.mrf.mxu0 }
 0xbc6   : > { %v15010_v8 = vadd.f32 %v15009_v63, %v14969_v17  ;;  %v15050_v23 = vpop.f32.mrf.mxu1 }
 0xbc7   : > { %v15011_v12 = vpop.f32.mrf.mxu0 }
 0xbc8   : > { %v15051_v51 = vadd.f32 %v15050_v23, %v15010_v8  ;;  %v15012_v39 = vadd.f32 %v15011_v12, %v14971_v11  ;;  %v15052_v1 = vpop.f32.mrf.mxu1 }
 0xbc9   : > { %v15013_v53 = vpop.f32.mrf.mxu0 }
 0xbca   : > { %v15053_v61 = vadd.f32 %v15052_v1, %v15012_v39  ;;  %v15054_v42 = vpop.f32.mrf.mxu1  ;;  %v15063_v60 = vmax.f32 %v15051_v51, 0.0 }
 0xbcb   : > { %v15014_v59 = vpop.f32.mrf.mxu0 }
 0xbcc   : > { %v15064_v6 = vmax.f32 %v15053_v61, 0.0  ;;  %v15055_v27 = vpop.f32.mrf.mxu1  ;;  %v15071_v18 = vpack.c.bf16 %v15063_v60, %v15063_v60 }
 0xbce   : > { %v15072_v16 = vpack.c.bf16 %v15064_v6, %v15064_v6 }
 0xbd0   : > { %15738 = vmatprep.mubr.bf16.mxu1 %v15072_v16 }
 0xbd1   : > { %15739 = vmatmul.mubr.bf16.vlgmr.msra.gmra.mxu1 %v15071_v18 }
 0xbe5   : > { %v17203_v20 = vpop.f32.mrf.mxu0 }
 0xbe6   : > { %v17225_v21 = vpop.f32.mrf.mxu1 }
 0xbe7   : > { %v17204_v57 = vpop.f32.mrf.mxu0 }
 0xbe8   : > { %v17205_v0 = vadd.f32 %v17204_v57, %v17203_v20  ;;  %v17226_v56 = vpop.f32.mrf.mxu1 }
 0xbe9   : > { %v17227_v46 = vadd.f32 %v17226_v56, %v17225_v21  ;;  %v17206_v38 = vpop.f32.mrf.mxu0 }
 0xbea   : > { %v15621_v30 = vadd.f32 %v17205_v0, %v15201_v50  ;;  %v17228_v44 = vpop.f32.mrf.mxu1 }
 0xbeb   : > { %v17207_v45 = vpop.f32.mrf.mxu0 }
 0xbec   : > { %v15661_v48 = vadd.f32 %v17227_v46, %v15621_v30  ;;  %v17229_v7 = vpop.f32.mrf.mxu1 }
 0xc11   : > { %v17247_v49 = vpop.f32.mrf.mxu0 }
 0xc13   : > { %v17248_v5 = vpop.f32.mrf.mxu0 }
 0xc14   : > { %v17249_v13 = vadd.f32 %v17248_v5, %v17247_v49 }
 0xc15   : > { %v17250_v35 = vpop.f32.mrf.mxu0 }
 0xc16   : > { %v15701_v47 = vadd.f32 %v17249_v13, %v15661_v48 }
 0xc17   : > { %v17251_v4 = vpop.f32.mrf.mxu0 }
 0xc91   : > { %v17269_v58 = vpop.f32.mrf.mxu1 }
 0xc93   : > { %v17270_v15 = vpop.f32.mrf.mxu1 }
 0xc94   : > { %v17271_v10 = vadd.f32 %v17270_v15, %v17269_v58 }
 0xc95   : > { %v17272_v29 = vpop.f32.mrf.mxu1 }
 0xc96   : > { %v15741_v22 = vadd.f32 %v17271_v10, %v15701_v47 }
 0xc97   : > { %v17273_v34 = vpop.f32.mrf.mxu1 }
 0xc98   : > { %15747 = vst.msk [vmem:[%s594_s26] sm:$0x1] %vm15746_vm0, %v15741_v22 }
 0xc99   : > { %18550 = shalt.err (!%p18547_p3)
}
 0xc9a   : > { %s18551_s2 = scalar_lea.hbm %s25474_s24, 16  ;;  %s18555_s25 = scalar_lea.hbm %s25941_s23, 32 }
 0xc9b   : > { %p18552_p4 = scmp.ne.s32.totalorder %s25474_s24, %s18551_s2  ;;  %p18556_p9 = scmp.lt.s32.totalorder %s25474_s24, %s25941_s23 }
 0xc9c   : > { %p18557_p10 = scmp.lt.s32.totalorder %s18555_s25, %s18551_s2 }
 0xc9d   : > { %p18553_p7 = pnand %p18552_p4, %p18742_p5 }
 0xc9e   : > { %p18558_p11 = por %p18557_p10, %p18556_p9 }
 0xc9f   : > { %p18554_p8 = pneg %p18553_p7 }
 0xca1   : > { %p18559_p12 = pnand %p18558_p11, %p18554_p8 }
 0xca3   : > { %18562 = shalt.err (!%p18559_p12)
}
 0xca4   : > { %17275 = dma.vmem_to_hbm [thread:$0]  (%p18742_p5), %s15762_s27, 16, %s25474_s24, %s15749_s1  }
 0xca5 PF: > { %s25942_s4 = sld [smem:[#allocation7_spill]] }
 0xca6   : > { %s25943_s5 = sld [smem:[#allocation5_spill]] }
 0xcab   : > { %p17281_p13 = scmp.ge.s32.totalorder %s25942_s4, 2 }
 0xcac   : > { %s15773_s20 = sand.u32 1, %s25943_s5  }
 0xcad   : > { %p17278_p0 = pnand %p17281_p13, %p18746_p6  ;;  %s15774_s19 = scalar_lea.sflag [#allocation3], %s15773_s20 }
 0xcaf   : > { %p17279_p1 = pneg %p17278_p0 }
 0xcb1   : > { %18580 = dma.done.wait (%p17279_p1), %s15774_s19, 16  }
 0xcb2   : > { %18582 = vsyncadd (%p17279_p1), %s15774_s19, 4294967280  ;;  %s25945_s21 = sld [smem:[#allocation9_spill]]  ;;  %s25948_s0 = smov %s18589_s30 }
 0xcb3   : > { %s25946_s2 = sld [smem:[#allocation6_spill]] }
 0xcb4   : > { %s25947_s20 = sld [smem:[#allocation10_spill]] }
 0xcb8   : > { %p29_p2 = scmp.ge.s32.totalorder %s25945_s21, 4  }
 0xcb9   : > { %s25949_s30 = smov %s25946_s2 }
 0xcba   :  { %31 = sbr.rel (!%p29_p2) target bundleno = 11 (0xb), region = 131 }
 0xcbf   :  { %15778 = vsyncpa [#allocation3], 1 }
 0xcc0   :  { %15780 = vsyncpa [#allocation3 + $0x1], 1 }

</bundles_post_ra>
